<compile_context>
chip_gen: v5e
topology: v5e:2x2
jax: 0.10.0
libtpu: 0.0.40
codegen_flags: <defaults>
</compile_context>

<pallas_src>
import functools
import math

import numpy as np
import jax
import jax.numpy as jnp
from jax.experimental import pallas as pl
from jax.experimental.pallas import tpu as pltpu

LRELU_SLOPE = 0.1


def _round_up(v, m):
    return (v + m - 1) // m * m


# ---------------------------------------------------------------------------
# Pallas kernel 1: dilated stride-1 Conv1d  ==  in-VMEM im2col + one MXU matmul
# ---------------------------------------------------------------------------
def _conv1d_kernel(x_ref, w_ref, b_ref, o_ref, *, K, dil, t_out, pre_slope):
    # x_ref : (1, cin, t_in)       bf16 (pre-padded by the wrapper)
    # w_ref : (co_tile, K*cin)     bf16, w[co, k*cin + ci] = weight[co, ci, k]
    # b_ref : (co_tile, 1)         f32
    # o_ref : (1, co_tile, t_out)  f32
    cin = x_ref.shape[1]
    x = x_ref[0]
    if pre_slope is not None:
        xf = x.astype(jnp.float32)
        x = jnp.where(xf >= 0.0, xf, pre_slope * xf).astype(jnp.bfloat16)
    cols = [jax.lax.slice(x, (0, k * dil), (cin, k * dil + t_out)) for k in range(K)]
    xcol = cols[0] if K == 1 else jnp.concatenate(cols, axis=0)   # (K*cin, t_out)
    acc = jnp.dot(w_ref[...], xcol, preferred_element_type=jnp.float32)
    o_ref[0] = acc + b_ref[...]


def _pick_co_tile(cout):
    if cout <= 128:           # keep tiles <=128 rows (also the v5e MXU width)
        return cout
    for t in (128, 64, 32, 16, 8):
        if cout % t == 0:
            return t
    return cout


def conv1d_pallas(x, w, b, *, dilation=1, padding=0, pre_slope=None):
    """y = conv1d(leaky_relu(x) if pre_slope else x, w, b); NCL layout."""
    x = x.astype(jnp.float32)
    w = w.astype(jnp.float32)
    b = b.astype(jnp.float32)
    B, cin, L = x.shape
    cout, cin_w, K = w.shape
    assert cin_w == cin
    l_out = L + 2 * padding - dilation * (K - 1)
    assert l_out >= 1

    # lane-dense time (x128) and sublane-dense out-channels (x8)
    t_out = _round_up(l_out, 128)
    t_in = _round_up(t_out + dilation * (K - 1), 128)
    xp = jnp.pad(x, ((0, 0), (0, 0), (padding, t_in - L - padding)))
    xp = xp.astype(jnp.bfloat16)                       # bf16 into the MXU / half the DMA

    cout_p = _round_up(max(cout, 8), 8)
    if cout_p != cout:
        w = jnp.pad(w, ((0, cout_p - cout), (0, 0), (0, 0)))
        b = jnp.pad(b, ((0, cout_p - cout),))
    co_tile = _pick_co_tile(cout_p)
    n_co = cout_p // co_tile

    wflat = jnp.transpose(w, (0, 2, 1)).reshape(cout_p, K * cin).astype(jnp.bfloat16)
    b2 = b.reshape(cout_p, 1)

    if cin % 16 == 0:
        # sublane-aligned pieces -> build the im2col matrix inside the kernel
        cin_eff, K_eff, dil_eff, t_in_eff = cin, K, dilation, t_in
    else:
        # tiny channel count (e.g. PQMF synthesis, cin=subbands): fold the taps
        # into the channel dim outside the kernel so the Pallas kernel is a
        # single well-shaped matmul (avoids misaligned sublane concatenation).
        cols = [jax.lax.slice_in_dim(xp, k * dilation, k * dilation + t_out, axis=2)
                for k in range(K)]
        xp = jnp.concatenate(cols, axis=1)             # (B, K*cin, t_out)
        cin_eff, K_eff, dil_eff, t_in_eff = K * cin, 1, 1, t_out

    kernel = functools.partial(_conv1d_kernel, K=K_eff, dil=dil_eff,
                               t_out=t_out, pre_slope=pre_slope)
    flops = 2 * B * cout_p * cin * K * t_out
    bytes_accessed = xp.size * 2 + wflat.size * 2 + b2.size * 4 + B * cout_p * t_out * 4

    out = pl.pallas_call(
        kernel,
        out_shape=jax.ShapeDtypeStruct((B, cout_p, t_out), jnp.float32),
        grid=(B, n_co),
        in_specs=[
            pl.BlockSpec((1, cin_eff, t_in_eff), lambda bi, ci: (bi, 0, 0)),
            pl.BlockSpec((co_tile, K * cin), lambda bi, ci: (ci, 0)),
            pl.BlockSpec((co_tile, 1), lambda bi, ci: (ci, 0)),
        ],
        out_specs=pl.BlockSpec((1, co_tile, t_out), lambda bi, ci: (bi, ci, 0)),
        compiler_params=pltpu.CompilerParams(
            dimension_semantics=("parallel", "parallel")),
        cost_estimate=pl.CostEstimate(flops=int(flops), transcendentals=0,
                                      bytes_accessed=int(bytes_accessed)),
    )(xp, wflat, b2)
    return out[:, :cout, :l_out]


def conv_transpose1d_pallas(x, w_t, b, *, stride, padding, pre_slope=None):
    """PyTorch ConvTranspose1d; w_t layout (Cin, Cout, K)."""
    c_in, c_out, K = w_t.shape
    B, _, L = x.shape
    # zero-stuffed upsampling to L*stride (the trailing stride-1 zeros do not
    # affect the first l_out outputs, which are all we keep)
    xup = jnp.pad(x[..., None], ((0, 0), (0, 0), (0, 0), (0, stride - 1)))
    xup = xup.reshape(B, c_in, L * stride)
    w_conv = jnp.transpose(jnp.flip(w_t, axis=-1), (1, 0, 2))      # (Cout, Cin, K)
    out = conv1d_pallas(xup, w_conv, b, dilation=1,
                        padding=K - 1 - padding, pre_slope=pre_slope)
    l_out = (L - 1) * stride + K - 2 * padding
    return out[:, :, :l_out]


# ---------------------------------------------------------------------------
# Pallas kernel 2: iSTFT frame synthesis (windowed inverse rDFT as a matmul)
# ---------------------------------------------------------------------------
def _istft_frames_kernel(re_ref, im_ref, cb_ref, sb_ref, o_ref):
    o_ref[0] = (jnp.dot(cb_ref[...], re_ref[0], preferred_element_type=jnp.float32)
                + jnp.dot(sb_ref[...], im_ref[0], preferred_element_type=jnp.float32))


def istft_frames_pallas(re, im, n_fft, window):
    """(N, n_freq, M) real/imag per-frame spectra -> (N, n_fft, M) windowed frames."""
    N, n_freq, M = re.shape
    Mp = _round_up(M, 128)
    rep = jnp.pad(re, ((0, 0), (0, 0), (0, Mp - M))).astype(jnp.float32)
    imp = jnp.pad(im, ((0, 0), (0, 0), (0, Mp - M))).astype(jnp.float32)

    n = np.arange(n_fft, dtype=np.float64)[:, None]
    f = np.arange(n_freq, dtype=np.float64)[None, :]
    cf = np.where((f == 0) | (f == n_fft // 2), 1.0, 2.0)
    ang = 2.0 * np.pi * f * n / n_fft
    wcol = np.asarray(window, np.float64)[:, None]
    cb = jnp.asarray(wcol * cf * np.cos(ang) / n_fft, jnp.float32)    # (n_fft, n_freq)
    sb = jnp.asarray(-wcol * cf * np.sin(ang) / n_fft, jnp.float32)

    out = pl.pallas_call(
        _istft_frames_kernel,
        out_shape=jax.ShapeDtypeStruct((N, n_fft, Mp), jnp.float32),
        grid=(N,),
        in_specs=[
            pl.BlockSpec((1, n_freq, Mp), lambda i: (i, 0, 0)),
            pl.BlockSpec((1, n_freq, Mp), lambda i: (i, 0, 0)),
            pl.BlockSpec((n_fft, n_freq), lambda i: (0, 0)),
            pl.BlockSpec((n_fft, n_freq), lambda i: (0, 0)),
        ],
        out_specs=pl.BlockSpec((1, n_fft, Mp), lambda i: (i, 0, 0)),
        compiler_params=pltpu.CompilerParams(dimension_semantics=("parallel",)),
        cost_estimate=pl.CostEstimate(
            flops=int(4 * N * n_fft * n_freq * Mp), transcendentals=0,
            bytes_accessed=int((rep.size + imp.size + N * n_fft * Mp) * 4)),
    )(rep, imp, cb, sb)
    return out[:, :, :M]


# ---------------------------------------------------------------------------
# JAX glue: overlap-add (scatter-free fold), PQMF synthesis, resblocks, forward
# ---------------------------------------------------------------------------
def _overlap_add(frames, hop):
    # frames: (N, n_fft, M) -> (N, (M-1)*hop + n_fft)
    N, n_fft, M = frames.shape
    assert n_fft % hop == 0
    r = n_fft // hop
    total = (M - 1) * hop + n_fft
    out = jnp.zeros((N, total), jnp.float32)
    for j in range(r):
        seg = frames[:, j * hop:(j + 1) * hop, :]
        seg = jnp.transpose(seg, (0, 2, 1)).reshape(N, M * hop)
        out = out.at[:, j * hop:j * hop + M * hop].add(seg)
    return out


def pqmf_synthesis_pallas(y_mb, syn_filter):
    # PQMF.synthesis: updown conv_transpose == zero-stuffing scaled by subbands,
    # followed by the synthesis FIR (runs on the Pallas conv kernel).
    B, S, T = y_mb.shape
    taps_p1 = syn_filter.shape[-1]
    xup = jnp.pad((y_mb * S)[..., None], ((0, 0), (0, 0), (0, 0), (0, S - 1)))
    xup = xup.reshape(B, S, T * S)
    return conv1d_pallas(xup, syn_filter, jnp.zeros((1,), jnp.float32),
                         padding=(taps_p1 - 1) // 2)


def resblock1_forward(x, layers, k, dilations):
    for (w1, b1, w2, b2), d in zip(layers, dilations):
        xt = conv1d_pallas(x, w1, b1, dilation=d, padding=d * (k - 1) // 2,
                           pre_slope=LRELU_SLOPE)
        xt = conv1d_pallas(xt, w2, b2, dilation=1, padding=(k - 1) // 2,
                           pre_slope=LRELU_SLOPE)
        x = xt + x
    return x


def resblock2_forward(x, layers, k, dilations):
    for (w1, b1), d in zip(layers, dilations):
        xt = conv1d_pallas(x, w1, b1, dilation=d, padding=d * (k - 1) // 2,
                           pre_slope=LRELU_SLOPE)
        x = xt + x
    return x


def generator_forward(x, params, cfg, syn_filter, window):
    n_fft = cfg["gen_istft_n_fft"]
    hop = cfg["gen_istft_hop_size"]
    S = cfg["subbands"]
    n_freq = n_fft // 2 + 1
    num_kernels = len(cfg["resblock_kernel_sizes"])

    x = conv1d_pallas(x, *params["conv_pre"], padding=3)
    for i, (u, k_up) in enumerate(zip(cfg["upsample_rates"],
                                      cfg["upsample_kernel_sizes"])):
        w_t, b_t = params["ups"][i]
        x = conv_transpose1d_pallas(x, w_t, b_t, stride=u, padding=(k_up - u) // 2,
                                    pre_slope=LRELU_SLOPE)
        xs = None
        for j, (ks, ds) in enumerate(zip(cfg["resblock_kernel_sizes"],
                                         cfg["resblock_dilation_sizes"])):
            rb = params["resblocks"][i][j]
            r = (resblock1_forward(x, rb, ks, ds) if cfg["resblock"] == "1"
                 else resblock2_forward(x, rb, ks, ds))
            xs = r if xs is None else xs + r
        x = xs / num_kernels

    # F.leaky_relu(x) [slope 0.01] -> ReflectionPad1d((1,0)) -> subband_conv_post
    # (leaky commutes with the reflection copy, so it is fused into the conv)
    x = jnp.pad(x, ((0, 0), (0, 0), (1, 0)), mode="reflect")
    x = conv1d_pallas(x, *params["conv_post"], padding=3, pre_slope=0.01)

    B, _, M = x.shape
    xr = x.reshape(B * S, n_fft + 2, M)
    spec = jnp.exp(xr[:, :n_freq, :])
    phase = jnp.pi * jnp.sin(xr[:, n_freq:, :])
    re = spec * jnp.cos(phase)
    im = spec * jnp.sin(phase)

    frames = istft_frames_pallas(re, im, n_fft, window)          # (B*S, n_fft, M)
    y = _overlap_add(frames, hop)
    total = y.shape[-1]
    w32 = jnp.asarray(window, jnp.float32)
    env = _overlap_add(jnp.broadcast_to((w32 ** 2)[None, :, None], (1, n_fft, M)),
                       hop)[0]
    y = jnp.where(env[None, :] > 1e-9, y / env[None, :], y)
    y = y[:, n_fft // 2: total - n_fft // 2]                     # torch.istft(center=True)

    y_mb_hat = y.reshape(B, S, -1)
    y_g_hat = pqmf_synthesis_pallas(y_mb_hat, syn_filter)
    return y_g_hat, y_mb_hat


# ---------------------------------------------------------------------------
# PQMF synthesis filter + parameter init
# ---------------------------------------------------------------------------
def design_prototype_filter(taps=62, cutoff_ratio=0.15, beta=9.0):
    assert taps % 2 == 0
    omega_c = np.pi * cutoff_ratio
    idx = np.arange(taps + 1) - 0.5 * taps
    with np.errstate(invalid="ignore"):
        h_i = np.sin(omega_c * idx) / (np.pi * idx)
    h_i[taps // 2] = cutoff_ratio
    return h_i * np.kaiser(taps + 1, beta)


def make_pqmf_synthesis_filter(subbands=4, taps=62, cutoff_ratio=0.15, beta=9.0):
    h_proto = design_prototype_filter(taps, cutoff_ratio, beta)
    idx = np.arange(taps + 1) - (taps - 1) / 2.0
    h_syn = np.zeros((subbands, taps + 1))
    for k in range(subbands):
        h_syn[k] = 2.0 * h_proto * np.cos(
            (2 * k + 1) * (np.pi / (2 * subbands)) * idx - (-1) ** k * np.pi / 4)
    return jnp.asarray(h_syn[None, :, :], jnp.float32)      # (1, subbands, taps+1)


def _init_conv(key, cout, cin, k, scale=1.0):
    kw, kb = jax.random.split(key)
    w = scale / math.sqrt(cin * k) * jax.random.normal(kw, (cout, cin, k), jnp.float32)
    b = 0.01 * jax.random.normal(kb, (cout,), jnp.float32)
    return w, b


def init_generator_params(key, cfg):
    uic = cfg["upsample_initial_channel"]
    params = {}
    key, k0 = jax.random.split(key)
    params["conv_pre"] = _init_conv(k0, uic, cfg["initial_channel"], 7)
    ups, resblocks = [], []
    ch = uic
    for i, (u, k_up) in enumerate(zip(cfg["upsample_rates"],
                                      cfg["upsample_kernel_sizes"])):
        c_in, c_out = uic // (2 ** i), uic // (2 ** (i + 1))
        key, kw, kb = jax.random.split(key, 3)
        w_t = jax.random.normal(kw, (c_in, c_out, k_up), jnp.float32) / math.sqrt(c_in * k_up)
        b_t = 0.01 * jax.random.normal(kb, (c_out,), jnp.float32)
        ups.append((w_t, b_t))
        stage = []
        for ks, ds in zip(cfg["resblock_kernel_sizes"], cfg["resblock_dilation_sizes"]):
            layers = []
            for _d in ds:
                key, k1, k2 = jax.random.split(key, 3)
                w1, b1 = _init_conv(k1, c_out, c_out, ks)
                if cfg["resblock"] == "1":
                    w2, b2 = _init_conv(k2, c_out, c_out, ks)
                    layers.append((w1, b1, w2, b2))
                else:
                    layers.append((w1, b1))
            stage.append(layers)
        resblocks.append(stage)
        ch = c_out
    params["ups"] = ups
    params["resblocks"] = resblocks
    key, kp = jax.random.split(key)
    params["conv_post"] = _init_conv(
        kp, cfg["subbands"] * (cfg["gen_istft_n_fft"] + 2), ch, 7, scale=0.5)
    return params


# ---------------------------------------------------------------------------
# Pure-JAX reference (same bf16-operand / f32-accumulate semantics)
# ---------------------------------------------------------------------------
def _q(x):
    return x.astype(jnp.bfloat16)


def _leaky(x, slope):
    return jnp.where(x >= 0.0, x, slope * x)


def _ref_conv1d(x, w, b, *, dilation=1, padding=0, pre_slope=None):
    xq = _q(x).astype(jnp.float32)
    if pre_slope is not None:
        xq = _leaky(xq, pre_slope)
    out = jax.lax.conv_general_dilated(
        _q(xq), _q(w), window_strides=(1,), padding=[(padding, padding)],
        rhs_dilation=(dilation,), dimension_numbers=("NCH", "OIH", "NCH"),
        preferred_element_type=jnp.float32)
    return out + b[None, :, None]


def _ref_conv_transpose1d(x, w_t, b, *, stride, padding, pre_slope=None):
    c_in, c_out, K = w_t.shape
    xq = _q(x).astype(jnp.float32)
    if pre_slope is not None:
        xq = _leaky(xq, pre_slope)
    w_conv = jnp.transpose(jnp.flip(w_t, axis=-1), (1, 0, 2))
    out = jax.lax.conv_general_dilated(
        _q(xq), _q(w_conv), window_strides=(1,),
        padding=[(K - 1 - padding, K - 1 - padding)], lhs_dilation=(stride,),
        dimension_numbers=("NCH", "OIH", "NCH"),
        preferred_element_type=jnp.float32)
    return out + b[None, :, None]


def _ref_resblock1(x, layers, k, dilations):
    for (w1, b1, w2, b2), d in zip(layers, dilations):
        xt = _ref_conv1d(x, w1, b1, dilation=d, padding=d * (k - 1) // 2,
                         pre_slope=LRELU_SLOPE)
        xt = _ref_conv1d(xt, w2, b2, dilation=1, padding=(k - 1) // 2,
                         pre_slope=LRELU_SLOPE)
        x = xt + x
    return x


def _ref_resblock2(x, layers, k, dilations):
    for (w1, b1), d in zip(layers, dilations):
        xt = _ref_conv1d(x, w1, b1, dilation=d, padding=d * (k - 1) // 2,
                         pre_slope=LRELU_SLOPE)
        x = xt + x
    return x


def _ref_istft(re, im, n_fft, hop, window):
    frames = jnp.fft.irfft(re + 1j * im, n=n_fft, axis=1)
    w32 = jnp.asarray(window, jnp.float32)
    frames = frames * w32[None, :, None]
    N, _, M = frames.shape
    total = (M - 1) * hop + n_fft
    idx = jnp.arange(n_fft)[:, None] + hop * jnp.arange(M)[None, :]
    y = jnp.zeros((N, total), jnp.float32).at[:, idx].add(frames)
    env = jnp.zeros((total,), jnp.float32).at[idx].add(
        (w32 ** 2)[:, None] * jnp.ones((1, M), jnp.float32))
    y = jnp.where(env[None, :] > 1e-9, y / env[None, :], y)
    return y[:, n_fft // 2: total - n_fft // 2]


def _ref_forward(x, params, cfg, syn_filter, window):
    n_fft = cfg["gen_istft_n_fft"]
    hop = cfg["gen_istft_hop_size"]
    S = cfg["subbands"]
    n_freq = n_fft // 2 + 1
    num_kernels = len(cfg["resblock_kernel_sizes"])

    x = _ref_conv1d(x, *params["conv_pre"], padding=3)
    for i, (u, k_up) in enumerate(zip(cfg["upsample_rates"],
                                      cfg["upsample_kernel_sizes"])):
        w_t, b_t = params["ups"][i]
        x = _ref_conv_transpose1d(x, w_t, b_t, stride=u, padding=(k_up - u) // 2,
                                  pre_slope=LRELU_SLOPE)
        xs = None
        for j, (ks, ds) in enumerate(zip(cfg["resblock_kernel_sizes"],
                                         cfg["resblock_dilation_sizes"])):
            rb = params["resblocks"][i][j]
            r = (_ref_resblock1(x, rb, ks, ds) if cfg["resblock"] == "1"
                 else _ref_resblock2(x, rb, ks, ds))
            xs = r if xs is None else xs + r
        x = xs / num_kernels

    x = jnp.pad(x, ((0, 0), (0, 0), (1, 0)), mode="reflect")
    x = _ref_conv1d(x, *params["conv_post"], padding=3, pre_slope=0.01)

    B, _, M = x.shape
    xr = x.reshape(B * S, n_fft + 2, M)
    spec = jnp.exp(xr[:, :n_freq, :])
    phase = jnp.pi * jnp.sin(xr[:, n_freq:, :])
    re = spec * jnp.cos(phase)
    im = spec * jnp.sin(phase)
    y = _ref_istft(re, im, n_fft, hop, window)
    y_mb = y.reshape(B, S, -1)

    T = y_mb.shape[-1]
    xup = jnp.pad((y_mb * S)[..., None], ((0, 0), (0, 0), (0, 0), (0, S - 1)))
    xup = xup.reshape(B, S, T * S)
    taps_p1 = syn_filter.shape[-1]
    p = (taps_p1 - 1) // 2
    y_g = jax.lax.conv_general_dilated(
        _q(xup), _q(syn_filter), (1,), [(p, p)],
        dimension_numbers=("NCH", "OIH", "NCH"),
        preferred_element_type=jnp.float32)
    return y_g, y_mb


# ---------------------------------------------------------------------------
if __name__ == "__main__":
    cfg = dict(
        initial_channel=32,
        resblock="1",
        resblock_kernel_sizes=[3, 7],
        resblock_dilation_sizes=[[1, 3, 5], [1, 3, 5]],
        upsample_rates=[4, 4],
        upsample_initial_channel=64,
        upsample_kernel_sizes=[8, 8],
        gen_istft_n_fft=16,
        gen_istft_hop_size=4,
        subbands=4,
    )
    key = jax.random.PRNGKey(0)
    kp, kx = jax.random.split(key)
    params = init_generator_params(kp, cfg)

    B, L0 = 2, 8
    x = jax.random.normal(kx, (B, cfg["initial_channel"], L0), jnp.float32)

    syn_filter = make_pqmf_synthesis_filter(cfg["subbands"])
    n_fft = cfg["gen_istft_n_fft"]
    window = 0.5 - 0.5 * np.cos(2.0 * np.pi * np.arange(n_fft) / n_fft)  # periodic hann

    fwd = jax.jit(lambda xx, pp: generator_forward(xx, pp, cfg, syn_filter, window))
    y_g, y_mb = fwd(x, params)
    y_g, y_mb = jax.block_until_ready((y_g, y_mb))

    ref_fwd = jax.jit(lambda xx, pp: _ref_forward(xx, pp, cfg, syn_filter, window))
    rg, rmb = ref_fwd(x, params)
    rg, rmb = jax.block_until_ready((rg, rmb))

    def _check(a, b, name):
        a = np.asarray(a)
        b = np.asarray(b)
        assert a.shape == b.shape, (name, a.shape, b.shape)
        assert np.allclose(a, b, rtol=5e-3, atol=2e-3), \
            f"{name}: max abs diff {np.max(np.abs(a - b))}"

    _check(y_mb, rmb, "y_mb_hat")
    _check(y_g, rg, "y_g_hat")
    print("KERNEL_OK")
</pallas_src>

<mosaic_0001>
module attributes {stable_mosaic.version = 11 : i64} {
  func.func @_conv1d_kernel(%arg0: i32, %arg1: i32, %arg2: memref<1x32x256xbf16, #tpu.memory_space<vmem>>, %arg3: memref<64x224xbf16, #tpu.memory_space<vmem>>, %arg4: memref<64x1xf32, #tpu.memory_space<vmem>>, %arg5: memref<1x64x128xf32, #tpu.memory_space<vmem>>) attributes {dimension_semantics = [#tpu.dimension_semantics<parallel>, #tpu.dimension_semantics<parallel>], iteration_bounds = array<i64: 2, 1>, scalar_prefetch = 0 : i64, scratch_operands = 0 : i64, tpu.core_type = #tpu.core_type<tc>, window_params = [{transform_indices = @transform_0, window_bounds = array<i64: 1, 32, 256>}, {transform_indices = @transform_1, window_bounds = array<i64: 64, 224>}, {transform_indices = @transform_2, window_bounds = array<i64: 64, 1>}, {transform_indices = @transform_3, window_bounds = array<i64: 1, 64, 128>}]} {
    %c0 = arith.constant 0 : index
    %c0_0 = arith.constant 0 : index
    %c0_1 = arith.constant 0 : index
    %0 = vector.load %arg2[%c0, %c0_0, %c0_1] : memref<1x32x256xbf16, #tpu.memory_space<vmem>>, vector<1x32x256xbf16>
    %1 = vector.shape_cast %0 : vector<1x32x256xbf16> to vector<32x256xbf16>
    %2 = vector.extract_strided_slice %1 {offsets = [0, 0], sizes = [32, 128], strides = [1, 1]} : vector<32x256xbf16> to vector<32x128xbf16>
    %3 = vector.extract_strided_slice %1 {offsets = [0, 1], sizes = [32, 128], strides = [1, 1]} : vector<32x256xbf16> to vector<32x128xbf16>
    %4 = vector.extract_strided_slice %1 {offsets = [0, 2], sizes = [32, 128], strides = [1, 1]} : vector<32x256xbf16> to vector<32x128xbf16>
    %5 = vector.extract_strided_slice %1 {offsets = [0, 3], sizes = [32, 128], strides = [1, 1]} : vector<32x256xbf16> to vector<32x128xbf16>
    %6 = vector.extract_strided_slice %1 {offsets = [0, 4], sizes = [32, 128], strides = [1, 1]} : vector<32x256xbf16> to vector<32x128xbf16>
    %7 = vector.extract_strided_slice %1 {offsets = [0, 5], sizes = [32, 128], strides = [1, 1]} : vector<32x256xbf16> to vector<32x128xbf16>
    %8 = vector.extract_strided_slice %1 {offsets = [0, 6], sizes = [32, 128], strides = [1, 1]} : vector<32x256xbf16> to vector<32x128xbf16>
    %9 = tpu.concatenate %2, %3, %4, %5, %6, %7, %8 in 0 : vector<32x128xbf16>, vector<32x128xbf16>, vector<32x128xbf16>, vector<32x128xbf16>, vector<32x128xbf16>, vector<32x128xbf16>, vector<32x128xbf16> -> vector<224x128xbf16>
    %c0_2 = arith.constant 0 : index
    %c0_3 = arith.constant 0 : index
    %10 = vector.load %arg3[%c0_2, %c0_3] : memref<64x224xbf16, #tpu.memory_space<vmem>>, vector<64x224xbf16>
    %cst = arith.constant dense<0.000000e+00> : vector<64x128xf32>
    %11 = tpu.matmul %10, %9, %cst {dimension_numbers = #tpu.dot_dimension_numbers<[1], [0], [0], [1], [0, 0, 1, 1], [], []>} : vector<64x224xbf16>, vector<224x128xbf16>, vector<64x128xf32> -> vector<64x128xf32>
    %c0_4 = arith.constant 0 : index
    %c0_5 = arith.constant 0 : index
    %12 = vector.load %arg4[%c0_4, %c0_5] : memref<64x1xf32, #tpu.memory_space<vmem>>, vector<64x1xf32>
    %13 = vector.broadcast %12 : vector<64x1xf32> to vector<64x128xf32>
    %14 = arith.addf %11, %13 : vector<64x128xf32>
    %c0_6 = arith.constant 0 : index
    %c0_7 = arith.constant 0 : index
    %c0_8 = arith.constant 0 : index
    %15 = vector.load %arg5[%c0_6, %c0_7, %c0_8] : memref<1x64x128xf32, #tpu.memory_space<vmem>>, vector<1x64x128xf32>
    %16 = vector.shape_cast %15 : vector<1x64x128xf32> to vector<64x128xf32>
    %17 = vector.shape_cast %14 : vector<64x128xf32> to vector<1x64x128xf32>
    tpu.vector_store %arg5[%c0_6, %c0_7, %c0_8], %17 {strides = array<i32>} : memref<1x64x128xf32, #tpu.memory_space<vmem>>, vector<1x64x128xf32>,
    return
  }
  func.func @transform_0(%arg0: i32, %arg1: i32) -> (i32, i32, i32) {
    %c0_i32 = arith.constant 0 : i32
    %c0_i32_0 = arith.constant 0 : i32
    %c0_i32_1 = arith.constant 0 : i32
    return %arg0, %c0_i32, %c0_i32_0 : i32, i32, i32
  }
  func.func @transform_1(%arg0: i32, %arg1: i32) -> (i32, i32) {
    %c0_i32 = arith.constant 0 : i32
    %c0_i32_0 = arith.constant 0 : i32
    return %arg1, %c0_i32 : i32, i32
  }
  func.func @transform_2(%arg0: i32, %arg1: i32) -> (i32, i32) {
    %c0_i32 = arith.constant 0 : i32
    %c0_i32_0 = arith.constant 0 : i32
    return %arg1, %c0_i32 : i32, i32
  }
  func.func @transform_3(%arg0: i32, %arg1: i32) -> (i32, i32, i32) {
    %c0_i32 = arith.constant 0 : i32
    %c0_i32_0 = arith.constant 0 : i32
    return %arg0, %arg1, %c0_i32 : i32, i32, i32
  }
}

module attributes {stable_mosaic.version = 11 : i64} {
  func.func @_conv1d_kernel(%arg0: i32, %arg1: i32, %arg2: memref<1x64x256xbf16, #tpu.memory_space<vmem>>, %arg3: memref<32x512xbf16, #tpu.memory_space<vmem>>, %arg4: memref<32x1xf32, #tpu.memory_space<vmem>>, %arg5: memref<1x32x128xf32, #tpu.memory_space<vmem>>) attributes {dimension_semantics = [#tpu.dimension_semantics<parallel>, #tpu.dimension_semantics<parallel>], iteration_bounds = array<i64: 2, 1>, scalar_prefetch = 0 : i64, scratch_operands = 0 : i64, tpu.core_type = #tpu.core_type<tc>, window_params = [{transform_indices = @transform_0, window_bounds = array<i64: 1, 64, 256>}, {transform_indices = @transform_1, window_bounds = array<i64: 32, 512>}, {transform_indices = @transform_2, window_bounds = array<i64: 32, 1>}, {transform_indices = @transform_3, window_bounds = array<i64: 1, 32, 128>}]} {
    %c0 = arith.constant 0 : index
    %c0_0 = arith.constant 0 : index
    %c0_1 = arith.constant 0 : index
    %0 = vector.load %arg2[%c0, %c0_0, %c0_1] : memref<1x64x256xbf16, #tpu.memory_space<vmem>>, vector<1x64x256xbf16>
    %1 = vector.shape_cast %0 : vector<1x64x256xbf16> to vector<64x256xbf16>
    %2 = arith.extf %1 : vector<64x256xbf16> to vector<64x256xf32>
    %cst = arith.constant 0.000000e+00 : f32
    %3 = vector.broadcast %cst : f32 to vector<64x256xf32>
    %4 = arith.cmpf oge, %2, %3 : vector<64x256xf32>
    %cst_2 = arith.constant 1.000000e-01 : f32
    %5 = vector.broadcast %cst_2 : f32 to vector<64x256xf32>
    %6 = arith.mulf %5, %2 : vector<64x256xf32>
    %7 = arith.select %4, %2, %6 : vector<64x256xi1>, vector<64x256xf32>
    %8 = arith.truncf %7 : vector<64x256xf32> to vector<64x256xbf16>
    %9 = vector.extract_strided_slice %8 {offsets = [0, 0], sizes = [64, 128], strides = [1, 1]} : vector<64x256xbf16> to vector<64x128xbf16>
    %10 = vector.extract_strided_slice %8 {offsets = [0, 1], sizes = [64, 128], strides = [1, 1]} : vector<64x256xbf16> to vector<64x128xbf16>
    %11 = vector.extract_strided_slice %8 {offsets = [0, 2], sizes = [64, 128], strides = [1, 1]} : vector<64x256xbf16> to vector<64x128xbf16>
    %12 = vector.extract_strided_slice %8 {offsets = [0, 3], sizes = [64, 128], strides = [1, 1]} : vector<64x256xbf16> to vector<64x128xbf16>
    %13 = vector.extract_strided_slice %8 {offsets = [0, 4], sizes = [64, 128], strides = [1, 1]} : vector<64x256xbf16> to vector<64x128xbf16>
    %14 = vector.extract_strided_slice %8 {offsets = [0, 5], sizes = [64, 128], strides = [1, 1]} : vector<64x256xbf16> to vector<64x128xbf16>
    %15 = vector.extract_strided_slice %8 {offsets = [0, 6], sizes = [64, 128], strides = [1, 1]} : vector<64x256xbf16> to vector<64x128xbf16>
    %16 = vector.extract_strided_slice %8 {offsets = [0, 7], sizes = [64, 128], strides = [1, 1]} : vector<64x256xbf16> to vector<64x128xbf16>
    %17 = tpu.concatenate %9, %10, %11, %12, %13, %14, %15, %16 in 0 : vector<64x128xbf16>, vector<64x128xbf16>, vector<64x128xbf16>, vector<64x128xbf16>, vector<64x128xbf16>, vector<64x128xbf16>, vector<64x128xbf16>, vector<64x128xbf16> -> vector<512x128xbf16>
    %c0_3 = arith.constant 0 : index
    %c0_4 = arith.constant 0 : index
    %18 = vector.load %arg3[%c0_3, %c0_4] : memref<32x512xbf16, #tpu.memory_space<vmem>>, vector<32x512xbf16>
    %cst_5 = arith.constant dense<0.000000e+00> : vector<32x128xf32>
    %19 = tpu.matmul %18, %17, %cst_5 {dimension_numbers = #tpu.dot_dimension_numbers<[1], [0], [0], [1], [0, 0, 1, 1], [], []>} : vector<32x512xbf16>, vector<512x128xbf16>, vector<32x128xf32> -> vector<32x128xf32>
    %c0_6 = arith.constant 0 : index
    %c0_7 = arith.constant 0 : index
    %20 = vector.load %arg4[%c0_6, %c0_7] : memref<32x1xf32, #tpu.memory_space<vmem>>, vector<32x1xf32>
    %21 = vector.broadcast %20 : vector<32x1xf32> to vector<32x128xf32>
    %22 = arith.addf %19, %21 : vector<32x128xf32>
    %c0_8 = arith.constant 0 : index
    %c0_9 = arith.constant 0 : index
    %c0_10 = arith.constant 0 : index
    %23 = vector.load %arg5[%c0_8, %c0_9, %c0_10] : memref<1x32x128xf32, #tpu.memory_space<vmem>>, vector<1x32x128xf32>
    %24 = vector.shape_cast %23 : vector<1x32x128xf32> to vector<32x128xf32>
    %25 = vector.shape_cast %22 : vector<32x128xf32> to vector<1x32x128xf32>
    tpu.vector_store %arg5[%c0_8, %c0_9, %c0_10], %25 {strides = array<i32>} : memref<1x32x128xf32, #tpu.memory_space<vmem>>, vector<1x32x128xf32>,
    return
  }
  func.func @transform_0(%arg0: i32, %arg1: i32) -> (i32, i32, i32) {
    %c0_i32 = arith.constant 0 : i32
    %c0_i32_0 = arith.constant 0 : i32
    %c0_i32_1 = arith.constant 0 : i32
    return %arg0, %c0_i32, %c0_i32_0 : i32, i32, i32
  }
  func.func @transform_1(%arg0: i32, %arg1: i32) -> (i32, i32) {
    %c0_i32 = arith.constant 0 : i32
    %c0_i32_0 = arith.constant 0 : i32
    return %arg1, %c0_i32 : i32, i32
  }
  func.func @transform_2(%arg0: i32, %arg1: i32) -> (i32, i32) {
    %c0_i32 = arith.constant 0 : i32
    %c0_i32_0 = arith.constant 0 : i32
    return %arg1, %c0_i32 : i32, i32
  }
  func.func @transform_3(%arg0: i32, %arg1: i32) -> (i32, i32, i32) {
    %c0_i32 = arith.constant 0 : i32
    %c0_i32_0 = arith.constant 0 : i32
    return %arg0, %arg1, %c0_i32 : i32, i32, i32
  }
}

module attributes {stable_mosaic.version = 11 : i64} {
  func.func @_conv1d_kernel(%arg0: i32, %arg1: i32, %arg2: memref<1x32x256xbf16, #tpu.memory_space<vmem>>, %arg3: memref<32x224xbf16, #tpu.memory_space<vmem>>, %arg4: memref<32x1xf32, #tpu.memory_space<vmem>>, %arg5: memref<1x32x128xf32, #tpu.memory_space<vmem>>) attributes {dimension_semantics = [#tpu.dimension_semantics<parallel>, #tpu.dimension_semantics<parallel>], iteration_bounds = array<i64: 2, 1>, scalar_prefetch = 0 : i64, scratch_operands = 0 : i64, tpu.core_type = #tpu.core_type<tc>, window_params = [{transform_indices = @transform_0, window_bounds = array<i64: 1, 32, 256>}, {transform_indices = @transform_1, window_bounds = array<i64: 32, 224>}, {transform_indices = @transform_2, window_bounds = array<i64: 32, 1>}, {transform_indices = @transform_3, window_bounds = array<i64: 1, 32, 128>}]} {
    %c0 = arith.constant 0 : index
    %c0_0 = arith.constant 0 : index
    %c0_1 = arith.constant 0 : index
    %0 = vector.load %arg2[%c0, %c0_0, %c0_1] : memref<1x32x256xbf16, #tpu.memory_space<vmem>>, vector<1x32x256xbf16>
    %1 = vector.shape_cast %0 : vector<1x32x256xbf16> to vector<32x256xbf16>
    %2 = arith.extf %1 : vector<32x256xbf16> to vector<32x256xf32>
    %cst = arith.constant 0.000000e+00 : f32
    %3 = vector.broadcast %cst : f32 to vector<32x256xf32>
    %4 = arith.cmpf oge, %2, %3 : vector<32x256xf32>
    %cst_2 = arith.constant 1.000000e-01 : f32
    %5 = vector.broadcast %cst_2 : f32 to vector<32x256xf32>
    %6 = arith.mulf %5, %2 : vector<32x256xf32>
    %7 = arith.select %4, %2, %6 : vector<32x256xi1>, vector<32x256xf32>
    %8 = arith.truncf %7 : vector<32x256xf32> to vector<32x256xbf16>
    %9 = vector.extract_strided_slice %8 {offsets = [0, 0], sizes = [32, 128], strides = [1, 1]} : vector<32x256xbf16> to vector<32x128xbf16>
    %10 = vector.extract_strided_slice %8 {offsets = [0, 1], sizes = [32, 128], strides = [1, 1]} : vector<32x256xbf16> to vector<32x128xbf16>
    %11 = vector.extract_strided_slice %8 {offsets = [0, 2], sizes = [32, 128], strides = [1, 1]} : vector<32x256xbf16> to vector<32x128xbf16>
    %12 = vector.extract_strided_slice %8 {offsets = [0, 3], sizes = [32, 128], strides = [1, 1]} : vector<32x256xbf16> to vector<32x128xbf16>
    %13 = vector.extract_strided_slice %8 {offsets = [0, 4], sizes = [32, 128], strides = [1, 1]} : vector<32x256xbf16> to vector<32x128xbf16>
    %14 = vector.extract_strided_slice %8 {offsets = [0, 5], sizes = [32, 128], strides = [1, 1]} : vector<32x256xbf16> to vector<32x128xbf16>
    %15 = vector.extract_strided_slice %8 {offsets = [0, 6], sizes = [32, 128], strides = [1, 1]} : vector<32x256xbf16> to vector<32x128xbf16>
    %16 = tpu.concatenate %9, %10, %11, %12, %13, %14, %15 in 0 : vector<32x128xbf16>, vector<32x128xbf16>, vector<32x128xbf16>, vector<32x128xbf16>, vector<32x128xbf16>, vector<32x128xbf16>, vector<32x128xbf16> -> vector<224x128xbf16>
    %c0_3 = arith.constant 0 : index
    %c0_4 = arith.constant 0 : index
    %17 = vector.load %arg3[%c0_3, %c0_4] : memref<32x224xbf16, #tpu.memory_space<vmem>>, vector<32x224xbf16>
    %cst_5 = arith.constant dense<0.000000e+00> : vector<32x128xf32>
    %18 = tpu.matmul %17, %16, %cst_5 {dimension_numbers = #tpu.dot_dimension_numbers<[1], [0], [0], [1], [0, 0, 1, 1], [], []>} : vector<32x224xbf16>, vector<224x128xbf16>, vector<32x128xf32> -> vector<32x128xf32>
    %c0_6 = arith.constant 0 : index
    %c0_7 = arith.constant 0 : index
    %19 = vector.load %arg4[%c0_6, %c0_7] : memref<32x1xf32, #tpu.memory_space<vmem>>, vector<32x1xf32>
    %20 = vector.broadcast %19 : vector<32x1xf32> to vector<32x128xf32>
    %21 = arith.addf %18, %20 : vector<32x128xf32>
    %c0_8 = arith.constant 0 : index
    %c0_9 = arith.constant 0 : index
    %c0_10 = arith.constant 0 : index
    %22 = vector.load %arg5[%c0_8, %c0_9, %c0_10] : memref<1x32x128xf32, #tpu.memory_space<vmem>>, vector<1x32x128xf32>
    %23 = vector.shape_cast %22 : vector<1x32x128xf32> to vector<32x128xf32>
    %24 = vector.shape_cast %21 : vector<32x128xf32> to vector<1x32x128xf32>
    tpu.vector_store %arg5[%c0_8, %c0_9, %c0_10], %24 {strides = array<i32>} : memref<1x32x128xf32, #tpu.memory_space<vmem>>, vector<1x32x128xf32>,
    return
  }
  func.func @transform_0(%arg0: i32, %arg1: i32) -> (i32, i32, i32) {
    %c0_i32 = arith.constant 0 : i32
    %c0_i32_0 = arith.constant 0 : i32
    %c0_i32_1 = arith.constant 0 : i32
    return %arg0, %c0_i32, %c0_i32_0 : i32, i32, i32
  }
  func.func @transform_1(%arg0: i32, %arg1: i32) -> (i32, i32) {
    %c0_i32 = arith.constant 0 : i32
    %c0_i32_0 = arith.constant 0 : i32
    return %arg1, %c0_i32 : i32, i32
  }
  func.func @transform_2(%arg0: i32, %arg1: i32) -> (i32, i32) {
    %c0_i32 = arith.constant 0 : i32
    %c0_i32_0 = arith.constant 0 : i32
    return %arg1, %c0_i32 : i32, i32
  }
  func.func @transform_3(%arg0: i32, %arg1: i32) -> (i32, i32, i32) {
    %c0_i32 = arith.constant 0 : i32
    %c0_i32_0 = arith.constant 0 : i32
    return %arg0, %arg1, %c0_i32 : i32, i32, i32
  }
}

module attributes {stable_mosaic.version = 11 : i64} {
  func.func @_conv1d_kernel(%arg0: i32, %arg1: i32, %arg2: memref<1x32x256xbf16, #tpu.memory_space<vmem>>, %arg3: memref<32x96xbf16, #tpu.memory_space<vmem>>, %arg4: memref<32x1xf32, #tpu.memory_space<vmem>>, %arg5: memref<1x32x128xf32, #tpu.memory_space<vmem>>) attributes {dimension_semantics = [#tpu.dimension_semantics<parallel>, #tpu.dimension_semantics<parallel>], iteration_bounds = array<i64: 2, 1>, scalar_prefetch = 0 : i64, scratch_operands = 0 : i64, tpu.core_type = #tpu.core_type<tc>, window_params = [{transform_indices = @transform_0, window_bounds = array<i64: 1, 32, 256>}, {transform_indices = @transform_1, window_bounds = array<i64: 32, 96>}, {transform_indices = @transform_2, window_bounds = array<i64: 32, 1>}, {transform_indices = @transform_3, window_bounds = array<i64: 1, 32, 128>}]} {
    %c0 = arith.constant 0 : index
    %c0_0 = arith.constant 0 : index
    %c0_1 = arith.constant 0 : index
    %0 = vector.load %arg2[%c0, %c0_0, %c0_1] : memref<1x32x256xbf16, #tpu.memory_space<vmem>>, vector<1x32x256xbf16>
    %1 = vector.shape_cast %0 : vector<1x32x256xbf16> to vector<32x256xbf16>
    %2 = arith.extf %1 : vector<32x256xbf16> to vector<32x256xf32>
    %cst = arith.constant 0.000000e+00 : f32
    %3 = vector.broadcast %cst : f32 to vector<32x256xf32>
    %4 = arith.cmpf oge, %2, %3 : vector<32x256xf32>
    %cst_2 = arith.constant 1.000000e-01 : f32
    %5 = vector.broadcast %cst_2 : f32 to vector<32x256xf32>
    %6 = arith.mulf %5, %2 : vector<32x256xf32>
    %7 = arith.select %4, %2, %6 : vector<32x256xi1>, vector<32x256xf32>
    %8 = arith.truncf %7 : vector<32x256xf32> to vector<32x256xbf16>
    %9 = vector.extract_strided_slice %8 {offsets = [0, 0], sizes = [32, 128], strides = [1, 1]} : vector<32x256xbf16> to vector<32x128xbf16>
    %10 = vector.extract_strided_slice %8 {offsets = [0, 1], sizes = [32, 128], strides = [1, 1]} : vector<32x256xbf16> to vector<32x128xbf16>
    %11 = vector.extract_strided_slice %8 {offsets = [0, 2], sizes = [32, 128], strides = [1, 1]} : vector<32x256xbf16> to vector<32x128xbf16>
    %12 = tpu.concatenate %9, %10, %11 in 0 : vector<32x128xbf16>, vector<32x128xbf16>, vector<32x128xbf16> -> vector<96x128xbf16>
    %c0_3 = arith.constant 0 : index
    %c0_4 = arith.constant 0 : index
    %13 = vector.load %arg3[%c0_3, %c0_4] : memref<32x96xbf16, #tpu.memory_space<vmem>>, vector<32x96xbf16>
    %cst_5 = arith.constant dense<0.000000e+00> : vector<32x128xf32>
    %14 = tpu.matmul %13, %12, %cst_5 {dimension_numbers = #tpu.dot_dimension_numbers<[1], [0], [0], [1], [0, 0, 1, 1], [], []>} : vector<32x96xbf16>, vector<96x128xbf16>, vector<32x128xf32> -> vector<32x128xf32>
    %c0_6 = arith.constant 0 : index
    %c0_7 = arith.constant 0 : index
    %15 = vector.load %arg4[%c0_6, %c0_7] : memref<32x1xf32, #tpu.memory_space<vmem>>, vector<32x1xf32>
    %16 = vector.broadcast %15 : vector<32x1xf32> to vector<32x128xf32>
    %17 = arith.addf %14, %16 : vector<32x128xf32>
    %c0_8 = arith.constant 0 : index
    %c0_9 = arith.constant 0 : index
    %c0_10 = arith.constant 0 : index
    %18 = vector.load %arg5[%c0_8, %c0_9, %c0_10] : memref<1x32x128xf32, #tpu.memory_space<vmem>>, vector<1x32x128xf32>
    %19 = vector.shape_cast %18 : vector<1x32x128xf32> to vector<32x128xf32>
    %20 = vector.shape_cast %17 : vector<32x128xf32> to vector<1x32x128xf32>
    tpu.vector_store %arg5[%c0_8, %c0_9, %c0_10], %20 {strides = array<i32>} : memref<1x32x128xf32, #tpu.memory_space<vmem>>, vector<1x32x128xf32>,
    return
  }
  func.func @transform_0(%arg0: i32, %arg1: i32) -> (i32, i32, i32) {
    %c0_i32 = arith.constant 0 : i32
    %c0_i32_0 = arith.constant 0 : i32
    %c0_i32_1 = arith.constant 0 : i32
    return %arg0, %c0_i32, %c0_i32_0 : i32, i32, i32
  }
  func.func @transform_1(%arg0: i32, %arg1: i32) -> (i32, i32) {
    %c0_i32 = arith.constant 0 : i32
    %c0_i32_0 = arith.constant 0 : i32
    return %arg1, %c0_i32 : i32, i32
  }
  func.func @transform_2(%arg0: i32, %arg1: i32) -> (i32, i32) {
    %c0_i32 = arith.constant 0 : i32
    %c0_i32_0 = arith.constant 0 : i32
    return %arg1, %c0_i32 : i32, i32
  }
  func.func @transform_3(%arg0: i32, %arg1: i32) -> (i32, i32, i32) {
    %c0_i32 = arith.constant 0 : i32
    %c0_i32_0 = arith.constant 0 : i32
    return %arg0, %arg1, %c0_i32 : i32, i32, i32
  }
}

module attributes {stable_mosaic.version = 11 : i64} {
  func.func @_conv1d_kernel(%arg0: i32, %arg1: i32, %arg2: memref<1x32x256xbf16, #tpu.memory_space<vmem>>, %arg3: memref<32x224xbf16, #tpu.memory_space<vmem>>, %arg4: memref<32x1xf32, #tpu.memory_space<vmem>>, %arg5: memref<1x32x128xf32, #tpu.memory_space<vmem>>) attributes {dimension_semantics = [#tpu.dimension_semantics<parallel>, #tpu.dimension_semantics<parallel>], iteration_bounds = array<i64: 2, 1>, scalar_prefetch = 0 : i64, scratch_operands = 0 : i64, tpu.core_type = #tpu.core_type<tc>, window_params = [{transform_indices = @transform_0, window_bounds = array<i64: 1, 32, 256>}, {transform_indices = @transform_1, window_bounds = array<i64: 32, 224>}, {transform_indices = @transform_2, window_bounds = array<i64: 32, 1>}, {transform_indices = @transform_3, window_bounds = array<i64: 1, 32, 128>}]} {
    %c0 = arith.constant 0 : index
    %c0_0 = arith.constant 0 : index
    %c0_1 = arith.constant 0 : index
    %0 = vector.load %arg2[%c0, %c0_0, %c0_1] : memref<1x32x256xbf16, #tpu.memory_space<vmem>>, vector<1x32x256xbf16>
    %1 = vector.shape_cast %0 : vector<1x32x256xbf16> to vector<32x256xbf16>
    %2 = arith.extf %1 : vector<32x256xbf16> to vector<32x256xf32>
    %cst = arith.constant 0.000000e+00 : f32
    %3 = vector.broadcast %cst : f32 to vector<32x256xf32>
    %4 = arith.cmpf oge, %2, %3 : vector<32x256xf32>
    %cst_2 = arith.constant 1.000000e-01 : f32
    %5 = vector.broadcast %cst_2 : f32 to vector<32x256xf32>
    %6 = arith.mulf %5, %2 : vector<32x256xf32>
    %7 = arith.select %4, %2, %6 : vector<32x256xi1>, vector<32x256xf32>
    %8 = arith.truncf %7 : vector<32x256xf32> to vector<32x256xbf16>
    %9 = vector.extract_strided_slice %8 {offsets = [0, 0], sizes = [32, 128], strides = [1, 1]} : vector<32x256xbf16> to vector<32x128xbf16>
    %10 = vector.extract_strided_slice %8 {offsets = [0, 3], sizes = [32, 128], strides = [1, 1]} : vector<32x256xbf16> to vector<32x128xbf16>
    %11 = vector.extract_strided_slice %8 {offsets = [0, 6], sizes = [32, 128], strides = [1, 1]} : vector<32x256xbf16> to vector<32x128xbf16>
    %12 = vector.extract_strided_slice %8 {offsets = [0, 9], sizes = [32, 128], strides = [1, 1]} : vector<32x256xbf16> to vector<32x128xbf16>
    %13 = vector.extract_strided_slice %8 {offsets = [0, 12], sizes = [32, 128], strides = [1, 1]} : vector<32x256xbf16> to vector<32x128xbf16>
    %14 = vector.extract_strided_slice %8 {offsets = [0, 15], sizes = [32, 128], strides = [1, 1]} : vector<32x256xbf16> to vector<32x128xbf16>
    %15 = vector.extract_strided_slice %8 {offsets = [0, 18], sizes = [32, 128], strides = [1, 1]} : vector<32x256xbf16> to vector<32x128xbf16>
    %16 = tpu.concatenate %9, %10, %11, %12, %13, %14, %15 in 0 : vector<32x128xbf16>, vector<32x128xbf16>, vector<32x128xbf16>, vector<32x128xbf16>, vector<32x128xbf16>, vector<32x128xbf16>, vector<32x128xbf16> -> vector<224x128xbf16>
    %c0_3 = arith.constant 0 : index
    %c0_4 = arith.constant 0 : index
    %17 = vector.load %arg3[%c0_3, %c0_4] : memref<32x224xbf16, #tpu.memory_space<vmem>>, vector<32x224xbf16>
    %cst_5 = arith.constant dense<0.000000e+00> : vector<32x128xf32>
    %18 = tpu.matmul %17, %16, %cst_5 {dimension_numbers = #tpu.dot_dimension_numbers<[1], [0], [0], [1], [0, 0, 1, 1], [], []>} : vector<32x224xbf16>, vector<224x128xbf16>, vector<32x128xf32> -> vector<32x128xf32>
    %c0_6 = arith.constant 0 : index
    %c0_7 = arith.constant 0 : index
    %19 = vector.load %arg4[%c0_6, %c0_7] : memref<32x1xf32, #tpu.memory_space<vmem>>, vector<32x1xf32>
    %20 = vector.broadcast %19 : vector<32x1xf32> to vector<32x128xf32>
    %21 = arith.addf %18, %20 : vector<32x128xf32>
    %c0_8 = arith.constant 0 : index
    %c0_9 = arith.constant 0 : index
    %c0_10 = arith.constant 0 : index
    %22 = vector.load %arg5[%c0_8, %c0_9, %c0_10] : memref<1x32x128xf32, #tpu.memory_space<vmem>>, vector<1x32x128xf32>
    %23 = vector.shape_cast %22 : vector<1x32x128xf32> to vector<32x128xf32>
    %24 = vector.shape_cast %21 : vector<32x128xf32> to vector<1x32x128xf32>
    tpu.vector_store %arg5[%c0_8, %c0_9, %c0_10], %24 {strides = array<i32>} : memref<1x32x128xf32, #tpu.memory_space<vmem>>, vector<1x32x128xf32>,
    return
  }
  func.func @transform_0(%arg0: i32, %arg1: i32) -> (i32, i32, i32) {
    %c0_i32 = arith.constant 0 : i32
    %c0_i32_0 = arith.constant 0 : i32
    %c0_i32_1 = arith.constant 0 : i32
    return %arg0, %c0_i32, %c0_i32_0 : i32, i32, i32
  }
  func.func @transform_1(%arg0: i32, %arg1: i32) -> (i32, i32) {
    %c0_i32 = arith.constant 0 : i32
    %c0_i32_0 = arith.constant 0 : i32
    return %arg1, %c0_i32 : i32, i32
  }
  func.func @transform_2(%arg0: i32, %arg1: i32) -> (i32, i32) {
    %c0_i32 = arith.constant 0 : i32
    %c0_i32_0 = arith.constant 0 : i32
    return %arg1, %c0_i32 : i32, i32
  }
  func.func @transform_3(%arg0: i32, %arg1: i32) -> (i32, i32, i32) {
    %c0_i32 = arith.constant 0 : i32
    %c0_i32_0 = arith.constant 0 : i32
    return %arg0, %arg1, %c0_i32 : i32, i32, i32
  }
}

module attributes {stable_mosaic.version = 11 : i64} {
  func.func @_conv1d_kernel(%arg0: i32, %arg1: i32, %arg2: memref<1x32x256xbf16, #tpu.memory_space<vmem>>, %arg3: memref<32x96xbf16, #tpu.memory_space<vmem>>, %arg4: memref<32x1xf32, #tpu.memory_space<vmem>>, %arg5: memref<1x32x128xf32, #tpu.memory_space<vmem>>) attributes {dimension_semantics = [#tpu.dimension_semantics<parallel>, #tpu.dimension_semantics<parallel>], iteration_bounds = array<i64: 2, 1>, scalar_prefetch = 0 : i64, scratch_operands = 0 : i64, tpu.core_type = #tpu.core_type<tc>, window_params = [{transform_indices = @transform_0, window_bounds = array<i64: 1, 32, 256>}, {transform_indices = @transform_1, window_bounds = array<i64: 32, 96>}, {transform_indices = @transform_2, window_bounds = array<i64: 32, 1>}, {transform_indices = @transform_3, window_bounds = array<i64: 1, 32, 128>}]} {
    %c0 = arith.constant 0 : index
    %c0_0 = arith.constant 0 : index
    %c0_1 = arith.constant 0 : index
    %0 = vector.load %arg2[%c0, %c0_0, %c0_1] : memref<1x32x256xbf16, #tpu.memory_space<vmem>>, vector<1x32x256xbf16>
    %1 = vector.shape_cast %0 : vector<1x32x256xbf16> to vector<32x256xbf16>
    %2 = arith.extf %1 : vector<32x256xbf16> to vector<32x256xf32>
    %cst = arith.constant 0.000000e+00 : f32
    %3 = vector.broadcast %cst : f32 to vector<32x256xf32>
    %4 = arith.cmpf oge, %2, %3 : vector<32x256xf32>
    %cst_2 = arith.constant 1.000000e-01 : f32
    %5 = vector.broadcast %cst_2 : f32 to vector<32x256xf32>
    %6 = arith.mulf %5, %2 : vector<32x256xf32>
    %7 = arith.select %4, %2, %6 : vector<32x256xi1>, vector<32x256xf32>
    %8 = arith.truncf %7 : vector<32x256xf32> to vector<32x256xbf16>
    %9 = vector.extract_strided_slice %8 {offsets = [0, 0], sizes = [32, 128], strides = [1, 1]} : vector<32x256xbf16> to vector<32x128xbf16>
    %10 = vector.extract_strided_slice %8 {offsets = [0, 3], sizes = [32, 128], strides = [1, 1]} : vector<32x256xbf16> to vector<32x128xbf16>
    %11 = vector.extract_strided_slice %8 {offsets = [0, 6], sizes = [32, 128], strides = [1, 1]} : vector<32x256xbf16> to vector<32x128xbf16>
    %12 = tpu.concatenate %9, %10, %11 in 0 : vector<32x128xbf16>, vector<32x128xbf16>, vector<32x128xbf16> -> vector<96x128xbf16>
    %c0_3 = arith.constant 0 : index
    %c0_4 = arith.constant 0 : index
    %13 = vector.load %arg3[%c0_3, %c0_4] : memref<32x96xbf16, #tpu.memory_space<vmem>>, vector<32x96xbf16>
    %cst_5 = arith.constant dense<0.000000e+00> : vector<32x128xf32>
    %14 = tpu.matmul %13, %12, %cst_5 {dimension_numbers = #tpu.dot_dimension_numbers<[1], [0], [0], [1], [0, 0, 1, 1], [], []>} : vector<32x96xbf16>, vector<96x128xbf16>, vector<32x128xf32> -> vector<32x128xf32>
    %c0_6 = arith.constant 0 : index
    %c0_7 = arith.constant 0 : index
    %15 = vector.load %arg4[%c0_6, %c0_7] : memref<32x1xf32, #tpu.memory_space<vmem>>, vector<32x1xf32>
    %16 = vector.broadcast %15 : vector<32x1xf32> to vector<32x128xf32>
    %17 = arith.addf %14, %16 : vector<32x128xf32>
    %c0_8 = arith.constant 0 : index
    %c0_9 = arith.constant 0 : index
    %c0_10 = arith.constant 0 : index
    %18 = vector.load %arg5[%c0_8, %c0_9, %c0_10] : memref<1x32x128xf32, #tpu.memory_space<vmem>>, vector<1x32x128xf32>
    %19 = vector.shape_cast %18 : vector<1x32x128xf32> to vector<32x128xf32>
    %20 = vector.shape_cast %17 : vector<32x128xf32> to vector<1x32x128xf32>
    tpu.vector_store %arg5[%c0_8, %c0_9, %c0_10], %20 {strides = array<i32>} : memref<1x32x128xf32, #tpu.memory_space<vmem>>, vector<1x32x128xf32>,
    return
  }
  func.func @transform_0(%arg0: i32, %arg1: i32) -> (i32, i32, i32) {
    %c0_i32 = arith.constant 0 : i32
    %c0_i32_0 = arith.constant 0 : i32
    %c0_i32_1 = arith.constant 0 : i32
    return %arg0, %c0_i32, %c0_i32_0 : i32, i32, i32
  }
  func.func @transform_1(%arg0: i32, %arg1: i32) -> (i32, i32) {
    %c0_i32 = arith.constant 0 : i32
    %c0_i32_0 = arith.constant 0 : i32
    return %arg1, %c0_i32 : i32, i32
  }
  func.func @transform_2(%arg0: i32, %arg1: i32) -> (i32, i32) {
    %c0_i32 = arith.constant 0 : i32
    %c0_i32_0 = arith.constant 0 : i32
    return %arg1, %c0_i32 : i32, i32
  }
  func.func @transform_3(%arg0: i32, %arg1: i32) -> (i32, i32, i32) {
    %c0_i32 = arith.constant 0 : i32
    %c0_i32_0 = arith.constant 0 : i32
    return %arg0, %arg1, %c0_i32 : i32, i32, i32
  }
}

module attributes {stable_mosaic.version = 11 : i64} {
  func.func @_conv1d_kernel(%arg0: i32, %arg1: i32, %arg2: memref<1x32x256xbf16, #tpu.memory_space<vmem>>, %arg3: memref<32x224xbf16, #tpu.memory_space<vmem>>, %arg4: memref<32x1xf32, #tpu.memory_space<vmem>>, %arg5: memref<1x32x128xf32, #tpu.memory_space<vmem>>) attributes {dimension_semantics = [#tpu.dimension_semantics<parallel>, #tpu.dimension_semantics<parallel>], iteration_bounds = array<i64: 2, 1>, scalar_prefetch = 0 : i64, scratch_operands = 0 : i64, tpu.core_type = #tpu.core_type<tc>, window_params = [{transform_indices = @transform_0, window_bounds = array<i64: 1, 32, 256>}, {transform_indices = @transform_1, window_bounds = array<i64: 32, 224>}, {transform_indices = @transform_2, window_bounds = array<i64: 32, 1>}, {transform_indices = @transform_3, window_bounds = array<i64: 1, 32, 128>}]} {
    %c0 = arith.constant 0 : index
    %c0_0 = arith.constant 0 : index
    %c0_1 = arith.constant 0 : index
    %0 = vector.load %arg2[%c0, %c0_0, %c0_1] : memref<1x32x256xbf16, #tpu.memory_space<vmem>>, vector<1x32x256xbf16>
    %1 = vector.shape_cast %0 : vector<1x32x256xbf16> to vector<32x256xbf16>
    %2 = arith.extf %1 : vector<32x256xbf16> to vector<32x256xf32>
    %cst = arith.constant 0.000000e+00 : f32
    %3 = vector.broadcast %cst : f32 to vector<32x256xf32>
    %4 = arith.cmpf oge, %2, %3 : vector<32x256xf32>
    %cst_2 = arith.constant 1.000000e-01 : f32
    %5 = vector.broadcast %cst_2 : f32 to vector<32x256xf32>
    %6 = arith.mulf %5, %2 : vector<32x256xf32>
    %7 = arith.select %4, %2, %6 : vector<32x256xi1>, vector<32x256xf32>
    %8 = arith.truncf %7 : vector<32x256xf32> to vector<32x256xbf16>
    %9 = vector.extract_strided_slice %8 {offsets = [0, 0], sizes = [32, 128], strides = [1, 1]} : vector<32x256xbf16> to vector<32x128xbf16>
    %10 = vector.extract_strided_slice %8 {offsets = [0, 5], sizes = [32, 128], strides = [1, 1]} : vector<32x256xbf16> to vector<32x128xbf16>
    %11 = vector.extract_strided_slice %8 {offsets = [0, 10], sizes = [32, 128], strides = [1, 1]} : vector<32x256xbf16> to vector<32x128xbf16>
    %12 = vector.extract_strided_slice %8 {offsets = [0, 15], sizes = [32, 128], strides = [1, 1]} : vector<32x256xbf16> to vector<32x128xbf16>
    %13 = vector.extract_strided_slice %8 {offsets = [0, 20], sizes = [32, 128], strides = [1, 1]} : vector<32x256xbf16> to vector<32x128xbf16>
    %14 = vector.extract_strided_slice %8 {offsets = [0, 25], sizes = [32, 128], strides = [1, 1]} : vector<32x256xbf16> to vector<32x128xbf16>
    %15 = vector.extract_strided_slice %8 {offsets = [0, 30], sizes = [32, 128], strides = [1, 1]} : vector<32x256xbf16> to vector<32x128xbf16>
    %16 = tpu.concatenate %9, %10, %11, %12, %13, %14, %15 in 0 : vector<32x128xbf16>, vector<32x128xbf16>, vector<32x128xbf16>, vector<32x128xbf16>, vector<32x128xbf16>, vector<32x128xbf16>, vector<32x128xbf16> -> vector<224x128xbf16>
    %c0_3 = arith.constant 0 : index
    %c0_4 = arith.constant 0 : index
    %17 = vector.load %arg3[%c0_3, %c0_4] : memref<32x224xbf16, #tpu.memory_space<vmem>>, vector<32x224xbf16>
    %cst_5 = arith.constant dense<0.000000e+00> : vector<32x128xf32>
    %18 = tpu.matmul %17, %16, %cst_5 {dimension_numbers = #tpu.dot_dimension_numbers<[1], [0], [0], [1], [0, 0, 1, 1], [], []>} : vector<32x224xbf16>, vector<224x128xbf16>, vector<32x128xf32> -> vector<32x128xf32>
    %c0_6 = arith.constant 0 : index
    %c0_7 = arith.constant 0 : index
    %19 = vector.load %arg4[%c0_6, %c0_7] : memref<32x1xf32, #tpu.memory_space<vmem>>, vector<32x1xf32>
    %20 = vector.broadcast %19 : vector<32x1xf32> to vector<32x128xf32>
    %21 = arith.addf %18, %20 : vector<32x128xf32>
    %c0_8 = arith.constant 0 : index
    %c0_9 = arith.constant 0 : index
    %c0_10 = arith.constant 0 : index
    %22 = vector.load %arg5[%c0_8, %c0_9, %c0_10] : memref<1x32x128xf32, #tpu.memory_space<vmem>>, vector<1x32x128xf32>
    %23 = vector.shape_cast %22 : vector<1x32x128xf32> to vector<32x128xf32>
    %24 = vector.shape_cast %21 : vector<32x128xf32> to vector<1x32x128xf32>
    tpu.vector_store %arg5[%c0_8, %c0_9, %c0_10], %24 {strides = array<i32>} : memref<1x32x128xf32, #tpu.memory_space<vmem>>, vector<1x32x128xf32>,
    return
  }
  func.func @transform_0(%arg0: i32, %arg1: i32) -> (i32, i32, i32) {
    %c0_i32 = arith.constant 0 : i32
    %c0_i32_0 = arith.constant 0 : i32
    %c0_i32_1 = arith.constant 0 : i32
    return %arg0, %c0_i32, %c0_i32_0 : i32, i32, i32
  }
  func.func @transform_1(%arg0: i32, %arg1: i32) -> (i32, i32) {
    %c0_i32 = arith.constant 0 : i32
    %c0_i32_0 = arith.constant 0 : i32
    return %arg1, %c0_i32 : i32, i32
  }
  func.func @transform_2(%arg0: i32, %arg1: i32) -> (i32, i32) {
    %c0_i32 = arith.constant 0 : i32
    %c0_i32_0 = arith.constant 0 : i32
    return %arg1, %c0_i32 : i32, i32
  }
  func.func @transform_3(%arg0: i32, %arg1: i32) -> (i32, i32, i32) {
    %c0_i32 = arith.constant 0 : i32
    %c0_i32_0 = arith.constant 0 : i32
    return %arg0, %arg1, %c0_i32 : i32, i32, i32
  }
}

module attributes {stable_mosaic.version = 11 : i64} {
  func.func @_conv1d_kernel(%arg0: i32, %arg1: i32, %arg2: memref<1x32x256xbf16, #tpu.memory_space<vmem>>, %arg3: memref<32x96xbf16, #tpu.memory_space<vmem>>, %arg4: memref<32x1xf32, #tpu.memory_space<vmem>>, %arg5: memref<1x32x128xf32, #tpu.memory_space<vmem>>) attributes {dimension_semantics = [#tpu.dimension_semantics<parallel>, #tpu.dimension_semantics<parallel>], iteration_bounds = array<i64: 2, 1>, scalar_prefetch = 0 : i64, scratch_operands = 0 : i64, tpu.core_type = #tpu.core_type<tc>, window_params = [{transform_indices = @transform_0, window_bounds = array<i64: 1, 32, 256>}, {transform_indices = @transform_1, window_bounds = array<i64: 32, 96>}, {transform_indices = @transform_2, window_bounds = array<i64: 32, 1>}, {transform_indices = @transform_3, window_bounds = array<i64: 1, 32, 128>}]} {
    %c0 = arith.constant 0 : index
    %c0_0 = arith.constant 0 : index
    %c0_1 = arith.constant 0 : index
    %0 = vector.load %arg2[%c0, %c0_0, %c0_1] : memref<1x32x256xbf16, #tpu.memory_space<vmem>>, vector<1x32x256xbf16>
    %1 = vector.shape_cast %0 : vector<1x32x256xbf16> to vector<32x256xbf16>
    %2 = arith.extf %1 : vector<32x256xbf16> to vector<32x256xf32>
    %cst = arith.constant 0.000000e+00 : f32
    %3 = vector.broadcast %cst : f32 to vector<32x256xf32>
    %4 = arith.cmpf oge, %2, %3 : vector<32x256xf32>
    %cst_2 = arith.constant 1.000000e-01 : f32
    %5 = vector.broadcast %cst_2 : f32 to vector<32x256xf32>
    %6 = arith.mulf %5, %2 : vector<32x256xf32>
    %7 = arith.select %4, %2, %6 : vector<32x256xi1>, vector<32x256xf32>
    %8 = arith.truncf %7 : vector<32x256xf32> to vector<32x256xbf16>
    %9 = vector.extract_strided_slice %8 {offsets = [0, 0], sizes = [32, 128], strides = [1, 1]} : vector<32x256xbf16> to vector<32x128xbf16>
    %10 = vector.extract_strided_slice %8 {offsets = [0, 5], sizes = [32, 128], strides = [1, 1]} : vector<32x256xbf16> to vector<32x128xbf16>
    %11 = vector.extract_strided_slice %8 {offsets = [0, 10], sizes = [32, 128], strides = [1, 1]} : vector<32x256xbf16> to vector<32x128xbf16>
    %12 = tpu.concatenate %9, %10, %11 in 0 : vector<32x128xbf16>, vector<32x128xbf16>, vector<32x128xbf16> -> vector<96x128xbf16>
    %c0_3 = arith.constant 0 : index
    %c0_4 = arith.constant 0 : index
    %13 = vector.load %arg3[%c0_3, %c0_4] : memref<32x96xbf16, #tpu.memory_space<vmem>>, vector<32x96xbf16>
    %cst_5 = arith.constant dense<0.000000e+00> : vector<32x128xf32>
    %14 = tpu.matmul %13, %12, %cst_5 {dimension_numbers = #tpu.dot_dimension_numbers<[1], [0], [0], [1], [0, 0, 1, 1], [], []>} : vector<32x96xbf16>, vector<96x128xbf16>, vector<32x128xf32> -> vector<32x128xf32>
    %c0_6 = arith.constant 0 : index
    %c0_7 = arith.constant 0 : index
    %15 = vector.load %arg4[%c0_6, %c0_7] : memref<32x1xf32, #tpu.memory_space<vmem>>, vector<32x1xf32>
    %16 = vector.broadcast %15 : vector<32x1xf32> to vector<32x128xf32>
    %17 = arith.addf %14, %16 : vector<32x128xf32>
    %c0_8 = arith.constant 0 : index
    %c0_9 = arith.constant 0 : index
    %c0_10 = arith.constant 0 : index
    %18 = vector.load %arg5[%c0_8, %c0_9, %c0_10] : memref<1x32x128xf32, #tpu.memory_space<vmem>>, vector<1x32x128xf32>
    %19 = vector.shape_cast %18 : vector<1x32x128xf32> to vector<32x128xf32>
    %20 = vector.shape_cast %17 : vector<32x128xf32> to vector<1x32x128xf32>
    tpu.vector_store %arg5[%c0_8, %c0_9, %c0_10], %20 {strides = array<i32>} : memref<1x32x128xf32, #tpu.memory_space<vmem>>, vector<1x32x128xf32>,
    return
  }
  func.func @transform_0(%arg0: i32, %arg1: i32) -> (i32, i32, i32) {
    %c0_i32 = arith.constant 0 : i32
    %c0_i32_0 = arith.constant 0 : i32
    %c0_i32_1 = arith.constant 0 : i32
    return %arg0, %c0_i32, %c0_i32_0 : i32, i32, i32
  }
  func.func @transform_1(%arg0: i32, %arg1: i32) -> (i32, i32) {
    %c0_i32 = arith.constant 0 : i32
    %c0_i32_0 = arith.constant 0 : i32
    return %arg1, %c0_i32 : i32, i32
  }
  func.func @transform_2(%arg0: i32, %arg1: i32) -> (i32, i32) {
    %c0_i32 = arith.constant 0 : i32
    %c0_i32_0 = arith.constant 0 : i32
    return %arg1, %c0_i32 : i32, i32
  }
  func.func @transform_3(%arg0: i32, %arg1: i32) -> (i32, i32, i32) {
    %c0_i32 = arith.constant 0 : i32
    %c0_i32_0 = arith.constant 0 : i32
    return %arg0, %arg1, %c0_i32 : i32, i32, i32
  }
}

module attributes {stable_mosaic.version = 11 : i64} {
  func.func @_conv1d_kernel(%arg0: i32, %arg1: i32, %arg2: memref<1x32x384xbf16, #tpu.memory_space<vmem>>, %arg3: memref<16x256xbf16, #tpu.memory_space<vmem>>, %arg4: memref<16x1xf32, #tpu.memory_space<vmem>>, %arg5: memref<1x16x256xf32, #tpu.memory_space<vmem>>) attributes {dimension_semantics = [#tpu.dimension_semantics<parallel>, #tpu.dimension_semantics<parallel>], iteration_bounds = array<i64: 2, 1>, scalar_prefetch = 0 : i64, scratch_operands = 0 : i64, tpu.core_type = #tpu.core_type<tc>, window_params = [{transform_indices = @transform_0, window_bounds = array<i64: 1, 32, 384>}, {transform_indices = @transform_1, window_bounds = array<i64: 16, 256>}, {transform_indices = @transform_2, window_bounds = array<i64: 16, 1>}, {transform_indices = @transform_3, window_bounds = array<i64: 1, 16, 256>}]} {
    %c0 = arith.constant 0 : index
    %c0_0 = arith.constant 0 : index
    %c0_1 = arith.constant 0 : index
    %0 = vector.load %arg2[%c0, %c0_0, %c0_1] : memref<1x32x384xbf16, #tpu.memory_space<vmem>>, vector<1x32x384xbf16>
    %1 = vector.shape_cast %0 : vector<1x32x384xbf16> to vector<32x384xbf16>
    %2 = arith.extf %1 : vector<32x384xbf16> to vector<32x384xf32>
    %cst = arith.constant 0.000000e+00 : f32
    %3 = vector.broadcast %cst : f32 to vector<32x384xf32>
    %4 = arith.cmpf oge, %2, %3 : vector<32x384xf32>
    %cst_2 = arith.constant 1.000000e-01 : f32
    %5 = vector.broadcast %cst_2 : f32 to vector<32x384xf32>
    %6 = arith.mulf %5, %2 : vector<32x384xf32>
    %7 = arith.select %4, %2, %6 : vector<32x384xi1>, vector<32x384xf32>
    %8 = arith.truncf %7 : vector<32x384xf32> to vector<32x384xbf16>
    %9 = vector.extract_strided_slice %8 {offsets = [0, 0], sizes = [32, 256], strides = [1, 1]} : vector<32x384xbf16> to vector<32x256xbf16>
    %10 = vector.extract_strided_slice %8 {offsets = [0, 1], sizes = [32, 256], strides = [1, 1]} : vector<32x384xbf16> to vector<32x256xbf16>
    %11 = vector.extract_strided_slice %8 {offsets = [0, 2], sizes = [32, 256], strides = [1, 1]} : vector<32x384xbf16> to vector<32x256xbf16>
    %12 = vector.extract_strided_slice %8 {offsets = [0, 3], sizes = [32, 256], strides = [1, 1]} : vector<32x384xbf16> to vector<32x256xbf16>
    %13 = vector.extract_strided_slice %8 {offsets = [0, 4], sizes = [32, 256], strides = [1, 1]} : vector<32x384xbf16> to vector<32x256xbf16>
    %14 = vector.extract_strided_slice %8 {offsets = [0, 5], sizes = [32, 256], strides = [1, 1]} : vector<32x384xbf16> to vector<32x256xbf16>
    %15 = vector.extract_strided_slice %8 {offsets = [0, 6], sizes = [32, 256], strides = [1, 1]} : vector<32x384xbf16> to vector<32x256xbf16>
    %16 = vector.extract_strided_slice %8 {offsets = [0, 7], sizes = [32, 256], strides = [1, 1]} : vector<32x384xbf16> to vector<32x256xbf16>
    %17 = tpu.concatenate %9, %10, %11, %12, %13, %14, %15, %16 in 0 : vector<32x256xbf16>, vector<32x256xbf16>, vector<32x256xbf16>, vector<32x256xbf16>, vector<32x256xbf16>, vector<32x256xbf16>, vector<32x256xbf16>, vector<32x256xbf16> -> vector<256x256xbf16>
    %c0_3 = arith.constant 0 : index
    %c0_4 = arith.constant 0 : index
    %18 = vector.load %arg3[%c0_3, %c0_4] : memref<16x256xbf16, #tpu.memory_space<vmem>>, vector<16x256xbf16>
    %cst_5 = arith.constant dense<0.000000e+00> : vector<16x256xf32>
    %19 = tpu.matmul %18, %17, %cst_5 {dimension_numbers = #tpu.dot_dimension_numbers<[1], [0], [0], [1], [0, 0, 1, 1], [], []>} : vector<16x256xbf16>, vector<256x256xbf16>, vector<16x256xf32> -> vector<16x256xf32>
    %c0_6 = arith.constant 0 : index
    %c0_7 = arith.constant 0 : index
    %20 = vector.load %arg4[%c0_6, %c0_7] : memref<16x1xf32, #tpu.memory_space<vmem>>, vector<16x1xf32>
    %21 = vector.broadcast %20 : vector<16x1xf32> to vector<16x256xf32>
    %22 = arith.addf %19, %21 : vector<16x256xf32>
    %c0_8 = arith.constant 0 : index
    %c0_9 = arith.constant 0 : index
    %c0_10 = arith.constant 0 : index
    %23 = vector.load %arg5[%c0_8, %c0_9, %c0_10] : memref<1x16x256xf32, #tpu.memory_space<vmem>>, vector<1x16x256xf32>
    %24 = vector.shape_cast %23 : vector<1x16x256xf32> to vector<16x256xf32>
    %25 = vector.shape_cast %22 : vector<16x256xf32> to vector<1x16x256xf32>
    tpu.vector_store %arg5[%c0_8, %c0_9, %c0_10], %25 {strides = array<i32>} : memref<1x16x256xf32, #tpu.memory_space<vmem>>, vector<1x16x256xf32>,
    return
  }
  func.func @transform_0(%arg0: i32, %arg1: i32) -> (i32, i32, i32) {
    %c0_i32 = arith.constant 0 : i32
    %c0_i32_0 = arith.constant 0 : i32
    %c0_i32_1 = arith.constant 0 : i32
    return %arg0, %c0_i32, %c0_i32_0 : i32, i32, i32
  }
  func.func @transform_1(%arg0: i32, %arg1: i32) -> (i32, i32) {
    %c0_i32 = arith.constant 0 : i32
    %c0_i32_0 = arith.constant 0 : i32
    return %arg1, %c0_i32 : i32, i32
  }
  func.func @transform_2(%arg0: i32, %arg1: i32) -> (i32, i32) {
    %c0_i32 = arith.constant 0 : i32
    %c0_i32_0 = arith.constant 0 : i32
    return %arg1, %c0_i32 : i32, i32
  }
  func.func @transform_3(%arg0: i32, %arg1: i32) -> (i32, i32, i32) {
    %c0_i32 = arith.constant 0 : i32
    %c0_i32_0 = arith.constant 0 : i32
    return %arg0, %arg1, %c0_i32 : i32, i32, i32
  }
}

module attributes {stable_mosaic.version = 11 : i64} {
  func.func @_conv1d_kernel(%arg0: i32, %arg1: i32, %arg2: memref<1x16x256xbf16, #tpu.memory_space<vmem>>, %arg3: memref<16x112xbf16, #tpu.memory_space<vmem>>, %arg4: memref<16x1xf32, #tpu.memory_space<vmem>>, %arg5: memref<1x16x128xf32, #tpu.memory_space<vmem>>) attributes {dimension_semantics = [#tpu.dimension_semantics<parallel>, #tpu.dimension_semantics<parallel>], iteration_bounds = array<i64: 2, 1>, scalar_prefetch = 0 : i64, scratch_operands = 0 : i64, tpu.core_type = #tpu.core_type<tc>, window_params = [{transform_indices = @transform_0, window_bounds = array<i64: 1, 16, 256>}, {transform_indices = @transform_1, window_bounds = array<i64: 16, 112>}, {transform_indices = @transform_2, window_bounds = array<i64: 16, 1>}, {transform_indices = @transform_3, window_bounds = array<i64: 1, 16, 128>}]} {
    %c0 = arith.constant 0 : index
    %c0_0 = arith.constant 0 : index
    %c0_1 = arith.constant 0 : index
    %0 = vector.load %arg2[%c0, %c0_0, %c0_1] : memref<1x16x256xbf16, #tpu.memory_space<vmem>>, vector<1x16x256xbf16>
    %1 = vector.shape_cast %0 : vector<1x16x256xbf16> to vector<16x256xbf16>
    %2 = arith.extf %1 : vector<16x256xbf16> to vector<16x256xf32>
    %cst = arith.constant 0.000000e+00 : f32
    %3 = vector.broadcast %cst : f32 to vector<16x256xf32>
    %4 = arith.cmpf oge, %2, %3 : vector<16x256xf32>
    %cst_2 = arith.constant 1.000000e-01 : f32
    %5 = vector.broadcast %cst_2 : f32 to vector<16x256xf32>
    %6 = arith.mulf %5, %2 : vector<16x256xf32>
    %7 = arith.select %4, %2, %6 : vector<16x256xi1>, vector<16x256xf32>
    %8 = arith.truncf %7 : vector<16x256xf32> to vector<16x256xbf16>
    %9 = vector.extract_strided_slice %8 {offsets = [0, 0], sizes = [16, 128], strides = [1, 1]} : vector<16x256xbf16> to vector<16x128xbf16>
    %10 = vector.extract_strided_slice %8 {offsets = [0, 1], sizes = [16, 128], strides = [1, 1]} : vector<16x256xbf16> to vector<16x128xbf16>
    %11 = vector.extract_strided_slice %8 {offsets = [0, 2], sizes = [16, 128], strides = [1, 1]} : vector<16x256xbf16> to vector<16x128xbf16>
    %12 = vector.extract_strided_slice %8 {offsets = [0, 3], sizes = [16, 128], strides = [1, 1]} : vector<16x256xbf16> to vector<16x128xbf16>
    %13 = vector.extract_strided_slice %8 {offsets = [0, 4], sizes = [16, 128], strides = [1, 1]} : vector<16x256xbf16> to vector<16x128xbf16>
    %14 = vector.extract_strided_slice %8 {offsets = [0, 5], sizes = [16, 128], strides = [1, 1]} : vector<16x256xbf16> to vector<16x128xbf16>
    %15 = vector.extract_strided_slice %8 {offsets = [0, 6], sizes = [16, 128], strides = [1, 1]} : vector<16x256xbf16> to vector<16x128xbf16>
    %16 = tpu.concatenate %9, %10, %11, %12, %13, %14, %15 in 0 : vector<16x128xbf16>, vector<16x128xbf16>, vector<16x128xbf16>, vector<16x128xbf16>, vector<16x128xbf16>, vector<16x128xbf16>, vector<16x128xbf16> -> vector<112x128xbf16>
    %c0_3 = arith.constant 0 : index
    %c0_4 = arith.constant 0 : index
    %17 = vector.load %arg3[%c0_3, %c0_4] : memref<16x112xbf16, #tpu.memory_space<vmem>>, vector<16x112xbf16>
    %cst_5 = arith.constant dense<0.000000e+00> : vector<16x128xf32>
    %18 = tpu.matmul %17, %16, %cst_5 {dimension_numbers = #tpu.dot_dimension_numbers<[1], [0], [0], [1], [0, 0, 1, 1], [], []>} : vector<16x112xbf16>, vector<112x128xbf16>, vector<16x128xf32> -> vector<16x128xf32>
    %c0_6 = arith.constant 0 : index
    %c0_7 = arith.constant 0 : index
    %19 = vector.load %arg4[%c0_6, %c0_7] : memref<16x1xf32, #tpu.memory_space<vmem>>, vector<16x1xf32>
    %20 = vector.broadcast %19 : vector<16x1xf32> to vector<16x128xf32>
    %21 = arith.addf %18, %20 : vector<16x128xf32>
    %c0_8 = arith.constant 0 : index
    %c0_9 = arith.constant 0 : index
    %c0_10 = arith.constant 0 : index
    %22 = vector.load %arg5[%c0_8, %c0_9, %c0_10] : memref<1x16x128xf32, #tpu.memory_space<vmem>>, vector<1x16x128xf32>
    %23 = vector.shape_cast %22 : vector<1x16x128xf32> to vector<16x128xf32>
    %24 = vector.shape_cast %21 : vector<16x128xf32> to vector<1x16x128xf32>
    tpu.vector_store %arg5[%c0_8, %c0_9, %c0_10], %24 {strides = array<i32>} : memref<1x16x128xf32, #tpu.memory_space<vmem>>, vector<1x16x128xf32>,
    return
  }
  func.func @transform_0(%arg0: i32, %arg1: i32) -> (i32, i32, i32) {
    %c0_i32 = arith.constant 0 : i32
    %c0_i32_0 = arith.constant 0 : i32
    %c0_i32_1 = arith.constant 0 : i32
    return %arg0, %c0_i32, %c0_i32_0 : i32, i32, i32
  }
  func.func @transform_1(%arg0: i32, %arg1: i32) -> (i32, i32) {
    %c0_i32 = arith.constant 0 : i32
    %c0_i32_0 = arith.constant 0 : i32
    return %arg1, %c0_i32 : i32, i32
  }
  func.func @transform_2(%arg0: i32, %arg1: i32) -> (i32, i32) {
    %c0_i32 = arith.constant 0 : i32
    %c0_i32_0 = arith.constant 0 : i32
    return %arg1, %c0_i32 : i32, i32
  }
  func.func @transform_3(%arg0: i32, %arg1: i32) -> (i32, i32, i32) {
    %c0_i32 = arith.constant 0 : i32
    %c0_i32_0 = arith.constant 0 : i32
    return %arg0, %arg1, %c0_i32 : i32, i32, i32
  }
}

module attributes {stable_mosaic.version = 11 : i64} {
  func.func @_conv1d_kernel(%arg0: i32, %arg1: i32, %arg2: memref<1x16x256xbf16, #tpu.memory_space<vmem>>, %arg3: memref<16x48xbf16, #tpu.memory_space<vmem>>, %arg4: memref<16x1xf32, #tpu.memory_space<vmem>>, %arg5: memref<1x16x128xf32, #tpu.memory_space<vmem>>) attributes {dimension_semantics = [#tpu.dimension_semantics<parallel>, #tpu.dimension_semantics<parallel>], iteration_bounds = array<i64: 2, 1>, scalar_prefetch = 0 : i64, scratch_operands = 0 : i64, tpu.core_type = #tpu.core_type<tc>, window_params = [{transform_indices = @transform_0, window_bounds = array<i64: 1, 16, 256>}, {transform_indices = @transform_1, window_bounds = array<i64: 16, 48>}, {transform_indices = @transform_2, window_bounds = array<i64: 16, 1>}, {transform_indices = @transform_3, window_bounds = array<i64: 1, 16, 128>}]} {
    %c0 = arith.constant 0 : index
    %c0_0 = arith.constant 0 : index
    %c0_1 = arith.constant 0 : index
    %0 = vector.load %arg2[%c0, %c0_0, %c0_1] : memref<1x16x256xbf16, #tpu.memory_space<vmem>>, vector<1x16x256xbf16>
    %1 = vector.shape_cast %0 : vector<1x16x256xbf16> to vector<16x256xbf16>
    %2 = arith.extf %1 : vector<16x256xbf16> to vector<16x256xf32>
    %cst = arith.constant 0.000000e+00 : f32
    %3 = vector.broadcast %cst : f32 to vector<16x256xf32>
    %4 = arith.cmpf oge, %2, %3 : vector<16x256xf32>
    %cst_2 = arith.constant 1.000000e-01 : f32
    %5 = vector.broadcast %cst_2 : f32 to vector<16x256xf32>
    %6 = arith.mulf %5, %2 : vector<16x256xf32>
    %7 = arith.select %4, %2, %6 : vector<16x256xi1>, vector<16x256xf32>
    %8 = arith.truncf %7 : vector<16x256xf32> to vector<16x256xbf16>
    %9 = vector.extract_strided_slice %8 {offsets = [0, 0], sizes = [16, 128], strides = [1, 1]} : vector<16x256xbf16> to vector<16x128xbf16>
    %10 = vector.extract_strided_slice %8 {offsets = [0, 1], sizes = [16, 128], strides = [1, 1]} : vector<16x256xbf16> to vector<16x128xbf16>
    %11 = vector.extract_strided_slice %8 {offsets = [0, 2], sizes = [16, 128], strides = [1, 1]} : vector<16x256xbf16> to vector<16x128xbf16>
    %12 = tpu.concatenate %9, %10, %11 in 0 : vector<16x128xbf16>, vector<16x128xbf16>, vector<16x128xbf16> -> vector<48x128xbf16>
    %c0_3 = arith.constant 0 : index
    %c0_4 = arith.constant 0 : index
    %13 = vector.load %arg3[%c0_3, %c0_4] : memref<16x48xbf16, #tpu.memory_space<vmem>>, vector<16x48xbf16>
    %cst_5 = arith.constant dense<0.000000e+00> : vector<16x128xf32>
    %14 = tpu.matmul %13, %12, %cst_5 {dimension_numbers = #tpu.dot_dimension_numbers<[1], [0], [0], [1], [0, 0, 1, 1], [], []>} : vector<16x48xbf16>, vector<48x128xbf16>, vector<16x128xf32> -> vector<16x128xf32>
    %c0_6 = arith.constant 0 : index
    %c0_7 = arith.constant 0 : index
    %15 = vector.load %arg4[%c0_6, %c0_7] : memref<16x1xf32, #tpu.memory_space<vmem>>, vector<16x1xf32>
    %16 = vector.broadcast %15 : vector<16x1xf32> to vector<16x128xf32>
    %17 = arith.addf %14, %16 : vector<16x128xf32>
    %c0_8 = arith.constant 0 : index
    %c0_9 = arith.constant 0 : index
    %c0_10 = arith.constant 0 : index
    %18 = vector.load %arg5[%c0_8, %c0_9, %c0_10] : memref<1x16x128xf32, #tpu.memory_space<vmem>>, vector<1x16x128xf32>
    %19 = vector.shape_cast %18 : vector<1x16x128xf32> to vector<16x128xf32>
    %20 = vector.shape_cast %17 : vector<16x128xf32> to vector<1x16x128xf32>
    tpu.vector_store %arg5[%c0_8, %c0_9, %c0_10], %20 {strides = array<i32>} : memref<1x16x128xf32, #tpu.memory_space<vmem>>, vector<1x16x128xf32>,
    return
  }
  func.func @transform_0(%arg0: i32, %arg1: i32) -> (i32, i32, i32) {
    %c0_i32 = arith.constant 0 : i32
    %c0_i32_0 = arith.constant 0 : i32
    %c0_i32_1 = arith.constant 0 : i32
    return %arg0, %c0_i32, %c0_i32_0 : i32, i32, i32
  }
  func.func @transform_1(%arg0: i32, %arg1: i32) -> (i32, i32) {
    %c0_i32 = arith.constant 0 : i32
    %c0_i32_0 = arith.constant 0 : i32
    return %arg1, %c0_i32 : i32, i32
  }
  func.func @transform_2(%arg0: i32, %arg1: i32) -> (i32, i32) {
    %c0_i32 = arith.constant 0 : i32
    %c0_i32_0 = arith.constant 0 : i32
    return %arg1, %c0_i32 : i32, i32
  }
  func.func @transform_3(%arg0: i32, %arg1: i32) -> (i32, i32, i32) {
    %c0_i32 = arith.constant 0 : i32
    %c0_i32_0 = arith.constant 0 : i32
    return %arg0, %arg1, %c0_i32 : i32, i32, i32
  }
}

module attributes {stable_mosaic.version = 11 : i64} {
  func.func @_conv1d_kernel(%arg0: i32, %arg1: i32, %arg2: memref<1x16x256xbf16, #tpu.memory_space<vmem>>, %arg3: memref<16x48xbf16, #tpu.memory_space<vmem>>, %arg4: memref<16x1xf32, #tpu.memory_space<vmem>>, %arg5: memref<1x16x128xf32, #tpu.memory_space<vmem>>) attributes {dimension_semantics = [#tpu.dimension_semantics<parallel>, #tpu.dimension_semantics<parallel>], iteration_bounds = array<i64: 2, 1>, scalar_prefetch = 0 : i64, scratch_operands = 0 : i64, tpu.core_type = #tpu.core_type<tc>, window_params = [{transform_indices = @transform_0, window_bounds = array<i64: 1, 16, 256>}, {transform_indices = @transform_1, window_bounds = array<i64: 16, 48>}, {transform_indices = @transform_2, window_bounds = array<i64: 16, 1>}, {transform_indices = @transform_3, window_bounds = array<i64: 1, 16, 128>}]} {
    %c0 = arith.constant 0 : index
    %c0_0 = arith.constant 0 : index
    %c0_1 = arith.constant 0 : index
    %0 = vector.load %arg2[%c0, %c0_0, %c0_1] : memref<1x16x256xbf16, #tpu.memory_space<vmem>>, vector<1x16x256xbf16>
    %1 = vector.shape_cast %0 : vector<1x16x256xbf16> to vector<16x256xbf16>
    %2 = arith.extf %1 : vector<16x256xbf16> to vector<16x256xf32>
    %cst = arith.constant 0.000000e+00 : f32
    %3 = vector.broadcast %cst : f32 to vector<16x256xf32>
    %4 = arith.cmpf oge, %2, %3 : vector<16x256xf32>
    %cst_2 = arith.constant 1.000000e-01 : f32
    %5 = vector.broadcast %cst_2 : f32 to vector<16x256xf32>
    %6 = arith.mulf %5, %2 : vector<16x256xf32>
    %7 = arith.select %4, %2, %6 : vector<16x256xi1>, vector<16x256xf32>
    %8 = arith.truncf %7 : vector<16x256xf32> to vector<16x256xbf16>
    %9 = vector.extract_strided_slice %8 {offsets = [0, 0], sizes = [16, 128], strides = [1, 1]} : vector<16x256xbf16> to vector<16x128xbf16>
    %10 = vector.extract_strided_slice %8 {offsets = [0, 3], sizes = [16, 128], strides = [1, 1]} : vector<16x256xbf16> to vector<16x128xbf16>
    %11 = vector.extract_strided_slice %8 {offsets = [0, 6], sizes = [16, 128], strides = [1, 1]} : vector<16x256xbf16> to vector<16x128xbf16>
    %12 = tpu.concatenate %9, %10, %11 in 0 : vector<16x128xbf16>, vector<16x128xbf16>, vector<16x128xbf16> -> vector<48x128xbf16>
    %c0_3 = arith.constant 0 : index
    %c0_4 = arith.constant 0 : index
    %13 = vector.load %arg3[%c0_3, %c0_4] : memref<16x48xbf16, #tpu.memory_space<vmem>>, vector<16x48xbf16>
    %cst_5 = arith.constant dense<0.000000e+00> : vector<16x128xf32>
    %14 = tpu.matmul %13, %12, %cst_5 {dimension_numbers = #tpu.dot_dimension_numbers<[1], [0], [0], [1], [0, 0, 1, 1], [], []>} : vector<16x48xbf16>, vector<48x128xbf16>, vector<16x128xf32> -> vector<16x128xf32>
    %c0_6 = arith.constant 0 : index
    %c0_7 = arith.constant 0 : index
    %15 = vector.load %arg4[%c0_6, %c0_7] : memref<16x1xf32, #tpu.memory_space<vmem>>, vector<16x1xf32>
    %16 = vector.broadcast %15 : vector<16x1xf32> to vector<16x128xf32>
    %17 = arith.addf %14, %16 : vector<16x128xf32>
    %c0_8 = arith.constant 0 : index
    %c0_9 = arith.constant 0 : index
    %c0_10 = arith.constant 0 : index
    %18 = vector.load %arg5[%c0_8, %c0_9, %c0_10] : memref<1x16x128xf32, #tpu.memory_space<vmem>>, vector<1x16x128xf32>
    %19 = vector.shape_cast %18 : vector<1x16x128xf32> to vector<16x128xf32>
    %20 = vector.shape_cast %17 : vector<16x128xf32> to vector<1x16x128xf32>
    tpu.vector_store %arg5[%c0_8, %c0_9, %c0_10], %20 {strides = array<i32>} : memref<1x16x128xf32, #tpu.memory_space<vmem>>, vector<1x16x128xf32>,
    return
  }
  func.func @transform_0(%arg0: i32, %arg1: i32) -> (i32, i32, i32) {
    %c0_i32 = arith.constant 0 : i32
    %c0_i32_0 = arith.constant 0 : i32
    %c0_i32_1 = arith.constant 0 : i32
    return %arg0, %c0_i32, %c0_i32_0 : i32, i32, i32
  }
  func.func @transform_1(%arg0: i32, %arg1: i32) -> (i32, i32) {
    %c0_i32 = arith.constant 0 : i32
    %c0_i32_0 = arith.constant 0 : i32
    return %arg1, %c0_i32 : i32, i32
  }
  func.func @transform_2(%arg0: i32, %arg1: i32) -> (i32, i32) {
    %c0_i32 = arith.constant 0 : i32
    %c0_i32_0 = arith.constant 0 : i32
    return %arg1, %c0_i32 : i32, i32
  }
  func.func @transform_3(%arg0: i32, %arg1: i32) -> (i32, i32, i32) {
    %c0_i32 = arith.constant 0 : i32
    %c0_i32_0 = arith.constant 0 : i32
    return %arg0, %arg1, %c0_i32 : i32, i32, i32
  }
}

module attributes {stable_mosaic.version = 11 : i64} {
  func.func @_conv1d_kernel(%arg0: i32, %arg1: i32, %arg2: memref<1x16x256xbf16, #tpu.memory_space<vmem>>, %arg3: memref<16x112xbf16, #tpu.memory_space<vmem>>, %arg4: memref<16x1xf32, #tpu.memory_space<vmem>>, %arg5: memref<1x16x128xf32, #tpu.memory_space<vmem>>) attributes {dimension_semantics = [#tpu.dimension_semantics<parallel>, #tpu.dimension_semantics<parallel>], iteration_bounds = array<i64: 2, 1>, scalar_prefetch = 0 : i64, scratch_operands = 0 : i64, tpu.core_type = #tpu.core_type<tc>, window_params = [{transform_indices = @transform_0, window_bounds = array<i64: 1, 16, 256>}, {transform_indices = @transform_1, window_bounds = array<i64: 16, 112>}, {transform_indices = @transform_2, window_bounds = array<i64: 16, 1>}, {transform_indices = @transform_3, window_bounds = array<i64: 1, 16, 128>}]} {
    %c0 = arith.constant 0 : index
    %c0_0 = arith.constant 0 : index
    %c0_1 = arith.constant 0 : index
    %0 = vector.load %arg2[%c0, %c0_0, %c0_1] : memref<1x16x256xbf16, #tpu.memory_space<vmem>>, vector<1x16x256xbf16>
    %1 = vector.shape_cast %0 : vector<1x16x256xbf16> to vector<16x256xbf16>
    %2 = arith.extf %1 : vector<16x256xbf16> to vector<16x256xf32>
    %cst = arith.constant 0.000000e+00 : f32
    %3 = vector.broadcast %cst : f32 to vector<16x256xf32>
    %4 = arith.cmpf oge, %2, %3 : vector<16x256xf32>
    %cst_2 = arith.constant 1.000000e-01 : f32
    %5 = vector.broadcast %cst_2 : f32 to vector<16x256xf32>
    %6 = arith.mulf %5, %2 : vector<16x256xf32>
    %7 = arith.select %4, %2, %6 : vector<16x256xi1>, vector<16x256xf32>
    %8 = arith.truncf %7 : vector<16x256xf32> to vector<16x256xbf16>
    %9 = vector.extract_strided_slice %8 {offsets = [0, 0], sizes = [16, 128], strides = [1, 1]} : vector<16x256xbf16> to vector<16x128xbf16>
    %10 = vector.extract_strided_slice %8 {offsets = [0, 3], sizes = [16, 128], strides = [1, 1]} : vector<16x256xbf16> to vector<16x128xbf16>
    %11 = vector.extract_strided_slice %8 {offsets = [0, 6], sizes = [16, 128], strides = [1, 1]} : vector<16x256xbf16> to vector<16x128xbf16>
    %12 = vector.extract_strided_slice %8 {offsets = [0, 9], sizes = [16, 128], strides = [1, 1]} : vector<16x256xbf16> to vector<16x128xbf16>
    %13 = vector.extract_strided_slice %8 {offsets = [0, 12], sizes = [16, 128], strides = [1, 1]} : vector<16x256xbf16> to vector<16x128xbf16>
    %14 = vector.extract_strided_slice %8 {offsets = [0, 15], sizes = [16, 128], strides = [1, 1]} : vector<16x256xbf16> to vector<16x128xbf16>
    %15 = vector.extract_strided_slice %8 {offsets = [0, 18], sizes = [16, 128], strides = [1, 1]} : vector<16x256xbf16> to vector<16x128xbf16>
    %16 = tpu.concatenate %9, %10, %11, %12, %13, %14, %15 in 0 : vector<16x128xbf16>, vector<16x128xbf16>, vector<16x128xbf16>, vector<16x128xbf16>, vector<16x128xbf16>, vector<16x128xbf16>, vector<16x128xbf16> -> vector<112x128xbf16>
    %c0_3 = arith.constant 0 : index
    %c0_4 = arith.constant 0 : index
    %17 = vector.load %arg3[%c0_3, %c0_4] : memref<16x112xbf16, #tpu.memory_space<vmem>>, vector<16x112xbf16>
    %cst_5 = arith.constant dense<0.000000e+00> : vector<16x128xf32>
    %18 = tpu.matmul %17, %16, %cst_5 {dimension_numbers = #tpu.dot_dimension_numbers<[1], [0], [0], [1], [0, 0, 1, 1], [], []>} : vector<16x112xbf16>, vector<112x128xbf16>, vector<16x128xf32> -> vector<16x128xf32>
    %c0_6 = arith.constant 0 : index
    %c0_7 = arith.constant 0 : index
    %19 = vector.load %arg4[%c0_6, %c0_7] : memref<16x1xf32, #tpu.memory_space<vmem>>, vector<16x1xf32>
    %20 = vector.broadcast %19 : vector<16x1xf32> to vector<16x128xf32>
    %21 = arith.addf %18, %20 : vector<16x128xf32>
    %c0_8 = arith.constant 0 : index
    %c0_9 = arith.constant 0 : index
    %c0_10 = arith.constant 0 : index
    %22 = vector.load %arg5[%c0_8, %c0_9, %c0_10] : memref<1x16x128xf32, #tpu.memory_space<vmem>>, vector<1x16x128xf32>
    %23 = vector.shape_cast %22 : vector<1x16x128xf32> to vector<16x128xf32>
    %24 = vector.shape_cast %21 : vector<16x128xf32> to vector<1x16x128xf32>
    tpu.vector_store %arg5[%c0_8, %c0_9, %c0_10], %24 {strides = array<i32>} : memref<1x16x128xf32, #tpu.memory_space<vmem>>, vector<1x16x128xf32>,
    return
  }
  func.func @transform_0(%arg0: i32, %arg1: i32) -> (i32, i32, i32) {
    %c0_i32 = arith.constant 0 : i32
    %c0_i32_0 = arith.constant 0 : i32
    %c0_i32_1 = arith.constant 0 : i32
    return %arg0, %c0_i32, %c0_i32_0 : i32, i32, i32
  }
  func.func @transform_1(%arg0: i32, %arg1: i32) -> (i32, i32) {
    %c0_i32 = arith.constant 0 : i32
    %c0_i32_0 = arith.constant 0 : i32
    return %arg1, %c0_i32 : i32, i32
  }
  func.func @transform_2(%arg0: i32, %arg1: i32) -> (i32, i32) {
    %c0_i32 = arith.constant 0 : i32
    %c0_i32_0 = arith.constant 0 : i32
    return %arg1, %c0_i32 : i32, i32
  }
  func.func @transform_3(%arg0: i32, %arg1: i32) -> (i32, i32, i32) {
    %c0_i32 = arith.constant 0 : i32
    %c0_i32_0 = arith.constant 0 : i32
    return %arg0, %arg1, %c0_i32 : i32, i32, i32
  }
}

module attributes {stable_mosaic.version = 11 : i64} {
  func.func @_conv1d_kernel(%arg0: i32, %arg1: i32, %arg2: memref<1x16x256xbf16, #tpu.memory_space<vmem>>, %arg3: memref<16x112xbf16, #tpu.memory_space<vmem>>, %arg4: memref<16x1xf32, #tpu.memory_space<vmem>>, %arg5: memref<1x16x128xf32, #tpu.memory_space<vmem>>) attributes {dimension_semantics = [#tpu.dimension_semantics<parallel>, #tpu.dimension_semantics<parallel>], iteration_bounds = array<i64: 2, 1>, scalar_prefetch = 0 : i64, scratch_operands = 0 : i64, tpu.core_type = #tpu.core_type<tc>, window_params = [{transform_indices = @transform_0, window_bounds = array<i64: 1, 16, 256>}, {transform_indices = @transform_1, window_bounds = array<i64: 16, 112>}, {transform_indices = @transform_2, window_bounds = array<i64: 16, 1>}, {transform_indices = @transform_3, window_bounds = array<i64: 1, 16, 128>}]} {
    %c0 = arith.constant 0 : index
    %c0_0 = arith.constant 0 : index
    %c0_1 = arith.constant 0 : index
    %0 = vector.load %arg2[%c0, %c0_0, %c0_1] : memref<1x16x256xbf16, #tpu.memory_space<vmem>>, vector<1x16x256xbf16>
    %1 = vector.shape_cast %0 : vector<1x16x256xbf16> to vector<16x256xbf16>
    %2 = arith.extf %1 : vector<16x256xbf16> to vector<16x256xf32>
    %cst = arith.constant 0.000000e+00 : f32
    %3 = vector.broadcast %cst : f32 to vector<16x256xf32>
    %4 = arith.cmpf oge, %2, %3 : vector<16x256xf32>
    %cst_2 = arith.constant 1.000000e-01 : f32
    %5 = vector.broadcast %cst_2 : f32 to vector<16x256xf32>
    %6 = arith.mulf %5, %2 : vector<16x256xf32>
    %7 = arith.select %4, %2, %6 : vector<16x256xi1>, vector<16x256xf32>
    %8 = arith.truncf %7 : vector<16x256xf32> to vector<16x256xbf16>
    %9 = vector.extract_strided_slice %8 {offsets = [0, 0], sizes = [16, 128], strides = [1, 1]} : vector<16x256xbf16> to vector<16x128xbf16>
    %10 = vector.extract_strided_slice %8 {offsets = [0, 5], sizes = [16, 128], strides = [1, 1]} : vector<16x256xbf16> to vector<16x128xbf16>
    %11 = vector.extract_strided_slice %8 {offsets = [0, 10], sizes = [16, 128], strides = [1, 1]} : vector<16x256xbf16> to vector<16x128xbf16>
    %12 = vector.extract_strided_slice %8 {offsets = [0, 15], sizes = [16, 128], strides = [1, 1]} : vector<16x256xbf16> to vector<16x128xbf16>
    %13 = vector.extract_strided_slice %8 {offsets = [0, 20], sizes = [16, 128], strides = [1, 1]} : vector<16x256xbf16> to vector<16x128xbf16>
    %14 = vector.extract_strided_slice %8 {offsets = [0, 25], sizes = [16, 128], strides = [1, 1]} : vector<16x256xbf16> to vector<16x128xbf16>
    %15 = vector.extract_strided_slice %8 {offsets = [0, 30], sizes = [16, 128], strides = [1, 1]} : vector<16x256xbf16> to vector<16x128xbf16>
    %16 = tpu.concatenate %9, %10, %11, %12, %13, %14, %15 in 0 : vector<16x128xbf16>, vector<16x128xbf16>, vector<16x128xbf16>, vector<16x128xbf16>, vector<16x128xbf16>, vector<16x128xbf16>, vector<16x128xbf16> -> vector<112x128xbf16>
    %c0_3 = arith.constant 0 : index
    %c0_4 = arith.constant 0 : index
    %17 = vector.load %arg3[%c0_3, %c0_4] : memref<16x112xbf16, #tpu.memory_space<vmem>>, vector<16x112xbf16>
    %cst_5 = arith.constant dense<0.000000e+00> : vector<16x128xf32>
    %18 = tpu.matmul %17, %16, %cst_5 {dimension_numbers = #tpu.dot_dimension_numbers<[1], [0], [0], [1], [0, 0, 1, 1], [], []>} : vector<16x112xbf16>, vector<112x128xbf16>, vector<16x128xf32> -> vector<16x128xf32>
    %c0_6 = arith.constant 0 : index
    %c0_7 = arith.constant 0 : index
    %19 = vector.load %arg4[%c0_6, %c0_7] : memref<16x1xf32, #tpu.memory_space<vmem>>, vector<16x1xf32>
    %20 = vector.broadcast %19 : vector<16x1xf32> to vector<16x128xf32>
    %21 = arith.addf %18, %20 : vector<16x128xf32>
    %c0_8 = arith.constant 0 : index
    %c0_9 = arith.constant 0 : index
    %c0_10 = arith.constant 0 : index
    %22 = vector.load %arg5[%c0_8, %c0_9, %c0_10] : memref<1x16x128xf32, #tpu.memory_space<vmem>>, vector<1x16x128xf32>
    %23 = vector.shape_cast %22 : vector<1x16x128xf32> to vector<16x128xf32>
    %24 = vector.shape_cast %21 : vector<16x128xf32> to vector<1x16x128xf32>
    tpu.vector_store %arg5[%c0_8, %c0_9, %c0_10], %24 {strides = array<i32>} : memref<1x16x128xf32, #tpu.memory_space<vmem>>, vector<1x16x128xf32>,
    return
  }
  func.func @transform_0(%arg0: i32, %arg1: i32) -> (i32, i32, i32) {
    %c0_i32 = arith.constant 0 : i32
    %c0_i32_0 = arith.constant 0 : i32
    %c0_i32_1 = arith.constant 0 : i32
    return %arg0, %c0_i32, %c0_i32_0 : i32, i32, i32
  }
  func.func @transform_1(%arg0: i32, %arg1: i32) -> (i32, i32) {
    %c0_i32 = arith.constant 0 : i32
    %c0_i32_0 = arith.constant 0 : i32
    return %arg1, %c0_i32 : i32, i32
  }
  func.func @transform_2(%arg0: i32, %arg1: i32) -> (i32, i32) {
    %c0_i32 = arith.constant 0 : i32
    %c0_i32_0 = arith.constant 0 : i32
    return %arg1, %c0_i32 : i32, i32
  }
  func.func @transform_3(%arg0: i32, %arg1: i32) -> (i32, i32, i32) {
    %c0_i32 = arith.constant 0 : i32
    %c0_i32_0 = arith.constant 0 : i32
    return %arg0, %arg1, %c0_i32 : i32, i32, i32
  }
}

module attributes {stable_mosaic.version = 11 : i64} {
  func.func @_conv1d_kernel(%arg0: i32, %arg1: i32, %arg2: memref<1x16x256xbf16, #tpu.memory_space<vmem>>, %arg3: memref<16x48xbf16, #tpu.memory_space<vmem>>, %arg4: memref<16x1xf32, #tpu.memory_space<vmem>>, %arg5: memref<1x16x128xf32, #tpu.memory_space<vmem>>) attributes {dimension_semantics = [#tpu.dimension_semantics<parallel>, #tpu.dimension_semantics<parallel>], iteration_bounds = array<i64: 2, 1>, scalar_prefetch = 0 : i64, scratch_operands = 0 : i64, tpu.core_type = #tpu.core_type<tc>, window_params = [{transform_indices = @transform_0, window_bounds = array<i64: 1, 16, 256>}, {transform_indices = @transform_1, window_bounds = array<i64: 16, 48>}, {transform_indices = @transform_2, window_bounds = array<i64: 16, 1>}, {transform_indices = @transform_3, window_bounds = array<i64: 1, 16, 128>}]} {
    %c0 = arith.constant 0 : index
    %c0_0 = arith.constant 0 : index
    %c0_1 = arith.constant 0 : index
    %0 = vector.load %arg2[%c0, %c0_0, %c0_1] : memref<1x16x256xbf16, #tpu.memory_space<vmem>>, vector<1x16x256xbf16>
    %1 = vector.shape_cast %0 : vector<1x16x256xbf16> to vector<16x256xbf16>
    %2 = arith.extf %1 : vector<16x256xbf16> to vector<16x256xf32>
    %cst = arith.constant 0.000000e+00 : f32
    %3 = vector.broadcast %cst : f32 to vector<16x256xf32>
    %4 = arith.cmpf oge, %2, %3 : vector<16x256xf32>
    %cst_2 = arith.constant 1.000000e-01 : f32
    %5 = vector.broadcast %cst_2 : f32 to vector<16x256xf32>
    %6 = arith.mulf %5, %2 : vector<16x256xf32>
    %7 = arith.select %4, %2, %6 : vector<16x256xi1>, vector<16x256xf32>
    %8 = arith.truncf %7 : vector<16x256xf32> to vector<16x256xbf16>
    %9 = vector.extract_strided_slice %8 {offsets = [0, 0], sizes = [16, 128], strides = [1, 1]} : vector<16x256xbf16> to vector<16x128xbf16>
    %10 = vector.extract_strided_slice %8 {offsets = [0, 5], sizes = [16, 128], strides = [1, 1]} : vector<16x256xbf16> to vector<16x128xbf16>
    %11 = vector.extract_strided_slice %8 {offsets = [0, 10], sizes = [16, 128], strides = [1, 1]} : vector<16x256xbf16> to vector<16x128xbf16>
    %12 = tpu.concatenate %9, %10, %11 in 0 : vector<16x128xbf16>, vector<16x128xbf16>, vector<16x128xbf16> -> vector<48x128xbf16>
    %c0_3 = arith.constant 0 : index
    %c0_4 = arith.constant 0 : index
    %13 = vector.load %arg3[%c0_3, %c0_4] : memref<16x48xbf16, #tpu.memory_space<vmem>>, vector<16x48xbf16>
    %cst_5 = arith.constant dense<0.000000e+00> : vector<16x128xf32>
    %14 = tpu.matmul %13, %12, %cst_5 {dimension_numbers = #tpu.dot_dimension_numbers<[1], [0], [0], [1], [0, 0, 1, 1], [], []>} : vector<16x48xbf16>, vector<48x128xbf16>, vector<16x128xf32> -> vector<16x128xf32>
    %c0_6 = arith.constant 0 : index
    %c0_7 = arith.constant 0 : index
    %15 = vector.load %arg4[%c0_6, %c0_7] : memref<16x1xf32, #tpu.memory_space<vmem>>, vector<16x1xf32>
    %16 = vector.broadcast %15 : vector<16x1xf32> to vector<16x128xf32>
    %17 = arith.addf %14, %16 : vector<16x128xf32>
    %c0_8 = arith.constant 0 : index
    %c0_9 = arith.constant 0 : index
    %c0_10 = arith.constant 0 : index
    %18 = vector.load %arg5[%c0_8, %c0_9, %c0_10] : memref<1x16x128xf32, #tpu.memory_space<vmem>>, vector<1x16x128xf32>
    %19 = vector.shape_cast %18 : vector<1x16x128xf32> to vector<16x128xf32>
    %20 = vector.shape_cast %17 : vector<16x128xf32> to vector<1x16x128xf32>
    tpu.vector_store %arg5[%c0_8, %c0_9, %c0_10], %20 {strides = array<i32>} : memref<1x16x128xf32, #tpu.memory_space<vmem>>, vector<1x16x128xf32>,
    return
  }
  func.func @transform_0(%arg0: i32, %arg1: i32) -> (i32, i32, i32) {
    %c0_i32 = arith.constant 0 : i32
    %c0_i32_0 = arith.constant 0 : i32
    %c0_i32_1 = arith.constant 0 : i32
    return %arg0, %c0_i32, %c0_i32_0 : i32, i32, i32
  }
  func.func @transform_1(%arg0: i32, %arg1: i32) -> (i32, i32) {
    %c0_i32 = arith.constant 0 : i32
    %c0_i32_0 = arith.constant 0 : i32
    return %arg1, %c0_i32 : i32, i32
  }
  func.func @transform_2(%arg0: i32, %arg1: i32) -> (i32, i32) {
    %c0_i32 = arith.constant 0 : i32
    %c0_i32_0 = arith.constant 0 : i32
    return %arg1, %c0_i32 : i32, i32
  }
  func.func @transform_3(%arg0: i32, %arg1: i32) -> (i32, i32, i32) {
    %c0_i32 = arith.constant 0 : i32
    %c0_i32_0 = arith.constant 0 : i32
    return %arg0, %arg1, %c0_i32 : i32, i32, i32
  }
}

module attributes {stable_mosaic.version = 11 : i64} {
  func.func @_conv1d_kernel(%arg0: i32, %arg1: i32, %arg2: memref<1x16x384xbf16, #tpu.memory_space<vmem>>, %arg3: memref<72x112xbf16, #tpu.memory_space<vmem>>, %arg4: memref<72x1xf32, #tpu.memory_space<vmem>>, %arg5: memref<1x72x256xf32, #tpu.memory_space<vmem>>) attributes {dimension_semantics = [#tpu.dimension_semantics<parallel>, #tpu.dimension_semantics<parallel>], iteration_bounds = array<i64: 2, 1>, scalar_prefetch = 0 : i64, scratch_operands = 0 : i64, tpu.core_type = #tpu.core_type<tc>, window_params = [{transform_indices = @transform_0, window_bounds = array<i64: 1, 16, 384>}, {transform_indices = @transform_1, window_bounds = array<i64: 72, 112>}, {transform_indices = @transform_2, window_bounds = array<i64: 72, 1>}, {transform_indices = @transform_3, window_bounds = array<i64: 1, 72, 256>}]} {
    %c0 = arith.constant 0 : index
    %c0_0 = arith.constant 0 : index
    %c0_1 = arith.constant 0 : index
    %0 = vector.load %arg2[%c0, %c0_0, %c0_1] : memref<1x16x384xbf16, #tpu.memory_space<vmem>>, vector<1x16x384xbf16>
    %1 = vector.shape_cast %0 : vector<1x16x384xbf16> to vector<16x384xbf16>
    %2 = arith.extf %1 : vector<16x384xbf16> to vector<16x384xf32>
    %cst = arith.constant 0.000000e+00 : f32
    %3 = vector.broadcast %cst : f32 to vector<16x384xf32>
    %4 = arith.cmpf oge, %2, %3 : vector<16x384xf32>
    %cst_2 = arith.constant 0.00999999977 : f32
    %5 = vector.broadcast %cst_2 : f32 to vector<16x384xf32>
    %6 = arith.mulf %5, %2 : vector<16x384xf32>
    %7 = arith.select %4, %2, %6 : vector<16x384xi1>, vector<16x384xf32>
    %8 = arith.truncf %7 : vector<16x384xf32> to vector<16x384xbf16>
    %9 = vector.extract_strided_slice %8 {offsets = [0, 0], sizes = [16, 256], strides = [1, 1]} : vector<16x384xbf16> to vector<16x256xbf16>
    %10 = vector.extract_strided_slice %8 {offsets = [0, 1], sizes = [16, 256], strides = [1, 1]} : vector<16x384xbf16> to vector<16x256xbf16>
    %11 = vector.extract_strided_slice %8 {offsets = [0, 2], sizes = [16, 256], strides = [1, 1]} : vector<16x384xbf16> to vector<16x256xbf16>
    %12 = vector.extract_strided_slice %8 {offsets = [0, 3], sizes = [16, 256], strides = [1, 1]} : vector<16x384xbf16> to vector<16x256xbf16>
    %13 = vector.extract_strided_slice %8 {offsets = [0, 4], sizes = [16, 256], strides = [1, 1]} : vector<16x384xbf16> to vector<16x256xbf16>
    %14 = vector.extract_strided_slice %8 {offsets = [0, 5], sizes = [16, 256], strides = [1, 1]} : vector<16x384xbf16> to vector<16x256xbf16>
    %15 = vector.extract_strided_slice %8 {offsets = [0, 6], sizes = [16, 256], strides = [1, 1]} : vector<16x384xbf16> to vector<16x256xbf16>
    %16 = tpu.concatenate %9, %10, %11, %12, %13, %14, %15 in 0 : vector<16x256xbf16>, vector<16x256xbf16>, vector<16x256xbf16>, vector<16x256xbf16>, vector<16x256xbf16>, vector<16x256xbf16>, vector<16x256xbf16> -> vector<112x256xbf16>
    %c0_3 = arith.constant 0 : index
    %c0_4 = arith.constant 0 : index
    %17 = vector.load %arg3[%c0_3, %c0_4] : memref<72x112xbf16, #tpu.memory_space<vmem>>, vector<72x112xbf16>
    %cst_5 = arith.constant dense<0.000000e+00> : vector<72x256xf32>
    %18 = tpu.matmul %17, %16, %cst_5 {dimension_numbers = #tpu.dot_dimension_numbers<[1], [0], [0], [1], [0, 0, 1, 1], [], []>} : vector<72x112xbf16>, vector<112x256xbf16>, vector<72x256xf32> -> vector<72x256xf32>
    %c0_6 = arith.constant 0 : index
    %c0_7 = arith.constant 0 : index
    %19 = vector.load %arg4[%c0_6, %c0_7] : memref<72x1xf32, #tpu.memory_space<vmem>>, vector<72x1xf32>
    %20 = vector.broadcast %19 : vector<72x1xf32> to vector<72x256xf32>
    %21 = arith.addf %18, %20 : vector<72x256xf32>
    %c0_8 = arith.constant 0 : index
    %c0_9 = arith.constant 0 : index
    %c0_10 = arith.constant 0 : index
    %22 = vector.load %arg5[%c0_8, %c0_9, %c0_10] : memref<1x72x256xf32, #tpu.memory_space<vmem>>, vector<1x72x256xf32>
    %23 = vector.shape_cast %22 : vector<1x72x256xf32> to vector<72x256xf32>
    %24 = vector.shape_cast %21 : vector<72x256xf32> to vector<1x72x256xf32>
    tpu.vector_store %arg5[%c0_8, %c0_9, %c0_10], %24 {strides = array<i32>} : memref<1x72x256xf32, #tpu.memory_space<vmem>>, vector<1x72x256xf32>,
    return
  }
  func.func @transform_0(%arg0: i32, %arg1: i32) -> (i32, i32, i32) {
    %c0_i32 = arith.constant 0 : i32
    %c0_i32_0 = arith.constant 0 : i32
    %c0_i32_1 = arith.constant 0 : i32
    return %arg0, %c0_i32, %c0_i32_0 : i32, i32, i32
  }
  func.func @transform_1(%arg0: i32, %arg1: i32) -> (i32, i32) {
    %c0_i32 = arith.constant 0 : i32
    %c0_i32_0 = arith.constant 0 : i32
    return %arg1, %c0_i32 : i32, i32
  }
  func.func @transform_2(%arg0: i32, %arg1: i32) -> (i32, i32) {
    %c0_i32 = arith.constant 0 : i32
    %c0_i32_0 = arith.constant 0 : i32
    return %arg1, %c0_i32 : i32, i32
  }
  func.func @transform_3(%arg0: i32, %arg1: i32) -> (i32, i32, i32) {
    %c0_i32 = arith.constant 0 : i32
    %c0_i32_0 = arith.constant 0 : i32
    return %arg0, %arg1, %c0_i32 : i32, i32, i32
  }
}

module attributes {stable_mosaic.version = 11 : i64} {
  func.func @_istft_frames_kernel(%arg0: i32, %arg1: memref<1x9x256xf32, #tpu.memory_space<vmem>>, %arg2: memref<1x9x256xf32, #tpu.memory_space<vmem>>, %arg3: memref<16x9xf32, #tpu.memory_space<vmem>>, %arg4: memref<16x9xf32, #tpu.memory_space<vmem>>, %arg5: memref<1x16x256xf32, #tpu.memory_space<vmem>>) attributes {dimension_semantics = [#tpu.dimension_semantics<parallel>], iteration_bounds = array<i64: 8>, scalar_prefetch = 0 : i64, scratch_operands = 0 : i64, tpu.core_type = #tpu.core_type<tc>, window_params = [{transform_indices = @transform_0, window_bounds = array<i64: 1, 9, 256>}, {transform_indices = @transform_1, window_bounds = array<i64: 1, 9, 256>}, {pipeline_mode = #tpu.pipeline_mode<synchronous>, transform_indices = @transform_2, window_bounds = array<i64: 16, 9>}, {pipeline_mode = #tpu.pipeline_mode<synchronous>, transform_indices = @transform_3, window_bounds = array<i64: 16, 9>}, {transform_indices = @transform_4, window_bounds = array<i64: 1, 16, 256>}]} {
    %c0 = arith.constant 0 : index
    %c0_0 = arith.constant 0 : index
    %0 = vector.load %arg3[%c0, %c0_0] : memref<16x9xf32, #tpu.memory_space<vmem>>, vector<16x9xf32>
    %c0_1 = arith.constant 0 : index
    %c0_2 = arith.constant 0 : index
    %c0_3 = arith.constant 0 : index
    %1 = vector.load %arg1[%c0_1, %c0_2, %c0_3] : memref<1x9x256xf32, #tpu.memory_space<vmem>>, vector<1x9x256xf32>
    %2 = vector.shape_cast %1 : vector<1x9x256xf32> to vector<9x256xf32>
    %cst = arith.constant dense<0.000000e+00> : vector<16x256xf32>
    %3 = tpu.matmul %0, %2, %cst {dimension_numbers = #tpu.dot_dimension_numbers<[1], [0], [0], [1], [0, 0, 1, 1], [], []>} : vector<16x9xf32>, vector<9x256xf32>, vector<16x256xf32> -> vector<16x256xf32>
    %c0_4 = arith.constant 0 : index
    %c0_5 = arith.constant 0 : index
    %4 = vector.load %arg4[%c0_4, %c0_5] : memref<16x9xf32, #tpu.memory_space<vmem>>, vector<16x9xf32>
    %c0_6 = arith.constant 0 : index
    %c0_7 = arith.constant 0 : index
    %c0_8 = arith.constant 0 : index
    %5 = vector.load %arg2[%c0_6, %c0_7, %c0_8] : memref<1x9x256xf32, #tpu.memory_space<vmem>>, vector<1x9x256xf32>
    %6 = vector.shape_cast %5 : vector<1x9x256xf32> to vector<9x256xf32>
    %cst_9 = arith.constant dense<0.000000e+00> : vector<16x256xf32>
    %7 = tpu.matmul %4, %6, %cst_9 {dimension_numbers = #tpu.dot_dimension_numbers<[1], [0], [0], [1], [0, 0, 1, 1], [], []>} : vector<16x9xf32>, vector<9x256xf32>, vector<16x256xf32> -> vector<16x256xf32>
    %8 = arith.addf %3, %7 : vector<16x256xf32>
    %c0_10 = arith.constant 0 : index
    %c0_11 = arith.constant 0 : index
    %c0_12 = arith.constant 0 : index
    %9 = vector.load %arg5[%c0_10, %c0_11, %c0_12] : memref<1x16x256xf32, #tpu.memory_space<vmem>>, vector<1x16x256xf32>
    %10 = vector.shape_cast %9 : vector<1x16x256xf32> to vector<16x256xf32>
    %11 = vector.shape_cast %8 : vector<16x256xf32> to vector<1x16x256xf32>
    tpu.vector_store %arg5[%c0_10, %c0_11, %c0_12], %11 {strides = array<i32>} : memref<1x16x256xf32, #tpu.memory_space<vmem>>, vector<1x16x256xf32>,
    return
  }
  func.func @transform_0(%arg0: i32) -> (i32, i32, i32) {
    %c0_i32 = arith.constant 0 : i32
    %c0_i32_0 = arith.constant 0 : i32
    %c0_i32_1 = arith.constant 0 : i32
    return %arg0, %c0_i32, %c0_i32_0 : i32, i32, i32
  }
  func.func @transform_1(%arg0: i32) -> (i32, i32, i32) {
    %c0_i32 = arith.constant 0 : i32
    %c0_i32_0 = arith.constant 0 : i32
    %c0_i32_1 = arith.constant 0 : i32
    return %arg0, %c0_i32, %c0_i32_0 : i32, i32, i32
  }
  func.func @transform_2(%arg0: i32) -> (i32, i32) {
    %c0_i32 = arith.constant 0 : i32
    %c0_i32_0 = arith.constant 0 : i32
    %c0_i32_1 = arith.constant 0 : i32
    return %c0_i32, %c0_i32_0 : i32, i32
  }
  func.func @transform_3(%arg0: i32) -> (i32, i32) {
    %c0_i32 = arith.constant 0 : i32
    %c0_i32_0 = arith.constant 0 : i32
    %c0_i32_1 = arith.constant 0 : i32
    return %c0_i32, %c0_i32_0 : i32, i32
  }
  func.func @transform_4(%arg0: i32) -> (i32, i32, i32) {
    %c0_i32 = arith.constant 0 : i32
    %c0_i32_0 = arith.constant 0 : i32
    %c0_i32_1 = arith.constant 0 : i32
    return %arg0, %c0_i32, %c0_i32_0 : i32, i32, i32
  }
}

module attributes {stable_mosaic.version = 11 : i64} {
  func.func @_conv1d_kernel(%arg0: i32, %arg1: i32, %arg2: memref<1x252x2048xbf16, #tpu.memory_space<vmem>>, %arg3: memref<8x252xbf16, #tpu.memory_space<vmem>>, %arg4: memref<8x1xf32, #tpu.memory_space<vmem>>, %arg5: memref<1x8x2048xf32, #tpu.memory_space<vmem>>) attributes {dimension_semantics = [#tpu.dimension_semantics<parallel>, #tpu.dimension_semantics<parallel>], iteration_bounds = array<i64: 2, 1>, scalar_prefetch = 0 : i64, scratch_operands = 0 : i64, tpu.core_type = #tpu.core_type<tc>, window_params = [{transform_indices = @transform_0, window_bounds = array<i64: 1, 252, 2048>}, {transform_indices = @transform_1, window_bounds = array<i64: 8, 252>}, {transform_indices = @transform_2, window_bounds = array<i64: 8, 1>}, {transform_indices = @transform_3, window_bounds = array<i64: 1, 8, 2048>}]} {
    %c0 = arith.constant 0 : index
    %c0_0 = arith.constant 0 : index
    %c0_1 = arith.constant 0 : index
    %0 = vector.load %arg2[%c0, %c0_0, %c0_1] : memref<1x252x2048xbf16, #tpu.memory_space<vmem>>, vector<1x252x2048xbf16>
    %1 = vector.shape_cast %0 : vector<1x252x2048xbf16> to vector<252x2048xbf16>
    %2 = vector.extract_strided_slice %1 {offsets = [0, 0], sizes = [252, 2048], strides = [1, 1]} : vector<252x2048xbf16> to vector<252x2048xbf16>
    %c0_2 = arith.constant 0 : index
    %c0_3 = arith.constant 0 : index
    %3 = vector.load %arg3[%c0_2, %c0_3] : memref<8x252xbf16, #tpu.memory_space<vmem>>, vector<8x252xbf16>
    %cst = arith.constant dense<0.000000e+00> : vector<8x2048xf32>
    %4 = tpu.matmul %3, %2, %cst {dimension_numbers = #tpu.dot_dimension_numbers<[1], [0], [0], [1], [0, 0, 1, 1], [], []>} : vector<8x252xbf16>, vector<252x2048xbf16>, vector<8x2048xf32> -> vector<8x2048xf32>
    %c0_4 = arith.constant 0 : index
    %c0_5 = arith.constant 0 : index
    %5 = vector.load %arg4[%c0_4, %c0_5] : memref<8x1xf32, #tpu.memory_space<vmem>>, vector<8x1xf32>
    %6 = vector.broadcast %5 : vector<8x1xf32> to vector<8x2048xf32>
    %7 = arith.addf %4, %6 : vector<8x2048xf32>
    %c0_6 = arith.constant 0 : index
    %c0_7 = arith.constant 0 : index
    %c0_8 = arith.constant 0 : index
    %8 = vector.load %arg5[%c0_6, %c0_7, %c0_8] : memref<1x8x2048xf32, #tpu.memory_space<vmem>>, vector<1x8x2048xf32>
    %9 = vector.shape_cast %8 : vector<1x8x2048xf32> to vector<8x2048xf32>
    %10 = vector.shape_cast %7 : vector<8x2048xf32> to vector<1x8x2048xf32>
    tpu.vector_store %arg5[%c0_6, %c0_7, %c0_8], %10 {strides = array<i32>} : memref<1x8x2048xf32, #tpu.memory_space<vmem>>, vector<1x8x2048xf32>,
    return
  }
  func.func @transform_0(%arg0: i32, %arg1: i32) -> (i32, i32, i32) {
    %c0_i32 = arith.constant 0 : i32
    %c0_i32_0 = arith.constant 0 : i32
    %c0_i32_1 = arith.constant 0 : i32
    return %arg0, %c0_i32, %c0_i32_0 : i32, i32, i32
  }
  func.func @transform_1(%arg0: i32, %arg1: i32) -> (i32, i32) {
    %c0_i32 = arith.constant 0 : i32
    %c0_i32_0 = arith.constant 0 : i32
    return %arg1, %c0_i32 : i32, i32
  }
  func.func @transform_2(%arg0: i32, %arg1: i32) -> (i32, i32) {
    %c0_i32 = arith.constant 0 : i32
    %c0_i32_0 = arith.constant 0 : i32
    return %arg1, %c0_i32 : i32, i32
  }
  func.func @transform_3(%arg0: i32, %arg1: i32) -> (i32, i32, i32) {
    %c0_i32 = arith.constant 0 : i32
    %c0_i32_0 = arith.constant 0 : i32
    return %arg0, %arg1, %c0_i32 : i32, i32, i32
  }
}

</mosaic_0001>

<bundles_post_ra>
// kernel: _lambda_.30
= control target key start
LH: loop header
LB: loop body
LE: loop exit
PB: predicated region body
PF: predicated region fallthrough
CT: control target
= control target key end

     0   :  { %s802_s12 = smov 0   ;;  %s804_s13 = smov 0   ;;  %s949_s0 = inlined_call_operand.vmem [shape: bf16[2,32,256], index: 0, kind: input, shape index: {}]   ;;  %s950_s1 = inlined_call_operand.vmem [shape: bf16[64,224], index: 1, kind: input, shape index: {}]   ;;  %s951_s2 = inlined_call_operand.vmem [shape: f32[64,1], index: 2, kind: input, shape index: {}]   ;;  %s952_s3 = inlined_call_operand.vmem [shape: f32[2,64,128], index: 3, kind: output, shape index: {}]  }
   0x1   :  { %s806_s14 = smov 0  }
   0x2 LB: > { %s25_s15 = sadd.s32 1, %s769_s13  ;;  %p630_p0 = scmp.ge.s32.totalorder %s773_s14, 1  ;;  %s773_s14 = sphi %s806_s14, %s13_s14   ;;  %s769_s13 = sphi %s804_s13, %s954_s13   ;;  %s765_s12 = sphi %s802_s12, %s953_s12  }
   0x3   : > { %p27_p1 = scmp.ge.s32.totalorder %s25_s15, 2  ;;  %p174_p2 = scmp.lt.s32.totalorder %s773_s14, 3 }
   0x5   : > { %s956_s15 = smov (%p27_p1, %s25_s15), 0  ;;  %p175_p3 = pnand %p630_p0, %p174_p2 }
   0x6   : > { %p213_p4 = scmp.lt.s32.totalorder (!%p175_p3), %s765_s12, 1  ;;  %s775_s20 = smov (!%p175_p3), 122  }
   0x7   : > { %178 = sbr.rel (%p175_p3) target bundleno = 367 (0x16f), region = 32  ;;  %s776_s21 = smov (!%p175_p3), 125  }
   0x8   : > { %s777_s22 = smov (!%p175_p3), 123   ;;  %s778_s23 = smov (!%p175_p3), 126  }
   0x9   : > { %s779_s24 = smov (!%p175_p3), 124   ;;  %s780_s25 = smov (!%p175_p3), 127  }
   0xc   : > { %s958_s12 = smov (!%p213_p4, %s765_s12), 1  ;;  %vm298_vm0 = vcmask 1022976   ;;  %vm337_vm1 = vcmask 998400   ;;  %vm324_vm2 = vcmask 1006592   ;;  %vm285_vm3 = vcmask 1031168   ;;  %v351_v39 = vld [vmem:[%s951_s2 + $0x8] sm:$0xff] }
   0xd   : > { %s689_s16 = sshll.u32 %s958_s12, 5  ;;  %vm311_vm4 = vcmask 1014784   ;;  %v781_v40 = vmov 0   ;;  %v697_v42 = vld [vmem:[%s950_s1 + $0x14] sm:$0xf]  ;;  %vm434_vm5 = vcmask 785408  }
   0xe   : > { %s217_s19 = scalar_lea.vmem %s949_s0, %s689_s16  ;;  %749 = vset.pattern.permute.xlu1 %v781_v40  ;;  %748 = vset.pattern.permute.xlu0 %v781_v40  ;;  %v663_v43 = vld [vmem:[%s950_s1 + $0x18] sm:$0xf0]  ;;  %v695_v44 = vld [vmem:[%s950_s1 + $0x4] sm:$0xf]  ;;  %v655_v45 = vld [vmem:[%s950_s1 + $0x8] sm:$0xf0] }
   0xf   : > { %v641_v0 = vld [vmem:[%s217_s19 + $0x10] sm:$0xf]  ;;  %v694_v1 = vld [vmem:[%s217_s19 + $0x14] sm:$0xf0]  ;;  %v637_v2 = vld [vmem:[%s217_s19] sm:$0xf]  ;;  %750 = vset.pattern.permute.xlu2 %v781_v40  ;;  %v666_v49 = vor.u32 %v697_v42, %v663_v43  ;;  %v658_v50 = vor.u32 %v695_v44, %v655_v45 }
  0x10   : > { %v826_v3 = vor.u32 %v694_v1, %v641_v0  ;;  %v692_v4 = vld [vmem:[%s217_s19 + $0x4] sm:$0xf0]  ;;  %v693_v6 = vld [vmem:[%s217_s19 + $0x14] sm:$0xf]  ;;  %v647_v7 = vld [vmem:[%s217_s19 + $0x18] sm:$0xf0] }
  0x11   : > { %v828_v5 = vor.u32 %v692_v4, %v637_v2  ;;  %v691_v8 = vld [vmem:[%s217_s19 + $0x4] sm:$0xf]  ;;  %v643_v9 = vld [vmem:[%s217_s19 + $0x8] sm:$0xf0]  ;;  %v650_v10 = vor.u32 %v693_v6, %v647_v7  ;;  %vm272_vm6 = vcmask 1039360   ;;  %v353_v56 = vld [vmem:[%s951_s2 + $0x18] sm:$0xff] }
  0x12   : > { %333 = vrot.lane.b32.xlu0 %v826_v3, %s775_s20  ;;  %294 = vrot.lane.b32.xlu2 %v826_v3, %s776_s21  ;;  %v646_v11 = vor.u32 %v691_v8, %v643_v9  ;;  %v350_v55 = vld [vmem:[%s951_s2] sm:$0xff]  ;;  %v352_v58 = vld [vmem:[%s951_s2 + $0x10] sm:$0xff]  ;;  %s690_s28 = sshll.u32 %s958_s12, 6 }
  0x13   : > { %329 = vrot.lane.b32.xlu1 %v828_v5, %s775_s20  ;;  %v699_v59 = vld [vmem:[%s950_s1 + $0x24] sm:$0xf]  ;;  %v671_v60 = vld [vmem:[%s950_s1 + $0x28] sm:$0xf0]  ;;  %v356_v62 = vld [vmem:[%s951_s2 + $0x30] sm:$0xff]  ;;  %s930_s4 = scalar_lea.vmem %s952_s3, %s690_s28 }
  0x14   : > { %v355_v61 = vld [vmem:[%s951_s2 + $0x28] sm:$0xff]  ;;  %v354_v63 = vld [vmem:[%s951_s2 + $0x20] sm:$0xff]  ;;  %v674_v0 = vor.u32 %v699_v59, %v671_v60  ;;  %v357_v8 = vld [vmem:[%s951_s2 + $0x38] sm:$0xff] }
  0x15   : > { %v653_v1 = vld [vmem:[%s950_s1] sm:$0xf]  ;;  %v696_v2 = vld [vmem:[%s950_s1 + $0x4] sm:$0xf0]  ;;  %v701_v9 = vld [vmem:[%s950_s1 + $0x34] sm:$0xf] }
  0x16   : > { %v669_v4 = vld [vmem:[%s950_s1 + $0x20] sm:$0xf]  ;;  %v700_v6 = vld [vmem:[%s950_s1 + $0x24] sm:$0xf0] }
  0x17   : > { %v670_v7 = vor.u32 %v700_v6, %v669_v4 }
  0x1a   : > { %335 = vrot.lane.b32.xlu0 %v650_v10, %s775_s20  ;;  %296 = vrot.lane.b32.xlu2 %v650_v10, %s776_s21 }
  0x1b   : > { %331 = vrot.lane.b32.xlu1 %v646_v11, %s775_s20 }
  0x22   : > { %320 = vrot.lane.b32.xlu0 %v826_v3, %s777_s22  ;;  %290 = vrot.lane.b32.xlu2 %v828_v5, %s776_s21 }
  0x23   : > { %322 = vrot.lane.b32.xlu1 %v650_v10, %s777_s22 }
  0x2a   : > { %292 = vrot.lane.b32.xlu0 %v646_v11, %s776_s21  ;;  %318 = vrot.lane.b32.xlu2 %v646_v11, %s777_s22 }
  0x2b   : > { %316 = vrot.lane.b32.xlu1 %v828_v5, %s777_s22 }
  0x32   : > { %281 = vrot.lane.b32.xlu0 %v826_v3, %s778_s23  ;;  %307 = vrot.lane.b32.xlu2 %v826_v3, %s779_s24 }
  0x33   : > { %283 = vrot.lane.b32.xlu1 %v650_v10, %s778_s23 }
  0x3a   : > { %309 = vrot.lane.b32.xlu0 %v650_v10, %s779_s24  ;;  %279 = vrot.lane.b32.xlu2 %v646_v11, %s778_s23 }
  0x3b   : > { %277 = vrot.lane.b32.xlu1 %v828_v5, %s778_s23 }
  0x42   : > { %303 = vrot.lane.b32.xlu0 %v828_v5, %s779_s24  ;;  %268 = vrot.lane.b32.xlu2 %v826_v3, %s780_s25 }
  0x43   : > { %305 = vrot.lane.b32.xlu1 %v646_v11, %s779_s24 }
  0x4a   : > { %270 = vrot.lane.b32.xlu0 %v650_v10, %s780_s25  ;;  %266 = vrot.lane.b32.xlu2 %v646_v11, %s780_s25  ;;  %v679_v10 = vld [vmem:[%s950_s1 + $0x38] sm:$0xf0] }
  0x4b   : > { %264 = vrot.lane.b32.xlu1 %v828_v5, %s780_s25  ;;  %v682_v11 = vor.u32 %v701_v9, %v679_v10 }
  0x52   : > { %360 = vperm.xlu0 %748, %v350_v55   ;;  %370 = vperm.xlu2 %750, %v352_v58  }
  0x53   : > { %365 = vperm.xlu1 %749, %v351_v39  }
  0x5a   : > { %385 = vperm.xlu0 %748, %v355_v61   ;;  %380 = vperm.xlu2 %750, %v354_v63  }
  0x5b   : > { %375 = vperm.xlu1 %749, %v353_v56  }
  0x62   : > { %395 = vperm.xlu2 %750, %v357_v8  }
  0x63   : > { %390 = vperm.xlu1 %749, %v356_v62  }
  0x6c   : > { %v295_v12 = vpop.permute.xlu2 %294 }
  0x74   : > { %v297_v13 = vpop.permute.xlu2 %296 }
  0x75   : > { %v300_v14 = vsel %vm298_vm0, %v295_v12, %v297_v13  ;;  %v698_v12 = vld [vmem:[%s950_s1 + $0x14] sm:$0xf0]  ;;  %v677_v13 = vld [vmem:[%s950_s1 + $0x30] sm:$0xf] }
  0x76   : > { %447 = vmatpush.bf16.msra.mxu0 %v300_v14  ;;  %703 = vmatpush.bf16.msra.mxu2 %v300_v14  ;;  %v702_v14 = vld [vmem:[%s950_s1 + $0x34] sm:$0xf0] }
  0x7c   : > { %v291_v17 = vpop.permute.xlu2 %290 }
  0x84   : > { %v334_v15 = vpop.permute.xlu0 %333  ;;  %v319_v23 = vpop.permute.xlu2 %318 }
  0x85   : > { %v330_v16 = vpop.permute.xlu1 %329 }
  0x8c   : > { %v336_v18 = vpop.permute.xlu0 %335  ;;  %v308_v30 = vpop.permute.xlu2 %307 }
  0x8d   : > { %v332_v19 = vpop.permute.xlu1 %331  ;;  %v339_v20 = vsel %vm337_vm1, %v334_v15, %v336_v18 }
  0x8e   : > { %478 = vmatpush.bf16.msra.mxu1 %v339_v20  ;;  %711 = vmatpush.bf16.msra.mxu3 %v339_v20  ;;  %v338_v21 = vsel %vm337_vm1, %v330_v16, %v332_v19  ;;  %v678_v16 = vor.u32 %v702_v14, %v677_v13 }
  0x92   : > { %479 = vmatpush.bf16.msra.mxu1 %v338_v21  ;;  %712 = vmatpush.bf16.msra.mxu3 %v338_v21 }
  0x94   : > { %v321_v22 = vpop.permute.xlu0 %320  ;;  %v280_v34 = vpop.permute.xlu2 %279 }
  0x95   : > { %v323_v24 = vpop.permute.xlu1 %322 }
  0x96   : > { %v326_v25 = vsel %vm324_vm2, %v321_v22, %v323_v24 }
  0x97   : > { %480 = vmatpush.bf16.msra.mxu1 %v326_v25  ;;  %713 = vmatpush.bf16.msra.mxu3 %v326_v25 }
  0x9c   : > { %v293_v26 = vpop.permute.xlu0 %292  ;;  %v269_v41 = vpop.permute.xlu2 %268 }
  0x9d   : > { %v317_v27 = vpop.permute.xlu1 %316  ;;  %v299_v28 = vsel %vm298_vm0, %v291_v17, %v293_v26 }
  0x9e   : > { %448 = vmatpush.bf16.msra.mxu0 %v299_v28  ;;  %704 = vmatpush.bf16.msra.mxu2 %v299_v28  ;;  %v325_v29 = vsel %vm324_vm2, %v317_v27, %v319_v23 }
  0x9f   : > { %481 = vmatpush.bf16.msra.mxu1 %v325_v29  ;;  %714 = vmatpush.bf16.msra.mxu3 %v325_v29 }
  0xa4   : > { %v282_v31 = vpop.permute.xlu0 %281  ;;  %v267_v52 = vpop.permute.xlu2 %266 }
  0xa5   : > { %v284_v32 = vpop.permute.xlu1 %283 }
  0xa6   : > { %v287_v33 = vsel %vm285_vm3, %v282_v31, %v284_v32 }
  0xa7   : > { %449 = vmatpush.bf16.msra.mxu0 %v287_v33  ;;  %705 = vmatpush.bf16.msra.mxu2 %v287_v33 }
  0xac   : > { %v310_v35 = vpop.permute.xlu0 %309  ;;  %v371_v19 = vpop.permute.xlu2 %370 }
  0xad   : > { %v278_v36 = vpop.permute.xlu1 %277  ;;  %v313_v37 = vsel %vm311_vm4, %v308_v30, %v310_v35 }
  0xae   : > { %482 = vmatpush.bf16.msra.mxu1 %v313_v37  ;;  %715 = vmatpush.bf16.msra.mxu3 %v313_v37  ;;  %v286_v38 = vsel %vm285_vm3, %v278_v36, %v280_v34 }
  0xaf   : > { %450 = vmatpush.bf16.msra.mxu0 %v286_v38  ;;  %706 = vmatpush.bf16.msra.mxu2 %v286_v38 }
  0xb4   : > { %v304_v46 = vpop.permute.xlu0 %303  ;;  %v381_v27 = vpop.permute.xlu2 %380 }
  0xb5   : > { %v306_v47 = vpop.permute.xlu1 %305 }
  0xb6   : > { %v312_v48 = vsel %vm311_vm4, %v304_v46, %v306_v47 }
  0xb7   : > { %483 = vmatpush.bf16.msra.mxu1 %v312_v48  ;;  %716 = vmatpush.bf16.msra.mxu3 %v312_v48 }
  0xba   : > { %684 = vmatmul.msk.bf16.vlgmr.msra.gmra.mxu3 %vm434_vm5, %v666_v49  ;;  %683 = vmatmul.msk.bf16.vlgmr.msra.gmra.mxu1 %vm434_vm5, %v658_v50 }
  0xbc   : > { %v271_v51 = vpop.permute.xlu0 %270 }
  0xbd   : > { %v274_v53 = vsel %vm272_vm6, %v269_v41, %v271_v51  ;;  %v265_v54 = vpop.permute.xlu1 %264 }
  0xbe   : > { %451 = vmatpush.bf16.msra.mxu0 %v274_v53  ;;  %707 = vmatpush.bf16.msra.mxu2 %v274_v53  ;;  %v273_v57 = vsel %vm272_vm6, %v265_v54, %v267_v52  ;;  %v396_v52 = vpop.permute.xlu2 %395 }
  0xc2   : > { %452 = vmatpush.bf16.msra.mxu0 %v273_v57  ;;  %708 = vmatpush.bf16.msra.mxu2 %v273_v57 }
  0xc4   : > { %v361_v21 = vpop.permute.xlu0 %360 }
  0xc5   : > { %v366_v24 = vpop.permute.xlu1 %365 }
  0xc6   : > { %453 = vmatpush.bf16.msra.mxu0 %v826_v3  ;;  %709 = vmatpush.bf16.msra.mxu2 %v826_v3  ;;  %v654_v3 = vor.u32 %v696_v2, %v653_v1 }
  0xca   : > { %685 = vmatmul.msk.bf16.gmra.mxu3 %vm434_vm5, %v674_v0  ;;  %454 = vmatpush.bf16.msra.mxu0 %v828_v5 }
  0xcb   : > { %710 = vmatpush.bf16.msra.mxu2 %v828_v5  ;;  %v661_v5 = vld [vmem:[%s950_s1 + $0x10] sm:$0xf] }
  0xcc   : > { %v662_v15 = vor.u32 %v698_v12, %v661_v5  ;;  %v386_v37 = vpop.permute.xlu0 %385 }
  0xcd   : > { %455 = vmatmul.bf16.vlgmr.msra.gmra.mxu0 %v654_v3  ;;  %v376_v35 = vpop.permute.xlu1 %375 }
  0xce   : > { %465 = vmatmul.bf16.vlgmr.msra.gmra.mxu2 %v670_v7 }
  0xd5   : > { %v391_v44 = vpop.permute.xlu1 %390 }
  0xda   : > { %686 = vmatmul.msk.bf16.gmra.mxu3 %vm434_vm5, %v682_v11 }
  0xdd   : > { %460 = vmatmul.bf16.gmra.mxu0 %v662_v15 }
  0xde   : > { %470 = vmatmul.bf16.gmra.mxu2 %v678_v16 }
 0x137   : > { %v485_v20 = vpop.f32.mrf.mxu1 }
 0x13d   : > { %v490_v17 = vpop.f32.mrf.mxu3 }
 0x13f   : > { %v487_v31 = vpop.f32.mrf.mxu1 }
 0x145   : > { %v492_v18 = vpop.f32.mrf.mxu3 }
 0x14a   : > { %v456_v22 = vpop.f32.mrf.mxu0 }
 0x14b   : > { %v457_v23 = vadd.f32 %v456_v22, %v361_v21 }
 0x14d   : > { %v495_v25 = vpop.f32.mrf.mxu3  ;;  %v486_v26 = vadd.f32 %v485_v20, %v457_v23 }
 0x14f   : > { %505 = vst [vmem:[%s930_s4] sm:$0xff] %v486_v26 }
 0x151   : > { %v466_v28 = vpop.f32.mrf.mxu2 }
 0x152   : > { %v467_v29 = vadd.f32 %v466_v28, %v381_v27  ;;  %v458_v30 = vpop.f32.mrf.mxu0 }
 0x153   : > { %v459_v32 = vadd.f32 %v458_v30, %v366_v24 }
 0x154   : > { %v496_v33 = vadd.f32 %v495_v25, %v467_v29 }
 0x155   : > { %v488_v34 = vadd.f32 %v487_v31, %v459_v32  ;;  %v497_v36 = vpop.f32.mrf.mxu3 }
 0x156   : > { %509 = vst [vmem:[%s930_s4 + $0x20] sm:$0xff] %v496_v33 }
 0x157   : > { %506 = vst [vmem:[%s930_s4 + $0x8] sm:$0xff] %v488_v34 }
 0x159   : > { %v468_v38 = vpop.f32.mrf.mxu2 }
 0x15a   : > { %v469_v39 = vadd.f32 %v468_v38, %v386_v37  ;;  %v461_v40 = vpop.f32.mrf.mxu0 }
 0x15b   : > { %v462_v41 = vadd.f32 %v461_v40, %v371_v19 }
 0x15c   : > { %v498_v42 = vadd.f32 %v497_v36, %v469_v39 }
 0x15d   : > { %v491_v43 = vadd.f32 %v490_v17, %v462_v41  ;;  %v500_v45 = vpop.f32.mrf.mxu3 }
 0x15e   : > { %510 = vst [vmem:[%s930_s4 + $0x28] sm:$0xff] %v498_v42 }
 0x15f   : > { %507 = vst [vmem:[%s930_s4 + $0x10] sm:$0xff] %v491_v43 }
 0x161   : > { %v471_v46 = vpop.f32.mrf.mxu2 }
 0x162   : > { %v472_v47 = vadd.f32 %v471_v46, %v391_v44  ;;  %v463_v48 = vpop.f32.mrf.mxu0 }
 0x163   : > { %v464_v49 = vadd.f32 %v463_v48, %v376_v35 }
 0x164   : > { %v501_v50 = vadd.f32 %v500_v45, %v472_v47 }
 0x165   : > { %v493_v51 = vadd.f32 %v492_v18, %v464_v49  ;;  %v502_v55 = vpop.f32.mrf.mxu3 }
 0x166   : > { %511 = vst [vmem:[%s930_s4 + $0x30] sm:$0xff] %v501_v50 }
 0x167   : > { %508 = vst [vmem:[%s930_s4 + $0x18] sm:$0xff] %v493_v51 }
 0x169   : > { %v473_v53 = vpop.f32.mrf.mxu2 }
 0x16a   : > { %v474_v54 = vadd.f32 %v473_v53, %v396_v52 }
 0x16c   : > { %v503_v56 = vadd.f32 %v502_v55, %v474_v54 }
 0x16e   : > { %512 = vst [vmem:[%s930_s4 + $0x38] sm:$0xff] %v503_v56 }
 0x16f PF: > { %s13_s14 = sadd.s32 1, %s773_s14   ;;  %s953_s12 = smov %s769_s13 }
 0x170   : > { %p10_p5 = scmp.ge.s32.totalorder %s13_s14, 4   ;;  %s954_s13 = smov %s956_s15 }
 0x172   :  { %12 = sbr.rel (!%p10_p5) target bundleno = 2 (0x2), region = 68 }

// kernel: _lambda_.31
= control target key start
LH: loop header
LB: loop body
LE: loop exit
PB: predicated region body
PF: predicated region fallthrough
CT: control target
= control target key end

     0   :  { %s937_s12 = smov 0   ;;  %s939_s13 = smov 0   ;;  %s1205_s0 = inlined_call_operand.vmem [shape: bf16[2,64,256], index: 0, kind: input, shape index: {}]   ;;  %s1206_s1 = inlined_call_operand.vmem [shape: bf16[32,512], index: 1, kind: input, shape index: {}]   ;;  %s1207_s2 = inlined_call_operand.vmem [shape: f32[32,1], index: 2, kind: input, shape index: {}]   ;;  %s1208_s3 = inlined_call_operand.vmem [shape: f32[2,32,128], index: 3, kind: output, shape index: {}]  }
   0x1   :  { %s941_s14 = smov 0  }
   0x2 LB: > { %s25_s15 = sadd.s32 1, %s903_s13  ;;  %p801_p0 = scmp.ge.s32.totalorder %s907_s14, 1  ;;  %s907_s14 = sphi %s941_s14, %s13_s14   ;;  %s903_s13 = sphi %s939_s13, %s1210_s13   ;;  %s899_s12 = sphi %s937_s12, %s1209_s12  }
   0x3   : > { %p27_p1 = scmp.ge.s32.totalorder %s25_s15, 2  ;;  %p174_p2 = scmp.lt.s32.totalorder %s907_s14, 3 }
   0x5   : > { %s1212_s15 = smov (%p27_p1, %s25_s15), 0  ;;  %p175_p3 = pnand %p801_p0, %p174_p2 }
   0x6   : > { %p213_p4 = scmp.lt.s32.totalorder (!%p175_p3), %s899_s12, 1  ;;  %s909_s20 = smov (!%p175_p3), 127  }
   0x7   : > { %178 = sbr.rel (%p175_p3) target bundleno = 449 (0x1c1), region = 32  ;;  %s910_s21 = smov (!%p175_p3), 123  }
   0x8   : > { %s911_s22 = smov (!%p175_p3), 121   ;;  %s912_s23 = smov (!%p175_p3), 125  }
   0x9   : > { %s913_s24 = smov (!%p175_p3), 124   ;;  %s914_s25 = smov (!%p175_p3), 122  }
   0xa   : > { %s915_s26 = smov (!%p175_p3), 126  }
   0xc   : > { %s1214_s12 = smov (!%p213_p4, %s899_s12), 1 }
   0xd   : > { %s840_s16 = sshll.u32 %s1214_s12, 6 }
   0xe   : > { %s961_s19 = scalar_lea.vmem %s1205_s0, %s840_s16 }
   0xf   : > { %v247_v0 = vld [vmem:[%s961_s19 + $0x30] sm:$0xff]  ;;  %v248_v1 = vld [vmem:[%s961_s19 + $0x38] sm:$0xff]  ;;  %v245_v13 = vld [vmem:[%s961_s19 + $0x20] sm:$0xff] }
  0x10   : > { %v261_v2 = vunpack.c.l.bf16 %v247_v0  ;;  %v262_v3 = vunpack.c.h.bf16 %v247_v0  ;;  %v263_v4 = vunpack.c.l.bf16 %v248_v1  ;;  %v264_v5 = vunpack.c.h.bf16 %v248_v1  ;;  %v246_v16 = vld [vmem:[%s961_s19 + $0x28] sm:$0xff]  ;;  %v243_v40 = vld [vmem:[%s961_s19 + $0x10] sm:$0xff]  ;;  %v244_v41 = vld [vmem:[%s961_s19 + $0x18] sm:$0xff] }
  0x11   : > { %v257_v19 = vunpack.c.l.bf16 %v245_v13  ;;  %v258_v20 = vunpack.c.h.bf16 %v245_v13  ;;  %v259_v22 = vunpack.c.l.bf16 %v246_v16  ;;  %v260_v23 = vunpack.c.h.bf16 %v246_v16  ;;  %v241_v1 = vld [vmem:[%s961_s19] sm:$0xff] }
  0x12   : > { %vm277_vm0 = vcmp.ge.f32.partialorder %v261_v2, 0.0  ;;  %vm278_vm1 = vcmp.ge.f32.partialorder %v262_v3, 0.0  ;;  %vm279_vm2 = vcmp.ge.f32.partialorder %v263_v4, 0.0  ;;  %vm280_vm3 = vcmp.ge.f32.partialorder %v264_v5, 0.0 }
  0x13   : > { %v293_v6 = vmul.f32 0.1, %v261_v2  ;;  %v294_v7 = vmul.f32 0.1, %v262_v3  ;;  %v295_v8 = vmul.f32 0.1, %v263_v4  ;;  %v253_v45 = vunpack.c.l.bf16 %v243_v40 }
  0x14   : > { %v296_v9 = vmul.f32 0.1, %v264_v5  ;;  %vm273_vm4 = vcmp.ge.f32.partialorder %v257_v19, 0.0  ;;  %v289_v25 = vmul.f32 0.1, %v257_v19  ;;  %vm274_vm5 = vcmp.ge.f32.partialorder %v258_v20, 0.0 }
  0x15   : > { %v309_v10 = vsel %vm277_vm0, %v261_v2, %v293_v6  ;;  %v310_v11 = vsel %vm278_vm1, %v262_v3, %v294_v7  ;;  %v311_v12 = vsel %vm279_vm2, %v263_v4, %v295_v8  ;;  %v290_v26 = vmul.f32 0.1, %v258_v20  ;;  %v242_v2 = vld [vmem:[%s961_s19 + $0x8] sm:$0xff] }
  0x16   : > { %v312_v14 = vsel %vm280_vm3, %v264_v5, %v296_v9  ;;  %v319_v15 = vpack.c.bf16 %v310_v11, %v309_v10  ;;  %v291_v29 = vmul.f32 0.1, %v259_v22  ;;  %v292_v30 = vmul.f32 0.1, %v260_v23 }
  0x17   : > { %v320_v17 = vpack.c.bf16 %v312_v14, %v311_v12  ;;  %vm275_vm6 = vcmp.ge.f32.partialorder %v259_v22, 0.0  ;;  %vm276_vm7 = vcmp.ge.f32.partialorder %v260_v23, 0.0  ;;  %v305_v31 = vsel %vm273_vm4, %v257_v19, %v289_v25 }
  0x18   : > { %v335_v18 = vunpack.c.l.b16 %v319_v15  ;;  %v351_v27 = vunpack.c.h.b16 %v319_v15  ;;  %v306_v33 = vsel %vm274_vm5, %v258_v20, %v290_v26  ;;  %v307_v34 = vsel %vm275_vm6, %v259_v22, %v291_v29 }
  0x19   : > { %v336_v21 = vunpack.c.l.b16 %v320_v17  ;;  %v352_v28 = vunpack.c.h.b16 %v320_v17  ;;  %v308_v35 = vsel %vm276_vm7, %v260_v23, %v292_v30  ;;  %v317_v36 = vpack.c.bf16 %v306_v33, %v305_v31 }
  0x1a   : > { %v318_v37 = vpack.c.bf16 %v308_v35, %v307_v34  ;;  %v254_v46 = vunpack.c.h.bf16 %v243_v40  ;;  %v255_v47 = vunpack.c.l.bf16 %v244_v41  ;;  %v256_v48 = vunpack.c.h.bf16 %v244_v41 }
  0x1b   : > { %v967_v24 = vpack.c.b16 %v336_v21, %v335_v18  ;;  %v976_v32 = vpack.c.b16 %v352_v28, %v351_v27  ;;  %v333_v39 = vunpack.c.l.b16 %v317_v36  ;;  %v349_v43 = vunpack.c.h.b16 %v317_v36 }
  0x1c   : > { %v334_v38 = vunpack.c.l.b16 %v318_v37  ;;  %v350_v44 = vunpack.c.h.b16 %v318_v37  ;;  %v285_v50 = vmul.f32 0.1, %v253_v45  ;;  %v286_v51 = vmul.f32 0.1, %v254_v46 }
  0x1d   : > { %369 = vrot.lane.b32.xlu1 %v967_v24, %s909_s20  ;;  %469 = vrot.lane.b32.xlu0 %v967_v24, %s910_s21  ;;  %v287_v52 = vmul.f32 0.1, %v255_v47  ;;  %v288_v53 = vmul.f32 0.1, %v256_v48  ;;  %vm269_vm8 = vcmp.ge.f32.partialorder %v253_v45, 0.0  ;;  %vm270_vm9 = vcmp.ge.f32.partialorder %v254_v46, 0.0 }
  0x1e   : > { %519 = vrot.lane.b32.xlu2 %v967_v24, %s911_s22  ;;  %v986_v42 = vpack.c.b16 %v334_v38, %v333_v39  ;;  %v994_v49 = vpack.c.b16 %v350_v44, %v349_v43  ;;  %vm271_vm10 = vcmp.ge.f32.partialorder %v255_v47, 0.0  ;;  %vm272_vm11 = vcmp.ge.f32.partialorder %v256_v48, 0.0 }
  0x1f   : > { %v301_v54 = vsel %vm269_vm8, %v253_v45, %v285_v50  ;;  %v302_v55 = vsel %vm270_vm9, %v254_v46, %v286_v51  ;;  %v303_v56 = vsel %vm271_vm10, %v255_v47, %v287_v52  ;;  %v304_v57 = vsel %vm272_vm11, %v256_v48, %v288_v53 }
  0x20   : > { %v315_v58 = vpack.c.bf16 %v302_v55, %v301_v54  ;;  %v316_v59 = vpack.c.bf16 %v304_v57, %v303_v56  ;;  %v249_v4 = vunpack.c.l.bf16 %v241_v1  ;;  %v250_v5 = vunpack.c.h.bf16 %v241_v1 }
  0x21   : > { %v251_v6 = vunpack.c.l.bf16 %v242_v2  ;;  %v252_v7 = vunpack.c.h.bf16 %v242_v2  ;;  %vm523_vm0 = vcmask 990208   ;;  %vm373_vm1 = vcmask 1039360  }
  0x22   : > { %v331_v60 = vunpack.c.l.b16 %v315_v58  ;;  %v332_v61 = vunpack.c.l.b16 %v316_v59  ;;  %v347_v62 = vunpack.c.h.b16 %v315_v58  ;;  %v348_v63 = vunpack.c.h.b16 %v316_v59 }
  0x23   : > { %v281_v8 = vmul.f32 0.1, %v249_v4  ;;  %v282_v9 = vmul.f32 0.1, %v250_v5  ;;  %v283_v10 = vmul.f32 0.1, %v251_v6 }
  0x24   : > { %v1008_v0 = vpack.c.b16 %v332_v61, %v331_v60  ;;  %v1012_v3 = vpack.c.b16 %v348_v63, %v347_v62  ;;  %v284_v11 = vmul.f32 0.1, %v252_v7  ;;  %vm265_vm12 = vcmp.ge.f32.partialorder %v249_v4, 0.0 }
  0x25   : > { %371 = vrot.lane.b32.xlu1 %v976_v32, %s909_s20  ;;  %471 = vrot.lane.b32.xlu0 %v976_v32, %s910_s21  ;;  %vm266_vm13 = vcmp.ge.f32.partialorder %v250_v5, 0.0  ;;  %vm267_vm14 = vcmp.ge.f32.partialorder %v251_v6, 0.0  ;;  %vm268_vm15 = vcmp.ge.f32.partialorder %v252_v7, 0.0  ;;  %v297_v12 = vsel %vm265_vm12, %v249_v4, %v281_v8 }
  0x26   : > { %521 = vrot.lane.b32.xlu2 %v976_v32, %s911_s22  ;;  %v298_v13 = vsel %vm266_vm13, %v250_v5, %v282_v9  ;;  %v299_v14 = vsel %vm267_vm14, %v251_v6, %v283_v10  ;;  %v300_v15 = vsel %vm268_vm15, %v252_v7, %v284_v11  ;;  %vm473_vm2 = vcmask 1006592  }
  0x27   : > { %v313_v16 = vpack.c.bf16 %v298_v13, %v297_v12  ;;  %v314_v17 = vpack.c.bf16 %v300_v15, %v299_v14  ;;  %vm423_vm3 = vcmask 1022976   ;;  %vm448_vm4 = vcmask 1014784  }
  0x28   : > { %vm498_vm5 = vcmask 998400   ;;  %vm398_vm6 = vcmask 1031168  }
  0x29   : > { %v330_v18 = vunpack.c.l.b16 %v314_v17  ;;  %v345_v19 = vunpack.c.h.b16 %v313_v16  ;;  %v346_v20 = vunpack.c.h.b16 %v314_v17  ;;  %v329_v21 = vunpack.c.l.b16 %v313_v16 }
  0x2b   : > { %v1032_v22 = vpack.c.b16 %v346_v20, %v345_v19  ;;  %v1034_v23 = vpack.c.b16 %v330_v18, %v329_v21 }
  0x2d   : > { %421 = vrot.lane.b32.xlu1 %v976_v32, %s912_s23  ;;  %419 = vrot.lane.b32.xlu0 %v967_v24, %s912_s23 }
  0x2e   : > { %465 = vrot.lane.b32.xlu2 %v986_v42, %s910_s21 }
  0x35   : > { %467 = vrot.lane.b32.xlu0 %v994_v49, %s910_s21  ;;  %365 = vrot.lane.b32.xlu1 %v986_v42, %s909_s20 }
  0x36   : > { %367 = vrot.lane.b32.xlu2 %v994_v49, %s909_s20 }
  0x3d   : > { %515 = vrot.lane.b32.xlu0 %v986_v42, %s911_s22  ;;  %517 = vrot.lane.b32.xlu1 %v994_v49, %s911_s22 }
  0x3e   : > { %415 = vrot.lane.b32.xlu2 %v986_v42, %s912_s23 }
  0x45   : > { %417 = vrot.lane.b32.xlu0 %v994_v49, %s912_s23  ;;  %461 = vrot.lane.b32.xlu1 %v1008_v0, %s910_s21 }
  0x46   : > { %463 = vrot.lane.b32.xlu2 %v1012_v3, %s910_s21 }
  0x4d   : > { %361 = vrot.lane.b32.xlu0 %v1008_v0, %s909_s20  ;;  %363 = vrot.lane.b32.xlu1 %v1012_v3, %s909_s20 }
  0x4e   : > { %511 = vrot.lane.b32.xlu2 %v1008_v0, %s911_s22 }
  0x55   : > { %513 = vrot.lane.b32.xlu0 %v1012_v3, %s911_s22  ;;  %411 = vrot.lane.b32.xlu1 %v1008_v0, %s912_s23 }
  0x56   : > { %413 = vrot.lane.b32.xlu2 %v1012_v3, %s912_s23 }
  0x5d   : > { %459 = vrot.lane.b32.xlu1 %v1032_v22, %s910_s21  ;;  %457 = vrot.lane.b32.xlu0 %v1034_v23, %s910_s21  ;;  %s841_s21 = sshll.u32 %s1214_s12, 5 }
  0x5e   : > { %357 = vrot.lane.b32.xlu2 %v1034_v23, %s909_s20 }
  0x65   : > { %507 = vrot.lane.b32.xlu1 %v1034_v23, %s911_s22  ;;  %359 = vrot.lane.b32.xlu0 %v1032_v22, %s909_s20 }
  0x66   : > { %509 = vrot.lane.b32.xlu2 %v1032_v22, %s911_s22 }
  0x6d   : > { %409 = vrot.lane.b32.xlu1 %v1032_v22, %s912_s23  ;;  %407 = vrot.lane.b32.xlu0 %v1034_v23, %s912_s23 }
  0x6e   : > { %444 = vrot.lane.b32.xlu2 %v967_v24, %s913_s24 }
  0x75   : > { %494 = vrot.lane.b32.xlu1 %v967_v24, %s914_s25  ;;  %446 = vrot.lane.b32.xlu0 %v976_v32, %s913_s24 }
  0x76   : > { %496 = vrot.lane.b32.xlu2 %v976_v32, %s914_s25 }
  0x78   : > { %v520_v25 = vpop.permute.xlu2 %519 }
  0x7d   : > { %396 = vrot.lane.b32.xlu1 %v976_v32, %s915_s26  ;;  %394 = vrot.lane.b32.xlu0 %v967_v24, %s915_s26 }
  0x7e   : > { %440 = vrot.lane.b32.xlu2 %v986_v42, %s913_s24 }
  0x80   : > { %v522_v26 = vpop.permute.xlu2 %521 }
  0x81   : > { %v527_v27 = vsel %vm523_vm0, %v520_v25, %v522_v26  ;;  %v844_v25 = vld [vmem:[%s1206_s1 + $0xc] sm:$0xf0] }
  0x82   : > { %661 = vmatpush.bf16.msra.mxu3 %v527_v27 }
  0x85   : > { %490 = vrot.lane.b32.xlu1 %v986_v42, %s914_s25  ;;  %442 = vrot.lane.b32.xlu0 %v994_v49, %s913_s24 }
  0x86   : > { %492 = vrot.lane.b32.xlu2 %v994_v49, %s914_s25 }
  0x88   : > { %v466_v28 = vpop.permute.xlu2 %465 }
  0x8d   : > { %392 = vrot.lane.b32.xlu1 %v994_v49, %s915_s26  ;;  %390 = vrot.lane.b32.xlu0 %v986_v42, %s915_s26 }
  0x8e   : > { %436 = vrot.lane.b32.xlu2 %v1008_v0, %s913_s24 }
  0x8f   : > { %v370_v29 = vpop.permute.xlu1 %369  ;;  %v470_v30 = vpop.permute.xlu0 %469 }
  0x90   : > { %v368_v31 = vpop.permute.xlu2 %367 }
  0x95   : > { %486 = vrot.lane.b32.xlu1 %v1008_v0, %s914_s25  ;;  %438 = vrot.lane.b32.xlu0 %v1012_v3, %s913_s24 }
  0x96   : > { %488 = vrot.lane.b32.xlu2 %v1012_v3, %s914_s25 }
  0x97   : > { %v372_v32 = vpop.permute.xlu1 %371  ;;  %v472_v33 = vpop.permute.xlu0 %471 }
  0x98   : > { %v377_v34 = vsel %vm373_vm1, %v370_v29, %v372_v32  ;;  %v477_v35 = vsel %vm473_vm2, %v470_v30, %v472_v33  ;;  %v416_v36 = vpop.permute.xlu2 %415  ;;  %v824_v32 = vld [vmem:[%s1206_s1 + $0x20] sm:$0xf]  ;;  %v848_v33 = vld [vmem:[%s1206_s1 + $0x2c] sm:$0xf0] }
  0x99   : > { %604 = vmatpush.bf16.msra.mxu0 %v377_v34  ;;  %642 = vmatpush.bf16.msra.mxu2 %v477_v35  ;;  %v916_v34 = vmov 0   ;;  %v825_v35 = vor.u32 %v848_v33, %v824_v32 }
  0x9a   : > { %883 = vset.pattern.permute.xlu0 %v916_v34  ;;  %884 = vset.pattern.permute.xlu1 %v916_v34 }
  0x9b   : > { %882 = vset.pattern.permute.xlu2 %v916_v34 }
  0x9d   : > { %388 = vrot.lane.b32.xlu1 %v1012_v3, %s915_s26  ;;  %386 = vrot.lane.b32.xlu0 %v1008_v0, %s915_s26 }
  0x9e   : > { %432 = vrot.lane.b32.xlu2 %v1034_v23, %s913_s24 }
  0x9f   : > { %v422_v37 = vpop.permute.xlu1 %421  ;;  %v420_v38 = vpop.permute.xlu0 %419 }
  0xa0   : > { %v427_v39 = vsel %vm423_vm3, %v420_v38, %v422_v37  ;;  %v464_v40 = vpop.permute.xlu2 %463 }
  0xa1   : > { %623 = vmatpush.bf16.msra.mxu1 %v427_v39 }
  0xa5   : > { %482 = vrot.lane.b32.xlu1 %v1034_v23, %s914_s25  ;;  %434 = vrot.lane.b32.xlu0 %v1032_v22, %s913_s24  ;;  %s239_s24 = scalar_lea.vmem %s1208_s3, %s841_s21 }
  0xa6   : > { %484 = vrot.lane.b32.xlu2 %v1032_v22, %s914_s25 }
  0xa7   : > { %v468_v41 = vpop.permute.xlu0 %467  ;;  %v366_v43 = vpop.permute.xlu1 %365 }
  0xa8   : > { %v376_v44 = vsel %vm373_vm1, %v366_v43, %v368_v31  ;;  %v476_v45 = vsel %vm473_vm2, %v466_v28, %v468_v41  ;;  %v512_v46 = vpop.permute.xlu2 %511  ;;  %v541_v41 = vld [vmem:[%s1207_s2 + $0x8] sm:$0xff] }
  0xa9   : > { %605 = vmatpush.bf16.msra.mxu0 %v376_v44  ;;  %643 = vmatpush.bf16.msra.mxu2 %v476_v45 }
  0xad   : > { %384 = vrot.lane.b32.xlu1 %v1032_v22, %s915_s26  ;;  %382 = vrot.lane.b32.xlu0 %v1034_v23, %s915_s26  ;;  %v808_v22 = vld [vmem:[%s1206_s1] sm:$0xf] }
  0xae   : > { %v809_v27 = vor.u32 %v844_v25, %v808_v22 }
  0xaf   : > { %v516_v47 = vpop.permute.xlu0 %515  ;;  %v518_v48 = vpop.permute.xlu1 %517 }
  0xb0   : > { %v526_v49 = vsel %vm523_vm0, %v516_v47, %v518_v48  ;;  %v414_v50 = vpop.permute.xlu2 %413  ;;  %v542_v47 = vld [vmem:[%s1207_s2 + $0x10] sm:$0xff]  ;;  %v540_v48 = vld [vmem:[%s1207_s2] sm:$0xff] }
  0xb1   : > { %662 = vmatpush.bf16.msra.mxu3 %v526_v49  ;;  %546 = vperm.xlu2 %882, %v540_v48  }
  0xb5   : > { %551 = vperm.xlu0 %883, %v541_v41   ;;  %556 = vperm.xlu1 %884, %v542_v47  }
  0xb7   : > { %v418_v51 = vpop.permute.xlu0 %417  ;;  %v462_v52 = vpop.permute.xlu1 %461 }
  0xb8   : > { %v426_v53 = vsel %vm423_vm3, %v416_v36, %v418_v51  ;;  %v475_v54 = vsel %vm473_vm2, %v462_v52, %v464_v40  ;;  %v358_v55 = vpop.permute.xlu2 %357  ;;  %v843_v51 = vld [vmem:[%s1206_s1 + $0xc] sm:$0xf]  ;;  %v818_v52 = vld [vmem:[%s1206_s1 + $0x18] sm:$0xf0] }
  0xb9   : > { %624 = vmatpush.bf16.msra.mxu1 %v426_v53  ;;  %644 = vmatpush.bf16.msra.mxu2 %v475_v54 }
  0xbf   : > { %v362_v56 = vpop.permute.xlu0 %361  ;;  %v364_v57 = vpop.permute.xlu1 %363 }
  0xc0   : > { %v375_v58 = vsel %vm373_vm1, %v362_v56, %v364_v57  ;;  %v510_v59 = vpop.permute.xlu2 %509 }
  0xc1   : > { %606 = vmatpush.bf16.msra.mxu0 %v375_v58  ;;  %v821_v58 = vor.u32 %v843_v51, %v818_v52 }
  0xc7   : > { %v514_v60 = vpop.permute.xlu0 %513  ;;  %v412_v61 = vpop.permute.xlu1 %411 }
  0xc8   : > { %v425_v62 = vsel %vm423_vm3, %v412_v61, %v414_v50  ;;  %v525_v63 = vsel %vm523_vm0, %v512_v46, %v514_v60  ;;  %v445_v1 = vpop.permute.xlu2 %444  ;;  %v816_v46 = vld [vmem:[%s1206_s1 + $0x8] sm:$0xf]  ;;  %v845_v50 = vld [vmem:[%s1206_s1 + $0x14] sm:$0xf0]  ;;  %v842_v60 = vld [vmem:[%s1206_s1 + $0x4] sm:$0xf] }
  0xc9   : > { %625 = vmatpush.bf16.msra.mxu1 %v425_v62  ;;  %663 = vmatpush.bf16.msra.mxu3 %v525_v63  ;;  %v817_v57 = vor.u32 %v845_v50, %v816_v46  ;;  %v810_v61 = vld [vmem:[%s1206_s1 + $0x10] sm:$0xf0] }
  0xcf   : > { %v460_v2 = vpop.permute.xlu1 %459  ;;  %v458_v3 = vpop.permute.xlu0 %457 }
  0xd0   : > { %v474_v4 = vsel %vm473_vm2, %v458_v3, %v460_v2  ;;  %v497_v9 = vpop.permute.xlu2 %496  ;;  %v813_v2 = vor.u32 %v842_v60, %v810_v61  ;;  %v832_v3 = vld [vmem:[%s1206_s1 + $0x28] sm:$0xf] }
  0xd1   : > { %645 = vmatpush.bf16.msra.mxu2 %v474_v4  ;;  %v849_v4 = vld [vmem:[%s1206_s1 + $0x34] sm:$0xf0] }
  0xd7   : > { %v508_v5 = vpop.permute.xlu1 %507  ;;  %v360_v6 = vpop.permute.xlu0 %359 }
  0xd8   : > { %v374_v7 = vsel %vm373_vm1, %v358_v55, %v360_v6  ;;  %v524_v8 = vsel %vm523_vm0, %v508_v5, %v510_v59  ;;  %v441_v13 = vpop.permute.xlu2 %440  ;;  %v543_v59 = vld [vmem:[%s1207_s2 + $0x18] sm:$0xff]  ;;  %v847_v5 = vld [vmem:[%s1206_s1 + $0x2c] sm:$0xf] }
  0xd9   : > { %607 = vmatpush.bf16.msra.mxu0 %v374_v7  ;;  %664 = vmatpush.bf16.msra.mxu3 %v524_v8  ;;  %v834_v6 = vld [vmem:[%s1206_s1 + $0x38] sm:$0xf0]  ;;  %v833_v7 = vor.u32 %v849_v4, %v832_v3 }
  0xda   : > { %561 = vperm.xlu2 %882, %v543_v59   ;;  %v837_v8 = vor.u32 %v847_v5, %v834_v6 }
  0xdd   : > { %608 = vmatpush.bf16.msra.mxu0 %v967_v24 }
  0xdf   : > { %v410_v10 = vpop.permute.xlu1 %409  ;;  %v408_v11 = vpop.permute.xlu0 %407 }
  0xe0   : > { %v424_v12 = vsel %vm423_vm3, %v408_v11, %v410_v10  ;;  %v493_v24 = vpop.permute.xlu2 %492  ;;  %v826_v10 = vld [vmem:[%s1206_s1 + $0x30] sm:$0xf0] }
  0xe1   : > { %626 = vmatpush.bf16.msra.mxu1 %v424_v12  ;;  %609 = vmatpush.bf16.msra.mxu0 %v986_v42 }
  0xe5   : > { %610 = vmatpush.bf16.msra.mxu0 %v1008_v0 }
  0xe7   : > { %v495_v14 = vpop.permute.xlu1 %494  ;;  %v447_v15 = vpop.permute.xlu0 %446 }
  0xe8   : > { %v452_v16 = vsel %vm448_vm4, %v445_v1, %v447_v15  ;;  %v502_v17 = vsel %vm498_vm5, %v495_v14, %v497_v9  ;;  %v437_v20 = vpop.permute.xlu2 %436  ;;  %v846_v9 = vld [vmem:[%s1206_s1 + $0x24] sm:$0xf] }
  0xe9   : > { %646 = vmatpush.bf16.msra.mxu2 %v452_v16  ;;  %665 = vmatpush.bf16.msra.mxu3 %v502_v17  ;;  %v829_v11 = vor.u32 %v846_v9, %v826_v10 }
  0xea   : > { %611 = vmatpush.bf16.msra.mxu0 %v1034_v23 }
  0xed   : > { %612 = vmatmul.bf16.vlgmr.msra.gmra.mxu0 %v809_v27 }
  0xef   : > { %v397_v18 = vpop.permute.xlu1 %396  ;;  %v395_v19 = vpop.permute.xlu0 %394 }
  0xf0   : > { %v402_v42 = vsel %vm398_vm6, %v395_v19, %v397_v18  ;;  %v489_v31 = vpop.permute.xlu2 %488 }
  0xf1   : > { %627 = vmatpush.bf16.msra.mxu1 %v402_v42 }
  0xf7   : > { %v491_v21 = vpop.permute.xlu1 %490  ;;  %v443_v0 = vpop.permute.xlu0 %442 }
  0xf8   : > { %v451_v23 = vsel %vm448_vm4, %v441_v13, %v443_v0  ;;  %v501_v26 = vsel %vm498_vm5, %v491_v21, %v493_v24  ;;  %v433_v40 = vpop.permute.xlu2 %432 }
  0xf9   : > { %647 = vmatpush.bf16.msra.mxu2 %v451_v23  ;;  %666 = vmatpush.bf16.msra.mxu3 %v501_v26 }
  0xfd   : > { %617 = vmatmul.bf16.gmra.mxu0 %v825_v35 }
  0xff   : > { %v393_v28 = vpop.permute.xlu1 %392  ;;  %v391_v29 = vpop.permute.xlu0 %390 }
 0x100   : > { %v401_v30 = vsel %vm398_vm6, %v391_v29, %v393_v28  ;;  %v485_v49 = vpop.permute.xlu2 %484 }
 0x101   : > { %628 = vmatpush.bf16.msra.mxu1 %v401_v30 }
 0x107   : > { %v487_v36 = vpop.permute.xlu1 %486  ;;  %v439_v37 = vpop.permute.xlu0 %438 }
 0x108   : > { %v450_v38 = vsel %vm448_vm4, %v437_v20, %v439_v37  ;;  %v500_v39 = vsel %vm498_vm5, %v487_v36, %v489_v31 }
 0x109   : > { %648 = vmatpush.bf16.msra.mxu2 %v450_v38  ;;  %667 = vmatpush.bf16.msra.mxu3 %v500_v39 }
 0x10b   : > { %v547_v13 = vpop.permute.xlu2 %546 }
 0x10f   : > { %v389_v43 = vpop.permute.xlu1 %388  ;;  %v387_v44 = vpop.permute.xlu0 %386 }
 0x110   : > { %v400_v45 = vsel %vm398_vm6, %v387_v44, %v389_v43 }
 0x111   : > { %629 = vmatpush.bf16.msra.mxu1 %v400_v45 }
 0x117   : > { %v483_v53 = vpop.permute.xlu1 %482  ;;  %v435_v54 = vpop.permute.xlu0 %434 }
 0x118   : > { %v449_v55 = vsel %vm448_vm4, %v433_v40, %v435_v54  ;;  %v499_v56 = vsel %vm498_vm5, %v483_v53, %v485_v49 }
 0x119   : > { %649 = vmatpush.bf16.msra.mxu2 %v449_v55  ;;  %668 = vmatpush.bf16.msra.mxu3 %v499_v56 }
 0x11c   : > { %650 = vmatmul.bf16.vlgmr.msra.gmra.mxu2 %v817_v57  ;;  %669 = vmatmul.bf16.vlgmr.msra.gmra.mxu3 %v821_v58 }
 0x11f   : > { %v385_v62 = vpop.permute.xlu1 %384  ;;  %v383_v63 = vpop.permute.xlu0 %382 }
 0x120   : > { %v399_v1 = vsel %vm398_vm6, %v383_v63, %v385_v62 }
 0x121   : > { %630 = vmatpush.bf16.msra.mxu1 %v399_v1 }
 0x124   : > { %631 = vmatmul.bf16.vlgmr.msra.gmra.mxu1 %v813_v2 }
 0x127   : > { %v552_v42 = vpop.permute.xlu0 %551  ;;  %v557_v27 = vpop.permute.xlu1 %556 }
 0x12c   : > { %655 = vmatmul.bf16.gmra.mxu2 %v833_v7  ;;  %674 = vmatmul.bf16.gmra.mxu3 %v837_v8 }
 0x134   : > { %636 = vmatmul.bf16.gmra.mxu1 %v829_v11  ;;  %v562_v36 = vpop.permute.xlu2 %561 }
 0x16a   : > { %v613_v12 = vpop.f32.mrf.mxu0 }
 0x16b   : > { %v614_v14 = vadd.f32 %v613_v12, %v547_v13 }
 0x172   : > { %v615_v17 = vpop.f32.mrf.mxu0 }
 0x173   : > { %v616_v0 = vadd.f32 %v615_v17, %v552_v42 }
 0x17a   : > { %v618_v26 = vpop.f32.mrf.mxu0 }
 0x17b   : > { %v619_v30 = vadd.f32 %v618_v26, %v557_v27 }
 0x182   : > { %v620_v37 = vpop.f32.mrf.mxu0 }
 0x183   : > { %v621_v39 = vadd.f32 %v620_v37, %v562_v36 }
 0x19f   : > { %v670_v15 = vpop.f32.mrf.mxu3  ;;  %v651_v16 = vpop.f32.mrf.mxu2 }
 0x1a1   : > { %v632_v24 = vpop.f32.mrf.mxu1 }
 0x1a2   : > { %v633_v18 = vadd.f32 %v632_v24, %v614_v14 }
 0x1a4   : > { %v652_v19 = vadd.f32 %v651_v16, %v633_v18 }
 0x1a6   : > { %v671_v20 = vadd.f32 %v670_v15, %v652_v19 }
 0x1a7   : > { %v653_v21 = vpop.f32.mrf.mxu2  ;;  %v672_v22 = vpop.f32.mrf.mxu3 }
 0x1a8   : > { %680 = vst [vmem:[%s239_s24] sm:$0xff] %v671_v20 }
 0x1a9   : > { %v634_v25 = vpop.f32.mrf.mxu1 }
 0x1aa   : > { %v635_v23 = vadd.f32 %v634_v25, %v616_v0 }
 0x1ac   : > { %v654_v28 = vadd.f32 %v653_v21, %v635_v23 }
 0x1ae   : > { %v673_v29 = vadd.f32 %v672_v22, %v654_v28 }
 0x1af   : > { %v656_v31 = vpop.f32.mrf.mxu2  ;;  %v675_v34 = vpop.f32.mrf.mxu3 }
 0x1b0   : > { %681 = vst [vmem:[%s239_s24 + $0x8] sm:$0xff] %v673_v29 }
 0x1b1   : > { %v637_v32 = vpop.f32.mrf.mxu1 }
 0x1b2   : > { %v638_v33 = vadd.f32 %v637_v32, %v619_v30 }
 0x1b4   : > { %v657_v35 = vadd.f32 %v656_v31, %v638_v33 }
 0x1b6   : > { %v676_v38 = vadd.f32 %v675_v34, %v657_v35 }
 0x1b7   : > { %v658_v43 = vpop.f32.mrf.mxu2  ;;  %v677_v45 = vpop.f32.mrf.mxu3 }
 0x1b8   : > { %682 = vst [vmem:[%s239_s24 + $0x10] sm:$0xff] %v676_v38 }
 0x1b9   : > { %v639_v40 = vpop.f32.mrf.mxu1 }
 0x1ba   : > { %v640_v41 = vadd.f32 %v639_v40, %v621_v39 }
 0x1bc   : > { %v659_v44 = vadd.f32 %v658_v43, %v640_v41 }
 0x1be   : > { %v678_v46 = vadd.f32 %v677_v45, %v659_v44 }
 0x1c0   : > { %683 = vst [vmem:[%s239_s24 + $0x18] sm:$0xff] %v678_v46 }
 0x1c1 PF: > { %s13_s14 = sadd.s32 1, %s907_s14   ;;  %s1209_s12 = smov %s903_s13 }
 0x1c2   : > { %p10_p5 = scmp.ge.s32.totalorder %s13_s14, 4   ;;  %s1210_s13 = smov %s1212_s15 }
 0x1c4   :  { %12 = sbr.rel (!%p10_p5) target bundleno = 2 (0x2), region = 68 }

// kernel: _lambda_.38
= control target key start
LH: loop header
LB: loop body
LE: loop exit
PB: predicated region body
PF: predicated region fallthrough
CT: control target
= control target key end

     0   :  { %s720_s12 = smov 0   ;;  %s722_s13 = smov 0   ;;  %s821_s0 = inlined_call_operand.vmem [shape: bf16[2,32,256], index: 0, kind: input, shape index: {}]   ;;  %s822_s1 = inlined_call_operand.vmem [shape: bf16[32,224], index: 1, kind: input, shape index: {}]   ;;  %s823_s2 = inlined_call_operand.vmem [shape: f32[32,1], index: 2, kind: input, shape index: {}]   ;;  %s824_s3 = inlined_call_operand.vmem [shape: f32[2,32,128], index: 3, kind: output, shape index: {}]  }
   0x1   :  { %s724_s14 = smov 0  }
   0x2 LB: > { %s25_s15 = sadd.s32 1, %s687_s13  ;;  %p590_p0 = scmp.ge.s32.totalorder %s691_s14, 1  ;;  %s691_s14 = sphi %s724_s14, %s13_s14   ;;  %s687_s13 = sphi %s722_s13, %s826_s13   ;;  %s683_s12 = sphi %s720_s12, %s825_s12  }
   0x3   : > { %p27_p1 = scmp.ge.s32.totalorder %s25_s15, 2  ;;  %p174_p2 = scmp.lt.s32.totalorder %s691_s14, 3 }
   0x5   : > { %s828_s15 = smov (%p27_p1, %s25_s15), 0  ;;  %p175_p3 = pnand %p590_p0, %p174_p2 }
   0x6   : > { %p213_p4 = scmp.lt.s32.totalorder (!%p175_p3), %s683_s12, 1  ;;  %s693_s20 = smov (!%p175_p3), 125  }
   0x7   : > { %178 = sbr.rel (%p175_p3) target bundleno = 351 (0x15f), region = 32  ;;  %s694_s21 = smov (!%p175_p3), 126  }
   0x8   : > { %s695_s22 = smov (!%p175_p3), 122   ;;  %s696_s23 = smov (!%p175_p3), 127  }
   0x9   : > { %s697_s24 = smov (!%p175_p3), 123   ;;  %s698_s25 = smov (!%p175_p3), 124  }
   0xc   : > { %s830_s12 = smov (!%p213_p4, %s683_s12), 1  ;;  %vm334_vm8 = vcmask 1022976   ;;  %vm321_vm9 = vcmask 1031168   ;;  %vm373_vm10 = vcmask 998400   ;;  %vm308_vm11 = vcmask 1039360  }
   0xd   : > { %s615_s16 = sshll.u32 %s830_s12, 5  ;;  %vm360_vm12 = vcmask 1006592   ;;  %vm347_vm13 = vcmask 1014784   ;;  %vm424_vm14 = vcmask 785408  }
   0xe   : > { %s217_s19 = scalar_lea.vmem %s821_s0, %s615_s16  ;;  %s239_s30 = scalar_lea.vmem %s824_s3, %s615_s16 }
   0xf   : > { %v244_v0 = vld [vmem:[%s217_s19 + $0x10] sm:$0xff]  ;;  %v245_v1 = vld [vmem:[%s217_s19 + $0x18] sm:$0xff]  ;;  %v242_v2 = vld [vmem:[%s217_s19] sm:$0xff] }
  0x10   : > { %v250_v3 = vunpack.c.l.bf16 %v244_v0  ;;  %v251_v4 = vunpack.c.h.bf16 %v244_v0  ;;  %v252_v5 = vunpack.c.l.bf16 %v245_v1  ;;  %v253_v6 = vunpack.c.h.bf16 %v245_v1  ;;  %v243_v7 = vld [vmem:[%s217_s19 + $0x8] sm:$0xff] }
  0x11   : > { %v246_v8 = vunpack.c.l.bf16 %v242_v2  ;;  %v247_v9 = vunpack.c.h.bf16 %v242_v2  ;;  %v248_v10 = vunpack.c.l.bf16 %v243_v7  ;;  %v249_v11 = vunpack.c.h.bf16 %v243_v7  ;;  %v383_v0 = vld [vmem:[%s823_s2 + $0x8] sm:$0xff]  ;;  %v382_v2 = vld [vmem:[%s823_s2] sm:$0xff] }
  0x12   : > { %vm258_vm0 = vcmp.ge.f32.partialorder %v250_v3, 0.0  ;;  %vm259_vm1 = vcmp.ge.f32.partialorder %v251_v4, 0.0  ;;  %vm260_vm2 = vcmp.ge.f32.partialorder %v252_v5, 0.0  ;;  %vm261_vm3 = vcmp.ge.f32.partialorder %v253_v6, 0.0 }
  0x13   : > { %v266_v12 = vmul.f32 0.1, %v250_v3  ;;  %v267_v13 = vmul.f32 0.1, %v251_v4  ;;  %v268_v14 = vmul.f32 0.1, %v252_v5 }
  0x14   : > { %v269_v15 = vmul.f32 0.1, %v253_v6  ;;  %vm254_vm4 = vcmp.ge.f32.partialorder %v246_v8, 0.0  ;;  %vm255_vm5 = vcmp.ge.f32.partialorder %v247_v9, 0.0  ;;  %vm256_vm6 = vcmp.ge.f32.partialorder %v248_v10, 0.0 }
  0x15   : > { %v274_v16 = vsel %vm258_vm0, %v250_v3, %v266_v12  ;;  %v275_v17 = vsel %vm259_vm1, %v251_v4, %v267_v13  ;;  %v276_v18 = vsel %vm260_vm2, %v252_v5, %v268_v14  ;;  %vm257_vm7 = vcmp.ge.f32.partialorder %v249_v11, 0.0  ;;  %v384_v4 = vld [vmem:[%s823_s2 + $0x10] sm:$0xff] }
  0x16   : > { %v277_v19 = vsel %vm261_vm3, %v253_v6, %v269_v15  ;;  %v280_v20 = vpack.c.bf16 %v275_v17, %v274_v16  ;;  %v262_v21 = vmul.f32 0.1, %v246_v8  ;;  %v263_v22 = vmul.f32 0.1, %v247_v9  ;;  %v605_v14 = vld [vmem:[%s822_s1 + $0x10] sm:$0xf] }
  0x17   : > { %v281_v23 = vpack.c.bf16 %v277_v19, %v276_v18  ;;  %v264_v24 = vmul.f32 0.1, %v248_v10  ;;  %v265_v25 = vmul.f32 0.1, %v249_v11  ;;  %v699_v1 = vmov 0  }
  0x18   : > { %v288_v26 = vunpack.c.l.b16 %v280_v20  ;;  %v270_v27 = vsel %vm254_vm4, %v246_v8, %v262_v21  ;;  %v271_v28 = vsel %vm255_vm5, %v247_v9, %v263_v22  ;;  %v296_v37 = vunpack.c.h.b16 %v280_v20  ;;  %667 = vset.pattern.permute.xlu1 %v699_v1  ;;  %666 = vset.pattern.permute.xlu0 %v699_v1  ;;  %v385_v8 = vld [vmem:[%s823_s2 + $0x18] sm:$0xff]  ;;  %v597_v16 = vld [vmem:[%s822_s1] sm:$0xf]  ;;  %v618_v17 = vld [vmem:[%s822_s1 + $0x4] sm:$0xf0] }
  0x19   : > { %v289_v29 = vunpack.c.l.b16 %v281_v23  ;;  %v272_v30 = vsel %vm256_vm6, %v248_v10, %v264_v24  ;;  %v273_v31 = vsel %vm257_vm7, %v249_v11, %v265_v25  ;;  %v278_v32 = vpack.c.bf16 %v271_v28, %v270_v27  ;;  %668 = vset.pattern.permute.xlu2 %v699_v1  ;;  %v620_v15 = vld [vmem:[%s822_s1 + $0x14] sm:$0xf0]  ;;  %v617_v25 = vld [vmem:[%s822_s1 + $0x4] sm:$0xf]  ;;  %v619_v27 = vld [vmem:[%s822_s1 + $0x14] sm:$0xf] }
  0x1a   : > { %v279_v33 = vpack.c.bf16 %v273_v31, %v272_v30  ;;  %v297_v38 = vunpack.c.h.b16 %v281_v23  ;;  %v606_v20 = vor.u32 %v620_v15, %v605_v14  ;;  %v598_v21 = vor.u32 %v618_v17, %v597_v16  ;;  %v607_v28 = vld [vmem:[%s822_s1 + $0x18] sm:$0xf0] }
  0x1b   : > { %v747_v34 = vpack.c.b16 %v289_v29, %v288_v26  ;;  %v286_v35 = vunpack.c.l.b16 %v278_v32  ;;  %v294_v40 = vunpack.c.h.b16 %v278_v32  ;;  %v599_v26 = vld [vmem:[%s822_s1 + $0x8] sm:$0xf0]  ;;  %v610_v32 = vor.u32 %v619_v27, %v607_v28 }
  0x1c   : > { %v287_v36 = vunpack.c.l.b16 %v279_v33  ;;  %v295_v41 = vunpack.c.h.b16 %v279_v33  ;;  %v299_v42 = vpack.c.b16 %v297_v38, %v296_v37  ;;  %v602_v31 = vor.u32 %v617_v25, %v599_v26 }
  0x1d   : > { %330 = vrot.lane.b32.xlu0 %v747_v34, %s693_s20  ;;  %317 = vrot.lane.b32.xlu2 %v747_v34, %s694_s21 }
  0x1e   : > { %v751_v39 = vpack.c.b16 %v287_v36, %v286_v35  ;;  %v298_v43 = vpack.c.b16 %v295_v41, %v294_v40 }
  0x20   : > { %326 = vrot.lane.b32.xlu1 %v751_v39, %s693_s20 }
  0x25   : > { %332 = vrot.lane.b32.xlu0 %v299_v42, %s693_s20  ;;  %319 = vrot.lane.b32.xlu2 %v299_v42, %s694_s21 }
  0x28   : > { %328 = vrot.lane.b32.xlu1 %v298_v43, %s693_s20 }
  0x2d   : > { %369 = vrot.lane.b32.xlu0 %v747_v34, %s695_s22  ;;  %313 = vrot.lane.b32.xlu2 %v751_v39, %s694_s21 }
  0x30   : > { %371 = vrot.lane.b32.xlu1 %v299_v42, %s695_s22 }
  0x35   : > { %315 = vrot.lane.b32.xlu0 %v298_v43, %s694_s21  ;;  %367 = vrot.lane.b32.xlu2 %v298_v43, %s695_s22 }
  0x38   : > { %365 = vrot.lane.b32.xlu1 %v751_v39, %s695_s22 }
  0x3d   : > { %304 = vrot.lane.b32.xlu0 %v747_v34, %s696_s23  ;;  %356 = vrot.lane.b32.xlu2 %v747_v34, %s697_s24 }
  0x40   : > { %306 = vrot.lane.b32.xlu1 %v299_v42, %s696_s23 }
  0x45   : > { %358 = vrot.lane.b32.xlu0 %v299_v42, %s697_s24  ;;  %302 = vrot.lane.b32.xlu2 %v298_v43, %s696_s23 }
  0x48   : > { %300 = vrot.lane.b32.xlu1 %v751_v39, %s696_s23 }
  0x4d   : > { %352 = vrot.lane.b32.xlu0 %v751_v39, %s697_s24  ;;  %343 = vrot.lane.b32.xlu2 %v747_v34, %s698_s25 }
  0x50   : > { %354 = vrot.lane.b32.xlu1 %v298_v43, %s697_s24 }
  0x55   : > { %345 = vrot.lane.b32.xlu0 %v299_v42, %s698_s25  ;;  %341 = vrot.lane.b32.xlu2 %v298_v43, %s698_s25 }
  0x58   : > { %339 = vrot.lane.b32.xlu1 %v751_v39, %s698_s25 }
  0x5d   : > { %388 = vperm.xlu0 %666, %v382_v2   ;;  %398 = vperm.xlu2 %668, %v384_v4  }
  0x60   : > { %393 = vperm.xlu1 %667, %v383_v0  }
  0x68   : > { %403 = vperm.xlu1 %667, %v385_v8  }
  0x77   : > { %v318_v44 = vpop.permute.xlu2 %317 }
  0x7f   : > { %v320_v46 = vpop.permute.xlu2 %319 }
  0x80   : > { %v323_v54 = vsel %vm321_vm9, %v318_v44, %v320_v46 }
  0x87   : > { %v314_v50 = vpop.permute.xlu2 %313 }
  0x8f   : > { %v331_v45 = vpop.permute.xlu0 %330  ;;  %v368_v56 = vpop.permute.xlu2 %367 }
  0x92   : > { %v327_v47 = vpop.permute.xlu1 %326 }
  0x97   : > { %v333_v48 = vpop.permute.xlu0 %332  ;;  %v357_v62 = vpop.permute.xlu2 %356 }
  0x98   : > { %v336_v49 = vsel %vm334_vm8, %v331_v45, %v333_v48 }
  0x99   : > { %431 = vmatpush.bf16.msra.mxu0 %v336_v49  ;;  %621 = vmatpush.bf16.msra.mxu2 %v336_v49 }
  0x9a   : > { %v329_v51 = vpop.permute.xlu1 %328 }
  0x9b   : > { %v335_v52 = vsel %vm334_vm8, %v327_v47, %v329_v51 }
  0x9d   : > { %432 = vmatpush.bf16.msra.mxu0 %v335_v52  ;;  %622 = vmatpush.bf16.msra.mxu2 %v335_v52 }
  0x9f   : > { %v370_v53 = vpop.permute.xlu0 %369  ;;  %v303_v6 = vpop.permute.xlu2 %302 }
  0xa1   : > { %433 = vmatpush.bf16.msra.mxu0 %v323_v54  ;;  %623 = vmatpush.bf16.msra.mxu2 %v323_v54 }
  0xa2   : > { %v372_v55 = vpop.permute.xlu1 %371 }
  0xa3   : > { %v375_v57 = vsel %vm373_vm10, %v370_v53, %v372_v55 }
  0xa4   : > { %452 = vmatpush.bf16.msra.mxu1 %v375_v57  ;;  %629 = vmatpush.bf16.msra.mxu3 %v375_v57 }
  0xa7   : > { %v316_v58 = vpop.permute.xlu0 %315  ;;  %v344_v12 = vpop.permute.xlu2 %343 }
  0xa8   : > { %v322_v59 = vsel %vm321_vm9, %v314_v50, %v316_v58 }
  0xa9   : > { %434 = vmatpush.bf16.msra.mxu0 %v322_v59  ;;  %624 = vmatpush.bf16.msra.mxu2 %v322_v59 }
  0xaa   : > { %v366_v60 = vpop.permute.xlu1 %365 }
  0xab   : > { %v374_v61 = vsel %vm373_vm10, %v366_v60, %v368_v56 }
  0xac   : > { %453 = vmatpush.bf16.msra.mxu1 %v374_v61  ;;  %630 = vmatpush.bf16.msra.mxu3 %v374_v61 }
  0xaf   : > { %v305_v63 = vpop.permute.xlu0 %304  ;;  %v342_v24 = vpop.permute.xlu2 %341 }
  0xb2   : > { %v307_v3 = vpop.permute.xlu1 %306 }
  0xb3   : > { %v310_v5 = vsel %vm308_vm11, %v305_v63, %v307_v3 }
  0xb4   : > { %435 = vmatpush.bf16.msra.mxu0 %v310_v5  ;;  %625 = vmatpush.bf16.msra.mxu2 %v310_v5 }
  0xb7   : > { %v359_v7 = vpop.permute.xlu0 %358  ;;  %v399_v37 = vpop.permute.xlu2 %398 }
  0xb8   : > { %v362_v9 = vsel %vm360_vm12, %v357_v62, %v359_v7 }
  0xb9   : > { %454 = vmatpush.bf16.msra.mxu1 %v362_v9  ;;  %631 = vmatpush.bf16.msra.mxu3 %v362_v9 }
  0xba   : > { %v301_v10 = vpop.permute.xlu1 %300 }
  0xbb   : > { %v309_v11 = vsel %vm308_vm11, %v301_v10, %v303_v6 }
  0xbc   : > { %626 = vmatpush.bf16.msra.mxu2 %v309_v11  ;;  %436 = vmatpush.bf16.msra.mxu0 %v309_v11 }
  0xbf   : > { %v353_v13 = vpop.permute.xlu0 %352 }
  0xc0   : > { %627 = vmatpush.bf16.msra.mxu2 %v747_v34  ;;  %437 = vmatpush.bf16.msra.mxu0 %v747_v34 }
  0xc2   : > { %v355_v18 = vpop.permute.xlu1 %354 }
  0xc3   : > { %v361_v19 = vsel %vm360_vm12, %v353_v13, %v355_v18 }
  0xc4   : > { %455 = vmatpush.bf16.msra.mxu1 %v361_v19  ;;  %632 = vmatpush.bf16.msra.mxu3 %v361_v19 }
  0xc5   : > { %628 = vmatpush.bf16.msra.mxu2 %v751_v39  ;;  %438 = vmatpush.bf16.msra.mxu0 %v751_v39 }
  0xc7   : > { %v346_v22 = vpop.permute.xlu0 %345 }
  0xc8   : > { %444 = vmatmul.bf16.vlgmr.msra.gmra.mxu2 %v606_v20  ;;  %v349_v23 = vsel %vm347_vm13, %v344_v12, %v346_v22  ;;  %439 = vmatmul.bf16.vlgmr.msra.gmra.mxu0 %v598_v21 }
  0xc9   : > { %456 = vmatpush.bf16.msra.mxu1 %v349_v23  ;;  %633 = vmatpush.bf16.msra.mxu3 %v349_v23 }
  0xca   : > { %v340_v29 = vpop.permute.xlu1 %339 }
  0xcb   : > { %v348_v30 = vsel %vm347_vm13, %v340_v29, %v342_v24 }
  0xcd   : > { %457 = vmatpush.bf16.msra.mxu1 %v348_v30  ;;  %634 = vmatpush.bf16.msra.mxu3 %v348_v30 }
  0xcf   : > { %v389_v34 = vpop.permute.xlu0 %388 }
  0xd0   : > { %611 = vmatmul.msk.bf16.vlgmr.msra.gmra.mxu1 %vm424_vm14, %v602_v31  ;;  %612 = vmatmul.msk.bf16.vlgmr.msra.gmra.mxu3 %vm424_vm14, %v610_v32 }
  0xd2   : > { %v394_v36 = vpop.permute.xlu1 %393 }
  0xda   : > { %v404_v49 = vpop.permute.xlu1 %403 }
 0x145   : > { %v440_v33 = vpop.f32.mrf.mxu0 }
 0x146   : > { %v441_v35 = vadd.f32 %v440_v33, %v389_v34 }
 0x14b   : > { %v445_v38 = vpop.f32.mrf.mxu2 }
 0x14c   : > { %v446_v41 = vadd.f32 %v445_v38, %v399_v37 }
 0x14d   : > { %v459_v39 = vpop.f32.mrf.mxu1  ;;  %v442_v42 = vpop.f32.mrf.mxu0 }
 0x14e   : > { %v460_v40 = vadd.f32 %v459_v39, %v441_v35  ;;  %v443_v44 = vadd.f32 %v442_v42, %v394_v36 }
 0x150   : > { %469 = vst [vmem:[%s239_s30] sm:$0xff] %v460_v40 }
 0x153   : > { %v464_v43 = vpop.f32.mrf.mxu3  ;;  %v447_v48 = vpop.f32.mrf.mxu2 }
 0x154   : > { %v465_v45 = vadd.f32 %v464_v43, %v446_v41  ;;  %v448_v50 = vadd.f32 %v447_v48, %v404_v49 }
 0x155   : > { %v461_v46 = vpop.f32.mrf.mxu1 }
 0x156   : > { %471 = vst [vmem:[%s239_s30 + $0x10] sm:$0xff] %v465_v45  ;;  %v462_v47 = vadd.f32 %v461_v46, %v443_v44 }
 0x158   : > { %470 = vst [vmem:[%s239_s30 + $0x8] sm:$0xff] %v462_v47 }
 0x15b   : > { %v466_v51 = vpop.f32.mrf.mxu3 }
 0x15c   : > { %v467_v52 = vadd.f32 %v466_v51, %v448_v50 }
 0x15e   : > { %472 = vst [vmem:[%s239_s30 + $0x18] sm:$0xff] %v467_v52 }
 0x15f PF: > { %s13_s14 = sadd.s32 1, %s691_s14   ;;  %s825_s12 = smov %s687_s13 }
 0x160   : > { %p10_p5 = scmp.ge.s32.totalorder %s13_s14, 4   ;;  %s826_s13 = smov %s828_s15 }
 0x162   :  { %12 = sbr.rel (!%p10_p5) target bundleno = 2 (0x2), region = 68 }

// kernel: _lambda_.32
= control target key start
LH: loop header
LB: loop body
LE: loop exit
PB: predicated region body
PF: predicated region fallthrough
CT: control target
= control target key end

     0   :  { %s612_s12 = smov 0   ;;  %s614_s13 = smov 0   ;;  %s671_s0 = inlined_call_operand.vmem [shape: bf16[2,32,256], index: 0, kind: input, shape index: {}]   ;;  %s672_s1 = inlined_call_operand.vmem [shape: bf16[32,96], index: 1, kind: input, shape index: {}]   ;;  %s673_s2 = inlined_call_operand.vmem [shape: f32[32,1], index: 2, kind: input, shape index: {}]   ;;  %s674_s3 = inlined_call_operand.vmem [shape: f32[2,32,128], index: 3, kind: output, shape index: {}]  }
   0x1   :  { %s616_s14 = smov 0  }
   0x2 LB: > { %s25_s15 = sadd.s32 1, %s583_s13  ;;  %p508_p0 = scmp.ge.s32.totalorder %s587_s14, 1  ;;  %s587_s14 = sphi %s616_s14, %s13_s14   ;;  %s583_s13 = sphi %s614_s13, %s676_s13   ;;  %s579_s12 = sphi %s612_s12, %s675_s12  }
   0x3   : > { %p27_p1 = scmp.ge.s32.totalorder %s25_s15, 2  ;;  %p173_p2 = scmp.lt.s32.totalorder %s587_s14, 3 }
   0x5   : > { %s678_s15 = smov (%p27_p1, %s25_s15), 0  ;;  %p174_p3 = pnand %p508_p0, %p173_p2 }
   0x6   : > { %p211_p4 = scmp.lt.s32.totalorder (!%p174_p3), %s579_s12, 1  ;;  %s589_s20 = smov (!%p174_p3), 126  }
   0x7   : > { %177 = sbr.rel (%p174_p3) target bundleno = 314 (0x13a), region = 32  ;;  %s590_s21 = smov (!%p174_p3), 127  }
   0xc   : > { %s680_s12 = smov (!%p211_p4, %s579_s12), 1  ;;  %v329_v45 = vld [vmem:[%s673_s2 + $0x10] sm:$0xff]  ;;  %v328_v46 = vld [vmem:[%s673_s2 + $0x8] sm:$0xff]  ;;  %v591_v47 = vmov 0   ;;  %v327_v48 = vld [vmem:[%s673_s2] sm:$0xff]  ;;  %vm318_vm8 = vcmask 1031168  }
   0xd   : > { %s525_s16 = sshll.u32 %s680_s12, 5  ;;  %564 = vset.pattern.permute.xlu1 %v591_v47  ;;  %563 = vset.pattern.permute.xlu0 %v591_v47  ;;  %v330_v53 = vld [vmem:[%s673_s2 + $0x18] sm:$0xff]  ;;  %vm305_vm9 = vcmask 1039360   ;;  %v527_v61 = vld [vmem:[%s672_s1] sm:$0xff]  ;;  %v528_v62 = vld [vmem:[%s672_s1 + $0x8] sm:$0xff]  ;;  %vm361_vm10 = vcmask 785408  }
   0xe   : > { %s215_s19 = scalar_lea.vmem %s671_s0, %s525_s16  ;;  %562 = vset.pattern.permute.xlu2 %v591_v47  ;;  %s236_s9 = scalar_lea.vmem %s674_s3, %s525_s16 }
   0xf   : > { %v241_v0 = vld [vmem:[%s215_s19 + $0x10] sm:$0xff]  ;;  %v242_v1 = vld [vmem:[%s215_s19 + $0x18] sm:$0xff]  ;;  %v239_v2 = vld [vmem:[%s215_s19] sm:$0xff] }
  0x10   : > { %v247_v3 = vunpack.c.l.bf16 %v241_v0  ;;  %v248_v4 = vunpack.c.h.bf16 %v241_v0  ;;  %v249_v5 = vunpack.c.l.bf16 %v242_v1  ;;  %v250_v6 = vunpack.c.h.bf16 %v242_v1  ;;  %v240_v7 = vld [vmem:[%s215_s19 + $0x8] sm:$0xff] }
  0x11   : > { %v243_v8 = vunpack.c.l.bf16 %v239_v2  ;;  %v244_v9 = vunpack.c.h.bf16 %v239_v2  ;;  %v245_v10 = vunpack.c.l.bf16 %v240_v7  ;;  %v246_v11 = vunpack.c.h.bf16 %v240_v7 }
  0x12   : > { %vm255_vm0 = vcmp.ge.f32.partialorder %v247_v3, 0.0  ;;  %vm256_vm1 = vcmp.ge.f32.partialorder %v248_v4, 0.0  ;;  %vm257_vm2 = vcmp.ge.f32.partialorder %v249_v5, 0.0  ;;  %vm258_vm3 = vcmp.ge.f32.partialorder %v250_v6, 0.0 }
  0x13   : > { %v263_v12 = vmul.f32 0.1, %v247_v3  ;;  %v264_v13 = vmul.f32 0.1, %v248_v4  ;;  %v265_v14 = vmul.f32 0.1, %v249_v5 }
  0x14   : > { %v266_v15 = vmul.f32 0.1, %v250_v6  ;;  %vm251_vm4 = vcmp.ge.f32.partialorder %v243_v8, 0.0  ;;  %vm252_vm5 = vcmp.ge.f32.partialorder %v244_v9, 0.0  ;;  %vm253_vm6 = vcmp.ge.f32.partialorder %v245_v10, 0.0 }
  0x15   : > { %v271_v16 = vsel %vm255_vm0, %v247_v3, %v263_v12  ;;  %v272_v17 = vsel %vm256_vm1, %v248_v4, %v264_v13  ;;  %v273_v18 = vsel %vm257_vm2, %v249_v5, %v265_v14  ;;  %vm254_vm7 = vcmp.ge.f32.partialorder %v246_v11, 0.0 }
  0x16   : > { %v274_v19 = vsel %vm258_vm3, %v250_v6, %v266_v15  ;;  %v277_v20 = vpack.c.bf16 %v272_v17, %v271_v16  ;;  %v259_v21 = vmul.f32 0.1, %v243_v8  ;;  %v260_v22 = vmul.f32 0.1, %v244_v9 }
  0x17   : > { %v278_v23 = vpack.c.bf16 %v274_v19, %v273_v18  ;;  %v261_v24 = vmul.f32 0.1, %v245_v10  ;;  %v262_v25 = vmul.f32 0.1, %v246_v11 }
  0x18   : > { %v285_v26 = vunpack.c.l.b16 %v277_v20  ;;  %v267_v27 = vsel %vm251_vm4, %v243_v8, %v259_v21  ;;  %v268_v28 = vsel %vm252_vm5, %v244_v9, %v260_v22  ;;  %v293_v37 = vunpack.c.h.b16 %v277_v20 }
  0x19   : > { %v286_v29 = vunpack.c.l.b16 %v278_v23  ;;  %v269_v30 = vsel %vm253_vm6, %v245_v10, %v261_v24  ;;  %v270_v31 = vsel %vm254_vm7, %v246_v11, %v262_v25  ;;  %v275_v32 = vpack.c.bf16 %v268_v28, %v267_v27 }
  0x1a   : > { %v276_v33 = vpack.c.bf16 %v270_v31, %v269_v30  ;;  %v294_v38 = vunpack.c.h.b16 %v278_v23 }
  0x1b   : > { %v288_v34 = vpack.c.b16 %v286_v29, %v285_v26  ;;  %v283_v35 = vunpack.c.l.b16 %v275_v32  ;;  %v291_v40 = vunpack.c.h.b16 %v275_v32 }
  0x1c   : > { %v284_v36 = vunpack.c.l.b16 %v276_v33  ;;  %v292_v41 = vunpack.c.h.b16 %v276_v33  ;;  %v296_v42 = vpack.c.b16 %v294_v38, %v293_v37 }
  0x1d   : > { %314 = vrot.lane.b32.xlu0 %v288_v34, %s589_s20  ;;  %301 = vrot.lane.b32.xlu2 %v288_v34, %s590_s21 }
  0x1e   : > { %v287_v39 = vpack.c.b16 %v284_v36, %v283_v35  ;;  %v295_v43 = vpack.c.b16 %v292_v41, %v291_v40 }
  0x20   : > { %310 = vrot.lane.b32.xlu1 %v287_v39, %s589_s20 }
  0x25   : > { %316 = vrot.lane.b32.xlu0 %v296_v42, %s589_s20  ;;  %303 = vrot.lane.b32.xlu2 %v296_v42, %s590_s21 }
  0x28   : > { %312 = vrot.lane.b32.xlu1 %v295_v43, %s589_s20 }
  0x2d   : > { %297 = vrot.lane.b32.xlu0 %v287_v39, %s590_s21  ;;  %333 = vperm.xlu2 %562, %v327_v48  }
  0x30   : > { %299 = vrot.lane.b32.xlu1 %v295_v43, %s590_s21 }
  0x35   : > { %338 = vperm.xlu0 %563, %v328_v46   ;;  %348 = vperm.xlu2 %562, %v330_v53  }
  0x38   : > { %343 = vperm.xlu1 %564, %v329_v45  }
  0x77   : > { %v302_v50 = vpop.permute.xlu2 %301 }
  0x7f   : > { %v304_v56 = vpop.permute.xlu2 %303 }
  0x80   : > { %v307_v57 = vsel %vm305_vm9, %v302_v50, %v304_v56 }
  0x87   : > { %v334_v63 = vpop.permute.xlu2 %333 }
  0x8f   : > { %v315_v44 = vpop.permute.xlu0 %314  ;;  %v349_v6 = vpop.permute.xlu2 %348 }
  0x92   : > { %v311_v49 = vpop.permute.xlu1 %310 }
  0x97   : > { %v317_v51 = vpop.permute.xlu0 %316 }
  0x98   : > { %v320_v52 = vsel %vm318_vm8, %v315_v44, %v317_v51 }
  0x99   : > { %370 = vmatpush.bf16.msra.mxu0 %v320_v52  ;;  %529 = vmatpush.bf16.msra.mxu1 %v320_v52 }
  0x9a   : > { %v313_v54 = vpop.permute.xlu1 %312 }
  0x9b   : > { %v319_v55 = vsel %vm318_vm8, %v311_v49, %v313_v54 }
  0x9d   : > { %371 = vmatpush.bf16.msra.mxu0 %v319_v55  ;;  %530 = vmatpush.bf16.msra.mxu1 %v319_v55 }
  0x9f   : > { %v298_v58 = vpop.permute.xlu0 %297 }
  0xa1   : > { %372 = vmatpush.bf16.msra.mxu0 %v307_v57  ;;  %531 = vmatpush.bf16.msra.mxu1 %v307_v57 }
  0xa2   : > { %v300_v59 = vpop.permute.xlu1 %299 }
  0xa3   : > { %v306_v60 = vsel %vm305_vm9, %v298_v58, %v300_v59 }
  0xa5   : > { %373 = vmatpush.bf16.msra.mxu0 %v306_v60  ;;  %532 = vmatpush.bf16.msra.mxu1 %v306_v60 }
  0xa7   : > { %v339_v5 = vpop.permute.xlu0 %338 }
  0xa9   : > { %374 = vmatpush.bf16.msra.mxu0 %v288_v34  ;;  %533 = vmatpush.bf16.msra.mxu1 %v288_v34 }
  0xaa   : > { %v344_v0 = vpop.permute.xlu1 %343 }
  0xad   : > { %375 = vmatpush.bf16.msra.mxu0 %v287_v39  ;;  %534 = vmatpush.bf16.msra.mxu1 %v287_v39 }
  0xb0   : > { %521 = vmatmul.msk.bf16.vlgmr.msra.gmra.mxu0 %vm361_vm10, %v527_v61  ;;  %522 = vmatmul.msk.bf16.vlgmr.msra.gmra.mxu1 %vm361_vm10, %v528_v62 }
 0x12d   : > { %v377_v1 = vpop.f32.mrf.mxu0  ;;  %v382_v2 = vpop.f32.mrf.mxu1 }
 0x12e   : > { %v378_v3 = vadd.f32 %v377_v1, %v334_v63  ;;  %v383_v4 = vadd.f32 %v382_v2, %v344_v0 }
 0x130   : > { %387 = vst [vmem:[%s236_s9] sm:$0xff] %v378_v3 }
 0x131   : > { %389 = vst [vmem:[%s236_s9 + $0x10] sm:$0xff] %v383_v4 }
 0x135   : > { %v379_v7 = vpop.f32.mrf.mxu0  ;;  %v384_v8 = vpop.f32.mrf.mxu1 }
 0x136   : > { %v380_v9 = vadd.f32 %v379_v7, %v339_v5  ;;  %v385_v10 = vadd.f32 %v384_v8, %v349_v6 }
 0x138   : > { %388 = vst [vmem:[%s236_s9 + $0x8] sm:$0xff] %v380_v9 }
 0x139   : > { %390 = vst [vmem:[%s236_s9 + $0x18] sm:$0xff] %v385_v10 }
 0x13a PF: > { %s13_s14 = sadd.s32 1, %s587_s14   ;;  %s675_s12 = smov %s583_s13 }
 0x13b   : > { %p10_p5 = scmp.ge.s32.totalorder %s13_s14, 4   ;;  %s676_s13 = smov %s678_s15 }
 0x13d   :  { %12 = sbr.rel (!%p10_p5) target bundleno = 2 (0x2), region = 68 }

// kernel: _lambda_.34
= control target key start
LH: loop header
LB: loop body
LE: loop exit
PB: predicated region body
PF: predicated region fallthrough
CT: control target
= control target key end

     0   :  { %s612_s12 = smov 0   ;;  %s614_s13 = smov 0   ;;  %s671_s0 = inlined_call_operand.vmem [shape: bf16[2,32,256], index: 0, kind: input, shape index: {}]   ;;  %s672_s1 = inlined_call_operand.vmem [shape: bf16[32,96], index: 1, kind: input, shape index: {}]   ;;  %s673_s2 = inlined_call_operand.vmem [shape: f32[32,1], index: 2, kind: input, shape index: {}]   ;;  %s674_s3 = inlined_call_operand.vmem [shape: f32[2,32,128], index: 3, kind: output, shape index: {}]  }
   0x1   :  { %s616_s14 = smov 0  }
   0x2 LB: > { %s25_s15 = sadd.s32 1, %s583_s13  ;;  %p508_p0 = scmp.ge.s32.totalorder %s587_s14, 1  ;;  %s587_s14 = sphi %s616_s14, %s13_s14   ;;  %s583_s13 = sphi %s614_s13, %s676_s13   ;;  %s579_s12 = sphi %s612_s12, %s675_s12  }
   0x3   : > { %p27_p1 = scmp.ge.s32.totalorder %s25_s15, 2  ;;  %p173_p2 = scmp.lt.s32.totalorder %s587_s14, 3 }
   0x5   : > { %s678_s15 = smov (%p27_p1, %s25_s15), 0  ;;  %p174_p3 = pnand %p508_p0, %p173_p2 }
   0x6   : > { %p211_p4 = scmp.lt.s32.totalorder (!%p174_p3), %s579_s12, 1  ;;  %s589_s20 = smov (!%p174_p3), 122  }
   0x7   : > { %177 = sbr.rel (%p174_p3) target bundleno = 314 (0x13a), region = 32  ;;  %s590_s21 = smov (!%p174_p3), 125  }
   0xc   : > { %s680_s12 = smov (!%p211_p4, %s579_s12), 1  ;;  %v329_v45 = vld [vmem:[%s673_s2 + $0x10] sm:$0xff]  ;;  %v328_v46 = vld [vmem:[%s673_s2 + $0x8] sm:$0xff]  ;;  %v591_v47 = vmov 0   ;;  %v327_v48 = vld [vmem:[%s673_s2] sm:$0xff]  ;;  %vm318_vm8 = vcmask 998400  }
   0xd   : > { %s525_s16 = sshll.u32 %s680_s12, 5  ;;  %564 = vset.pattern.permute.xlu1 %v591_v47  ;;  %563 = vset.pattern.permute.xlu0 %v591_v47  ;;  %v330_v53 = vld [vmem:[%s673_s2 + $0x18] sm:$0xff]  ;;  %vm305_vm9 = vcmask 1022976   ;;  %v527_v61 = vld [vmem:[%s672_s1] sm:$0xff]  ;;  %v528_v62 = vld [vmem:[%s672_s1 + $0x8] sm:$0xff]  ;;  %vm361_vm10 = vcmask 785408  }
   0xe   : > { %s215_s19 = scalar_lea.vmem %s671_s0, %s525_s16  ;;  %562 = vset.pattern.permute.xlu2 %v591_v47  ;;  %s236_s9 = scalar_lea.vmem %s674_s3, %s525_s16 }
   0xf   : > { %v241_v0 = vld [vmem:[%s215_s19 + $0x10] sm:$0xff]  ;;  %v242_v1 = vld [vmem:[%s215_s19 + $0x18] sm:$0xff]  ;;  %v239_v2 = vld [vmem:[%s215_s19] sm:$0xff] }
  0x10   : > { %v247_v3 = vunpack.c.l.bf16 %v241_v0  ;;  %v248_v4 = vunpack.c.h.bf16 %v241_v0  ;;  %v249_v5 = vunpack.c.l.bf16 %v242_v1  ;;  %v250_v6 = vunpack.c.h.bf16 %v242_v1  ;;  %v240_v7 = vld [vmem:[%s215_s19 + $0x8] sm:$0xff] }
  0x11   : > { %v243_v8 = vunpack.c.l.bf16 %v239_v2  ;;  %v244_v9 = vunpack.c.h.bf16 %v239_v2  ;;  %v245_v10 = vunpack.c.l.bf16 %v240_v7  ;;  %v246_v11 = vunpack.c.h.bf16 %v240_v7 }
  0x12   : > { %vm255_vm0 = vcmp.ge.f32.partialorder %v247_v3, 0.0  ;;  %vm256_vm1 = vcmp.ge.f32.partialorder %v248_v4, 0.0  ;;  %vm257_vm2 = vcmp.ge.f32.partialorder %v249_v5, 0.0  ;;  %vm258_vm3 = vcmp.ge.f32.partialorder %v250_v6, 0.0 }
  0x13   : > { %v263_v12 = vmul.f32 0.1, %v247_v3  ;;  %v264_v13 = vmul.f32 0.1, %v248_v4  ;;  %v265_v14 = vmul.f32 0.1, %v249_v5 }
  0x14   : > { %v266_v15 = vmul.f32 0.1, %v250_v6  ;;  %vm251_vm4 = vcmp.ge.f32.partialorder %v243_v8, 0.0  ;;  %vm252_vm5 = vcmp.ge.f32.partialorder %v244_v9, 0.0  ;;  %vm253_vm6 = vcmp.ge.f32.partialorder %v245_v10, 0.0 }
  0x15   : > { %v271_v16 = vsel %vm255_vm0, %v247_v3, %v263_v12  ;;  %v272_v17 = vsel %vm256_vm1, %v248_v4, %v264_v13  ;;  %v273_v18 = vsel %vm257_vm2, %v249_v5, %v265_v14  ;;  %vm254_vm7 = vcmp.ge.f32.partialorder %v246_v11, 0.0 }
  0x16   : > { %v274_v19 = vsel %vm258_vm3, %v250_v6, %v266_v15  ;;  %v277_v20 = vpack.c.bf16 %v272_v17, %v271_v16  ;;  %v259_v21 = vmul.f32 0.1, %v243_v8  ;;  %v260_v22 = vmul.f32 0.1, %v244_v9 }
  0x17   : > { %v278_v23 = vpack.c.bf16 %v274_v19, %v273_v18  ;;  %v261_v24 = vmul.f32 0.1, %v245_v10  ;;  %v262_v25 = vmul.f32 0.1, %v246_v11 }
  0x18   : > { %v285_v26 = vunpack.c.l.b16 %v277_v20  ;;  %v267_v27 = vsel %vm251_vm4, %v243_v8, %v259_v21  ;;  %v268_v28 = vsel %vm252_vm5, %v244_v9, %v260_v22  ;;  %v293_v37 = vunpack.c.h.b16 %v277_v20 }
  0x19   : > { %v286_v29 = vunpack.c.l.b16 %v278_v23  ;;  %v269_v30 = vsel %vm253_vm6, %v245_v10, %v261_v24  ;;  %v270_v31 = vsel %vm254_vm7, %v246_v11, %v262_v25  ;;  %v275_v32 = vpack.c.bf16 %v268_v28, %v267_v27 }
  0x1a   : > { %v276_v33 = vpack.c.bf16 %v270_v31, %v269_v30  ;;  %v294_v38 = vunpack.c.h.b16 %v278_v23 }
  0x1b   : > { %v288_v34 = vpack.c.b16 %v286_v29, %v285_v26  ;;  %v283_v35 = vunpack.c.l.b16 %v275_v32  ;;  %v291_v40 = vunpack.c.h.b16 %v275_v32 }
  0x1c   : > { %v284_v36 = vunpack.c.l.b16 %v276_v33  ;;  %v292_v41 = vunpack.c.h.b16 %v276_v33  ;;  %v296_v42 = vpack.c.b16 %v294_v38, %v293_v37 }
  0x1d   : > { %314 = vrot.lane.b32.xlu0 %v288_v34, %s589_s20  ;;  %301 = vrot.lane.b32.xlu2 %v288_v34, %s590_s21 }
  0x1e   : > { %v287_v39 = vpack.c.b16 %v284_v36, %v283_v35  ;;  %v295_v43 = vpack.c.b16 %v292_v41, %v291_v40 }
  0x20   : > { %310 = vrot.lane.b32.xlu1 %v287_v39, %s589_s20 }
  0x25   : > { %316 = vrot.lane.b32.xlu0 %v296_v42, %s589_s20  ;;  %303 = vrot.lane.b32.xlu2 %v296_v42, %s590_s21 }
  0x28   : > { %312 = vrot.lane.b32.xlu1 %v295_v43, %s589_s20 }
  0x2d   : > { %297 = vrot.lane.b32.xlu0 %v287_v39, %s590_s21  ;;  %333 = vperm.xlu2 %562, %v327_v48  }
  0x30   : > { %299 = vrot.lane.b32.xlu1 %v295_v43, %s590_s21 }
  0x35   : > { %338 = vperm.xlu0 %563, %v328_v46   ;;  %348 = vperm.xlu2 %562, %v330_v53  }
  0x38   : > { %343 = vperm.xlu1 %564, %v329_v45  }
  0x77   : > { %v302_v50 = vpop.permute.xlu2 %301 }
  0x7f   : > { %v304_v56 = vpop.permute.xlu2 %303 }
  0x80   : > { %v307_v57 = vsel %vm305_vm9, %v302_v50, %v304_v56 }
  0x87   : > { %v334_v63 = vpop.permute.xlu2 %333 }
  0x8f   : > { %v315_v44 = vpop.permute.xlu0 %314  ;;  %v349_v6 = vpop.permute.xlu2 %348 }
  0x92   : > { %v311_v49 = vpop.permute.xlu1 %310 }
  0x97   : > { %v317_v51 = vpop.permute.xlu0 %316 }
  0x98   : > { %v320_v52 = vsel %vm318_vm8, %v315_v44, %v317_v51 }
  0x99   : > { %370 = vmatpush.bf16.msra.mxu0 %v320_v52  ;;  %529 = vmatpush.bf16.msra.mxu1 %v320_v52 }
  0x9a   : > { %v313_v54 = vpop.permute.xlu1 %312 }
  0x9b   : > { %v319_v55 = vsel %vm318_vm8, %v311_v49, %v313_v54 }
  0x9d   : > { %371 = vmatpush.bf16.msra.mxu0 %v319_v55  ;;  %530 = vmatpush.bf16.msra.mxu1 %v319_v55 }
  0x9f   : > { %v298_v58 = vpop.permute.xlu0 %297 }
  0xa1   : > { %372 = vmatpush.bf16.msra.mxu0 %v307_v57  ;;  %531 = vmatpush.bf16.msra.mxu1 %v307_v57 }
  0xa2   : > { %v300_v59 = vpop.permute.xlu1 %299 }
  0xa3   : > { %v306_v60 = vsel %vm305_vm9, %v298_v58, %v300_v59 }
  0xa5   : > { %373 = vmatpush.bf16.msra.mxu0 %v306_v60  ;;  %532 = vmatpush.bf16.msra.mxu1 %v306_v60 }
  0xa7   : > { %v339_v5 = vpop.permute.xlu0 %338 }
  0xa9   : > { %374 = vmatpush.bf16.msra.mxu0 %v288_v34  ;;  %533 = vmatpush.bf16.msra.mxu1 %v288_v34 }
  0xaa   : > { %v344_v0 = vpop.permute.xlu1 %343 }
  0xad   : > { %375 = vmatpush.bf16.msra.mxu0 %v287_v39  ;;  %534 = vmatpush.bf16.msra.mxu1 %v287_v39 }
  0xb0   : > { %521 = vmatmul.msk.bf16.vlgmr.msra.gmra.mxu0 %vm361_vm10, %v527_v61  ;;  %522 = vmatmul.msk.bf16.vlgmr.msra.gmra.mxu1 %vm361_vm10, %v528_v62 }
 0x12d   : > { %v377_v1 = vpop.f32.mrf.mxu0  ;;  %v382_v2 = vpop.f32.mrf.mxu1 }
 0x12e   : > { %v378_v3 = vadd.f32 %v377_v1, %v334_v63  ;;  %v383_v4 = vadd.f32 %v382_v2, %v344_v0 }
 0x130   : > { %387 = vst [vmem:[%s236_s9] sm:$0xff] %v378_v3 }
 0x131   : > { %389 = vst [vmem:[%s236_s9 + $0x10] sm:$0xff] %v383_v4 }
 0x135   : > { %v379_v7 = vpop.f32.mrf.mxu0  ;;  %v384_v8 = vpop.f32.mrf.mxu1 }
 0x136   : > { %v380_v9 = vadd.f32 %v379_v7, %v339_v5  ;;  %v385_v10 = vadd.f32 %v384_v8, %v349_v6 }
 0x138   : > { %388 = vst [vmem:[%s236_s9 + $0x8] sm:$0xff] %v380_v9 }
 0x139   : > { %390 = vst [vmem:[%s236_s9 + $0x18] sm:$0xff] %v385_v10 }
 0x13a PF: > { %s13_s14 = sadd.s32 1, %s587_s14   ;;  %s675_s12 = smov %s583_s13 }
 0x13b   : > { %p10_p5 = scmp.ge.s32.totalorder %s13_s14, 4   ;;  %s676_s13 = smov %s678_s15 }
 0x13d   :  { %12 = sbr.rel (!%p10_p5) target bundleno = 2 (0x2), region = 68 }

// kernel: _lambda_.40
= control target key start
LH: loop header
LB: loop body
LE: loop exit
PB: predicated region body
PF: predicated region fallthrough
CT: control target
= control target key end

     0   :  { %s720_s12 = smov 0   ;;  %s722_s13 = smov 0   ;;  %s821_s0 = inlined_call_operand.vmem [shape: bf16[2,32,256], index: 0, kind: input, shape index: {}]   ;;  %s822_s1 = inlined_call_operand.vmem [shape: bf16[32,224], index: 1, kind: input, shape index: {}]   ;;  %s823_s2 = inlined_call_operand.vmem [shape: f32[32,1], index: 2, kind: input, shape index: {}]   ;;  %s824_s3 = inlined_call_operand.vmem [shape: f32[2,32,128], index: 3, kind: output, shape index: {}]  }
   0x1   :  { %s724_s14 = smov 0  }
   0x2 LB: > { %s25_s15 = sadd.s32 1, %s687_s13  ;;  %p590_p0 = scmp.ge.s32.totalorder %s691_s14, 1  ;;  %s691_s14 = sphi %s724_s14, %s13_s14   ;;  %s687_s13 = sphi %s722_s13, %s826_s13   ;;  %s683_s12 = sphi %s720_s12, %s825_s12  }
   0x3   : > { %p27_p1 = scmp.ge.s32.totalorder %s25_s15, 2  ;;  %p174_p2 = scmp.lt.s32.totalorder %s691_s14, 3 }
   0x5   : > { %s828_s15 = smov (%p27_p1, %s25_s15), 0  ;;  %p175_p3 = pnand %p590_p0, %p174_p2 }
   0x6   : > { %p213_p4 = scmp.lt.s32.totalorder (!%p175_p3), %s683_s12, 1  ;;  %s693_s20 = smov (!%p175_p3), 119  }
   0x7   : > { %178 = sbr.rel (%p175_p3) target bundleno = 351 (0x15f), region = 32  ;;  %s694_s21 = smov (!%p175_p3), 122  }
   0x8   : > { %s695_s22 = smov (!%p175_p3), 110   ;;  %s696_s23 = smov (!%p175_p3), 125  }
   0x9   : > { %s697_s24 = smov (!%p175_p3), 113   ;;  %s698_s25 = smov (!%p175_p3), 116  }
   0xc   : > { %s830_s12 = smov (!%p213_p4, %s683_s12), 1  ;;  %vm334_vm8 = vcmask 973824   ;;  %vm321_vm9 = vcmask 998400   ;;  %vm373_vm10 = vcmask 900096   ;;  %vm308_vm11 = vcmask 1022976  }
   0xd   : > { %s615_s16 = sshll.u32 %s830_s12, 5  ;;  %vm360_vm12 = vcmask 924672   ;;  %vm347_vm13 = vcmask 949248   ;;  %vm424_vm14 = vcmask 785408  }
   0xe   : > { %s217_s19 = scalar_lea.vmem %s821_s0, %s615_s16  ;;  %s239_s30 = scalar_lea.vmem %s824_s3, %s615_s16 }
   0xf   : > { %v244_v0 = vld [vmem:[%s217_s19 + $0x10] sm:$0xff]  ;;  %v245_v1 = vld [vmem:[%s217_s19 + $0x18] sm:$0xff]  ;;  %v242_v2 = vld [vmem:[%s217_s19] sm:$0xff] }
  0x10   : > { %v250_v3 = vunpack.c.l.bf16 %v244_v0  ;;  %v251_v4 = vunpack.c.h.bf16 %v244_v0  ;;  %v252_v5 = vunpack.c.l.bf16 %v245_v1  ;;  %v253_v6 = vunpack.c.h.bf16 %v245_v1  ;;  %v243_v7 = vld [vmem:[%s217_s19 + $0x8] sm:$0xff] }
  0x11   : > { %v246_v8 = vunpack.c.l.bf16 %v242_v2  ;;  %v247_v9 = vunpack.c.h.bf16 %v242_v2  ;;  %v248_v10 = vunpack.c.l.bf16 %v243_v7  ;;  %v249_v11 = vunpack.c.h.bf16 %v243_v7  ;;  %v383_v0 = vld [vmem:[%s823_s2 + $0x8] sm:$0xff]  ;;  %v382_v2 = vld [vmem:[%s823_s2] sm:$0xff] }
  0x12   : > { %vm258_vm0 = vcmp.ge.f32.partialorder %v250_v3, 0.0  ;;  %vm259_vm1 = vcmp.ge.f32.partialorder %v251_v4, 0.0  ;;  %vm260_vm2 = vcmp.ge.f32.partialorder %v252_v5, 0.0  ;;  %vm261_vm3 = vcmp.ge.f32.partialorder %v253_v6, 0.0 }
  0x13   : > { %v266_v12 = vmul.f32 0.1, %v250_v3  ;;  %v267_v13 = vmul.f32 0.1, %v251_v4  ;;  %v268_v14 = vmul.f32 0.1, %v252_v5 }
  0x14   : > { %v269_v15 = vmul.f32 0.1, %v253_v6  ;;  %vm254_vm4 = vcmp.ge.f32.partialorder %v246_v8, 0.0  ;;  %vm255_vm5 = vcmp.ge.f32.partialorder %v247_v9, 0.0  ;;  %vm256_vm6 = vcmp.ge.f32.partialorder %v248_v10, 0.0 }
  0x15   : > { %v274_v16 = vsel %vm258_vm0, %v250_v3, %v266_v12  ;;  %v275_v17 = vsel %vm259_vm1, %v251_v4, %v267_v13  ;;  %v276_v18 = vsel %vm260_vm2, %v252_v5, %v268_v14  ;;  %vm257_vm7 = vcmp.ge.f32.partialorder %v249_v11, 0.0  ;;  %v384_v4 = vld [vmem:[%s823_s2 + $0x10] sm:$0xff] }
  0x16   : > { %v277_v19 = vsel %vm261_vm3, %v253_v6, %v269_v15  ;;  %v280_v20 = vpack.c.bf16 %v275_v17, %v274_v16  ;;  %v262_v21 = vmul.f32 0.1, %v246_v8  ;;  %v263_v22 = vmul.f32 0.1, %v247_v9  ;;  %v605_v14 = vld [vmem:[%s822_s1 + $0x10] sm:$0xf] }
  0x17   : > { %v281_v23 = vpack.c.bf16 %v277_v19, %v276_v18  ;;  %v264_v24 = vmul.f32 0.1, %v248_v10  ;;  %v265_v25 = vmul.f32 0.1, %v249_v11  ;;  %v699_v1 = vmov 0  }
  0x18   : > { %v288_v26 = vunpack.c.l.b16 %v280_v20  ;;  %v270_v27 = vsel %vm254_vm4, %v246_v8, %v262_v21  ;;  %v271_v28 = vsel %vm255_vm5, %v247_v9, %v263_v22  ;;  %v296_v37 = vunpack.c.h.b16 %v280_v20  ;;  %667 = vset.pattern.permute.xlu1 %v699_v1  ;;  %666 = vset.pattern.permute.xlu0 %v699_v1  ;;  %v385_v8 = vld [vmem:[%s823_s2 + $0x18] sm:$0xff]  ;;  %v597_v16 = vld [vmem:[%s822_s1] sm:$0xf]  ;;  %v618_v17 = vld [vmem:[%s822_s1 + $0x4] sm:$0xf0] }
  0x19   : > { %v289_v29 = vunpack.c.l.b16 %v281_v23  ;;  %v272_v30 = vsel %vm256_vm6, %v248_v10, %v264_v24  ;;  %v273_v31 = vsel %vm257_vm7, %v249_v11, %v265_v25  ;;  %v278_v32 = vpack.c.bf16 %v271_v28, %v270_v27  ;;  %668 = vset.pattern.permute.xlu2 %v699_v1  ;;  %v620_v15 = vld [vmem:[%s822_s1 + $0x14] sm:$0xf0]  ;;  %v617_v25 = vld [vmem:[%s822_s1 + $0x4] sm:$0xf]  ;;  %v619_v27 = vld [vmem:[%s822_s1 + $0x14] sm:$0xf] }
  0x1a   : > { %v279_v33 = vpack.c.bf16 %v273_v31, %v272_v30  ;;  %v297_v38 = vunpack.c.h.b16 %v281_v23  ;;  %v606_v20 = vor.u32 %v620_v15, %v605_v14  ;;  %v598_v21 = vor.u32 %v618_v17, %v597_v16  ;;  %v607_v28 = vld [vmem:[%s822_s1 + $0x18] sm:$0xf0] }
  0x1b   : > { %v747_v34 = vpack.c.b16 %v289_v29, %v288_v26  ;;  %v286_v35 = vunpack.c.l.b16 %v278_v32  ;;  %v294_v40 = vunpack.c.h.b16 %v278_v32  ;;  %v599_v26 = vld [vmem:[%s822_s1 + $0x8] sm:$0xf0]  ;;  %v610_v32 = vor.u32 %v619_v27, %v607_v28 }
  0x1c   : > { %v287_v36 = vunpack.c.l.b16 %v279_v33  ;;  %v295_v41 = vunpack.c.h.b16 %v279_v33  ;;  %v299_v42 = vpack.c.b16 %v297_v38, %v296_v37  ;;  %v602_v31 = vor.u32 %v617_v25, %v599_v26 }
  0x1d   : > { %330 = vrot.lane.b32.xlu0 %v747_v34, %s693_s20  ;;  %317 = vrot.lane.b32.xlu2 %v747_v34, %s694_s21 }
  0x1e   : > { %v751_v39 = vpack.c.b16 %v287_v36, %v286_v35  ;;  %v298_v43 = vpack.c.b16 %v295_v41, %v294_v40 }
  0x20   : > { %326 = vrot.lane.b32.xlu1 %v751_v39, %s693_s20 }
  0x25   : > { %332 = vrot.lane.b32.xlu0 %v299_v42, %s693_s20  ;;  %319 = vrot.lane.b32.xlu2 %v299_v42, %s694_s21 }
  0x28   : > { %328 = vrot.lane.b32.xlu1 %v298_v43, %s693_s20 }
  0x2d   : > { %369 = vrot.lane.b32.xlu0 %v747_v34, %s695_s22  ;;  %313 = vrot.lane.b32.xlu2 %v751_v39, %s694_s21 }
  0x30   : > { %371 = vrot.lane.b32.xlu1 %v299_v42, %s695_s22 }
  0x35   : > { %315 = vrot.lane.b32.xlu0 %v298_v43, %s694_s21  ;;  %367 = vrot.lane.b32.xlu2 %v298_v43, %s695_s22 }
  0x38   : > { %365 = vrot.lane.b32.xlu1 %v751_v39, %s695_s22 }
  0x3d   : > { %304 = vrot.lane.b32.xlu0 %v747_v34, %s696_s23  ;;  %356 = vrot.lane.b32.xlu2 %v747_v34, %s697_s24 }
  0x40   : > { %306 = vrot.lane.b32.xlu1 %v299_v42, %s696_s23 }
  0x45   : > { %358 = vrot.lane.b32.xlu0 %v299_v42, %s697_s24  ;;  %302 = vrot.lane.b32.xlu2 %v298_v43, %s696_s23 }
  0x48   : > { %300 = vrot.lane.b32.xlu1 %v751_v39, %s696_s23 }
  0x4d   : > { %352 = vrot.lane.b32.xlu0 %v751_v39, %s697_s24  ;;  %343 = vrot.lane.b32.xlu2 %v747_v34, %s698_s25 }
  0x50   : > { %354 = vrot.lane.b32.xlu1 %v298_v43, %s697_s24 }
  0x55   : > { %345 = vrot.lane.b32.xlu0 %v299_v42, %s698_s25  ;;  %341 = vrot.lane.b32.xlu2 %v298_v43, %s698_s25 }
  0x58   : > { %339 = vrot.lane.b32.xlu1 %v751_v39, %s698_s25 }
  0x5d   : > { %388 = vperm.xlu0 %666, %v382_v2   ;;  %398 = vperm.xlu2 %668, %v384_v4  }
  0x60   : > { %393 = vperm.xlu1 %667, %v383_v0  }
  0x68   : > { %403 = vperm.xlu1 %667, %v385_v8  }
  0x77   : > { %v318_v44 = vpop.permute.xlu2 %317 }
  0x7f   : > { %v320_v46 = vpop.permute.xlu2 %319 }
  0x80   : > { %v323_v54 = vsel %vm321_vm9, %v318_v44, %v320_v46 }
  0x87   : > { %v314_v50 = vpop.permute.xlu2 %313 }
  0x8f   : > { %v331_v45 = vpop.permute.xlu0 %330  ;;  %v368_v56 = vpop.permute.xlu2 %367 }
  0x92   : > { %v327_v47 = vpop.permute.xlu1 %326 }
  0x97   : > { %v333_v48 = vpop.permute.xlu0 %332  ;;  %v357_v62 = vpop.permute.xlu2 %356 }
  0x98   : > { %v336_v49 = vsel %vm334_vm8, %v331_v45, %v333_v48 }
  0x99   : > { %431 = vmatpush.bf16.msra.mxu0 %v336_v49  ;;  %621 = vmatpush.bf16.msra.mxu2 %v336_v49 }
  0x9a   : > { %v329_v51 = vpop.permute.xlu1 %328 }
  0x9b   : > { %v335_v52 = vsel %vm334_vm8, %v327_v47, %v329_v51 }
  0x9d   : > { %432 = vmatpush.bf16.msra.mxu0 %v335_v52  ;;  %622 = vmatpush.bf16.msra.mxu2 %v335_v52 }
  0x9f   : > { %v370_v53 = vpop.permute.xlu0 %369  ;;  %v303_v6 = vpop.permute.xlu2 %302 }
  0xa1   : > { %433 = vmatpush.bf16.msra.mxu0 %v323_v54  ;;  %623 = vmatpush.bf16.msra.mxu2 %v323_v54 }
  0xa2   : > { %v372_v55 = vpop.permute.xlu1 %371 }
  0xa3   : > { %v375_v57 = vsel %vm373_vm10, %v370_v53, %v372_v55 }
  0xa4   : > { %452 = vmatpush.bf16.msra.mxu1 %v375_v57  ;;  %629 = vmatpush.bf16.msra.mxu3 %v375_v57 }
  0xa7   : > { %v316_v58 = vpop.permute.xlu0 %315  ;;  %v344_v12 = vpop.permute.xlu2 %343 }
  0xa8   : > { %v322_v59 = vsel %vm321_vm9, %v314_v50, %v316_v58 }
  0xa9   : > { %434 = vmatpush.bf16.msra.mxu0 %v322_v59  ;;  %624 = vmatpush.bf16.msra.mxu2 %v322_v59 }
  0xaa   : > { %v366_v60 = vpop.permute.xlu1 %365 }
  0xab   : > { %v374_v61 = vsel %vm373_vm10, %v366_v60, %v368_v56 }
  0xac   : > { %453 = vmatpush.bf16.msra.mxu1 %v374_v61  ;;  %630 = vmatpush.bf16.msra.mxu3 %v374_v61 }
  0xaf   : > { %v305_v63 = vpop.permute.xlu0 %304  ;;  %v342_v24 = vpop.permute.xlu2 %341 }
  0xb2   : > { %v307_v3 = vpop.permute.xlu1 %306 }
  0xb3   : > { %v310_v5 = vsel %vm308_vm11, %v305_v63, %v307_v3 }
  0xb4   : > { %435 = vmatpush.bf16.msra.mxu0 %v310_v5  ;;  %625 = vmatpush.bf16.msra.mxu2 %v310_v5 }
  0xb7   : > { %v359_v7 = vpop.permute.xlu0 %358  ;;  %v399_v37 = vpop.permute.xlu2 %398 }
  0xb8   : > { %v362_v9 = vsel %vm360_vm12, %v357_v62, %v359_v7 }
  0xb9   : > { %454 = vmatpush.bf16.msra.mxu1 %v362_v9  ;;  %631 = vmatpush.bf16.msra.mxu3 %v362_v9 }
  0xba   : > { %v301_v10 = vpop.permute.xlu1 %300 }
  0xbb   : > { %v309_v11 = vsel %vm308_vm11, %v301_v10, %v303_v6 }
  0xbc   : > { %626 = vmatpush.bf16.msra.mxu2 %v309_v11  ;;  %436 = vmatpush.bf16.msra.mxu0 %v309_v11 }
  0xbf   : > { %v353_v13 = vpop.permute.xlu0 %352 }
  0xc0   : > { %627 = vmatpush.bf16.msra.mxu2 %v747_v34  ;;  %437 = vmatpush.bf16.msra.mxu0 %v747_v34 }
  0xc2   : > { %v355_v18 = vpop.permute.xlu1 %354 }
  0xc3   : > { %v361_v19 = vsel %vm360_vm12, %v353_v13, %v355_v18 }
  0xc4   : > { %455 = vmatpush.bf16.msra.mxu1 %v361_v19  ;;  %632 = vmatpush.bf16.msra.mxu3 %v361_v19 }
  0xc5   : > { %628 = vmatpush.bf16.msra.mxu2 %v751_v39  ;;  %438 = vmatpush.bf16.msra.mxu0 %v751_v39 }
  0xc7   : > { %v346_v22 = vpop.permute.xlu0 %345 }
  0xc8   : > { %444 = vmatmul.bf16.vlgmr.msra.gmra.mxu2 %v606_v20  ;;  %v349_v23 = vsel %vm347_vm13, %v344_v12, %v346_v22  ;;  %439 = vmatmul.bf16.vlgmr.msra.gmra.mxu0 %v598_v21 }
  0xc9   : > { %456 = vmatpush.bf16.msra.mxu1 %v349_v23  ;;  %633 = vmatpush.bf16.msra.mxu3 %v349_v23 }
  0xca   : > { %v340_v29 = vpop.permute.xlu1 %339 }
  0xcb   : > { %v348_v30 = vsel %vm347_vm13, %v340_v29, %v342_v24 }
  0xcd   : > { %457 = vmatpush.bf16.msra.mxu1 %v348_v30  ;;  %634 = vmatpush.bf16.msra.mxu3 %v348_v30 }
  0xcf   : > { %v389_v34 = vpop.permute.xlu0 %388 }
  0xd0   : > { %611 = vmatmul.msk.bf16.vlgmr.msra.gmra.mxu1 %vm424_vm14, %v602_v31  ;;  %612 = vmatmul.msk.bf16.vlgmr.msra.gmra.mxu3 %vm424_vm14, %v610_v32 }
  0xd2   : > { %v394_v36 = vpop.permute.xlu1 %393 }
  0xda   : > { %v404_v49 = vpop.permute.xlu1 %403 }
 0x145   : > { %v440_v33 = vpop.f32.mrf.mxu0 }
 0x146   : > { %v441_v35 = vadd.f32 %v440_v33, %v389_v34 }
 0x14b   : > { %v445_v38 = vpop.f32.mrf.mxu2 }
 0x14c   : > { %v446_v41 = vadd.f32 %v445_v38, %v399_v37 }
 0x14d   : > { %v459_v39 = vpop.f32.mrf.mxu1  ;;  %v442_v42 = vpop.f32.mrf.mxu0 }
 0x14e   : > { %v460_v40 = vadd.f32 %v459_v39, %v441_v35  ;;  %v443_v44 = vadd.f32 %v442_v42, %v394_v36 }
 0x150   : > { %469 = vst [vmem:[%s239_s30] sm:$0xff] %v460_v40 }
 0x153   : > { %v464_v43 = vpop.f32.mrf.mxu3  ;;  %v447_v48 = vpop.f32.mrf.mxu2 }
 0x154   : > { %v465_v45 = vadd.f32 %v464_v43, %v446_v41  ;;  %v448_v50 = vadd.f32 %v447_v48, %v404_v49 }
 0x155   : > { %v461_v46 = vpop.f32.mrf.mxu1 }
 0x156   : > { %471 = vst [vmem:[%s239_s30 + $0x10] sm:$0xff] %v465_v45  ;;  %v462_v47 = vadd.f32 %v461_v46, %v443_v44 }
 0x158   : > { %470 = vst [vmem:[%s239_s30 + $0x8] sm:$0xff] %v462_v47 }
 0x15b   : > { %v466_v51 = vpop.f32.mrf.mxu3 }
 0x15c   : > { %v467_v52 = vadd.f32 %v466_v51, %v448_v50 }
 0x15e   : > { %472 = vst [vmem:[%s239_s30 + $0x18] sm:$0xff] %v467_v52 }
 0x15f PF: > { %s13_s14 = sadd.s32 1, %s691_s14   ;;  %s825_s12 = smov %s687_s13 }
 0x160   : > { %p10_p5 = scmp.ge.s32.totalorder %s13_s14, 4   ;;  %s826_s13 = smov %s828_s15 }
 0x162   :  { %12 = sbr.rel (!%p10_p5) target bundleno = 2 (0x2), region = 68 }

// kernel: _lambda_.42
= control target key start
LH: loop header
LB: loop body
LE: loop exit
PB: predicated region body
PF: predicated region fallthrough
CT: control target
= control target key end

     0   :  { %s720_s12 = smov 0   ;;  %s722_s13 = smov 0   ;;  %s821_s0 = inlined_call_operand.vmem [shape: bf16[2,32,256], index: 0, kind: input, shape index: {}]   ;;  %s822_s1 = inlined_call_operand.vmem [shape: bf16[32,224], index: 1, kind: input, shape index: {}]   ;;  %s823_s2 = inlined_call_operand.vmem [shape: f32[32,1], index: 2, kind: input, shape index: {}]   ;;  %s824_s3 = inlined_call_operand.vmem [shape: f32[2,32,128], index: 3, kind: output, shape index: {}]  }
   0x1   :  { %s724_s14 = smov 0  }
   0x2 LB: > { %s25_s15 = sadd.s32 1, %s687_s13  ;;  %p590_p0 = scmp.ge.s32.totalorder %s691_s14, 1  ;;  %s691_s14 = sphi %s724_s14, %s13_s14   ;;  %s687_s13 = sphi %s722_s13, %s826_s13   ;;  %s683_s12 = sphi %s720_s12, %s825_s12  }
   0x3   : > { %p27_p1 = scmp.ge.s32.totalorder %s25_s15, 2  ;;  %p174_p2 = scmp.lt.s32.totalorder %s691_s14, 3 }
   0x5   : > { %s828_s15 = smov (%p27_p1, %s25_s15), 0  ;;  %p175_p3 = pnand %p590_p0, %p174_p2 }
   0x6   : > { %p213_p4 = scmp.lt.s32.totalorder (!%p175_p3), %s683_s12, 1  ;;  %s693_s20 = smov (!%p175_p3), 113  }
   0x7   : > { %178 = sbr.rel (%p175_p3) target bundleno = 351 (0x15f), region = 32  ;;  %s694_s21 = smov (!%p175_p3), 118  }
   0x8   : > { %s695_s22 = smov (!%p175_p3), 98   ;;  %s696_s23 = smov (!%p175_p3), 123  }
   0x9   : > { %s697_s24 = smov (!%p175_p3), 103   ;;  %s698_s25 = smov (!%p175_p3), 108  }
   0xc   : > { %s830_s12 = smov (!%p213_p4, %s683_s12), 1  ;;  %vm334_vm8 = vcmask 924672   ;;  %vm321_vm9 = vcmask 965632   ;;  %vm373_vm10 = vcmask 801792   ;;  %vm308_vm11 = vcmask 1006592  }
   0xd   : > { %s615_s16 = sshll.u32 %s830_s12, 5  ;;  %vm360_vm12 = vcmask 842752   ;;  %vm347_vm13 = vcmask 883712   ;;  %vm424_vm14 = vcmask 785408  }
   0xe   : > { %s217_s19 = scalar_lea.vmem %s821_s0, %s615_s16  ;;  %s239_s30 = scalar_lea.vmem %s824_s3, %s615_s16 }
   0xf   : > { %v244_v0 = vld [vmem:[%s217_s19 + $0x10] sm:$0xff]  ;;  %v245_v1 = vld [vmem:[%s217_s19 + $0x18] sm:$0xff]  ;;  %v242_v2 = vld [vmem:[%s217_s19] sm:$0xff] }
  0x10   : > { %v250_v3 = vunpack.c.l.bf16 %v244_v0  ;;  %v251_v4 = vunpack.c.h.bf16 %v244_v0  ;;  %v252_v5 = vunpack.c.l.bf16 %v245_v1  ;;  %v253_v6 = vunpack.c.h.bf16 %v245_v1  ;;  %v243_v7 = vld [vmem:[%s217_s19 + $0x8] sm:$0xff] }
  0x11   : > { %v246_v8 = vunpack.c.l.bf16 %v242_v2  ;;  %v247_v9 = vunpack.c.h.bf16 %v242_v2  ;;  %v248_v10 = vunpack.c.l.bf16 %v243_v7  ;;  %v249_v11 = vunpack.c.h.bf16 %v243_v7  ;;  %v383_v0 = vld [vmem:[%s823_s2 + $0x8] sm:$0xff]  ;;  %v382_v2 = vld [vmem:[%s823_s2] sm:$0xff] }
  0x12   : > { %vm258_vm0 = vcmp.ge.f32.partialorder %v250_v3, 0.0  ;;  %vm259_vm1 = vcmp.ge.f32.partialorder %v251_v4, 0.0  ;;  %vm260_vm2 = vcmp.ge.f32.partialorder %v252_v5, 0.0  ;;  %vm261_vm3 = vcmp.ge.f32.partialorder %v253_v6, 0.0 }
  0x13   : > { %v266_v12 = vmul.f32 0.1, %v250_v3  ;;  %v267_v13 = vmul.f32 0.1, %v251_v4  ;;  %v268_v14 = vmul.f32 0.1, %v252_v5 }
  0x14   : > { %v269_v15 = vmul.f32 0.1, %v253_v6  ;;  %vm254_vm4 = vcmp.ge.f32.partialorder %v246_v8, 0.0  ;;  %vm255_vm5 = vcmp.ge.f32.partialorder %v247_v9, 0.0  ;;  %vm256_vm6 = vcmp.ge.f32.partialorder %v248_v10, 0.0 }
  0x15   : > { %v274_v16 = vsel %vm258_vm0, %v250_v3, %v266_v12  ;;  %v275_v17 = vsel %vm259_vm1, %v251_v4, %v267_v13  ;;  %v276_v18 = vsel %vm260_vm2, %v252_v5, %v268_v14  ;;  %vm257_vm7 = vcmp.ge.f32.partialorder %v249_v11, 0.0  ;;  %v384_v4 = vld [vmem:[%s823_s2 + $0x10] sm:$0xff] }
  0x16   : > { %v277_v19 = vsel %vm261_vm3, %v253_v6, %v269_v15  ;;  %v280_v20 = vpack.c.bf16 %v275_v17, %v274_v16  ;;  %v262_v21 = vmul.f32 0.1, %v246_v8  ;;  %v263_v22 = vmul.f32 0.1, %v247_v9  ;;  %v605_v14 = vld [vmem:[%s822_s1 + $0x10] sm:$0xf] }
  0x17   : > { %v281_v23 = vpack.c.bf16 %v277_v19, %v276_v18  ;;  %v264_v24 = vmul.f32 0.1, %v248_v10  ;;  %v265_v25 = vmul.f32 0.1, %v249_v11  ;;  %v699_v1 = vmov 0  }
  0x18   : > { %v288_v26 = vunpack.c.l.b16 %v280_v20  ;;  %v270_v27 = vsel %vm254_vm4, %v246_v8, %v262_v21  ;;  %v271_v28 = vsel %vm255_vm5, %v247_v9, %v263_v22  ;;  %v296_v37 = vunpack.c.h.b16 %v280_v20  ;;  %667 = vset.pattern.permute.xlu1 %v699_v1  ;;  %666 = vset.pattern.permute.xlu0 %v699_v1  ;;  %v385_v8 = vld [vmem:[%s823_s2 + $0x18] sm:$0xff]  ;;  %v597_v16 = vld [vmem:[%s822_s1] sm:$0xf]  ;;  %v618_v17 = vld [vmem:[%s822_s1 + $0x4] sm:$0xf0] }
  0x19   : > { %v289_v29 = vunpack.c.l.b16 %v281_v23  ;;  %v272_v30 = vsel %vm256_vm6, %v248_v10, %v264_v24  ;;  %v273_v31 = vsel %vm257_vm7, %v249_v11, %v265_v25  ;;  %v278_v32 = vpack.c.bf16 %v271_v28, %v270_v27  ;;  %668 = vset.pattern.permute.xlu2 %v699_v1  ;;  %v620_v15 = vld [vmem:[%s822_s1 + $0x14] sm:$0xf0]  ;;  %v617_v25 = vld [vmem:[%s822_s1 + $0x4] sm:$0xf]  ;;  %v619_v27 = vld [vmem:[%s822_s1 + $0x14] sm:$0xf] }
  0x1a   : > { %v279_v33 = vpack.c.bf16 %v273_v31, %v272_v30  ;;  %v297_v38 = vunpack.c.h.b16 %v281_v23  ;;  %v606_v20 = vor.u32 %v620_v15, %v605_v14  ;;  %v598_v21 = vor.u32 %v618_v17, %v597_v16  ;;  %v607_v28 = vld [vmem:[%s822_s1 + $0x18] sm:$0xf0] }
  0x1b   : > { %v747_v34 = vpack.c.b16 %v289_v29, %v288_v26  ;;  %v286_v35 = vunpack.c.l.b16 %v278_v32  ;;  %v294_v40 = vunpack.c.h.b16 %v278_v32  ;;  %v599_v26 = vld [vmem:[%s822_s1 + $0x8] sm:$0xf0]  ;;  %v610_v32 = vor.u32 %v619_v27, %v607_v28 }
  0x1c   : > { %v287_v36 = vunpack.c.l.b16 %v279_v33  ;;  %v295_v41 = vunpack.c.h.b16 %v279_v33  ;;  %v299_v42 = vpack.c.b16 %v297_v38, %v296_v37  ;;  %v602_v31 = vor.u32 %v617_v25, %v599_v26 }
  0x1d   : > { %330 = vrot.lane.b32.xlu0 %v747_v34, %s693_s20  ;;  %317 = vrot.lane.b32.xlu2 %v747_v34, %s694_s21 }
  0x1e   : > { %v751_v39 = vpack.c.b16 %v287_v36, %v286_v35  ;;  %v298_v43 = vpack.c.b16 %v295_v41, %v294_v40 }
  0x20   : > { %326 = vrot.lane.b32.xlu1 %v751_v39, %s693_s20 }
  0x25   : > { %332 = vrot.lane.b32.xlu0 %v299_v42, %s693_s20  ;;  %319 = vrot.lane.b32.xlu2 %v299_v42, %s694_s21 }
  0x28   : > { %328 = vrot.lane.b32.xlu1 %v298_v43, %s693_s20 }
  0x2d   : > { %369 = vrot.lane.b32.xlu0 %v747_v34, %s695_s22  ;;  %313 = vrot.lane.b32.xlu2 %v751_v39, %s694_s21 }
  0x30   : > { %371 = vrot.lane.b32.xlu1 %v299_v42, %s695_s22 }
  0x35   : > { %315 = vrot.lane.b32.xlu0 %v298_v43, %s694_s21  ;;  %367 = vrot.lane.b32.xlu2 %v298_v43, %s695_s22 }
  0x38   : > { %365 = vrot.lane.b32.xlu1 %v751_v39, %s695_s22 }
  0x3d   : > { %304 = vrot.lane.b32.xlu0 %v747_v34, %s696_s23  ;;  %356 = vrot.lane.b32.xlu2 %v747_v34, %s697_s24 }
  0x40   : > { %306 = vrot.lane.b32.xlu1 %v299_v42, %s696_s23 }
  0x45   : > { %358 = vrot.lane.b32.xlu0 %v299_v42, %s697_s24  ;;  %302 = vrot.lane.b32.xlu2 %v298_v43, %s696_s23 }
  0x48   : > { %300 = vrot.lane.b32.xlu1 %v751_v39, %s696_s23 }
  0x4d   : > { %352 = vrot.lane.b32.xlu0 %v751_v39, %s697_s24  ;;  %343 = vrot.lane.b32.xlu2 %v747_v34, %s698_s25 }
  0x50   : > { %354 = vrot.lane.b32.xlu1 %v298_v43, %s697_s24 }
  0x55   : > { %345 = vrot.lane.b32.xlu0 %v299_v42, %s698_s25  ;;  %341 = vrot.lane.b32.xlu2 %v298_v43, %s698_s25 }
  0x58   : > { %339 = vrot.lane.b32.xlu1 %v751_v39, %s698_s25 }
  0x5d   : > { %388 = vperm.xlu0 %666, %v382_v2   ;;  %398 = vperm.xlu2 %668, %v384_v4  }
  0x60   : > { %393 = vperm.xlu1 %667, %v383_v0  }
  0x68   : > { %403 = vperm.xlu1 %667, %v385_v8  }
  0x77   : > { %v318_v44 = vpop.permute.xlu2 %317 }
  0x7f   : > { %v320_v46 = vpop.permute.xlu2 %319 }
  0x80   : > { %v323_v54 = vsel %vm321_vm9, %v318_v44, %v320_v46 }
  0x87   : > { %v314_v50 = vpop.permute.xlu2 %313 }
  0x8f   : > { %v331_v45 = vpop.permute.xlu0 %330  ;;  %v368_v56 = vpop.permute.xlu2 %367 }
  0x92   : > { %v327_v47 = vpop.permute.xlu1 %326 }
  0x97   : > { %v333_v48 = vpop.permute.xlu0 %332  ;;  %v357_v62 = vpop.permute.xlu2 %356 }
  0x98   : > { %v336_v49 = vsel %vm334_vm8, %v331_v45, %v333_v48 }
  0x99   : > { %431 = vmatpush.bf16.msra.mxu0 %v336_v49  ;;  %621 = vmatpush.bf16.msra.mxu2 %v336_v49 }
  0x9a   : > { %v329_v51 = vpop.permute.xlu1 %328 }
  0x9b   : > { %v335_v52 = vsel %vm334_vm8, %v327_v47, %v329_v51 }
  0x9d   : > { %432 = vmatpush.bf16.msra.mxu0 %v335_v52  ;;  %622 = vmatpush.bf16.msra.mxu2 %v335_v52 }
  0x9f   : > { %v370_v53 = vpop.permute.xlu0 %369  ;;  %v303_v6 = vpop.permute.xlu2 %302 }
  0xa1   : > { %433 = vmatpush.bf16.msra.mxu0 %v323_v54  ;;  %623 = vmatpush.bf16.msra.mxu2 %v323_v54 }
  0xa2   : > { %v372_v55 = vpop.permute.xlu1 %371 }
  0xa3   : > { %v375_v57 = vsel %vm373_vm10, %v370_v53, %v372_v55 }
  0xa4   : > { %452 = vmatpush.bf16.msra.mxu1 %v375_v57  ;;  %629 = vmatpush.bf16.msra.mxu3 %v375_v57 }
  0xa7   : > { %v316_v58 = vpop.permute.xlu0 %315  ;;  %v344_v12 = vpop.permute.xlu2 %343 }
  0xa8   : > { %v322_v59 = vsel %vm321_vm9, %v314_v50, %v316_v58 }
  0xa9   : > { %434 = vmatpush.bf16.msra.mxu0 %v322_v59  ;;  %624 = vmatpush.bf16.msra.mxu2 %v322_v59 }
  0xaa   : > { %v366_v60 = vpop.permute.xlu1 %365 }
  0xab   : > { %v374_v61 = vsel %vm373_vm10, %v366_v60, %v368_v56 }
  0xac   : > { %453 = vmatpush.bf16.msra.mxu1 %v374_v61  ;;  %630 = vmatpush.bf16.msra.mxu3 %v374_v61 }
  0xaf   : > { %v305_v63 = vpop.permute.xlu0 %304  ;;  %v342_v24 = vpop.permute.xlu2 %341 }
  0xb2   : > { %v307_v3 = vpop.permute.xlu1 %306 }
  0xb3   : > { %v310_v5 = vsel %vm308_vm11, %v305_v63, %v307_v3 }
  0xb4   : > { %435 = vmatpush.bf16.msra.mxu0 %v310_v5  ;;  %625 = vmatpush.bf16.msra.mxu2 %v310_v5 }
  0xb7   : > { %v359_v7 = vpop.permute.xlu0 %358  ;;  %v399_v37 = vpop.permute.xlu2 %398 }
  0xb8   : > { %v362_v9 = vsel %vm360_vm12, %v357_v62, %v359_v7 }
  0xb9   : > { %454 = vmatpush.bf16.msra.mxu1 %v362_v9  ;;  %631 = vmatpush.bf16.msra.mxu3 %v362_v9 }
  0xba   : > { %v301_v10 = vpop.permute.xlu1 %300 }
  0xbb   : > { %v309_v11 = vsel %vm308_vm11, %v301_v10, %v303_v6 }
  0xbc   : > { %626 = vmatpush.bf16.msra.mxu2 %v309_v11  ;;  %436 = vmatpush.bf16.msra.mxu0 %v309_v11 }
  0xbf   : > { %v353_v13 = vpop.permute.xlu0 %352 }
  0xc0   : > { %627 = vmatpush.bf16.msra.mxu2 %v747_v34  ;;  %437 = vmatpush.bf16.msra.mxu0 %v747_v34 }
  0xc2   : > { %v355_v18 = vpop.permute.xlu1 %354 }
  0xc3   : > { %v361_v19 = vsel %vm360_vm12, %v353_v13, %v355_v18 }
  0xc4   : > { %455 = vmatpush.bf16.msra.mxu1 %v361_v19  ;;  %632 = vmatpush.bf16.msra.mxu3 %v361_v19 }
  0xc5   : > { %628 = vmatpush.bf16.msra.mxu2 %v751_v39  ;;  %438 = vmatpush.bf16.msra.mxu0 %v751_v39 }
  0xc7   : > { %v346_v22 = vpop.permute.xlu0 %345 }
  0xc8   : > { %444 = vmatmul.bf16.vlgmr.msra.gmra.mxu2 %v606_v20  ;;  %v349_v23 = vsel %vm347_vm13, %v344_v12, %v346_v22  ;;  %439 = vmatmul.bf16.vlgmr.msra.gmra.mxu0 %v598_v21 }
  0xc9   : > { %456 = vmatpush.bf16.msra.mxu1 %v349_v23  ;;  %633 = vmatpush.bf16.msra.mxu3 %v349_v23 }
  0xca   : > { %v340_v29 = vpop.permute.xlu1 %339 }
  0xcb   : > { %v348_v30 = vsel %vm347_vm13, %v340_v29, %v342_v24 }
  0xcd   : > { %457 = vmatpush.bf16.msra.mxu1 %v348_v30  ;;  %634 = vmatpush.bf16.msra.mxu3 %v348_v30 }
  0xcf   : > { %v389_v34 = vpop.permute.xlu0 %388 }
  0xd0   : > { %611 = vmatmul.msk.bf16.vlgmr.msra.gmra.mxu1 %vm424_vm14, %v602_v31  ;;  %612 = vmatmul.msk.bf16.vlgmr.msra.gmra.mxu3 %vm424_vm14, %v610_v32 }
  0xd2   : > { %v394_v36 = vpop.permute.xlu1 %393 }
  0xda   : > { %v404_v49 = vpop.permute.xlu1 %403 }
 0x145   : > { %v440_v33 = vpop.f32.mrf.mxu0 }
 0x146   : > { %v441_v35 = vadd.f32 %v440_v33, %v389_v34 }
 0x14b   : > { %v445_v38 = vpop.f32.mrf.mxu2 }
 0x14c   : > { %v446_v41 = vadd.f32 %v445_v38, %v399_v37 }
 0x14d   : > { %v459_v39 = vpop.f32.mrf.mxu1  ;;  %v442_v42 = vpop.f32.mrf.mxu0 }
 0x14e   : > { %v460_v40 = vadd.f32 %v459_v39, %v441_v35  ;;  %v443_v44 = vadd.f32 %v442_v42, %v394_v36 }
 0x150   : > { %469 = vst [vmem:[%s239_s30] sm:$0xff] %v460_v40 }
 0x153   : > { %v464_v43 = vpop.f32.mrf.mxu3  ;;  %v447_v48 = vpop.f32.mrf.mxu2 }
 0x154   : > { %v465_v45 = vadd.f32 %v464_v43, %v446_v41  ;;  %v448_v50 = vadd.f32 %v447_v48, %v404_v49 }
 0x155   : > { %v461_v46 = vpop.f32.mrf.mxu1 }
 0x156   : > { %471 = vst [vmem:[%s239_s30 + $0x10] sm:$0xff] %v465_v45  ;;  %v462_v47 = vadd.f32 %v461_v46, %v443_v44 }
 0x158   : > { %470 = vst [vmem:[%s239_s30 + $0x8] sm:$0xff] %v462_v47 }
 0x15b   : > { %v466_v51 = vpop.f32.mrf.mxu3 }
 0x15c   : > { %v467_v52 = vadd.f32 %v466_v51, %v448_v50 }
 0x15e   : > { %472 = vst [vmem:[%s239_s30 + $0x18] sm:$0xff] %v467_v52 }
 0x15f PF: > { %s13_s14 = sadd.s32 1, %s691_s14   ;;  %s825_s12 = smov %s687_s13 }
 0x160   : > { %p10_p5 = scmp.ge.s32.totalorder %s13_s14, 4   ;;  %s826_s13 = smov %s828_s15 }
 0x162   :  { %12 = sbr.rel (!%p10_p5) target bundleno = 2 (0x2), region = 68 }

// kernel: _lambda_.36
= control target key start
LH: loop header
LB: loop body
LE: loop exit
PB: predicated region body
PF: predicated region fallthrough
CT: control target
= control target key end

     0   :  { %s612_s12 = smov 0   ;;  %s614_s13 = smov 0   ;;  %s671_s0 = inlined_call_operand.vmem [shape: bf16[2,32,256], index: 0, kind: input, shape index: {}]   ;;  %s672_s1 = inlined_call_operand.vmem [shape: bf16[32,96], index: 1, kind: input, shape index: {}]   ;;  %s673_s2 = inlined_call_operand.vmem [shape: f32[32,1], index: 2, kind: input, shape index: {}]   ;;  %s674_s3 = inlined_call_operand.vmem [shape: f32[2,32,128], index: 3, kind: output, shape index: {}]  }
   0x1   :  { %s616_s14 = smov 0  }
   0x2 LB: > { %s25_s15 = sadd.s32 1, %s583_s13  ;;  %p508_p0 = scmp.ge.s32.totalorder %s587_s14, 1  ;;  %s587_s14 = sphi %s616_s14, %s13_s14   ;;  %s583_s13 = sphi %s614_s13, %s676_s13   ;;  %s579_s12 = sphi %s612_s12, %s675_s12  }
   0x3   : > { %p27_p1 = scmp.ge.s32.totalorder %s25_s15, 2  ;;  %p173_p2 = scmp.lt.s32.totalorder %s587_s14, 3 }
   0x5   : > { %s678_s15 = smov (%p27_p1, %s25_s15), 0  ;;  %p174_p3 = pnand %p508_p0, %p173_p2 }
   0x6   : > { %p211_p4 = scmp.lt.s32.totalorder (!%p174_p3), %s579_s12, 1  ;;  %s589_s20 = smov (!%p174_p3), 118  }
   0x7   : > { %177 = sbr.rel (%p174_p3) target bundleno = 314 (0x13a), region = 32  ;;  %s590_s21 = smov (!%p174_p3), 123  }
   0xc   : > { %s680_s12 = smov (!%p211_p4, %s579_s12), 1  ;;  %v329_v45 = vld [vmem:[%s673_s2 + $0x10] sm:$0xff]  ;;  %v328_v46 = vld [vmem:[%s673_s2 + $0x8] sm:$0xff]  ;;  %v591_v47 = vmov 0   ;;  %v327_v48 = vld [vmem:[%s673_s2] sm:$0xff]  ;;  %vm318_vm8 = vcmask 965632  }
   0xd   : > { %s525_s16 = sshll.u32 %s680_s12, 5  ;;  %564 = vset.pattern.permute.xlu1 %v591_v47  ;;  %563 = vset.pattern.permute.xlu0 %v591_v47  ;;  %v330_v53 = vld [vmem:[%s673_s2 + $0x18] sm:$0xff]  ;;  %vm305_vm9 = vcmask 1006592   ;;  %v527_v61 = vld [vmem:[%s672_s1] sm:$0xff]  ;;  %v528_v62 = vld [vmem:[%s672_s1 + $0x8] sm:$0xff]  ;;  %vm361_vm10 = vcmask 785408  }
   0xe   : > { %s215_s19 = scalar_lea.vmem %s671_s0, %s525_s16  ;;  %562 = vset.pattern.permute.xlu2 %v591_v47  ;;  %s236_s9 = scalar_lea.vmem %s674_s3, %s525_s16 }
   0xf   : > { %v241_v0 = vld [vmem:[%s215_s19 + $0x10] sm:$0xff]  ;;  %v242_v1 = vld [vmem:[%s215_s19 + $0x18] sm:$0xff]  ;;  %v239_v2 = vld [vmem:[%s215_s19] sm:$0xff] }
  0x10   : > { %v247_v3 = vunpack.c.l.bf16 %v241_v0  ;;  %v248_v4 = vunpack.c.h.bf16 %v241_v0  ;;  %v249_v5 = vunpack.c.l.bf16 %v242_v1  ;;  %v250_v6 = vunpack.c.h.bf16 %v242_v1  ;;  %v240_v7 = vld [vmem:[%s215_s19 + $0x8] sm:$0xff] }
  0x11   : > { %v243_v8 = vunpack.c.l.bf16 %v239_v2  ;;  %v244_v9 = vunpack.c.h.bf16 %v239_v2  ;;  %v245_v10 = vunpack.c.l.bf16 %v240_v7  ;;  %v246_v11 = vunpack.c.h.bf16 %v240_v7 }
  0x12   : > { %vm255_vm0 = vcmp.ge.f32.partialorder %v247_v3, 0.0  ;;  %vm256_vm1 = vcmp.ge.f32.partialorder %v248_v4, 0.0  ;;  %vm257_vm2 = vcmp.ge.f32.partialorder %v249_v5, 0.0  ;;  %vm258_vm3 = vcmp.ge.f32.partialorder %v250_v6, 0.0 }
  0x13   : > { %v263_v12 = vmul.f32 0.1, %v247_v3  ;;  %v264_v13 = vmul.f32 0.1, %v248_v4  ;;  %v265_v14 = vmul.f32 0.1, %v249_v5 }
  0x14   : > { %v266_v15 = vmul.f32 0.1, %v250_v6  ;;  %vm251_vm4 = vcmp.ge.f32.partialorder %v243_v8, 0.0  ;;  %vm252_vm5 = vcmp.ge.f32.partialorder %v244_v9, 0.0  ;;  %vm253_vm6 = vcmp.ge.f32.partialorder %v245_v10, 0.0 }
  0x15   : > { %v271_v16 = vsel %vm255_vm0, %v247_v3, %v263_v12  ;;  %v272_v17 = vsel %vm256_vm1, %v248_v4, %v264_v13  ;;  %v273_v18 = vsel %vm257_vm2, %v249_v5, %v265_v14  ;;  %vm254_vm7 = vcmp.ge.f32.partialorder %v246_v11, 0.0 }
  0x16   : > { %v274_v19 = vsel %vm258_vm3, %v250_v6, %v266_v15  ;;  %v277_v20 = vpack.c.bf16 %v272_v17, %v271_v16  ;;  %v259_v21 = vmul.f32 0.1, %v243_v8  ;;  %v260_v22 = vmul.f32 0.1, %v244_v9 }
  0x17   : > { %v278_v23 = vpack.c.bf16 %v274_v19, %v273_v18  ;;  %v261_v24 = vmul.f32 0.1, %v245_v10  ;;  %v262_v25 = vmul.f32 0.1, %v246_v11 }
  0x18   : > { %v285_v26 = vunpack.c.l.b16 %v277_v20  ;;  %v267_v27 = vsel %vm251_vm4, %v243_v8, %v259_v21  ;;  %v268_v28 = vsel %vm252_vm5, %v244_v9, %v260_v22  ;;  %v293_v37 = vunpack.c.h.b16 %v277_v20 }
  0x19   : > { %v286_v29 = vunpack.c.l.b16 %v278_v23  ;;  %v269_v30 = vsel %vm253_vm6, %v245_v10, %v261_v24  ;;  %v270_v31 = vsel %vm254_vm7, %v246_v11, %v262_v25  ;;  %v275_v32 = vpack.c.bf16 %v268_v28, %v267_v27 }
  0x1a   : > { %v276_v33 = vpack.c.bf16 %v270_v31, %v269_v30  ;;  %v294_v38 = vunpack.c.h.b16 %v278_v23 }
  0x1b   : > { %v288_v34 = vpack.c.b16 %v286_v29, %v285_v26  ;;  %v283_v35 = vunpack.c.l.b16 %v275_v32  ;;  %v291_v40 = vunpack.c.h.b16 %v275_v32 }
  0x1c   : > { %v284_v36 = vunpack.c.l.b16 %v276_v33  ;;  %v292_v41 = vunpack.c.h.b16 %v276_v33  ;;  %v296_v42 = vpack.c.b16 %v294_v38, %v293_v37 }
  0x1d   : > { %314 = vrot.lane.b32.xlu0 %v288_v34, %s589_s20  ;;  %301 = vrot.lane.b32.xlu2 %v288_v34, %s590_s21 }
  0x1e   : > { %v287_v39 = vpack.c.b16 %v284_v36, %v283_v35  ;;  %v295_v43 = vpack.c.b16 %v292_v41, %v291_v40 }
  0x20   : > { %310 = vrot.lane.b32.xlu1 %v287_v39, %s589_s20 }
  0x25   : > { %316 = vrot.lane.b32.xlu0 %v296_v42, %s589_s20  ;;  %303 = vrot.lane.b32.xlu2 %v296_v42, %s590_s21 }
  0x28   : > { %312 = vrot.lane.b32.xlu1 %v295_v43, %s589_s20 }
  0x2d   : > { %297 = vrot.lane.b32.xlu0 %v287_v39, %s590_s21  ;;  %333 = vperm.xlu2 %562, %v327_v48  }
  0x30   : > { %299 = vrot.lane.b32.xlu1 %v295_v43, %s590_s21 }
  0x35   : > { %338 = vperm.xlu0 %563, %v328_v46   ;;  %348 = vperm.xlu2 %562, %v330_v53  }
  0x38   : > { %343 = vperm.xlu1 %564, %v329_v45  }
  0x77   : > { %v302_v50 = vpop.permute.xlu2 %301 }
  0x7f   : > { %v304_v56 = vpop.permute.xlu2 %303 }
  0x80   : > { %v307_v57 = vsel %vm305_vm9, %v302_v50, %v304_v56 }
  0x87   : > { %v334_v63 = vpop.permute.xlu2 %333 }
  0x8f   : > { %v315_v44 = vpop.permute.xlu0 %314  ;;  %v349_v6 = vpop.permute.xlu2 %348 }
  0x92   : > { %v311_v49 = vpop.permute.xlu1 %310 }
  0x97   : > { %v317_v51 = vpop.permute.xlu0 %316 }
  0x98   : > { %v320_v52 = vsel %vm318_vm8, %v315_v44, %v317_v51 }
  0x99   : > { %370 = vmatpush.bf16.msra.mxu0 %v320_v52  ;;  %529 = vmatpush.bf16.msra.mxu1 %v320_v52 }
  0x9a   : > { %v313_v54 = vpop.permute.xlu1 %312 }
  0x9b   : > { %v319_v55 = vsel %vm318_vm8, %v311_v49, %v313_v54 }
  0x9d   : > { %371 = vmatpush.bf16.msra.mxu0 %v319_v55  ;;  %530 = vmatpush.bf16.msra.mxu1 %v319_v55 }
  0x9f   : > { %v298_v58 = vpop.permute.xlu0 %297 }
  0xa1   : > { %372 = vmatpush.bf16.msra.mxu0 %v307_v57  ;;  %531 = vmatpush.bf16.msra.mxu1 %v307_v57 }
  0xa2   : > { %v300_v59 = vpop.permute.xlu1 %299 }
  0xa3   : > { %v306_v60 = vsel %vm305_vm9, %v298_v58, %v300_v59 }
  0xa5   : > { %373 = vmatpush.bf16.msra.mxu0 %v306_v60  ;;  %532 = vmatpush.bf16.msra.mxu1 %v306_v60 }
  0xa7   : > { %v339_v5 = vpop.permute.xlu0 %338 }
  0xa9   : > { %374 = vmatpush.bf16.msra.mxu0 %v288_v34  ;;  %533 = vmatpush.bf16.msra.mxu1 %v288_v34 }
  0xaa   : > { %v344_v0 = vpop.permute.xlu1 %343 }
  0xad   : > { %375 = vmatpush.bf16.msra.mxu0 %v287_v39  ;;  %534 = vmatpush.bf16.msra.mxu1 %v287_v39 }
  0xb0   : > { %521 = vmatmul.msk.bf16.vlgmr.msra.gmra.mxu0 %vm361_vm10, %v527_v61  ;;  %522 = vmatmul.msk.bf16.vlgmr.msra.gmra.mxu1 %vm361_vm10, %v528_v62 }
 0x12d   : > { %v377_v1 = vpop.f32.mrf.mxu0  ;;  %v382_v2 = vpop.f32.mrf.mxu1 }
 0x12e   : > { %v378_v3 = vadd.f32 %v377_v1, %v334_v63  ;;  %v383_v4 = vadd.f32 %v382_v2, %v344_v0 }
 0x130   : > { %387 = vst [vmem:[%s236_s9] sm:$0xff] %v378_v3 }
 0x131   : > { %389 = vst [vmem:[%s236_s9 + $0x10] sm:$0xff] %v383_v4 }
 0x135   : > { %v379_v7 = vpop.f32.mrf.mxu0  ;;  %v384_v8 = vpop.f32.mrf.mxu1 }
 0x136   : > { %v380_v9 = vadd.f32 %v379_v7, %v339_v5  ;;  %v385_v10 = vadd.f32 %v384_v8, %v349_v6 }
 0x138   : > { %388 = vst [vmem:[%s236_s9 + $0x8] sm:$0xff] %v380_v9 }
 0x139   : > { %390 = vst [vmem:[%s236_s9 + $0x18] sm:$0xff] %v385_v10 }
 0x13a PF: > { %s13_s14 = sadd.s32 1, %s587_s14   ;;  %s675_s12 = smov %s583_s13 }
 0x13b   : > { %p10_p5 = scmp.ge.s32.totalorder %s13_s14, 4   ;;  %s676_s13 = smov %s678_s15 }
 0x13d   :  { %12 = sbr.rel (!%p10_p5) target bundleno = 2 (0x2), region = 68 }

// kernel: _lambda_.44
= control target key start
LH: loop header
LB: loop body
LE: loop exit
PB: predicated region body
PF: predicated region fallthrough
CT: control target
= control target key end

     0   :  { %s795_s12 = smov 0   ;;  %s797_s13 = smov 0   ;;  %s945_s0 = inlined_call_operand.vmem [shape: bf16[2,32,384], index: 0, kind: input, shape index: {}]   ;;  %s946_s1 = inlined_call_operand.vmem [shape: bf16[16,256], index: 1, kind: input, shape index: {}]   ;;  %s947_s2 = inlined_call_operand.vmem [shape: f32[16,1], index: 2, kind: input, shape index: {}]   ;;  %s948_s3 = inlined_call_operand.vmem [shape: f32[2,16,256], index: 3, kind: output, shape index: {}]  }
   0x1   :  { %s799_s14 = smov 0  }
   0x2 LB: > { %s25_s15 = sadd.s32 1, %s761_s13  ;;  %p691_p0 = scmp.ge.s32.totalorder %s765_s14, 1  ;;  %s765_s14 = sphi %s799_s14, %s13_s14   ;;  %s761_s13 = sphi %s797_s13, %s950_s13   ;;  %s757_s12 = sphi %s795_s12, %s949_s12  }
   0x3   : > { %p27_p1 = scmp.ge.s32.totalorder %s25_s15, 2  ;;  %p174_p2 = scmp.lt.s32.totalorder %s765_s14, 3 }
   0x5   : > { %s952_s15 = smov (%p27_p1, %s25_s15), 0  ;;  %p175_p3 = pnand %p691_p0, %p174_p2 }
   0x6   : > { %p214_p4 = scmp.lt.s32.totalorder (!%p175_p3), %s757_s12, 1  ;;  %s767_s20 = smov (!%p175_p3), 121  }
   0x7   : > { %178 = sbr.rel (%p175_p3) target bundleno = 396 (0x18c), region = 32  ;;  %s768_s21 = smov (!%p175_p3), 125  }
   0x8   : > { %s769_s22 = smov (!%p175_p3), 126   ;;  %s770_s23 = smov (!%p175_p3), 122  }
   0x9   : > { %s771_s24 = smov (!%p175_p3), 127   ;;  %s772_s25 = smov (!%p175_p3), 123  }
   0xa   : > { %s773_s26 = smov (!%p175_p3), 124  }
   0xc   : > { %s954_s12 = smov (!%p214_p4, %s757_s12), 1  ;;  %vm475_vm12 = vcmask 990208   ;;  %vm391_vm13 = vcmask 1022976   ;;  %vm370_vm14 = vcmask 1031168   ;;  %vm454_vm15 = vcmask 998400  }
   0xd   : > { %s708_s16 = smul.u32 48, %s954_s12 }
   0xf   : > { %s819_s19 = scalar_lea.vmem %s945_s0, %s708_s16  ;;  %s705_s16 = sshll.u32 %s954_s12, 5 }
  0x10   : > { %v247_v0 = vld [vmem:[%s819_s19 + $0x18] sm:$0xff]  ;;  %v249_v1 = vld [vmem:[%s819_s19 + $0x24] sm:$0xff]  ;;  %v245_v7 = vld [vmem:[%s819_s19 + $0xc] sm:$0xff] }
  0x11   : > { %v243_v2 = vld [vmem:[%s819_s19] sm:$0xff]  ;;  %v257_v3 = vunpack.c.l.bf16 %v247_v0  ;;  %v258_v4 = vunpack.c.h.bf16 %v247_v0  ;;  %v260_v5 = vunpack.c.l.bf16 %v249_v1  ;;  %v261_v6 = vunpack.c.h.bf16 %v249_v1  ;;  %v250_v13 = vld [vmem:[%s819_s19 + $0x2c] sm:$0xf]  ;;  %v244_v33 = vld [vmem:[%s819_s19 + $0x8] sm:$0xf] }
  0x12   : > { %v248_v8 = vld [vmem:[%s819_s19 + $0x20] sm:$0xf]  ;;  %v251_v9 = vunpack.c.l.bf16 %v243_v2  ;;  %v252_v10 = vunpack.c.h.bf16 %v243_v2  ;;  %v254_v11 = vunpack.c.l.bf16 %v245_v7  ;;  %v255_v12 = vunpack.c.h.bf16 %v245_v7  ;;  %v246_v34 = vld [vmem:[%s819_s19 + $0x14] sm:$0xf]  ;;  %s241_s19 = scalar_lea.vmem %s948_s3, %s705_s16 }
  0x13   : > { %vm269_vm0 = vcmp.ge.f32.partialorder %v257_v3, 0.0  ;;  %vm270_vm1 = vcmp.ge.f32.partialorder %v258_v4, 0.0  ;;  %vm272_vm2 = vcmp.ge.f32.partialorder %v260_v5, 0.0  ;;  %vm273_vm3 = vcmp.ge.f32.partialorder %v261_v6, 0.0 }
  0x14   : > { %v281_v14 = vmul.f32 0.1, %v257_v3  ;;  %v282_v15 = vmul.f32 0.1, %v258_v4  ;;  %v284_v16 = vmul.f32 0.1, %v260_v5  ;;  %v259_v17 = vunpack.c.l.bf16 %v248_v8 }
  0x15   : > { %v285_v18 = vmul.f32 0.1, %v261_v6  ;;  %vm263_vm4 = vcmp.ge.f32.partialorder %v251_v9, 0.0  ;;  %vm264_vm5 = vcmp.ge.f32.partialorder %v252_v10, 0.0  ;;  %vm266_vm6 = vcmp.ge.f32.partialorder %v254_v11, 0.0 }
  0x16   : > { %v293_v19 = vsel %vm269_vm0, %v257_v3, %v281_v14  ;;  %v294_v20 = vsel %vm270_vm1, %v258_v4, %v282_v15  ;;  %v296_v21 = vsel %vm272_vm2, %v260_v5, %v284_v16  ;;  %vm267_vm7 = vcmp.ge.f32.partialorder %v255_v12, 0.0 }
  0x17   : > { %v297_v22 = vsel %vm273_vm3, %v261_v6, %v285_v18  ;;  %v303_v23 = vpack.c.bf16 %v294_v20, %v293_v19  ;;  %v275_v24 = vmul.f32 0.1, %v251_v9  ;;  %v276_v25 = vmul.f32 0.1, %v252_v10 }
  0x18   : > { %v305_v26 = vpack.c.bf16 %v297_v22, %v296_v21  ;;  %v278_v27 = vmul.f32 0.1, %v254_v11  ;;  %v279_v28 = vmul.f32 0.1, %v255_v12  ;;  %v262_v29 = vunpack.c.l.bf16 %v250_v13 }
  0x19   : > { %v316_v30 = vunpack.c.h.b16 %v303_v23  ;;  %v287_v31 = vsel %vm263_vm4, %v251_v9, %v275_v24  ;;  %v288_v32 = vsel %vm264_vm5, %v252_v10, %v276_v25  ;;  %vm271_vm8 = vcmp.ge.f32.partialorder %v259_v17, 0.0 }
  0x1a   : > { %v318_v35 = vunpack.c.h.b16 %v305_v26  ;;  %v290_v36 = vsel %vm266_vm6, %v254_v11, %v278_v27  ;;  %v291_v37 = vsel %vm267_vm7, %v255_v12, %v279_v28  ;;  %v299_v38 = vpack.c.bf16 %v288_v32, %v287_v31 }
  0x1b   : > { %v301_v39 = vpack.c.bf16 %v291_v37, %v290_v36  ;;  %vm274_vm9 = vcmp.ge.f32.partialorder %v262_v29, 0.0  ;;  %v283_v40 = vmul.f32 0.1, %v259_v17  ;;  %v286_v41 = vmul.f32 0.1, %v262_v29 }
  0x1c   : > { %v833_v42 = vpack.c.b16 %v318_v35, %v316_v30  ;;  %v312_v43 = vunpack.c.h.b16 %v299_v38  ;;  %v253_v44 = vunpack.c.l.bf16 %v244_v33  ;;  %v256_v45 = vunpack.c.l.bf16 %v246_v34 }
  0x1d   : > { %v314_v46 = vunpack.c.h.b16 %v301_v39  ;;  %v295_v47 = vsel %vm271_vm8, %v259_v17, %v283_v40  ;;  %v298_v48 = vsel %vm274_vm9, %v262_v29, %v286_v41  ;;  %v315_v0 = vunpack.c.l.b16 %v303_v23 }
  0x1e   : > { %471 = vrot.lane.b32.xlu1 %v833_v42, %s767_s20  ;;  %387 = vrot.lane.b32.xlu0 %v833_v42, %s768_s21  ;;  %v304_v49 = vpack.c.bf16 %v295_v47, %v295_v47  ;;  %v306_v50 = vpack.c.bf16 %v298_v48, %v298_v48  ;;  %vm265_vm10 = vcmp.ge.f32.partialorder %v253_v44, 0.0  ;;  %vm268_vm11 = vcmp.ge.f32.partialorder %v256_v45, 0.0 }
  0x1f   : > { %v840_v51 = vpack.c.b16 %v314_v46, %v312_v43  ;;  %v277_v52 = vmul.f32 0.1, %v253_v44  ;;  %v280_v53 = vmul.f32 0.1, %v256_v45  ;;  %v317_v1 = vunpack.c.l.b16 %v305_v26 }
  0x20   : > { %v333_v54 = vunpack.c.l.b16 %v304_v49  ;;  %v334_v55 = vunpack.c.l.b16 %v306_v50  ;;  %v311_v3 = vunpack.c.l.b16 %v299_v38  ;;  %v313_v4 = vunpack.c.l.b16 %v301_v39 }
  0x21   : > { %381 = vrot.lane.b32.xlu2 %v840_v51, %s768_s21  ;;  %v289_v56 = vsel %vm265_vm10, %v253_v44, %v277_v52  ;;  %v292_v57 = vsel %vm268_vm11, %v256_v45, %v280_v53  ;;  %v847_v2 = vpack.c.b16 %v317_v1, %v315_v0  ;;  %vm349_vm0 = vcmask 1039360   ;;  %v487_v0 = vld [vmem:[%s947_s2 + $0x8] sm:$0xff]  ;;  %v486_v1 = vld [vmem:[%s947_s2] sm:$0xff] }
  0x22   : > { %v336_v58 = vpack.c.b16 %v334_v55, %v333_v54  ;;  %v300_v59 = vpack.c.bf16 %v289_v56, %v289_v56  ;;  %v302_v60 = vpack.c.bf16 %v292_v57, %v292_v57  ;;  %v857_v5 = vpack.c.b16 %v313_v4, %v311_v3 }
  0x23   : > { %vm433_vm1 = vcmask 1006592   ;;  %v774_v3 = vmov 0   ;;  %vm412_vm2 = vcmask 1014784  }
  0x24   : > { %v331_v61 = vunpack.c.l.b16 %v300_v59  ;;  %v332_v62 = vunpack.c.l.b16 %v302_v60  ;;  %v707_v59 = vld [vmem:[%s946_s1 + $0x4] sm:$0xf0]  ;;  %742 = vset.pattern.permute.xlu1 %v774_v3  ;;  %741 = vset.pattern.permute.xlu0 %v774_v3 }
  0x26   : > { %473 = vrot.lane.b32.xlu1 %v336_v58, %s767_s20  ;;  %389 = vrot.lane.b32.xlu0 %v336_v58, %s768_s21  ;;  %v335_v63 = vpack.c.b16 %v332_v62, %v331_v61 }
  0x29   : > { %383 = vrot.lane.b32.xlu2 %v335_v63, %s768_s21 }
  0x2e   : > { %385 = vrot.lane.b32.xlu0 %v847_v2, %s768_s21  ;;  %465 = vrot.lane.b32.xlu1 %v840_v51, %s767_s20 }
  0x31   : > { %467 = vrot.lane.b32.xlu2 %v335_v63, %s767_s20 }
  0x36   : > { %366 = vrot.lane.b32.xlu0 %v833_v42, %s769_s22  ;;  %368 = vrot.lane.b32.xlu1 %v336_v58, %s769_s22 }
  0x39   : > { %469 = vrot.lane.b32.xlu2 %v847_v2, %s767_s20 }
  0x3e   : > { %450 = vrot.lane.b32.xlu1 %v833_v42, %s770_s23  ;;  %379 = vrot.lane.b32.xlu0 %v857_v5, %s768_s21 }
  0x41   : > { %452 = vrot.lane.b32.xlu2 %v336_v58, %s770_s23 }
  0x46   : > { %362 = vrot.lane.b32.xlu1 %v335_v63, %s769_s22  ;;  %360 = vrot.lane.b32.xlu0 %v840_v51, %s769_s22 }
  0x49   : > { %463 = vrot.lane.b32.xlu2 %v857_v5, %s767_s20 }
  0x4e   : > { %444 = vrot.lane.b32.xlu1 %v840_v51, %s770_s23  ;;  %364 = vrot.lane.b32.xlu0 %v847_v2, %s769_s22 }
  0x51   : > { %446 = vrot.lane.b32.xlu2 %v335_v63, %s770_s23 }
  0x56   : > { %347 = vrot.lane.b32.xlu1 %v336_v58, %s771_s24  ;;  %345 = vrot.lane.b32.xlu0 %v833_v42, %s771_s24 }
  0x59   : > { %448 = vrot.lane.b32.xlu2 %v847_v2, %s770_s23 }
  0x5e   : > { %429 = vrot.lane.b32.xlu1 %v833_v42, %s772_s25  ;;  %358 = vrot.lane.b32.xlu0 %v857_v5, %s769_s22 }
  0x61   : > { %431 = vrot.lane.b32.xlu2 %v336_v58, %s772_s25 }
  0x66   : > { %341 = vrot.lane.b32.xlu1 %v335_v63, %s771_s24  ;;  %339 = vrot.lane.b32.xlu0 %v840_v51, %s771_s24 }
  0x69   : > { %442 = vrot.lane.b32.xlu2 %v857_v5, %s770_s23 }
  0x6e   : > { %423 = vrot.lane.b32.xlu1 %v840_v51, %s772_s25  ;;  %343 = vrot.lane.b32.xlu0 %v847_v2, %s771_s24 }
  0x71   : > { %425 = vrot.lane.b32.xlu2 %v335_v63, %s772_s25 }
  0x76   : > { %337 = vrot.lane.b32.xlu1 %v857_v5, %s771_s24  ;;  %427 = vrot.lane.b32.xlu0 %v847_v2, %s772_s25 }
  0x79   : > { %408 = vrot.lane.b32.xlu2 %v833_v42, %s773_s26 }
  0x7b   : > { %v382_v6 = vpop.permute.xlu2 %381 }
  0x7e   : > { %421 = vrot.lane.b32.xlu1 %v857_v5, %s772_s25  ;;  %410 = vrot.lane.b32.xlu0 %v336_v58, %s773_s26  ;;  %v697_v58 = vld [vmem:[%s946_s1] sm:$0xf] }
  0x81   : > { %402 = vrot.lane.b32.xlu2 %v840_v51, %s773_s26 }
  0x83   : > { %v384_v7 = vpop.permute.xlu2 %383 }
  0x84   : > { %v393_v18 = vsel %vm391_vm13, %v382_v6, %v384_v7 }
  0x86   : > { %406 = vrot.lane.b32.xlu1 %v847_v2, %s773_s26  ;;  %404 = vrot.lane.b32.xlu0 %v335_v63, %s773_s26 }
  0x89   : > { %400 = vrot.lane.b32.xlu2 %v857_v5, %s773_s26 }
  0x8b   : > { %v468_v8 = vpop.permute.xlu2 %467 }
  0x8e   : > { %495 = vperm.xlu1 %742, %v487_v0   ;;  %490 = vperm.xlu0 %741, %v486_v1  }
  0x90   : > { %v472_v9 = vpop.permute.xlu1 %471  ;;  %v388_v10 = vpop.permute.xlu0 %387 }
  0x93   : > { %v470_v11 = vpop.permute.xlu2 %469 }
  0x94   : > { %v478_v12 = vsel %vm475_vm12, %v470_v11, %v472_v9 }
  0x95   : > { %522 = vmatpush.bf16.msra.mxu1 %v478_v12 }
  0x98   : > { %v474_v13 = vpop.permute.xlu1 %473  ;;  %v390_v14 = vpop.permute.xlu0 %389 }
  0x99   : > { %v395_v15 = vsel %vm391_vm13, %v388_v10, %v390_v14  ;;  %v479_v16 = vsel %vm475_vm12, %v472_v9, %v474_v13  ;;  %v706_v14 = vld [vmem:[%s946_s1 + $0x4] sm:$0xf] }
  0x9a   : > { %536 = vmatpush.bf16.msra.mxu2 %v395_v15  ;;  %550 = vmatpush.bf16.msra.mxu3 %v479_v16 }
  0x9b   : > { %v453_v17 = vpop.permute.xlu2 %452 }
  0x9e   : > { %537 = vmatpush.bf16.msra.mxu2 %v393_v18 }
  0xa0   : > { %v386_v19 = vpop.permute.xlu0 %385  ;;  %v466_v20 = vpop.permute.xlu1 %465 }
  0xa1   : > { %v394_v21 = vsel %vm391_vm13, %v386_v19, %v388_v10  ;;  %v477_v22 = vsel %vm475_vm12, %v466_v20, %v468_v8 }
  0xa2   : > { %508 = vmatpush.bf16.msra.mxu0 %v394_v21  ;;  %551 = vmatpush.bf16.msra.mxu3 %v477_v22 }
  0xa3   : > { %v464_v23 = vpop.permute.xlu2 %463 }
  0xa4   : > { %v476_v24 = vsel %vm475_vm12, %v464_v23, %v466_v20 }
  0xa5   : > { %523 = vmatpush.bf16.msra.mxu1 %v476_v24 }
  0xa8   : > { %v367_v25 = vpop.permute.xlu0 %366  ;;  %v369_v26 = vpop.permute.xlu1 %368 }
  0xa9   : > { %v374_v27 = vsel %vm370_vm14, %v367_v25, %v369_v26 }
  0xaa   : > { %538 = vmatpush.bf16.msra.mxu2 %v374_v27 }
  0xab   : > { %v447_v28 = vpop.permute.xlu2 %446 }
  0xb0   : > { %v451_v29 = vpop.permute.xlu1 %450  ;;  %v380_v30 = vpop.permute.xlu0 %379 }
  0xb1   : > { %v392_v31 = vsel %vm391_vm13, %v380_v30, %v382_v6  ;;  %v458_v32 = vsel %vm454_vm15, %v451_v29, %v453_v17 }
  0xb2   : > { %509 = vmatpush.bf16.msra.mxu0 %v392_v31  ;;  %552 = vmatpush.bf16.msra.mxu3 %v458_v32 }
  0xb3   : > { %v449_v33 = vpop.permute.xlu2 %448 }
  0xb4   : > { %v457_v34 = vsel %vm454_vm15, %v449_v33, %v451_v29 }
  0xb5   : > { %524 = vmatpush.bf16.msra.mxu1 %v457_v34 }
  0xb8   : > { %v363_v35 = vpop.permute.xlu1 %362  ;;  %v361_v36 = vpop.permute.xlu0 %360 }
  0xb9   : > { %v372_v37 = vsel %vm370_vm14, %v361_v36, %v363_v35 }
  0xba   : > { %539 = vmatpush.bf16.msra.mxu2 %v372_v37 }
  0xbb   : > { %v432_v38 = vpop.permute.xlu2 %431 }
  0xc0   : > { %v445_v39 = vpop.permute.xlu1 %444  ;;  %v365_v40 = vpop.permute.xlu0 %364 }
  0xc1   : > { %v373_v41 = vsel %vm370_vm14, %v365_v40, %v367_v25  ;;  %v456_v43 = vsel %vm454_vm15, %v445_v39, %v447_v28 }
  0xc2   : > { %510 = vmatpush.bf16.msra.mxu0 %v373_v41  ;;  %553 = vmatpush.bf16.msra.mxu3 %v456_v43 }
  0xc3   : > { %v443_v44 = vpop.permute.xlu2 %442 }
  0xc4   : > { %v455_v45 = vsel %vm454_vm15, %v443_v44, %v445_v39 }
  0xc5   : > { %525 = vmatpush.bf16.msra.mxu1 %v455_v45 }
  0xc8   : > { %v348_v46 = vpop.permute.xlu1 %347  ;;  %v346_v47 = vpop.permute.xlu0 %345 }
  0xc9   : > { %v353_v48 = vsel %vm349_vm0, %v346_v47, %v348_v46 }
  0xca   : > { %540 = vmatpush.bf16.msra.mxu2 %v353_v48 }
  0xcb   : > { %v426_v57 = vpop.permute.xlu2 %425 }
  0xd0   : > { %v430_v49 = vpop.permute.xlu1 %429  ;;  %v359_v50 = vpop.permute.xlu0 %358 }
  0xd1   : > { %v371_v52 = vsel %vm370_vm14, %v359_v50, %v361_v36  ;;  %v437_v53 = vsel %vm433_vm1, %v430_v49, %v432_v38 }
  0xd2   : > { %511 = vmatpush.bf16.msra.mxu0 %v371_v52  ;;  %554 = vmatpush.bf16.msra.mxu3 %v437_v53 }
  0xd3   : > { %v409_v4 = vpop.permute.xlu2 %408 }
  0xd8   : > { %v342_v54 = vpop.permute.xlu1 %341  ;;  %v340_v55 = vpop.permute.xlu0 %339 }
  0xd9   : > { %v351_v56 = vsel %vm349_vm0, %v340_v55, %v342_v54 }
  0xda   : > { %541 = vmatpush.bf16.msra.mxu2 %v351_v56 }
  0xdb   : > { %v403_v10 = vpop.permute.xlu2 %402 }
  0xde   : > { %542 = vmatpush.bf16.msra.mxu2 %v833_v42  ;;  %v698_v42 = vor.u32 %v707_v59, %v697_v58 }
  0xe0   : > { %v424_v60 = vpop.permute.xlu1 %423  ;;  %v344_v61 = vpop.permute.xlu0 %343 }
  0xe1   : > { %v352_v62 = vsel %vm349_vm0, %v344_v61, %v346_v47  ;;  %v435_v63 = vsel %vm433_vm1, %v424_v60, %v426_v57 }
  0xe2   : > { %512 = vmatpush.bf16.msra.mxu0 %v352_v62  ;;  %555 = vmatpush.bf16.msra.mxu3 %v435_v63 }
  0xe3   : > { %543 = vmatpush.bf16.msra.mxu2 %v840_v51  ;;  %v401_v20 = vpop.permute.xlu2 %400 }
  0xe6   : > { %544 = vmatmul.bf16.vlgmr.msra.gmra.mxu2 %v698_v42 }
  0xe8   : > { %v338_v6 = vpop.permute.xlu1 %337  ;;  %v428_v7 = vpop.permute.xlu0 %427 }
  0xe9   : > { %v350_v8 = vsel %vm349_vm0, %v338_v6, %v340_v55  ;;  %v436_v9 = vsel %vm433_vm1, %v428_v7, %v430_v49 }
  0xea   : > { %513 = vmatpush.bf16.msra.mxu0 %v350_v8  ;;  %526 = vmatpush.bf16.msra.mxu1 %v436_v9 }
  0xee   : > { %514 = vmatpush.bf16.msra.mxu0 %v847_v2  ;;  %v699_v2 = vld [vmem:[%s946_s1 + $0x8] sm:$0xf0] }
  0xef   : > { %v702_v19 = vor.u32 %v706_v14, %v699_v2 }
  0xf0   : > { %v422_v51 = vpop.permute.xlu1 %421  ;;  %v411_v11 = vpop.permute.xlu0 %410 }
  0xf1   : > { %v434_v12 = vsel %vm433_vm1, %v422_v51, %v424_v60  ;;  %v416_v13 = vsel %vm412_vm2, %v409_v4, %v411_v11 }
  0xf2   : > { %527 = vmatpush.bf16.msra.mxu1 %v434_v12  ;;  %556 = vmatpush.bf16.msra.mxu3 %v416_v13 }
  0xf3   : > { %515 = vmatpush.bf16.msra.mxu0 %v857_v5  ;;  %v413_v5 = vsel %vm412_vm2, %v401_v20, %v403_v10 }
  0xf6   : > { %516 = vmatmul.bf16.vlgmr.msra.gmra.mxu0 %v698_v42 }
  0xf8   : > { %v407_v15 = vpop.permute.xlu1 %406  ;;  %v405_v16 = vpop.permute.xlu0 %404 }
  0xf9   : > { %v415_v17 = vsel %vm412_vm2, %v407_v15, %v409_v4  ;;  %v414_v18 = vsel %vm412_vm2, %v403_v10, %v405_v16 }
  0xfa   : > { %528 = vmatpush.bf16.msra.mxu1 %v415_v17  ;;  %557 = vmatpush.bf16.msra.mxu3 %v414_v18 }
  0xfd   : > { %558 = vmatmul.bf16.vlgmr.msra.gmra.mxu3 %v702_v19 }
  0xfe   : > { %529 = vmatpush.bf16.msra.mxu1 %v413_v5 }
 0x100   : > { %v491_v22 = vpop.permute.xlu0 %490  ;;  %v496_v30 = vpop.permute.xlu1 %495 }
 0x101   : > { %530 = vmatmul.bf16.vlgmr.msra.gmra.mxu1 %v702_v19 }
 0x169   : > { %v545_v23 = vpop.f32.mrf.mxu2 }
 0x16a   : > { %v546_v25 = vadd.f32 %v545_v23, %v491_v22 }
 0x171   : > { %v547_v32 = vpop.f32.mrf.mxu2 }
 0x172   : > { %v548_v35 = vadd.f32 %v547_v32, %v496_v30 }
 0x173   : > { %v517_v21 = vpop.f32.mrf.mxu0 }
 0x174   : > { %v518_v24 = vadd.f32 %v517_v21, %v491_v22 }
 0x17b   : > { %v519_v31 = vpop.f32.mrf.mxu0 }
 0x17c   : > { %v520_v33 = vadd.f32 %v519_v31, %v496_v30 }
 0x17e   : > { %v531_v26 = vpop.f32.mrf.mxu1 }
 0x17f   : > { %v532_v27 = vadd.f32 %v531_v26, %v518_v24 }
 0x180   : > { %v559_v28 = vpop.f32.mrf.mxu3 }
 0x181   : > { %564 = vst [vmem:[%s241_s19] sm:$0xff] %v532_v27  ;;  %v560_v29 = vadd.f32 %v559_v28, %v546_v25 }
 0x183   : > { %565 = vst [vmem:[%s241_s19 + $0x8] sm:$0xff] %v560_v29 }
 0x186   : > { %v533_v34 = vpop.f32.mrf.mxu1 }
 0x187   : > { %v534_v36 = vadd.f32 %v533_v34, %v520_v33 }
 0x188   : > { %v561_v37 = vpop.f32.mrf.mxu3 }
 0x189   : > { %566 = vst [vmem:[%s241_s19 + $0x10] sm:$0xff] %v534_v36  ;;  %v562_v38 = vadd.f32 %v561_v37, %v548_v35 }
 0x18b   : > { %567 = vst [vmem:[%s241_s19 + $0x18] sm:$0xff] %v562_v38 }
 0x18c PF: > { %s13_s14 = sadd.s32 1, %s765_s14   ;;  %s949_s12 = smov %s761_s13 }
 0x18d   : > { %p10_p5 = scmp.ge.s32.totalorder %s13_s14, 4   ;;  %s950_s13 = smov %s952_s15 }
 0x18f   :  { %12 = sbr.rel (!%p10_p5) target bundleno = 2 (0x2), region = 68 }

// kernel: _lambda_.51
= control target key start
LH: loop header
LB: loop body
LE: loop exit
PB: predicated region body
PF: predicated region fallthrough
CT: control target
= control target key end

     0   :  { %s565_s12 = smov 0   ;;  %s567_s13 = smov 0   ;;  %s614_s0 = inlined_call_operand.vmem [shape: bf16[2,16,256], index: 0, kind: input, shape index: {}]   ;;  %s615_s1 = inlined_call_operand.vmem [shape: bf16[16,112], index: 1, kind: input, shape index: {}]   ;;  %s616_s2 = inlined_call_operand.vmem [shape: f32[16,1], index: 2, kind: input, shape index: {}]   ;;  %s617_s3 = inlined_call_operand.vmem [shape: f32[2,16,128], index: 3, kind: output, shape index: {}]  }
   0x1   :  { %s569_s14 = smov 0  }
   0x2 LB: > { %s25_s15 = sadd.s32 1, %s532_s13  ;;  %p466_p0 = scmp.ge.s32.totalorder %s536_s14, 1  ;;  %s536_s14 = sphi %s569_s14, %s13_s14   ;;  %s532_s13 = sphi %s567_s13, %s619_s13   ;;  %s528_s12 = sphi %s565_s12, %s618_s12  }
   0x3   : > { %p27_p1 = scmp.ge.s32.totalorder %s25_s15, 2  ;;  %p173_p2 = scmp.lt.s32.totalorder %s536_s14, 3 }
   0x5   : > { %s621_s15 = smov (%p27_p1, %s25_s15), 0  ;;  %p174_p3 = pnand %p466_p0, %p173_p2 }
   0x6   : > { %p211_p4 = scmp.lt.s32.totalorder (!%p174_p3), %s528_s12, 1  ;;  %s538_s20 = smov (!%p174_p3), 123  }
   0x7   : > { %177 = sbr.rel (%p174_p3) target bundleno = 317 (0x13d), region = 32  ;;  %s539_s21 = smov (!%p174_p3), 122  }
   0x8   : > { %s540_s22 = smov (!%p174_p3), 124   ;;  %s541_s23 = smov (!%p174_p3), 125  }
   0x9   : > { %s542_s24 = smov (!%p174_p3), 126   ;;  %s543_s25 = smov (!%p174_p3), 127  }
   0xc   : > { %s623_s12 = smov (!%p211_p4, %s528_s12), 1  ;;  %v312_v26 = vld [vmem:[%s616_s2] sm:$0xff]  ;;  %v313_v27 = vld [vmem:[%s616_s2 + $0x8] sm:$0xff]  ;;  %vm307_vm4 = vcmask 998400   ;;  %v544_v28 = vmov 0   ;;  %vm300_vm5 = vcmask 1006592  }
   0xd   : > { %s478_s16 = sshll.u32 %s623_s12, 4  ;;  %512 = vset.pattern.permute.xlu0 %v544_v28  ;;  %513 = vset.pattern.permute.xlu1 %v544_v28  ;;  %vm293_vm6 = vcmask 1014784   ;;  %vm286_vm7 = vcmask 1022976   ;;  %vm279_vm8 = vcmask 1031168   ;;  %vm272_vm9 = vcmask 1039360   ;;  %v480_v43 = vld [vmem:[%s615_s1] sm:$0xff] }
   0xe   : > { %s215_s19 = scalar_lea.vmem %s614_s0, %s478_s16  ;;  %vm329_vm10 = vcmask 916480   ;;  %s236_s7 = scalar_lea.vmem %s617_s3, %s478_s16 }
   0xf   : > { %v239_v0 = vld [vmem:[%s215_s19] sm:$0xff]  ;;  %v240_v1 = vld [vmem:[%s215_s19 + $0x8] sm:$0xff] }
  0x10   : > { %v241_v2 = vunpack.c.l.bf16 %v239_v0  ;;  %v242_v3 = vunpack.c.h.bf16 %v239_v0  ;;  %v243_v4 = vunpack.c.l.bf16 %v240_v1  ;;  %v244_v5 = vunpack.c.h.bf16 %v240_v1 }
  0x12   : > { %vm245_vm0 = vcmp.ge.f32.partialorder %v241_v2, 0.0  ;;  %vm246_vm1 = vcmp.ge.f32.partialorder %v242_v3, 0.0  ;;  %vm247_vm2 = vcmp.ge.f32.partialorder %v243_v4, 0.0  ;;  %vm248_vm3 = vcmp.ge.f32.partialorder %v244_v5, 0.0 }
  0x13   : > { %v249_v6 = vmul.f32 0.1, %v241_v2  ;;  %v250_v7 = vmul.f32 0.1, %v242_v3  ;;  %v251_v8 = vmul.f32 0.1, %v243_v4 }
  0x14   : > { %v252_v9 = vmul.f32 0.1, %v244_v5 }
  0x15   : > { %v253_v10 = vsel %vm245_vm0, %v241_v2, %v249_v6  ;;  %v254_v11 = vsel %vm246_vm1, %v242_v3, %v250_v7  ;;  %v255_v12 = vsel %vm247_vm2, %v243_v4, %v251_v8 }
  0x16   : > { %v256_v13 = vsel %vm248_vm3, %v244_v5, %v252_v9  ;;  %v257_v14 = vpack.c.bf16 %v254_v11, %v253_v10 }
  0x17   : > { %v258_v15 = vpack.c.bf16 %v256_v13, %v255_v12 }
  0x18   : > { %v261_v16 = vunpack.c.l.b16 %v257_v14  ;;  %v265_v19 = vunpack.c.h.b16 %v257_v14 }
  0x19   : > { %v262_v17 = vunpack.c.l.b16 %v258_v15  ;;  %v266_v20 = vunpack.c.h.b16 %v258_v15 }
  0x1b   : > { %v263_v18 = vpack.c.b16 %v262_v17, %v261_v16  ;;  %v267_v21 = vpack.c.b16 %v266_v20, %v265_v19 }
  0x1d   : > { %296 = vrot.lane.b32.xlu1 %v263_v18, %s538_s20  ;;  %303 = vrot.lane.b32.xlu0 %v263_v18, %s539_s21 }
  0x1e   : > { %289 = vrot.lane.b32.xlu2 %v263_v18, %s540_s22 }
  0x25   : > { %298 = vrot.lane.b32.xlu1 %v267_v21, %s538_s20  ;;  %305 = vrot.lane.b32.xlu0 %v267_v21, %s539_s21 }
  0x26   : > { %291 = vrot.lane.b32.xlu2 %v267_v21, %s540_s22 }
  0x2d   : > { %284 = vrot.lane.b32.xlu1 %v267_v21, %s541_s23  ;;  %282 = vrot.lane.b32.xlu0 %v263_v18, %s541_s23 }
  0x2e   : > { %275 = vrot.lane.b32.xlu2 %v263_v18, %s542_s24 }
  0x35   : > { %277 = vrot.lane.b32.xlu0 %v267_v21, %s542_s24  ;;  %268 = vrot.lane.b32.xlu1 %v263_v18, %s543_s25 }
  0x36   : > { %270 = vrot.lane.b32.xlu2 %v267_v21, %s543_s25 }
  0x3d   : > { %316 = vperm.xlu0 %512, %v312_v26   ;;  %321 = vperm.xlu1 %513, %v313_v27  }
  0x78   : > { %v290_v22 = vpop.permute.xlu2 %289 }
  0x80   : > { %v292_v25 = vpop.permute.xlu2 %291 }
  0x81   : > { %v294_v36 = vsel %vm293_vm6, %v290_v22, %v292_v25 }
  0x88   : > { %v276_v33 = vpop.permute.xlu2 %275 }
  0x8f   : > { %v297_v23 = vpop.permute.xlu1 %296  ;;  %v304_v24 = vpop.permute.xlu0 %303 }
  0x90   : > { %v271_v38 = vpop.permute.xlu2 %270 }
  0x97   : > { %v299_v29 = vpop.permute.xlu1 %298  ;;  %v306_v30 = vpop.permute.xlu0 %305 }
  0x98   : > { %v308_v31 = vsel %vm307_vm4, %v304_v24, %v306_v30  ;;  %v301_v32 = vsel %vm300_vm5, %v297_v23, %v299_v29 }
  0x99   : > { %334 = vmatpush.bf16.msra.mxu0 %v308_v31 }
  0x9d   : > { %335 = vmatpush.bf16.msra.mxu0 %v301_v32 }
  0x9f   : > { %v285_v34 = vpop.permute.xlu1 %284  ;;  %v283_v35 = vpop.permute.xlu0 %282 }
  0xa0   : > { %v287_v37 = vsel %vm286_vm7, %v283_v35, %v285_v34 }
  0xa1   : > { %336 = vmatpush.bf16.msra.mxu0 %v294_v36 }
  0xa5   : > { %337 = vmatpush.bf16.msra.mxu0 %v287_v37 }
  0xa7   : > { %v278_v39 = vpop.permute.xlu0 %277  ;;  %v269_v40 = vpop.permute.xlu1 %268 }
  0xa8   : > { %v280_v41 = vsel %vm279_vm8, %v276_v33, %v278_v39  ;;  %v273_v42 = vsel %vm272_vm9, %v269_v40, %v271_v38 }
  0xa9   : > { %338 = vmatpush.bf16.msra.mxu0 %v280_v41 }
  0xad   : > { %339 = vmatpush.bf16.msra.mxu0 %v273_v42 }
  0xaf   : > { %v317_v44 = vpop.permute.xlu0 %316  ;;  %v322_v47 = vpop.permute.xlu1 %321 }
  0xb1   : > { %340 = vmatpush.bf16.msra.mxu0 %v263_v18 }
  0xb4   : > { %475 = vmatmul.msk.bf16.vlgmr.msra.gmra.mxu0 %vm329_vm10, %v480_v43 }
 0x131   : > { %v342_v45 = vpop.f32.mrf.mxu0 }
 0x132   : > { %v343_v46 = vadd.f32 %v342_v45, %v317_v44 }
 0x134   : > { %347 = vst [vmem:[%s236_s7] sm:$0xff] %v343_v46 }
 0x139   : > { %v344_v48 = vpop.f32.mrf.mxu0 }
 0x13a   : > { %v345_v49 = vadd.f32 %v344_v48, %v322_v47 }
 0x13c   : > { %348 = vst [vmem:[%s236_s7 + $0x8] sm:$0xff] %v345_v49 }
 0x13d PF: > { %s13_s14 = sadd.s32 1, %s536_s14   ;;  %s618_s12 = smov %s532_s13 }
 0x13e   : > { %p10_p5 = scmp.ge.s32.totalorder %s13_s14, 4   ;;  %s619_s13 = smov %s621_s15 }
 0x140   :  { %12 = sbr.rel (!%p10_p5) target bundleno = 2 (0x2), region = 68 }

// kernel: _lambda_.45
= control target key start
LH: loop header
LB: loop body
LE: loop exit
PB: predicated region body
PF: predicated region fallthrough
CT: control target
= control target key end

     0   :  { %s529_s12 = smov 0   ;;  %s531_s13 = smov 0   ;;  %s578_s0 = inlined_call_operand.vmem [shape: bf16[2,16,256], index: 0, kind: input, shape index: {}]   ;;  %s579_s1 = inlined_call_operand.vmem [shape: bf16[16,48], index: 1, kind: input, shape index: {}]   ;;  %s580_s2 = inlined_call_operand.vmem [shape: f32[16,1], index: 2, kind: input, shape index: {}]   ;;  %s581_s3 = inlined_call_operand.vmem [shape: f32[2,16,128], index: 3, kind: output, shape index: {}]  }
   0x1   :  { %s533_s14 = smov 0  }
   0x2 LB: > { %s25_s15 = sadd.s32 1, %s500_s13  ;;  %p438_p0 = scmp.ge.s32.totalorder %s504_s14, 1  ;;  %s504_s14 = sphi %s533_s14, %s13_s14   ;;  %s500_s13 = sphi %s531_s13, %s583_s13   ;;  %s496_s12 = sphi %s529_s12, %s582_s12  }
   0x3   : > { %p27_p1 = scmp.ge.s32.totalorder %s25_s15, 2  ;;  %p173_p2 = scmp.lt.s32.totalorder %s504_s14, 3 }
   0x5   : > { %s585_s15 = smov (%p27_p1, %s25_s15), 0  ;;  %p174_p3 = pnand %p438_p0, %p173_p2 }
   0x6   : > { %p211_p4 = scmp.lt.s32.totalorder (!%p174_p3), %s496_s12, 1  ;;  %s506_s20 = smov (!%p174_p3), 127  }
   0x7   : > { %177 = sbr.rel (%p174_p3) target bundleno = 301 (0x12d), region = 32  ;;  %s507_s21 = smov (!%p174_p3), 126  }
   0xc   : > { %s587_s12 = smov (!%p211_p4, %s496_s12), 1  ;;  %v284_v22 = vld [vmem:[%s580_s2] sm:$0xff]  ;;  %v508_v23 = vmov 0   ;;  %v285_v24 = vld [vmem:[%s580_s2 + $0x8] sm:$0xff]  ;;  %vm279_vm4 = vcmask 1031168   ;;  %vm272_vm5 = vcmask 1039360  }
   0xd   : > { %s450_s16 = sshll.u32 %s587_s12, 4  ;;  %480 = vset.pattern.permute.xlu2 %v508_v23  ;;  %481 = vset.pattern.permute.xlu0 %v508_v23  ;;  %v452_v31 = vld [vmem:[%s579_s1] sm:$0xff]  ;;  %vm301_vm6 = vcmask 392192  }
   0xe   : > { %s215_s19 = scalar_lea.vmem %s578_s0, %s450_s16  ;;  %288 = vperm.xlu2 %480, %v284_v22   ;;  %s236_s30 = scalar_lea.vmem %s581_s3, %s450_s16 }
   0xf   : > { %v239_v0 = vld [vmem:[%s215_s19] sm:$0xff]  ;;  %v240_v1 = vld [vmem:[%s215_s19 + $0x8] sm:$0xff] }
  0x10   : > { %v241_v2 = vunpack.c.l.bf16 %v239_v0  ;;  %v242_v3 = vunpack.c.h.bf16 %v239_v0  ;;  %v243_v4 = vunpack.c.l.bf16 %v240_v1  ;;  %v244_v5 = vunpack.c.h.bf16 %v240_v1 }
  0x12   : > { %vm245_vm0 = vcmp.ge.f32.partialorder %v241_v2, 0.0  ;;  %vm246_vm1 = vcmp.ge.f32.partialorder %v242_v3, 0.0  ;;  %vm247_vm2 = vcmp.ge.f32.partialorder %v243_v4, 0.0  ;;  %vm248_vm3 = vcmp.ge.f32.partialorder %v244_v5, 0.0 }
  0x13   : > { %v249_v6 = vmul.f32 0.1, %v241_v2  ;;  %v250_v7 = vmul.f32 0.1, %v242_v3  ;;  %v251_v8 = vmul.f32 0.1, %v243_v4 }
  0x14   : > { %v252_v9 = vmul.f32 0.1, %v244_v5 }
  0x15   : > { %v253_v10 = vsel %vm245_vm0, %v241_v2, %v249_v6  ;;  %v254_v11 = vsel %vm246_vm1, %v242_v3, %v250_v7  ;;  %v255_v12 = vsel %vm247_vm2, %v243_v4, %v251_v8 }
  0x16   : > { %v256_v13 = vsel %vm248_vm3, %v244_v5, %v252_v9  ;;  %v257_v14 = vpack.c.bf16 %v254_v11, %v253_v10  ;;  %293 = vperm.xlu2 %480, %v285_v24  }
  0x17   : > { %v258_v15 = vpack.c.bf16 %v256_v13, %v255_v12 }
  0x18   : > { %v261_v16 = vunpack.c.l.b16 %v257_v14  ;;  %v265_v19 = vunpack.c.h.b16 %v257_v14 }
  0x19   : > { %v262_v17 = vunpack.c.l.b16 %v258_v15  ;;  %v266_v20 = vunpack.c.h.b16 %v258_v15 }
  0x1b   : > { %v263_v18 = vpack.c.b16 %v262_v17, %v261_v16  ;;  %v267_v21 = vpack.c.b16 %v266_v20, %v265_v19 }
  0x1d   : > { %268 = vrot.lane.b32.xlu1 %v263_v18, %s506_s20  ;;  %275 = vrot.lane.b32.xlu0 %v263_v18, %s507_s21 }
  0x25   : > { %270 = vrot.lane.b32.xlu1 %v267_v21, %s506_s20  ;;  %277 = vrot.lane.b32.xlu0 %v267_v21, %s507_s21 }
  0x68   : > { %v289_v32 = vpop.permute.xlu2 %288 }
  0x70   : > { %v294_v35 = vpop.permute.xlu2 %293 }
  0x8f   : > { %v269_v25 = vpop.permute.xlu1 %268  ;;  %v276_v26 = vpop.permute.xlu0 %275 }
  0x97   : > { %v278_v27 = vpop.permute.xlu0 %277  ;;  %v271_v29 = vpop.permute.xlu1 %270 }
  0x98   : > { %v280_v28 = vsel %vm279_vm4, %v276_v26, %v278_v27  ;;  %v273_v30 = vsel %vm272_vm5, %v269_v25, %v271_v29 }
  0x99   : > { %310 = vmatpush.bf16.msra.mxu0 %v280_v28 }
  0x9d   : > { %311 = vmatpush.bf16.msra.mxu0 %v273_v30 }
  0xa1   : > { %312 = vmatpush.bf16.msra.mxu0 %v263_v18 }
  0xa4   : > { %447 = vmatmul.msk.bf16.vlgmr.msra.gmra.mxu0 %vm301_vm6, %v452_v31 }
 0x121   : > { %v314_v33 = vpop.f32.mrf.mxu0 }
 0x122   : > { %v315_v34 = vadd.f32 %v314_v33, %v289_v32 }
 0x124   : > { %319 = vst [vmem:[%s236_s30] sm:$0xff] %v315_v34 }
 0x129   : > { %v316_v36 = vpop.f32.mrf.mxu0 }
 0x12a   : > { %v317_v37 = vadd.f32 %v316_v36, %v294_v35 }
 0x12c   : > { %320 = vst [vmem:[%s236_s30 + $0x8] sm:$0xff] %v317_v37 }
 0x12d PF: > { %s13_s14 = sadd.s32 1, %s504_s14   ;;  %s582_s12 = smov %s500_s13 }
 0x12e   : > { %p10_p5 = scmp.ge.s32.totalorder %s13_s14, 4   ;;  %s583_s13 = smov %s585_s15 }
 0x130   :  { %12 = sbr.rel (!%p10_p5) target bundleno = 2 (0x2), region = 68 }

// kernel: _lambda_.47
= control target key start
LH: loop header
LB: loop body
LE: loop exit
PB: predicated region body
PF: predicated region fallthrough
CT: control target
= control target key end

     0   :  { %s529_s12 = smov 0   ;;  %s531_s13 = smov 0   ;;  %s578_s0 = inlined_call_operand.vmem [shape: bf16[2,16,256], index: 0, kind: input, shape index: {}]   ;;  %s579_s1 = inlined_call_operand.vmem [shape: bf16[16,48], index: 1, kind: input, shape index: {}]   ;;  %s580_s2 = inlined_call_operand.vmem [shape: f32[16,1], index: 2, kind: input, shape index: {}]   ;;  %s581_s3 = inlined_call_operand.vmem [shape: f32[2,16,128], index: 3, kind: output, shape index: {}]  }
   0x1   :  { %s533_s14 = smov 0  }
   0x2 LB: > { %s25_s15 = sadd.s32 1, %s500_s13  ;;  %p438_p0 = scmp.ge.s32.totalorder %s504_s14, 1  ;;  %s504_s14 = sphi %s533_s14, %s13_s14   ;;  %s500_s13 = sphi %s531_s13, %s583_s13   ;;  %s496_s12 = sphi %s529_s12, %s582_s12  }
   0x3   : > { %p27_p1 = scmp.ge.s32.totalorder %s25_s15, 2  ;;  %p173_p2 = scmp.lt.s32.totalorder %s504_s14, 3 }
   0x5   : > { %s585_s15 = smov (%p27_p1, %s25_s15), 0  ;;  %p174_p3 = pnand %p438_p0, %p173_p2 }
   0x6   : > { %p211_p4 = scmp.lt.s32.totalorder (!%p174_p3), %s496_s12, 1  ;;  %s506_s20 = smov (!%p174_p3), 125  }
   0x7   : > { %177 = sbr.rel (%p174_p3) target bundleno = 301 (0x12d), region = 32  ;;  %s507_s21 = smov (!%p174_p3), 122  }
   0xc   : > { %s587_s12 = smov (!%p211_p4, %s496_s12), 1  ;;  %v284_v22 = vld [vmem:[%s580_s2] sm:$0xff]  ;;  %v508_v23 = vmov 0   ;;  %v285_v24 = vld [vmem:[%s580_s2 + $0x8] sm:$0xff]  ;;  %vm279_vm4 = vcmask 998400   ;;  %vm272_vm5 = vcmask 1022976  }
   0xd   : > { %s450_s16 = sshll.u32 %s587_s12, 4  ;;  %480 = vset.pattern.permute.xlu2 %v508_v23  ;;  %481 = vset.pattern.permute.xlu0 %v508_v23  ;;  %v452_v31 = vld [vmem:[%s579_s1] sm:$0xff]  ;;  %vm301_vm6 = vcmask 392192  }
   0xe   : > { %s215_s19 = scalar_lea.vmem %s578_s0, %s450_s16  ;;  %288 = vperm.xlu2 %480, %v284_v22   ;;  %s236_s30 = scalar_lea.vmem %s581_s3, %s450_s16 }
   0xf   : > { %v239_v0 = vld [vmem:[%s215_s19] sm:$0xff]  ;;  %v240_v1 = vld [vmem:[%s215_s19 + $0x8] sm:$0xff] }
  0x10   : > { %v241_v2 = vunpack.c.l.bf16 %v239_v0  ;;  %v242_v3 = vunpack.c.h.bf16 %v239_v0  ;;  %v243_v4 = vunpack.c.l.bf16 %v240_v1  ;;  %v244_v5 = vunpack.c.h.bf16 %v240_v1 }
  0x12   : > { %vm245_vm0 = vcmp.ge.f32.partialorder %v241_v2, 0.0  ;;  %vm246_vm1 = vcmp.ge.f32.partialorder %v242_v3, 0.0  ;;  %vm247_vm2 = vcmp.ge.f32.partialorder %v243_v4, 0.0  ;;  %vm248_vm3 = vcmp.ge.f32.partialorder %v244_v5, 0.0 }
  0x13   : > { %v249_v6 = vmul.f32 0.1, %v241_v2  ;;  %v250_v7 = vmul.f32 0.1, %v242_v3  ;;  %v251_v8 = vmul.f32 0.1, %v243_v4 }
  0x14   : > { %v252_v9 = vmul.f32 0.1, %v244_v5 }
  0x15   : > { %v253_v10 = vsel %vm245_vm0, %v241_v2, %v249_v6  ;;  %v254_v11 = vsel %vm246_vm1, %v242_v3, %v250_v7  ;;  %v255_v12 = vsel %vm247_vm2, %v243_v4, %v251_v8 }
  0x16   : > { %v256_v13 = vsel %vm248_vm3, %v244_v5, %v252_v9  ;;  %v257_v14 = vpack.c.bf16 %v254_v11, %v253_v10  ;;  %293 = vperm.xlu2 %480, %v285_v24  }
  0x17   : > { %v258_v15 = vpack.c.bf16 %v256_v13, %v255_v12 }
  0x18   : > { %v261_v16 = vunpack.c.l.b16 %v257_v14  ;;  %v265_v19 = vunpack.c.h.b16 %v257_v14 }
  0x19   : > { %v262_v17 = vunpack.c.l.b16 %v258_v15  ;;  %v266_v20 = vunpack.c.h.b16 %v258_v15 }
  0x1b   : > { %v263_v18 = vpack.c.b16 %v262_v17, %v261_v16  ;;  %v267_v21 = vpack.c.b16 %v266_v20, %v265_v19 }
  0x1d   : > { %268 = vrot.lane.b32.xlu1 %v263_v18, %s506_s20  ;;  %275 = vrot.lane.b32.xlu0 %v263_v18, %s507_s21 }
  0x25   : > { %270 = vrot.lane.b32.xlu1 %v267_v21, %s506_s20  ;;  %277 = vrot.lane.b32.xlu0 %v267_v21, %s507_s21 }
  0x68   : > { %v289_v32 = vpop.permute.xlu2 %288 }
  0x70   : > { %v294_v35 = vpop.permute.xlu2 %293 }
  0x8f   : > { %v269_v25 = vpop.permute.xlu1 %268  ;;  %v276_v26 = vpop.permute.xlu0 %275 }
  0x97   : > { %v278_v27 = vpop.permute.xlu0 %277  ;;  %v271_v29 = vpop.permute.xlu1 %270 }
  0x98   : > { %v280_v28 = vsel %vm279_vm4, %v276_v26, %v278_v27  ;;  %v273_v30 = vsel %vm272_vm5, %v269_v25, %v271_v29 }
  0x99   : > { %310 = vmatpush.bf16.msra.mxu0 %v280_v28 }
  0x9d   : > { %311 = vmatpush.bf16.msra.mxu0 %v273_v30 }
  0xa1   : > { %312 = vmatpush.bf16.msra.mxu0 %v263_v18 }
  0xa4   : > { %447 = vmatmul.msk.bf16.vlgmr.msra.gmra.mxu0 %vm301_vm6, %v452_v31 }
 0x121   : > { %v314_v33 = vpop.f32.mrf.mxu0 }
 0x122   : > { %v315_v34 = vadd.f32 %v314_v33, %v289_v32 }
 0x124   : > { %319 = vst [vmem:[%s236_s30] sm:$0xff] %v315_v34 }
 0x129   : > { %v316_v36 = vpop.f32.mrf.mxu0 }
 0x12a   : > { %v317_v37 = vadd.f32 %v316_v36, %v294_v35 }
 0x12c   : > { %320 = vst [vmem:[%s236_s30 + $0x8] sm:$0xff] %v317_v37 }
 0x12d PF: > { %s13_s14 = sadd.s32 1, %s504_s14   ;;  %s582_s12 = smov %s500_s13 }
 0x12e   : > { %p10_p5 = scmp.ge.s32.totalorder %s13_s14, 4   ;;  %s583_s13 = smov %s585_s15 }
 0x130   :  { %12 = sbr.rel (!%p10_p5) target bundleno = 2 (0x2), region = 68 }

// kernel: _lambda_.53
= control target key start
LH: loop header
LB: loop body
LE: loop exit
PB: predicated region body
PF: predicated region fallthrough
CT: control target
= control target key end

     0   :  { %s565_s12 = smov 0   ;;  %s567_s13 = smov 0   ;;  %s614_s0 = inlined_call_operand.vmem [shape: bf16[2,16,256], index: 0, kind: input, shape index: {}]   ;;  %s615_s1 = inlined_call_operand.vmem [shape: bf16[16,112], index: 1, kind: input, shape index: {}]   ;;  %s616_s2 = inlined_call_operand.vmem [shape: f32[16,1], index: 2, kind: input, shape index: {}]   ;;  %s617_s3 = inlined_call_operand.vmem [shape: f32[2,16,128], index: 3, kind: output, shape index: {}]  }
   0x1   :  { %s569_s14 = smov 0  }
   0x2 LB: > { %s25_s15 = sadd.s32 1, %s532_s13  ;;  %p466_p0 = scmp.ge.s32.totalorder %s536_s14, 1  ;;  %s536_s14 = sphi %s569_s14, %s13_s14   ;;  %s532_s13 = sphi %s567_s13, %s619_s13   ;;  %s528_s12 = sphi %s565_s12, %s618_s12  }
   0x3   : > { %p27_p1 = scmp.ge.s32.totalorder %s25_s15, 2  ;;  %p173_p2 = scmp.lt.s32.totalorder %s536_s14, 3 }
   0x5   : > { %s621_s15 = smov (%p27_p1, %s25_s15), 0  ;;  %p174_p3 = pnand %p466_p0, %p173_p2 }
   0x6   : > { %p211_p4 = scmp.lt.s32.totalorder (!%p174_p3), %s528_s12, 1  ;;  %s538_s20 = smov (!%p174_p3), 113  }
   0x7   : > { %177 = sbr.rel (%p174_p3) target bundleno = 317 (0x13d), region = 32  ;;  %s539_s21 = smov (!%p174_p3), 110  }
   0x8   : > { %s540_s22 = smov (!%p174_p3), 116   ;;  %s541_s23 = smov (!%p174_p3), 119  }
   0x9   : > { %s542_s24 = smov (!%p174_p3), 122   ;;  %s543_s25 = smov (!%p174_p3), 125  }
   0xc   : > { %s623_s12 = smov (!%p211_p4, %s528_s12), 1  ;;  %v312_v26 = vld [vmem:[%s616_s2] sm:$0xff]  ;;  %v313_v27 = vld [vmem:[%s616_s2 + $0x8] sm:$0xff]  ;;  %vm307_vm4 = vcmask 900096   ;;  %v544_v28 = vmov 0   ;;  %vm300_vm5 = vcmask 924672  }
   0xd   : > { %s478_s16 = sshll.u32 %s623_s12, 4  ;;  %512 = vset.pattern.permute.xlu0 %v544_v28  ;;  %513 = vset.pattern.permute.xlu1 %v544_v28  ;;  %vm293_vm6 = vcmask 949248   ;;  %vm286_vm7 = vcmask 973824   ;;  %vm279_vm8 = vcmask 998400   ;;  %vm272_vm9 = vcmask 1022976   ;;  %v480_v43 = vld [vmem:[%s615_s1] sm:$0xff] }
   0xe   : > { %s215_s19 = scalar_lea.vmem %s614_s0, %s478_s16  ;;  %vm329_vm10 = vcmask 916480   ;;  %s236_s7 = scalar_lea.vmem %s617_s3, %s478_s16 }
   0xf   : > { %v239_v0 = vld [vmem:[%s215_s19] sm:$0xff]  ;;  %v240_v1 = vld [vmem:[%s215_s19 + $0x8] sm:$0xff] }
  0x10   : > { %v241_v2 = vunpack.c.l.bf16 %v239_v0  ;;  %v242_v3 = vunpack.c.h.bf16 %v239_v0  ;;  %v243_v4 = vunpack.c.l.bf16 %v240_v1  ;;  %v244_v5 = vunpack.c.h.bf16 %v240_v1 }
  0x12   : > { %vm245_vm0 = vcmp.ge.f32.partialorder %v241_v2, 0.0  ;;  %vm246_vm1 = vcmp.ge.f32.partialorder %v242_v3, 0.0  ;;  %vm247_vm2 = vcmp.ge.f32.partialorder %v243_v4, 0.0  ;;  %vm248_vm3 = vcmp.ge.f32.partialorder %v244_v5, 0.0 }
  0x13   : > { %v249_v6 = vmul.f32 0.1, %v241_v2  ;;  %v250_v7 = vmul.f32 0.1, %v242_v3  ;;  %v251_v8 = vmul.f32 0.1, %v243_v4 }
  0x14   : > { %v252_v9 = vmul.f32 0.1, %v244_v5 }
  0x15   : > { %v253_v10 = vsel %vm245_vm0, %v241_v2, %v249_v6  ;;  %v254_v11 = vsel %vm246_vm1, %v242_v3, %v250_v7  ;;  %v255_v12 = vsel %vm247_vm2, %v243_v4, %v251_v8 }
  0x16   : > { %v256_v13 = vsel %vm248_vm3, %v244_v5, %v252_v9  ;;  %v257_v14 = vpack.c.bf16 %v254_v11, %v253_v10 }
  0x17   : > { %v258_v15 = vpack.c.bf16 %v256_v13, %v255_v12 }
  0x18   : > { %v261_v16 = vunpack.c.l.b16 %v257_v14  ;;  %v265_v19 = vunpack.c.h.b16 %v257_v14 }
  0x19   : > { %v262_v17 = vunpack.c.l.b16 %v258_v15  ;;  %v266_v20 = vunpack.c.h.b16 %v258_v15 }
  0x1b   : > { %v263_v18 = vpack.c.b16 %v262_v17, %v261_v16  ;;  %v267_v21 = vpack.c.b16 %v266_v20, %v265_v19 }
  0x1d   : > { %296 = vrot.lane.b32.xlu1 %v263_v18, %s538_s20  ;;  %303 = vrot.lane.b32.xlu0 %v263_v18, %s539_s21 }
  0x1e   : > { %289 = vrot.lane.b32.xlu2 %v263_v18, %s540_s22 }
  0x25   : > { %298 = vrot.lane.b32.xlu1 %v267_v21, %s538_s20  ;;  %305 = vrot.lane.b32.xlu0 %v267_v21, %s539_s21 }
  0x26   : > { %291 = vrot.lane.b32.xlu2 %v267_v21, %s540_s22 }
  0x2d   : > { %284 = vrot.lane.b32.xlu1 %v267_v21, %s541_s23  ;;  %282 = vrot.lane.b32.xlu0 %v263_v18, %s541_s23 }
  0x2e   : > { %275 = vrot.lane.b32.xlu2 %v263_v18, %s542_s24 }
  0x35   : > { %277 = vrot.lane.b32.xlu0 %v267_v21, %s542_s24  ;;  %268 = vrot.lane.b32.xlu1 %v263_v18, %s543_s25 }
  0x36   : > { %270 = vrot.lane.b32.xlu2 %v267_v21, %s543_s25 }
  0x3d   : > { %316 = vperm.xlu0 %512, %v312_v26   ;;  %321 = vperm.xlu1 %513, %v313_v27  }
  0x78   : > { %v290_v22 = vpop.permute.xlu2 %289 }
  0x80   : > { %v292_v25 = vpop.permute.xlu2 %291 }
  0x81   : > { %v294_v36 = vsel %vm293_vm6, %v290_v22, %v292_v25 }
  0x88   : > { %v276_v33 = vpop.permute.xlu2 %275 }
  0x8f   : > { %v297_v23 = vpop.permute.xlu1 %296  ;;  %v304_v24 = vpop.permute.xlu0 %303 }
  0x90   : > { %v271_v38 = vpop.permute.xlu2 %270 }
  0x97   : > { %v299_v29 = vpop.permute.xlu1 %298  ;;  %v306_v30 = vpop.permute.xlu0 %305 }
  0x98   : > { %v308_v31 = vsel %vm307_vm4, %v304_v24, %v306_v30  ;;  %v301_v32 = vsel %vm300_vm5, %v297_v23, %v299_v29 }
  0x99   : > { %334 = vmatpush.bf16.msra.mxu0 %v308_v31 }
  0x9d   : > { %335 = vmatpush.bf16.msra.mxu0 %v301_v32 }
  0x9f   : > { %v285_v34 = vpop.permute.xlu1 %284  ;;  %v283_v35 = vpop.permute.xlu0 %282 }
  0xa0   : > { %v287_v37 = vsel %vm286_vm7, %v283_v35, %v285_v34 }
  0xa1   : > { %336 = vmatpush.bf16.msra.mxu0 %v294_v36 }
  0xa5   : > { %337 = vmatpush.bf16.msra.mxu0 %v287_v37 }
  0xa7   : > { %v278_v39 = vpop.permute.xlu0 %277  ;;  %v269_v40 = vpop.permute.xlu1 %268 }
  0xa8   : > { %v280_v41 = vsel %vm279_vm8, %v276_v33, %v278_v39  ;;  %v273_v42 = vsel %vm272_vm9, %v269_v40, %v271_v38 }
  0xa9   : > { %338 = vmatpush.bf16.msra.mxu0 %v280_v41 }
  0xad   : > { %339 = vmatpush.bf16.msra.mxu0 %v273_v42 }
  0xaf   : > { %v317_v44 = vpop.permute.xlu0 %316  ;;  %v322_v47 = vpop.permute.xlu1 %321 }
  0xb1   : > { %340 = vmatpush.bf16.msra.mxu0 %v263_v18 }
  0xb4   : > { %475 = vmatmul.msk.bf16.vlgmr.msra.gmra.mxu0 %vm329_vm10, %v480_v43 }
 0x131   : > { %v342_v45 = vpop.f32.mrf.mxu0 }
 0x132   : > { %v343_v46 = vadd.f32 %v342_v45, %v317_v44 }
 0x134   : > { %347 = vst [vmem:[%s236_s7] sm:$0xff] %v343_v46 }
 0x139   : > { %v344_v48 = vpop.f32.mrf.mxu0 }
 0x13a   : > { %v345_v49 = vadd.f32 %v344_v48, %v322_v47 }
 0x13c   : > { %348 = vst [vmem:[%s236_s7 + $0x8] sm:$0xff] %v345_v49 }
 0x13d PF: > { %s13_s14 = sadd.s32 1, %s536_s14   ;;  %s618_s12 = smov %s532_s13 }
 0x13e   : > { %p10_p5 = scmp.ge.s32.totalorder %s13_s14, 4   ;;  %s619_s13 = smov %s621_s15 }
 0x140   :  { %12 = sbr.rel (!%p10_p5) target bundleno = 2 (0x2), region = 68 }

// kernel: _lambda_.55
= control target key start
LH: loop header
LB: loop body
LE: loop exit
PB: predicated region body
PF: predicated region fallthrough
CT: control target
= control target key end

     0   :  { %s565_s12 = smov 0   ;;  %s567_s13 = smov 0   ;;  %s614_s0 = inlined_call_operand.vmem [shape: bf16[2,16,256], index: 0, kind: input, shape index: {}]   ;;  %s615_s1 = inlined_call_operand.vmem [shape: bf16[16,112], index: 1, kind: input, shape index: {}]   ;;  %s616_s2 = inlined_call_operand.vmem [shape: f32[16,1], index: 2, kind: input, shape index: {}]   ;;  %s617_s3 = inlined_call_operand.vmem [shape: f32[2,16,128], index: 3, kind: output, shape index: {}]  }
   0x1   :  { %s569_s14 = smov 0  }
   0x2 LB: > { %s25_s15 = sadd.s32 1, %s532_s13  ;;  %p466_p0 = scmp.ge.s32.totalorder %s536_s14, 1  ;;  %s536_s14 = sphi %s569_s14, %s13_s14   ;;  %s532_s13 = sphi %s567_s13, %s619_s13   ;;  %s528_s12 = sphi %s565_s12, %s618_s12  }
   0x3   : > { %p27_p1 = scmp.ge.s32.totalorder %s25_s15, 2  ;;  %p173_p2 = scmp.lt.s32.totalorder %s536_s14, 3 }
   0x5   : > { %s621_s15 = smov (%p27_p1, %s25_s15), 0  ;;  %p174_p3 = pnand %p466_p0, %p173_p2 }
   0x6   : > { %p211_p4 = scmp.lt.s32.totalorder (!%p174_p3), %s528_s12, 1  ;;  %s538_s20 = smov (!%p174_p3), 103  }
   0x7   : > { %177 = sbr.rel (%p174_p3) target bundleno = 317 (0x13d), region = 32  ;;  %s539_s21 = smov (!%p174_p3), 98  }
   0x8   : > { %s540_s22 = smov (!%p174_p3), 108   ;;  %s541_s23 = smov (!%p174_p3), 113  }
   0x9   : > { %s542_s24 = smov (!%p174_p3), 118   ;;  %s543_s25 = smov (!%p174_p3), 123  }
   0xc   : > { %s623_s12 = smov (!%p211_p4, %s528_s12), 1  ;;  %v312_v26 = vld [vmem:[%s616_s2] sm:$0xff]  ;;  %v313_v27 = vld [vmem:[%s616_s2 + $0x8] sm:$0xff]  ;;  %vm307_vm4 = vcmask 801792   ;;  %v544_v28 = vmov 0   ;;  %vm300_vm5 = vcmask 842752  }
   0xd   : > { %s478_s16 = sshll.u32 %s623_s12, 4  ;;  %512 = vset.pattern.permute.xlu0 %v544_v28  ;;  %513 = vset.pattern.permute.xlu1 %v544_v28  ;;  %vm293_vm6 = vcmask 883712   ;;  %vm286_vm7 = vcmask 924672   ;;  %vm279_vm8 = vcmask 965632   ;;  %vm272_vm9 = vcmask 1006592   ;;  %v480_v43 = vld [vmem:[%s615_s1] sm:$0xff] }
   0xe   : > { %s215_s19 = scalar_lea.vmem %s614_s0, %s478_s16  ;;  %vm329_vm10 = vcmask 916480   ;;  %s236_s7 = scalar_lea.vmem %s617_s3, %s478_s16 }
   0xf   : > { %v239_v0 = vld [vmem:[%s215_s19] sm:$0xff]  ;;  %v240_v1 = vld [vmem:[%s215_s19 + $0x8] sm:$0xff] }
  0x10   : > { %v241_v2 = vunpack.c.l.bf16 %v239_v0  ;;  %v242_v3 = vunpack.c.h.bf16 %v239_v0  ;;  %v243_v4 = vunpack.c.l.bf16 %v240_v1  ;;  %v244_v5 = vunpack.c.h.bf16 %v240_v1 }
  0x12   : > { %vm245_vm0 = vcmp.ge.f32.partialorder %v241_v2, 0.0  ;;  %vm246_vm1 = vcmp.ge.f32.partialorder %v242_v3, 0.0  ;;  %vm247_vm2 = vcmp.ge.f32.partialorder %v243_v4, 0.0  ;;  %vm248_vm3 = vcmp.ge.f32.partialorder %v244_v5, 0.0 }
  0x13   : > { %v249_v6 = vmul.f32 0.1, %v241_v2  ;;  %v250_v7 = vmul.f32 0.1, %v242_v3  ;;  %v251_v8 = vmul.f32 0.1, %v243_v4 }
  0x14   : > { %v252_v9 = vmul.f32 0.1, %v244_v5 }
  0x15   : > { %v253_v10 = vsel %vm245_vm0, %v241_v2, %v249_v6  ;;  %v254_v11 = vsel %vm246_vm1, %v242_v3, %v250_v7  ;;  %v255_v12 = vsel %vm247_vm2, %v243_v4, %v251_v8 }
  0x16   : > { %v256_v13 = vsel %vm248_vm3, %v244_v5, %v252_v9  ;;  %v257_v14 = vpack.c.bf16 %v254_v11, %v253_v10 }
  0x17   : > { %v258_v15 = vpack.c.bf16 %v256_v13, %v255_v12 }
  0x18   : > { %v261_v16 = vunpack.c.l.b16 %v257_v14  ;;  %v265_v19 = vunpack.c.h.b16 %v257_v14 }
  0x19   : > { %v262_v17 = vunpack.c.l.b16 %v258_v15  ;;  %v266_v20 = vunpack.c.h.b16 %v258_v15 }
  0x1b   : > { %v263_v18 = vpack.c.b16 %v262_v17, %v261_v16  ;;  %v267_v21 = vpack.c.b16 %v266_v20, %v265_v19 }
  0x1d   : > { %296 = vrot.lane.b32.xlu1 %v263_v18, %s538_s20  ;;  %303 = vrot.lane.b32.xlu0 %v263_v18, %s539_s21 }
  0x1e   : > { %289 = vrot.lane.b32.xlu2 %v263_v18, %s540_s22 }
  0x25   : > { %298 = vrot.lane.b32.xlu1 %v267_v21, %s538_s20  ;;  %305 = vrot.lane.b32.xlu0 %v267_v21, %s539_s21 }
  0x26   : > { %291 = vrot.lane.b32.xlu2 %v267_v21, %s540_s22 }
  0x2d   : > { %284 = vrot.lane.b32.xlu1 %v267_v21, %s541_s23  ;;  %282 = vrot.lane.b32.xlu0 %v263_v18, %s541_s23 }
  0x2e   : > { %275 = vrot.lane.b32.xlu2 %v263_v18, %s542_s24 }
  0x35   : > { %277 = vrot.lane.b32.xlu0 %v267_v21, %s542_s24  ;;  %268 = vrot.lane.b32.xlu1 %v263_v18, %s543_s25 }
  0x36   : > { %270 = vrot.lane.b32.xlu2 %v267_v21, %s543_s25 }
  0x3d   : > { %316 = vperm.xlu0 %512, %v312_v26   ;;  %321 = vperm.xlu1 %513, %v313_v27  }
  0x78   : > { %v290_v22 = vpop.permute.xlu2 %289 }
  0x80   : > { %v292_v25 = vpop.permute.xlu2 %291 }
  0x81   : > { %v294_v36 = vsel %vm293_vm6, %v290_v22, %v292_v25 }
  0x88   : > { %v276_v33 = vpop.permute.xlu2 %275 }
  0x8f   : > { %v297_v23 = vpop.permute.xlu1 %296  ;;  %v304_v24 = vpop.permute.xlu0 %303 }
  0x90   : > { %v271_v38 = vpop.permute.xlu2 %270 }
  0x97   : > { %v299_v29 = vpop.permute.xlu1 %298  ;;  %v306_v30 = vpop.permute.xlu0 %305 }
  0x98   : > { %v308_v31 = vsel %vm307_vm4, %v304_v24, %v306_v30  ;;  %v301_v32 = vsel %vm300_vm5, %v297_v23, %v299_v29 }
  0x99   : > { %334 = vmatpush.bf16.msra.mxu0 %v308_v31 }
  0x9d   : > { %335 = vmatpush.bf16.msra.mxu0 %v301_v32 }
  0x9f   : > { %v285_v34 = vpop.permute.xlu1 %284  ;;  %v283_v35 = vpop.permute.xlu0 %282 }
  0xa0   : > { %v287_v37 = vsel %vm286_vm7, %v283_v35, %v285_v34 }
  0xa1   : > { %336 = vmatpush.bf16.msra.mxu0 %v294_v36 }
  0xa5   : > { %337 = vmatpush.bf16.msra.mxu0 %v287_v37 }
  0xa7   : > { %v278_v39 = vpop.permute.xlu0 %277  ;;  %v269_v40 = vpop.permute.xlu1 %268 }
  0xa8   : > { %v280_v41 = vsel %vm279_vm8, %v276_v33, %v278_v39  ;;  %v273_v42 = vsel %vm272_vm9, %v269_v40, %v271_v38 }
  0xa9   : > { %338 = vmatpush.bf16.msra.mxu0 %v280_v41 }
  0xad   : > { %339 = vmatpush.bf16.msra.mxu0 %v273_v42 }
  0xaf   : > { %v317_v44 = vpop.permute.xlu0 %316  ;;  %v322_v47 = vpop.permute.xlu1 %321 }
  0xb1   : > { %340 = vmatpush.bf16.msra.mxu0 %v263_v18 }
  0xb4   : > { %475 = vmatmul.msk.bf16.vlgmr.msra.gmra.mxu0 %vm329_vm10, %v480_v43 }
 0x131   : > { %v342_v45 = vpop.f32.mrf.mxu0 }
 0x132   : > { %v343_v46 = vadd.f32 %v342_v45, %v317_v44 }
 0x134   : > { %347 = vst [vmem:[%s236_s7] sm:$0xff] %v343_v46 }
 0x139   : > { %v344_v48 = vpop.f32.mrf.mxu0 }
 0x13a   : > { %v345_v49 = vadd.f32 %v344_v48, %v322_v47 }
 0x13c   : > { %348 = vst [vmem:[%s236_s7 + $0x8] sm:$0xff] %v345_v49 }
 0x13d PF: > { %s13_s14 = sadd.s32 1, %s536_s14   ;;  %s618_s12 = smov %s532_s13 }
 0x13e   : > { %p10_p5 = scmp.ge.s32.totalorder %s13_s14, 4   ;;  %s619_s13 = smov %s621_s15 }
 0x140   :  { %12 = sbr.rel (!%p10_p5) target bundleno = 2 (0x2), region = 68 }

// kernel: _lambda_.49
= control target key start
LH: loop header
LB: loop body
LE: loop exit
PB: predicated region body
PF: predicated region fallthrough
CT: control target
= control target key end

     0   :  { %s529_s12 = smov 0   ;;  %s531_s13 = smov 0   ;;  %s578_s0 = inlined_call_operand.vmem [shape: bf16[2,16,256], index: 0, kind: input, shape index: {}]   ;;  %s579_s1 = inlined_call_operand.vmem [shape: bf16[16,48], index: 1, kind: input, shape index: {}]   ;;  %s580_s2 = inlined_call_operand.vmem [shape: f32[16,1], index: 2, kind: input, shape index: {}]   ;;  %s581_s3 = inlined_call_operand.vmem [shape: f32[2,16,128], index: 3, kind: output, shape index: {}]  }
   0x1   :  { %s533_s14 = smov 0  }
   0x2 LB: > { %s25_s15 = sadd.s32 1, %s500_s13  ;;  %p438_p0 = scmp.ge.s32.totalorder %s504_s14, 1  ;;  %s504_s14 = sphi %s533_s14, %s13_s14   ;;  %s500_s13 = sphi %s531_s13, %s583_s13   ;;  %s496_s12 = sphi %s529_s12, %s582_s12  }
   0x3   : > { %p27_p1 = scmp.ge.s32.totalorder %s25_s15, 2  ;;  %p173_p2 = scmp.lt.s32.totalorder %s504_s14, 3 }
   0x5   : > { %s585_s15 = smov (%p27_p1, %s25_s15), 0  ;;  %p174_p3 = pnand %p438_p0, %p173_p2 }
   0x6   : > { %p211_p4 = scmp.lt.s32.totalorder (!%p174_p3), %s496_s12, 1  ;;  %s506_s20 = smov (!%p174_p3), 123  }
   0x7   : > { %177 = sbr.rel (%p174_p3) target bundleno = 301 (0x12d), region = 32  ;;  %s507_s21 = smov (!%p174_p3), 118  }
   0xc   : > { %s587_s12 = smov (!%p211_p4, %s496_s12), 1  ;;  %v284_v22 = vld [vmem:[%s580_s2] sm:$0xff]  ;;  %v508_v23 = vmov 0   ;;  %v285_v24 = vld [vmem:[%s580_s2 + $0x8] sm:$0xff]  ;;  %vm279_vm4 = vcmask 965632   ;;  %vm272_vm5 = vcmask 1006592  }
   0xd   : > { %s450_s16 = sshll.u32 %s587_s12, 4  ;;  %480 = vset.pattern.permute.xlu2 %v508_v23  ;;  %481 = vset.pattern.permute.xlu0 %v508_v23  ;;  %v452_v31 = vld [vmem:[%s579_s1] sm:$0xff]  ;;  %vm301_vm6 = vcmask 392192  }
   0xe   : > { %s215_s19 = scalar_lea.vmem %s578_s0, %s450_s16  ;;  %288 = vperm.xlu2 %480, %v284_v22   ;;  %s236_s30 = scalar_lea.vmem %s581_s3, %s450_s16 }
   0xf   : > { %v239_v0 = vld [vmem:[%s215_s19] sm:$0xff]  ;;  %v240_v1 = vld [vmem:[%s215_s19 + $0x8] sm:$0xff] }
  0x10   : > { %v241_v2 = vunpack.c.l.bf16 %v239_v0  ;;  %v242_v3 = vunpack.c.h.bf16 %v239_v0  ;;  %v243_v4 = vunpack.c.l.bf16 %v240_v1  ;;  %v244_v5 = vunpack.c.h.bf16 %v240_v1 }
  0x12   : > { %vm245_vm0 = vcmp.ge.f32.partialorder %v241_v2, 0.0  ;;  %vm246_vm1 = vcmp.ge.f32.partialorder %v242_v3, 0.0  ;;  %vm247_vm2 = vcmp.ge.f32.partialorder %v243_v4, 0.0  ;;  %vm248_vm3 = vcmp.ge.f32.partialorder %v244_v5, 0.0 }
  0x13   : > { %v249_v6 = vmul.f32 0.1, %v241_v2  ;;  %v250_v7 = vmul.f32 0.1, %v242_v3  ;;  %v251_v8 = vmul.f32 0.1, %v243_v4 }
  0x14   : > { %v252_v9 = vmul.f32 0.1, %v244_v5 }
  0x15   : > { %v253_v10 = vsel %vm245_vm0, %v241_v2, %v249_v6  ;;  %v254_v11 = vsel %vm246_vm1, %v242_v3, %v250_v7  ;;  %v255_v12 = vsel %vm247_vm2, %v243_v4, %v251_v8 }
  0x16   : > { %v256_v13 = vsel %vm248_vm3, %v244_v5, %v252_v9  ;;  %v257_v14 = vpack.c.bf16 %v254_v11, %v253_v10  ;;  %293 = vperm.xlu2 %480, %v285_v24  }
  0x17   : > { %v258_v15 = vpack.c.bf16 %v256_v13, %v255_v12 }
  0x18   : > { %v261_v16 = vunpack.c.l.b16 %v257_v14  ;;  %v265_v19 = vunpack.c.h.b16 %v257_v14 }
  0x19   : > { %v262_v17 = vunpack.c.l.b16 %v258_v15  ;;  %v266_v20 = vunpack.c.h.b16 %v258_v15 }
  0x1b   : > { %v263_v18 = vpack.c.b16 %v262_v17, %v261_v16  ;;  %v267_v21 = vpack.c.b16 %v266_v20, %v265_v19 }
  0x1d   : > { %268 = vrot.lane.b32.xlu1 %v263_v18, %s506_s20  ;;  %275 = vrot.lane.b32.xlu0 %v263_v18, %s507_s21 }
  0x25   : > { %270 = vrot.lane.b32.xlu1 %v267_v21, %s506_s20  ;;  %277 = vrot.lane.b32.xlu0 %v267_v21, %s507_s21 }
  0x68   : > { %v289_v32 = vpop.permute.xlu2 %288 }
  0x70   : > { %v294_v35 = vpop.permute.xlu2 %293 }
  0x8f   : > { %v269_v25 = vpop.permute.xlu1 %268  ;;  %v276_v26 = vpop.permute.xlu0 %275 }
  0x97   : > { %v278_v27 = vpop.permute.xlu0 %277  ;;  %v271_v29 = vpop.permute.xlu1 %270 }
  0x98   : > { %v280_v28 = vsel %vm279_vm4, %v276_v26, %v278_v27  ;;  %v273_v30 = vsel %vm272_vm5, %v269_v25, %v271_v29 }
  0x99   : > { %310 = vmatpush.bf16.msra.mxu0 %v280_v28 }
  0x9d   : > { %311 = vmatpush.bf16.msra.mxu0 %v273_v30 }
  0xa1   : > { %312 = vmatpush.bf16.msra.mxu0 %v263_v18 }
  0xa4   : > { %447 = vmatmul.msk.bf16.vlgmr.msra.gmra.mxu0 %vm301_vm6, %v452_v31 }
 0x121   : > { %v314_v33 = vpop.f32.mrf.mxu0 }
 0x122   : > { %v315_v34 = vadd.f32 %v314_v33, %v289_v32 }
 0x124   : > { %319 = vst [vmem:[%s236_s30] sm:$0xff] %v315_v34 }
 0x129   : > { %v316_v36 = vpop.f32.mrf.mxu0 }
 0x12a   : > { %v317_v37 = vadd.f32 %v316_v36, %v294_v35 }
 0x12c   : > { %320 = vst [vmem:[%s236_s30 + $0x8] sm:$0xff] %v317_v37 }
 0x12d PF: > { %s13_s14 = sadd.s32 1, %s504_s14   ;;  %s582_s12 = smov %s500_s13 }
 0x12e   : > { %p10_p5 = scmp.ge.s32.totalorder %s13_s14, 4   ;;  %s583_s13 = smov %s585_s15 }
 0x130   :  { %12 = sbr.rel (!%p10_p5) target bundleno = 2 (0x2), region = 68 }

// kernel: _lambda_.57
= control target key start
LH: loop header
LB: loop body
LE: loop exit
PB: predicated region body
PF: predicated region fallthrough
CT: control target
= control target key end

     0   :  { %s799_s12 = smov 0   ;;  %s801_s13 = smov 0   ;;  %s928_s0 = inlined_call_operand.vmem [shape: bf16[2,16,384], index: 0, kind: input, shape index: {}]   ;;  %s929_s1 = inlined_call_operand.vmem [shape: bf16[72,112], index: 1, kind: input, shape index: {}]   ;;  %s930_s2 = inlined_call_operand.vmem [shape: f32[72,1], index: 2, kind: input, shape index: {}]   ;;  %s931_s3 = inlined_call_operand.vmem [shape: f32[2,72,256], index: 3, kind: output, shape index: {}]  }
   0x1   :  { %s803_s14 = smov 0  }
   0x2 LB: > { %s25_s15 = sadd.s32 1, %s766_s13  ;;  %p663_p0 = scmp.ge.s32.totalorder %s770_s14, 1  ;;  %s770_s14 = sphi %s803_s14, %s13_s14   ;;  %s766_s13 = sphi %s801_s13, %s933_s13   ;;  %s762_s12 = sphi %s799_s12, %s932_s12  }
   0x3   : > { %p27_p1 = scmp.ge.s32.totalorder %s25_s15, 2  ;;  %p173_p2 = scmp.lt.s32.totalorder %s770_s14, 3 }
   0x5   : > { %s935_s15 = smov (%p27_p1, %s25_s15), 0  ;;  %p174_p3 = pnand %p663_p0, %p173_p2 }
   0x6   : > { %p212_p4 = scmp.lt.s32.totalorder (!%p174_p3), %s762_s12, 1  ;;  %s772_s20 = smov (!%p174_p3), 122  }
   0x7   : > { %177 = sbr.rel (%p174_p3) target bundleno = 363 (0x16b), region = 32  ;;  %s773_s21 = smov (!%p174_p3), 123  }
   0x8   : > { %s774_s22 = smov (!%p174_p3), 124   ;;  %s775_s23 = smov (!%p174_p3), 125  }
   0x9   : > { %s776_s24 = smov (!%p174_p3), 126   ;;  %s777_s25 = smov (!%p174_p3), 127  }
   0xc   : > { %s937_s12 = smov (!%p212_p4, %s762_s12), 1  ;;  %vm349_vm6 = vcmask 998400   ;;  %vm338_vm7 = vcmask 1006592   ;;  %vm327_vm8 = vcmask 1014784   ;;  %v363_v51 = vld [vmem:[%s930_s2] sm:$0xff]  ;;  %v364_v52 = vld [vmem:[%s930_s2 + $0x8] sm:$0xff] }
   0xd   : > { %s712_s16 = smul.u32 24, %s937_s12  ;;  %v778_v53 = vmov 0   ;;  %vm316_vm9 = vcmask 1022976   ;;  %vm305_vm10 = vcmask 1031168   ;;  %v366_v63 = vld [vmem:[%s930_s2 + $0x18] sm:$0xff]  ;;  %vm294_vm11 = vcmask 1039360  }
   0xe   : > { %745 = vset.pattern.permute.xlu0 %v778_v53  ;;  %746 = vset.pattern.permute.xlu1 %v778_v53  ;;  %vm440_vm12 = vcmask 916480   ;;  %s713_s4 = smul.u32 144, %s937_s12 }
   0xf   : > { %s216_s19 = scalar_lea.vmem %s928_s0, %s712_s16  ;;  %747 = vset.pattern.permute.xlu2 %v778_v53 }
  0x10   : > { %v242_v0 = vld [vmem:[%s216_s19 + $0x8] sm:$0xf]  ;;  %v243_v1 = vld [vmem:[%s216_s19 + $0xc] sm:$0xff]  ;;  %v244_v2 = vld [vmem:[%s216_s19 + $0x14] sm:$0xf]  ;;  %s899_s7 = scalar_lea.vmem %s931_s3, %s713_s4 }
  0x11   : > { %v247_v3 = vunpack.c.l.bf16 %v242_v0  ;;  %v248_v4 = vunpack.c.l.bf16 %v243_v1  ;;  %v249_v5 = vunpack.c.h.bf16 %v243_v1  ;;  %v250_v6 = vunpack.c.l.bf16 %v244_v2  ;;  %v241_v7 = vld [vmem:[%s216_s19] sm:$0xff]  ;;  %v368_v0 = vld [vmem:[%s930_s2 + $0x28] sm:$0xff] }
  0x12   : > { %v245_v8 = vunpack.c.l.bf16 %v241_v7  ;;  %v246_v9 = vunpack.c.h.bf16 %v241_v7  ;;  %v694_v7 = vld [vmem:[%s929_s1] sm:$0xff] }
  0x13   : > { %vm253_vm0 = vcmp.ge.f32.partialorder %v247_v3, 0.0  ;;  %vm254_vm1 = vcmp.ge.f32.partialorder %v248_v4, 0.0  ;;  %vm255_vm2 = vcmp.ge.f32.partialorder %v249_v5, 0.0  ;;  %vm256_vm3 = vcmp.ge.f32.partialorder %v250_v6, 0.0 }
  0x14   : > { %v259_v10 = vmul.f32 0.01, %v247_v3  ;;  %v260_v11 = vmul.f32 0.01, %v248_v4  ;;  %v261_v12 = vmul.f32 0.01, %v249_v5 }
  0x15   : > { %v262_v13 = vmul.f32 0.01, %v250_v6  ;;  %vm251_vm4 = vcmp.ge.f32.partialorder %v245_v8, 0.0  ;;  %vm252_vm5 = vcmp.ge.f32.partialorder %v246_v9, 0.0  ;;  %v257_v14 = vmul.f32 0.01, %v245_v8 }
  0x16   : > { %v265_v15 = vsel %vm253_vm0, %v247_v3, %v259_v10  ;;  %v258_v16 = vmul.f32 0.01, %v246_v9  ;;  %v266_v17 = vsel %vm254_vm1, %v248_v4, %v260_v11  ;;  %v267_v18 = vsel %vm255_vm2, %v249_v5, %v261_v12  ;;  %v369_v5 = vld [vmem:[%s930_s2 + $0x30] sm:$0xff]  ;;  %v362_v11 = vld [vmem:[%s929_s1 + $0x20] sm:$0xf] }
  0x17   : > { %v268_v19 = vsel %vm256_vm3, %v250_v6, %v262_v13  ;;  %v270_v20 = vpack.c.bf16 %v265_v15, %v265_v15  ;;  %v263_v21 = vsel %vm251_vm4, %v245_v8, %v257_v14  ;;  %v271_v22 = vpack.c.bf16 %v267_v18, %v266_v17  ;;  %v697_v8 = vld [vmem:[%s929_s1 + $0x18] sm:$0xff]  ;;  %v365_v10 = vld [vmem:[%s930_s2 + $0x10] sm:$0xff]  ;;  %v367_v12 = vld [vmem:[%s930_s2 + $0x20] sm:$0xff] }
  0x18   : > { %v272_v23 = vpack.c.bf16 %v268_v19, %v268_v19  ;;  %v264_v24 = vsel %vm252_vm5, %v246_v9, %v258_v16  ;;  %v371_v9 = vld [vmem:[%s930_s2 + $0x40] sm:$0xff]  ;;  %v434_v13 = vunpack.c.l.b16 %v362_v11  ;;  %v695_v14 = vld [vmem:[%s929_s1 + $0x8] sm:$0xff]  ;;  %v370_v16 = vld [vmem:[%s930_s2 + $0x38] sm:$0xff] }
  0x19   : > { %v285_v25 = vunpack.c.l.b16 %v270_v20  ;;  %v269_v26 = vpack.c.bf16 %v264_v24, %v263_v21  ;;  %v277_v27 = vunpack.c.l.b16 %v271_v22  ;;  %v278_v28 = vunpack.c.h.b16 %v271_v22  ;;  %v696_v17 = vld [vmem:[%s929_s1 + $0x10] sm:$0xff] }
  0x1a   : > { %v286_v29 = vunpack.c.l.b16 %v272_v23  ;;  %v439_v15 = vpack.c.b16 %v434_v13, %v434_v13 }
  0x1b   : > { %v275_v30 = vunpack.c.l.b16 %v269_v26  ;;  %v276_v31 = vunpack.c.h.b16 %v269_v26 }
  0x1c   : > { %v287_v32 = vpack.c.b16 %v286_v29, %v285_v25 }
  0x1d   : > { %v823_v33 = vpack.c.b16 %v277_v27, %v275_v30  ;;  %v825_v34 = vpack.c.b16 %v278_v28, %v276_v31 }
  0x1e   : > { %347 = vrot.lane.b32.xlu1 %v287_v32, %s772_s20 }
  0x1f   : > { %343 = vrot.lane.b32.xlu0 %v823_v33, %s772_s20  ;;  %334 = vrot.lane.b32.xlu2 %v825_v34, %s773_s21 }
  0x26   : > { %332 = vrot.lane.b32.xlu1 %v823_v33, %s773_s21 }
  0x27   : > { %345 = vrot.lane.b32.xlu0 %v825_v34, %s772_s20  ;;  %336 = vrot.lane.b32.xlu2 %v287_v32, %s773_s21 }
  0x2e   : > { %323 = vrot.lane.b32.xlu1 %v825_v34, %s774_s22 }
  0x2f   : > { %321 = vrot.lane.b32.xlu0 %v823_v33, %s774_s22  ;;  %325 = vrot.lane.b32.xlu2 %v287_v32, %s774_s22 }
  0x36   : > { %312 = vrot.lane.b32.xlu1 %v825_v34, %s775_s23 }
  0x37   : > { %310 = vrot.lane.b32.xlu0 %v823_v33, %s775_s23  ;;  %314 = vrot.lane.b32.xlu2 %v287_v32, %s775_s23 }
  0x3e   : > { %301 = vrot.lane.b32.xlu1 %v825_v34, %s776_s24 }
  0x3f   : > { %299 = vrot.lane.b32.xlu0 %v823_v33, %s776_s24  ;;  %303 = vrot.lane.b32.xlu2 %v287_v32, %s776_s24 }
  0x46   : > { %290 = vrot.lane.b32.xlu1 %v825_v34, %s777_s25 }
  0x47   : > { %288 = vrot.lane.b32.xlu0 %v823_v33, %s777_s25  ;;  %292 = vrot.lane.b32.xlu2 %v287_v32, %s777_s25 }
  0x4e   : > { %379 = vperm.xlu1 %746, %v364_v52  }
  0x4f   : > { %374 = vperm.xlu0 %745, %v363_v51   ;;  %384 = vperm.xlu2 %747, %v365_v10  }
  0x56   : > { %389 = vperm.xlu1 %746, %v366_v63  }
  0x57   : > { %399 = vperm.xlu0 %745, %v368_v0   ;;  %394 = vperm.xlu2 %747, %v367_v12  }
  0x5e   : > { %404 = vperm.xlu1 %746, %v369_v5  }
  0x5f   : > { %414 = vperm.xlu0 %745, %v371_v9   ;;  %409 = vperm.xlu2 %747, %v370_v16  }
  0x79   : > { %v335_v35 = vpop.permute.xlu2 %334 }
  0x81   : > { %v337_v37 = vpop.permute.xlu2 %336 }
  0x82   : > { %v340_v45 = vsel %vm338_vm7, %v335_v35, %v337_v37 }
  0x89   : > { %v326_v40 = vpop.permute.xlu2 %325 }
  0x90   : > { %v348_v36 = vpop.permute.xlu1 %347 }
  0x91   : > { %v344_v38 = vpop.permute.xlu0 %343  ;;  %v315_v50 = vpop.permute.xlu2 %314 }
  0x98   : > { %v333_v39 = vpop.permute.xlu1 %332 }
  0x99   : > { %v346_v41 = vpop.permute.xlu0 %345  ;;  %v339_v44 = vsel %vm338_vm7, %v333_v39, %v335_v35  ;;  %v304_v58 = vpop.permute.xlu2 %303 }
  0x9a   : > { %v350_v42 = vsel %vm349_vm6, %v344_v38, %v346_v41  ;;  %v351_v43 = vsel %vm349_vm6, %v346_v41, %v348_v36 }
  0x9b   : > { %457 = vmatpush.bf16.msra.mxu0 %v350_v42  ;;  %698 = vmatpush.bf16.msra.mxu2 %v350_v42 }
  0x9c   : > { %490 = vmatpush.bf16.msra.mxu1 %v351_v43  ;;  %705 = vmatpush.bf16.msra.mxu3 %v351_v43 }
  0x9f   : > { %458 = vmatpush.bf16.msra.mxu0 %v339_v44  ;;  %699 = vmatpush.bf16.msra.mxu2 %v339_v44 }
  0xa0   : > { %491 = vmatpush.bf16.msra.mxu1 %v340_v45  ;;  %706 = vmatpush.bf16.msra.mxu3 %v340_v45  ;;  %v324_v46 = vpop.permute.xlu1 %323 }
  0xa1   : > { %v322_v47 = vpop.permute.xlu0 %321  ;;  %v329_v48 = vsel %vm327_vm8, %v324_v46, %v326_v40  ;;  %v293_v1 = vpop.permute.xlu2 %292 }
  0xa2   : > { %v328_v49 = vsel %vm327_vm8, %v322_v47, %v324_v46 }
  0xa3   : > { %459 = vmatpush.bf16.msra.mxu0 %v328_v49  ;;  %700 = vmatpush.bf16.msra.mxu2 %v328_v49 }
  0xa4   : > { %492 = vmatpush.bf16.msra.mxu1 %v329_v48  ;;  %707 = vmatpush.bf16.msra.mxu3 %v329_v48 }
  0xa8   : > { %v313_v54 = vpop.permute.xlu1 %312 }
  0xa9   : > { %v311_v55 = vpop.permute.xlu0 %310  ;;  %v318_v56 = vsel %vm316_vm9, %v313_v54, %v315_v50  ;;  %v385_v19 = vpop.permute.xlu2 %384 }
  0xaa   : > { %v317_v57 = vsel %vm316_vm9, %v311_v55, %v313_v54  ;;  %493 = vmatpush.bf16.msra.mxu1 %v318_v56  ;;  %708 = vmatpush.bf16.msra.mxu3 %v318_v56 }
  0xab   : > { %460 = vmatpush.bf16.msra.mxu0 %v317_v57  ;;  %701 = vmatpush.bf16.msra.mxu2 %v317_v57 }
  0xb0   : > { %v302_v59 = vpop.permute.xlu1 %301 }
  0xb1   : > { %v300_v60 = vpop.permute.xlu0 %299  ;;  %v307_v61 = vsel %vm305_vm10, %v302_v59, %v304_v58  ;;  %v395_v26 = vpop.permute.xlu2 %394 }
  0xb2   : > { %v306_v62 = vsel %vm305_vm10, %v300_v60, %v302_v59  ;;  %494 = vmatpush.bf16.msra.mxu1 %v307_v61  ;;  %709 = vmatpush.bf16.msra.mxu3 %v307_v61 }
  0xb3   : > { %461 = vmatpush.bf16.msra.mxu0 %v306_v62  ;;  %702 = vmatpush.bf16.msra.mxu2 %v306_v62 }
  0xb8   : > { %v291_v2 = vpop.permute.xlu1 %290 }
  0xb9   : > { %v289_v3 = vpop.permute.xlu0 %288  ;;  %v296_v4 = vsel %vm294_vm11, %v291_v2, %v293_v1  ;;  %v410_v37 = vpop.permute.xlu2 %409 }
  0xba   : > { %v295_v6 = vsel %vm294_vm11, %v289_v3, %v291_v2  ;;  %495 = vmatpush.bf16.msra.mxu1 %v296_v4  ;;  %710 = vmatpush.bf16.msra.mxu3 %v296_v4 }
  0xbb   : > { %462 = vmatpush.bf16.msra.mxu0 %v295_v6  ;;  %703 = vmatpush.bf16.msra.mxu2 %v295_v6 }
  0xbe   : > { %496 = vmatpush.bf16.msra.mxu1 %v825_v34  ;;  %711 = vmatpush.bf16.msra.mxu3 %v825_v34 }
  0xbf   : > { %463 = vmatpush.bf16.msra.mxu0 %v823_v33  ;;  %704 = vmatpush.bf16.msra.mxu2 %v823_v33 }
  0xc0   : > { %v380_v18 = vpop.permute.xlu1 %379 }
  0xc1   : > { %687 = vmatmul.msk.bf16.vlgmr.msra.gmra.mxu1 %vm440_vm12, %v694_v7  ;;  %690 = vmatmul.msk.bf16.vlgmr.msra.gmra.mxu3 %vm440_vm12, %v697_v8  ;;  %v375_v21 = vpop.permute.xlu0 %374 }
  0xc2   : > { %682 = vmatmul.msk.bf16.vlgmr.msra.gmra.mxu0 %vm440_vm12, %v694_v7  ;;  %685 = vmatmul.msk.bf16.vlgmr.msra.gmra.mxu2 %vm440_vm12, %v697_v8 }
  0xc8   : > { %v390_v20 = vpop.permute.xlu1 %389 }
  0xc9   : > { %v400_v36 = vpop.permute.xlu0 %399 }
  0xd0   : > { %v405_v27 = vpop.permute.xlu1 %404 }
  0xd1   : > { %688 = vmatmul.msk.bf16.gmra.mxu1 %vm440_vm12, %v695_v14  ;;  %691 = vmatmul.msk.bf16.gmra.mxu3 %vm440_vm12, %v439_v15  ;;  %v415_v46 = vpop.permute.xlu0 %414 }
  0xd2   : > { %683 = vmatmul.msk.bf16.gmra.mxu0 %vm440_vm12, %v695_v14  ;;  %686 = vmatmul.msk.bf16.gmra.mxu2 %vm440_vm12, %v439_v15 }
  0xe1   : > { %689 = vmatmul.msk.bf16.gmra.mxu1 %vm440_vm12, %v696_v17 }
  0xe2   : > { %684 = vmatmul.msk.bf16.gmra.mxu0 %vm440_vm12, %v696_v17 }
 0x13e   : > { %v498_v22 = vpop.f32.mrf.mxu1 }
 0x13f   : > { %v465_v23 = vpop.f32.mrf.mxu0  ;;  %v499_v24 = vadd.f32 %v498_v22, %v375_v21 }
 0x140   : > { %v466_v25 = vadd.f32 %v465_v23, %v375_v21 }
 0x141   : > { %523 = vst [vmem:[%s899_s7 + $0x8] sm:$0xff] %v499_v24 }
 0x142   : > { %522 = vst [vmem:[%s899_s7] sm:$0xff] %v466_v25 }
 0x144   : > { %v513_v28 = vpop.f32.mrf.mxu3 }
 0x145   : > { %v480_v29 = vpop.f32.mrf.mxu2  ;;  %v514_v30 = vadd.f32 %v513_v28, %v405_v27 }
 0x146   : > { %v500_v31 = vpop.f32.mrf.mxu1  ;;  %v481_v32 = vadd.f32 %v480_v29, %v405_v27 }
 0x147   : > { %v467_v33 = vpop.f32.mrf.mxu0  ;;  %v501_v34 = vadd.f32 %v500_v31, %v380_v18  ;;  %535 = vst [vmem:[%s899_s7 + $0x68] sm:$0xff] %v514_v30 }
 0x148   : > { %v468_v35 = vadd.f32 %v467_v33, %v380_v18  ;;  %534 = vst [vmem:[%s899_s7 + $0x60] sm:$0xff] %v481_v32 }
 0x149   : > { %525 = vst [vmem:[%s899_s7 + $0x18] sm:$0xff] %v501_v34 }
 0x14a   : > { %524 = vst [vmem:[%s899_s7 + $0x10] sm:$0xff] %v468_v35 }
 0x14c   : > { %v515_v38 = vpop.f32.mrf.mxu3 }
 0x14d   : > { %v482_v39 = vpop.f32.mrf.mxu2  ;;  %v516_v40 = vadd.f32 %v515_v38, %v410_v37 }
 0x14e   : > { %v503_v41 = vpop.f32.mrf.mxu1  ;;  %v483_v42 = vadd.f32 %v482_v39, %v410_v37 }
 0x14f   : > { %v470_v43 = vpop.f32.mrf.mxu0  ;;  %v504_v44 = vadd.f32 %v503_v41, %v385_v19  ;;  %537 = vst [vmem:[%s899_s7 + $0x78] sm:$0xff] %v516_v40 }
 0x150   : > { %v471_v45 = vadd.f32 %v470_v43, %v385_v19  ;;  %536 = vst [vmem:[%s899_s7 + $0x70] sm:$0xff] %v483_v42 }
 0x151   : > { %527 = vst [vmem:[%s899_s7 + $0x28] sm:$0xff] %v504_v44 }
 0x152   : > { %526 = vst [vmem:[%s899_s7 + $0x20] sm:$0xff] %v471_v45 }
 0x154   : > { %v518_v47 = vpop.f32.mrf.mxu3 }
 0x155   : > { %v485_v48 = vpop.f32.mrf.mxu2  ;;  %v519_v49 = vadd.f32 %v518_v47, %v415_v46 }
 0x156   : > { %v505_v50 = vpop.f32.mrf.mxu1  ;;  %v486_v51 = vadd.f32 %v485_v48, %v415_v46 }
 0x157   : > { %v472_v52 = vpop.f32.mrf.mxu0  ;;  %v506_v53 = vadd.f32 %v505_v50, %v390_v20  ;;  %539 = vst [vmem:[%s899_s7 + $0x88] sm:$0xff] %v519_v49 }
 0x158   : > { %v473_v54 = vadd.f32 %v472_v52, %v390_v20  ;;  %538 = vst [vmem:[%s899_s7 + $0x80] sm:$0xff] %v486_v51 }
 0x159   : > { %529 = vst [vmem:[%s899_s7 + $0x38] sm:$0xff] %v506_v53 }
 0x15a   : > { %528 = vst [vmem:[%s899_s7 + $0x30] sm:$0xff] %v473_v54 }
 0x15c   : > { %v520_v55 = vpop.f32.mrf.mxu3 }
 0x15d   : > { %v487_v56 = vpop.f32.mrf.mxu2 }
 0x15e   : > { %v508_v57 = vpop.f32.mrf.mxu1 }
 0x15f   : > { %v475_v58 = vpop.f32.mrf.mxu0  ;;  %v509_v59 = vadd.f32 %v508_v57, %v395_v26 }
 0x160   : > { %v476_v60 = vadd.f32 %v475_v58, %v395_v26 }
 0x161   : > { %531 = vst [vmem:[%s899_s7 + $0x48] sm:$0xff] %v509_v59 }
 0x162   : > { %530 = vst [vmem:[%s899_s7 + $0x40] sm:$0xff] %v476_v60 }
 0x166   : > { %v510_v61 = vpop.f32.mrf.mxu1 }
 0x167   : > { %v477_v62 = vpop.f32.mrf.mxu0  ;;  %v511_v63 = vadd.f32 %v510_v61, %v400_v36 }
 0x168   : > { %v478_v0 = vadd.f32 %v477_v62, %v400_v36 }
 0x169   : > { %533 = vst [vmem:[%s899_s7 + $0x58] sm:$0xff] %v511_v63 }
 0x16a   : > { %532 = vst [vmem:[%s899_s7 + $0x50] sm:$0xff] %v478_v0 }
 0x16b PF: > { %s13_s14 = sadd.s32 1, %s770_s14   ;;  %s932_s12 = smov %s766_s13 }
 0x16c   : > { %p10_p5 = scmp.ge.s32.totalorder %s13_s14, 4   ;;  %s933_s13 = smov %s935_s15 }
 0x16e   :  { %12 = sbr.rel (!%p10_p5) target bundleno = 2 (0x2), region = 68 }

// kernel: _lambda_.58
= control target key start
LH: loop header
LB: loop body
LE: loop exit
PB: predicated region body
PF: predicated region fallthrough
CT: control target
= control target key end

     0   :  { %s488_s15 = smov 0   ;;  %s533_s0 = inlined_call_operand.vmem [shape: f32[8,9,256], index: 0, kind: input, shape index: {}]   ;;  %s534_s1 = inlined_call_operand.vmem [shape: f32[8,9,256], index: 1, kind: input, shape index: {}]   ;;  %s535_s2 = inlined_call_operand.vmem [shape: f32[16,9], index: 2, kind: input, shape index: {}]   ;;  %s536_s3 = inlined_call_operand.vmem [shape: f32[16,9], index: 3, kind: input, shape index: {}]   ;;  %s537_s4 = inlined_call_operand.vmem [shape: f32[8,16,256], index: 4, kind: output, shape index: {}]  }
   0x1 LB: > { %s419_s16 = sadd.s32 4294967295, %s461_s15   ;;  %p423_p0 = scmp.ge.s32.totalorder %s461_s15, 1  ;;  %s461_s15 = sphi %s488_s15, %s14_s15  }
   0x2   : > { %p172_p1 = scmp.lt.s32.totalorder %s461_s15, 9 }
   0x4   : > { %p173_p2 = pnand %p423_p0, %p172_p1 }
   0x5   : > { %p203_p3 = scmp.lt.s32.totalorder (!%p173_p2), %s419_s16, 7 }
   0x6   : > { %176 = sbr.rel (%p173_p2) target bundleno = 162 (0xa2), region = 36 }
   0xb   : > { %s539_s16 = smov (!%p203_p3, %s419_s16), 7  ;;  %vm237_vm0 = vcmask 1040384   ;;  %v218_v0 = vld [vmem:[%s535_s2] sm:$0xff]  ;;  %vm230_vm1 = vcmask 72704   ;;  %v219_v10 = vld [vmem:[%s535_s2 + $0x8] sm:$0xff] }
   0xc   : > { %s496_s17 = sshll.u32 %s539_s16, 5  ;;  %v224_v9 = vld [vmem:[%s536_s3] sm:$0xff]  ;;  %v225_v11 = vld [vmem:[%s536_s3 + $0x8] sm:$0xff] }
   0xd   : > { %s207_s20 = scalar_lea.vmem %s533_s0, %s496_s17  ;;  %s212_s25 = scalar_lea.vmem %s534_s1, %s496_s17 }
   0xe   : > { %v222_v1 = vld [vmem:[%s207_s20 + $0x10] sm:$0x1]  ;;  %v223_v2 = vld [vmem:[%s207_s20 + $0x18] sm:$0x1]  ;;  %v220_v3 = vld [vmem:[%s207_s20] sm:$0xff]  ;;  %s217_s8 = scalar_lea.vmem %s537_s4, %s496_s17 }
   0xf   : > { %436 = vmatpush.msk.msra.mxu2 %vm237_vm0, %v222_v1  ;;  %439 = vmatpush.msk.msra.mxu3 %vm237_vm0, %v223_v2  ;;  %v221_v4 = vld [vmem:[%s207_s20 + $0x8] sm:$0xff]  ;;  %v228_v5 = vld [vmem:[%s212_s25 + $0x10] sm:$0x1]  ;;  %v229_v6 = vld [vmem:[%s212_s25 + $0x18] sm:$0x1] }
  0x10   : > { %430 = vmatpush.msk.msra.mxu0 %vm237_vm0, %v228_v5  ;;  %433 = vmatpush.msk.msra.mxu1 %vm237_vm0, %v229_v6  ;;  %v226_v7 = vld [vmem:[%s212_s25] sm:$0xff]  ;;  %v227_v8 = vld [vmem:[%s212_s25 + $0x8] sm:$0xff] }
  0x11   : > { %317 = vmatpush.msra.mxu2 %v220_v3  ;;  %340 = vmatpush.msra.mxu3 %v221_v4 }
  0x12   : > { %437 = vmatmul.msk.f32.vlgmr.msra.gmra.mxu2 %vm230_vm1, %v218_v0  ;;  %440 = vmatmul.msk.f32.vlgmr.msra.gmra.mxu3 %vm230_vm1, %v218_v0 }
  0x13   : > { %259 = vmatpush.msra.mxu0 %v226_v7  ;;  %282 = vmatpush.msra.mxu1 %v227_v8 }
  0x14   : > { %431 = vmatmul.msk.f32.vlgmr.msra.gmra.mxu0 %vm230_vm1, %v224_v9  ;;  %434 = vmatmul.msk.f32.vlgmr.msra.gmra.mxu1 %vm230_vm1, %v224_v9 }
  0x1a   : > { %438 = vmatmul.msk.f32.gmra.mxu2 %vm230_vm1, %v219_v10  ;;  %441 = vmatmul.msk.f32.gmra.mxu3 %vm230_vm1, %v219_v10 }
  0x1c   : > { %432 = vmatmul.msk.f32.gmra.mxu0 %vm230_vm1, %v225_v11  ;;  %435 = vmatmul.msk.f32.gmra.mxu1 %vm230_vm1, %v225_v11 }
  0x91   : > { %v261_v12 = vpop.f32.mrf.mxu0  ;;  %v284_v13 = vpop.f32.mrf.mxu1 }
  0x95   : > { %v319_v14 = vpop.f32.mrf.mxu2  ;;  %v342_v15 = vpop.f32.mrf.mxu3 }
  0x96   : > { %v320_v16 = vadd.f32 %v319_v14, %v261_v12  ;;  %v343_v17 = vadd.f32 %v342_v15, %v284_v13 }
  0x98   : > { %348 = vst [vmem:[%s217_s8] sm:$0xff] %v320_v16 }
  0x99   : > { %349 = vst [vmem:[%s217_s8 + $0x8] sm:$0xff] %v343_v17  ;;  %v264_v18 = vpop.f32.mrf.mxu0  ;;  %v287_v19 = vpop.f32.mrf.mxu1 }
  0x9d   : > { %v322_v20 = vpop.f32.mrf.mxu2  ;;  %v345_v21 = vpop.f32.mrf.mxu3 }
  0x9e   : > { %v323_v22 = vadd.f32 %v322_v20, %v264_v18  ;;  %v346_v23 = vadd.f32 %v345_v21, %v287_v19 }
  0xa0   : > { %350 = vst [vmem:[%s217_s8 + $0x10] sm:$0xff] %v323_v22 }
  0xa1   : > { %351 = vst [vmem:[%s217_s8 + $0x18] sm:$0xff] %v346_v23 }
  0xa2 PF: > { %s14_s15 = sadd.s32 1, %s461_s15  }
  0xa3   : > { %p11_p4 = scmp.ge.s32.totalorder %s14_s15, 10  }
  0xa5   :  { %13 = sbr.rel (!%p11_p4) target bundleno = 1 (0x1), region = 69 }

// kernel: _lambda_.59
= control target key start
LH: loop header
LB: loop body
LE: loop exit
PB: predicated region body
PF: predicated region fallthrough
CT: control target
= control target key end

     0   :  { %s3744_s12 = smov 0   ;;  %s3746_s13 = smov 0   ;;  %s4407_s0 = inlined_call_operand.vmem [shape: bf16[2,252,2048], index: 0, kind: input, shape index: {}]   ;;  %s4408_s1 = inlined_call_operand.vmem [shape: bf16[8,252], index: 1, kind: input, shape index: {}]   ;;  %s4409_s2 = inlined_call_operand.vmem [shape: f32[8,1], index: 2, kind: input, shape index: {}]   ;;  %s4410_s3 = inlined_call_operand.vmem [shape: f32[2,8,2048], index: 3, kind: output, shape index: {}]  }
   0x1   :  { %s3748_s14 = smov 0  }
   0x2 LB: > { %s25_s15 = sadd.s32 1, %s3717_s13  ;;  %p2368_p0 = scmp.ge.s32.totalorder %s3721_s14, 1  ;;  %s3721_s14 = sphi %s3748_s14, %s13_s14   ;;  %s3717_s13 = sphi %s3746_s13, %s4412_s13   ;;  %s3713_s12 = sphi %s3744_s12, %s4411_s12  }
   0x3   : > { %p27_p1 = scmp.ge.s32.totalorder %s25_s15, 2  ;;  %p170_p2 = scmp.lt.s32.totalorder %s3721_s14, 3 }
   0x5   : > { %s4414_s15 = smov (%p27_p1, %s25_s15), 0  ;;  %p171_p3 = pnand %p2368_p0, %p170_p2 }
   0x6   : > { %p207_p4 = scmp.lt.s32.totalorder (!%p171_p3), %s3713_s12, 1 }
   0x7   : > { %174 = sbr.rel (%p171_p3) target bundleno = 417 (0x1a1), region = 32 }
   0xc   : > { %s4416_s12 = smov (!%p207_p4, %s3713_s12), 1  ;;  %vm1767_vm0 = vcmask 1045504   ;;  %vm1763_vm1 = vcmask 1014784  }
   0xd   : > { %s3415_s16 = sshll.u32 %s4416_s12, 11  ;;  %s3416_s24 = sshll.u32 %s4416_s12, 7 }
   0xe   : > { %s3768_s19 = scalar_lea.vmem %s4407_s0, %s3415_s16  ;;  %s4224_s27 = scalar_lea.vmem %s4410_s3, %s3416_s24 }
   0xf   : > { %v2823_v0 = vld [vmem:[%s3768_s19 + $0x380] sm:$0xf]  ;;  %v3529_v2 = vld [vmem:[%s3768_s19 + $0x384] sm:$0xf] }
  0x10   : > { %v3537_v1 = vld [vmem:[%s3768_s19 + $0x3bc] sm:$0xf0]  ;;  %v2825_v4 = vld [vmem:[%s3768_s19 + $0x3c0] sm:$0xf0] }
  0x11   : > { %v2824_v3 = vor.u32 %v3537_v1, %v2823_v0  ;;  %v3335_v5 = vld [vmem:[%s3768_s19 + $0x780] sm:$0xf]  ;;  %v2828_v7 = vor.u32 %v3529_v2, %v2825_v4  ;;  %v3657_v9 = vld [vmem:[%s3768_s19 + $0x784] sm:$0xf] }
  0x12   : > { %v3665_v6 = vld [vmem:[%s3768_s19 + $0x7bc] sm:$0x30]  ;;  %v3337_v10 = vld [vmem:[%s3768_s19 + $0x7c0] sm:$0x30] }
  0x13   : > { %v3336_v8 = vor.u32 %v3665_v6, %v3335_v5  ;;  %v2759_v11 = vld [vmem:[%s3768_s19 + $0x300] sm:$0xf]  ;;  %1816 = vmatpush.bf16.msra.mxu0 %v2824_v3  ;;  %v3340_v12 = vor.u32 %v3657_v9, %v3337_v10  ;;  %v3513_v14 = vld [vmem:[%s3768_s19 + $0x304] sm:$0xf]  ;;  %1842 = vmatpush.bf16.msra.mxu2 %v2828_v7 }
  0x14   : > { %v3521_v13 = vld [vmem:[%s3768_s19 + $0x33c] sm:$0xf0]  ;;  %v2761_v15 = vld [vmem:[%s3768_s19 + $0x340] sm:$0xf0] }
  0x15   : > { %v1769_v16 = vsel %vm1767_vm0, %v3336_v8, 0  ;;  %v2760_v17 = vor.u32 %v3521_v13, %v2759_v11  ;;  %v2764_v18 = vor.u32 %v3513_v14, %v2761_v15  ;;  %v3271_v19 = vld [vmem:[%s3768_s19 + $0x700] sm:$0xf]  ;;  %v1772_v21 = vsel %vm1767_vm0, %v3340_v12, 0  ;;  %v3641_v23 = vld [vmem:[%s3768_s19 + $0x704] sm:$0xf] }
  0x16   : > { %v3649_v20 = vld [vmem:[%s3768_s19 + $0x73c] sm:$0xf0]  ;;  %1829 = vmatpush.bf16.msra.mxu1 %v1769_v16  ;;  %v3273_v24 = vld [vmem:[%s3768_s19 + $0x740] sm:$0xf0]  ;;  %1855 = vmatpush.bf16.msra.mxu3 %v1772_v21 }
  0x17   : > { %v3272_v22 = vor.u32 %v3649_v20, %v3271_v19  ;;  %v3276_v25 = vor.u32 %v3641_v23, %v3273_v24  ;;  %v2695_v26 = vld [vmem:[%s3768_s19 + $0x280] sm:$0xf]  ;;  %v3497_v28 = vld [vmem:[%s3768_s19 + $0x284] sm:$0xf]  ;;  %1817 = vmatpush.bf16.msra.mxu0 %v2760_v17  ;;  %1843 = vmatpush.bf16.msra.mxu2 %v2764_v18 }
  0x18   : > { %v3505_v27 = vld [vmem:[%s3768_s19 + $0x2bc] sm:$0xf0]  ;;  %v2697_v30 = vld [vmem:[%s3768_s19 + $0x2c0] sm:$0xf0] }
  0x19   : > { %v2696_v29 = vor.u32 %v3505_v27, %v2695_v26  ;;  %v3207_v31 = vld [vmem:[%s3768_s19 + $0x680] sm:$0xf]  ;;  %v2700_v33 = vor.u32 %v3497_v28, %v2697_v30  ;;  %v3625_v34 = vld [vmem:[%s3768_s19 + $0x684] sm:$0xf]  ;;  %v2831_v26 = vld [vmem:[%s3768_s19 + $0x388] sm:$0xf] }
  0x1a   : > { %v3633_v32 = vld [vmem:[%s3768_s19 + $0x6bc] sm:$0xf0]  ;;  %v3209_v35 = vld [vmem:[%s3768_s19 + $0x6c0] sm:$0xf0]  ;;  %1830 = vmatpush.bf16.msra.mxu1 %v3272_v22  ;;  %1856 = vmatpush.bf16.msra.mxu3 %v3276_v25  ;;  %v3343_v27 = vld [vmem:[%s3768_s19 + $0x788] sm:$0xf] }
  0x1b   : > { %v2631_v36 = vld [vmem:[%s3768_s19 + $0x200] sm:$0xf]  ;;  %v3208_v37 = vor.u32 %v3633_v32, %v3207_v31  ;;  %v3481_v39 = vld [vmem:[%s3768_s19 + $0x204] sm:$0xf]  ;;  %v3212_v41 = vor.u32 %v3625_v34, %v3209_v35  ;;  %1818 = vmatpush.bf16.msra.mxu0 %v2696_v29  ;;  %1844 = vmatpush.bf16.msra.mxu2 %v2700_v33  ;;  %v3666_v28 = vld [vmem:[%s3768_s19 + $0x7c4] sm:$0x30] }
  0x1c   : > { %v3489_v38 = vld [vmem:[%s3768_s19 + $0x23c] sm:$0xf0]  ;;  %v2633_v40 = vld [vmem:[%s3768_s19 + $0x240] sm:$0xf0]  ;;  %v3538_v30 = vld [vmem:[%s3768_s19 + $0x3c4] sm:$0xf0] }
  0x1d   : > { %v3143_v42 = vld [vmem:[%s3768_s19 + $0x600] sm:$0xf]  ;;  %v2632_v44 = vor.u32 %v3489_v38, %v2631_v36  ;;  %v3609_v45 = vld [vmem:[%s3768_s19 + $0x604] sm:$0xf]  ;;  %v2636_v47 = vor.u32 %v3481_v39, %v2633_v40  ;;  %v3658_v31 = vld [vmem:[%s3768_s19 + $0x78c] sm:$0xf]  ;;  %v3344_v40 = vor.u32 %v3666_v28, %v3343_v27 }
  0x1e   : > { %v3617_v43 = vld [vmem:[%s3768_s19 + $0x63c] sm:$0xf0]  ;;  %v3145_v46 = vld [vmem:[%s3768_s19 + $0x640] sm:$0xf0]  ;;  %1831 = vmatpush.bf16.msra.mxu1 %v3208_v37  ;;  %1857 = vmatpush.bf16.msra.mxu3 %v3212_v41  ;;  %v3345_v32 = vld [vmem:[%s3768_s19 + $0x7c8] sm:$0x30] }
  0x1f   : > { %v2567_v48 = vld [vmem:[%s3768_s19 + $0x180] sm:$0xf]  ;;  %v3144_v50 = vor.u32 %v3617_v43, %v3143_v42  ;;  %v3465_v51 = vld [vmem:[%s3768_s19 + $0x184] sm:$0xf]  ;;  %v3148_v53 = vor.u32 %v3609_v45, %v3145_v46  ;;  %1819 = vmatpush.bf16.msra.mxu0 %v2632_v44  ;;  %1845 = vmatpush.bf16.msra.mxu2 %v2636_v47  ;;  %v3530_v34 = vld [vmem:[%s3768_s19 + $0x38c] sm:$0xf]  ;;  %v2832_v43 = vor.u32 %v3538_v30, %v2831_v26 }
  0x20   : > { %v3473_v49 = vld [vmem:[%s3768_s19 + $0x1bc] sm:$0xf0]  ;;  %v2569_v52 = vld [vmem:[%s3768_s19 + $0x1c0] sm:$0xf0]  ;;  %v2833_v35 = vld [vmem:[%s3768_s19 + $0x3c8] sm:$0xf0]  ;;  %v3348_v44 = vor.u32 %v3658_v31, %v3345_v32 }
  0x21   : > { %v3079_v54 = vld [vmem:[%s3768_s19 + $0x580] sm:$0xf]  ;;  %v2568_v56 = vor.u32 %v3473_v49, %v2567_v48  ;;  %v3593_v57 = vld [vmem:[%s3768_s19 + $0x584] sm:$0xf]  ;;  %v2572_v59 = vor.u32 %v3465_v51, %v2569_v52  ;;  %v2836_v46 = vor.u32 %v3530_v34, %v2833_v35  ;;  %v2767_v47 = vld [vmem:[%s3768_s19 + $0x308] sm:$0xf] }
  0x22   : > { %v3601_v55 = vld [vmem:[%s3768_s19 + $0x5bc] sm:$0xf0]  ;;  %v3081_v58 = vld [vmem:[%s3768_s19 + $0x5c0] sm:$0xf0]  ;;  %1832 = vmatpush.bf16.msra.mxu1 %v3144_v50  ;;  %1858 = vmatpush.bf16.msra.mxu3 %v3148_v53  ;;  %v3522_v48 = vld [vmem:[%s3768_s19 + $0x344] sm:$0xf0] }
  0x23   : > { %v2503_v60 = vld [vmem:[%s3768_s19 + $0x100] sm:$0xf]  ;;  %v3080_v62 = vor.u32 %v3601_v55, %v3079_v54  ;;  %v3449_v63 = vld [vmem:[%s3768_s19 + $0x104] sm:$0xf]  ;;  %v3084_v1 = vor.u32 %v3593_v57, %v3081_v58  ;;  %1820 = vmatpush.bf16.msra.mxu0 %v2568_v56  ;;  %1846 = vmatpush.bf16.msra.mxu2 %v2572_v59  ;;  %v3514_v50 = vld [vmem:[%s3768_s19 + $0x30c] sm:$0xf]  ;;  %v2768_v57 = vor.u32 %v3522_v48, %v2767_v47 }
  0x24   : > { %v3457_v61 = vld [vmem:[%s3768_s19 + $0x13c] sm:$0xf0]  ;;  %v2505_v0 = vld [vmem:[%s3768_s19 + $0x140] sm:$0xf0]  ;;  %v2769_v51 = vld [vmem:[%s3768_s19 + $0x348] sm:$0xf0] }
  0x25   : > { %v3015_v2 = vld [vmem:[%s3768_s19 + $0x500] sm:$0xf]  ;;  %v2504_v4 = vor.u32 %v3457_v61, %v2503_v60  ;;  %v3577_v5 = vld [vmem:[%s3768_s19 + $0x504] sm:$0xf]  ;;  %v2508_v7 = vor.u32 %v3449_v63, %v2505_v0  ;;  %v1775_v52 = vsel %vm1767_vm0, %v3344_v40, 0  ;;  %v1778_v56 = vsel %vm1767_vm0, %v3348_v44, 0 }
  0x26   : > { %v3585_v3 = vld [vmem:[%s3768_s19 + $0x53c] sm:$0xf0]  ;;  %v3017_v6 = vld [vmem:[%s3768_s19 + $0x540] sm:$0xf0]  ;;  %1833 = vmatpush.bf16.msra.mxu1 %v3080_v62  ;;  %1859 = vmatpush.bf16.msra.mxu3 %v3084_v1  ;;  %v3279_v53 = vld [vmem:[%s3768_s19 + $0x708] sm:$0xf]  ;;  %v2772_v61 = vor.u32 %v3514_v50, %v2769_v51 }
  0x27   : > { %v2439_v8 = vld [vmem:[%s3768_s19 + $0x80] sm:$0xf]  ;;  %v3433_v10 = vld [vmem:[%s3768_s19 + $0x84] sm:$0xf]  ;;  %v3016_v11 = vor.u32 %v3585_v3, %v3015_v2  ;;  %v3020_v15 = vor.u32 %v3577_v5, %v3017_v6  ;;  %1821 = vmatpush.bf16.msra.mxu0 %v2504_v4  ;;  %1847 = vmatpush.bf16.msra.mxu2 %v2508_v7  ;;  %v3650_v54 = vld [vmem:[%s3768_s19 + $0x744] sm:$0xf0] }
  0x28   : > { %v3441_v9 = vld [vmem:[%s3768_s19 + $0xbc] sm:$0xf0]  ;;  %v2441_v12 = vld [vmem:[%s3768_s19 + $0xc0] sm:$0xf0]  ;;  %v3642_v58 = vld [vmem:[%s3768_s19 + $0x70c] sm:$0xf]  ;;  %v3280_v0 = vor.u32 %v3650_v54, %v3279_v53 }
  0x29   : > { %v2951_v13 = vld [vmem:[%s3768_s19 + $0x480] sm:$0xf]  ;;  %v3561_v16 = vld [vmem:[%s3768_s19 + $0x484] sm:$0xf]  ;;  %v2440_v19 = vor.u32 %v3441_v9, %v2439_v8  ;;  %v2444_v23 = vor.u32 %v3433_v10, %v2441_v12  ;;  %v3281_v59 = vld [vmem:[%s3768_s19 + $0x748] sm:$0xf0] }
  0x2a   : > { %v3569_v14 = vld [vmem:[%s3768_s19 + $0x4bc] sm:$0xf0]  ;;  %v2953_v17 = vld [vmem:[%s3768_s19 + $0x4c0] sm:$0xf0]  ;;  %1834 = vmatpush.bf16.msra.mxu1 %v3016_v11  ;;  %1860 = vmatpush.bf16.msra.mxu3 %v3020_v15  ;;  %v2703_v62 = vld [vmem:[%s3768_s19 + $0x288] sm:$0xf]  ;;  %v3284_v3 = vor.u32 %v3642_v58, %v3281_v59 }
  0x2b   : > { %v2375_v18 = vld [vmem:[%s3768_s19] sm:$0xf]  ;;  %v3417_v21 = vld [vmem:[%s3768_s19 + $0x4] sm:$0xf]  ;;  %v2952_v29 = vor.u32 %v3569_v14, %v2951_v13  ;;  %v2956_v33 = vor.u32 %v3561_v16, %v2953_v17  ;;  %1822 = vmatpush.bf16.msra.mxu0 %v2440_v19  ;;  %1848 = vmatpush.bf16.msra.mxu2 %v2444_v23  ;;  %v3506_v63 = vld [vmem:[%s3768_s19 + $0x2c4] sm:$0xf0] }
  0x2c   : > { %v3425_v20 = vld [vmem:[%s3768_s19 + $0x3c] sm:$0xf0]  ;;  %v2377_v22 = vld [vmem:[%s3768_s19 + $0x40] sm:$0xf0]  ;;  %v3498_v1 = vld [vmem:[%s3768_s19 + $0x28c] sm:$0xf]  ;;  %v2704_v6 = vor.u32 %v3506_v63, %v2703_v62 }
  0x2d   : > { %v2887_v24 = vld [vmem:[%s3768_s19 + $0x400] sm:$0xf]  ;;  %v2376_v37 = vor.u32 %v3425_v20, %v2375_v18  ;;  %v3545_v38 = vld [vmem:[%s3768_s19 + $0x404] sm:$0xf]  ;;  %v2380_v42 = vor.u32 %v3417_v21, %v2377_v22  ;;  %v2705_v2 = vld [vmem:[%s3768_s19 + $0x2c8] sm:$0xf0] }
  0x2e   : > { %v3553_v25 = vld [vmem:[%s3768_s19 + $0x43c] sm:$0xf0]  ;;  %v2889_v39 = vld [vmem:[%s3768_s19 + $0x440] sm:$0xf0]  ;;  %1835 = vmatpush.bf16.msra.mxu1 %v2952_v29  ;;  %1861 = vmatpush.bf16.msra.mxu3 %v2956_v33  ;;  %v3215_v4 = vld [vmem:[%s3768_s19 + $0x688] sm:$0xf]  ;;  %v2708_v10 = vor.u32 %v3498_v1, %v2705_v2 }
  0x2f   : > { %v486_v36 = vld [vmem:[%s4408_s1] sm:$0xff]  ;;  %v2888_v45 = vor.u32 %v3553_v25, %v2887_v24  ;;  %v2892_v49 = vor.u32 %v3545_v38, %v2889_v39  ;;  %1823 = vmatpush.bf16.msra.mxu0 %v2376_v37  ;;  %1849 = vmatpush.bf16.msra.mxu2 %v2380_v42  ;;  %v3634_v5 = vld [vmem:[%s3768_s19 + $0x6c4] sm:$0xf0]  ;;  %v3626_v7 = vld [vmem:[%s3768_s19 + $0x68c] sm:$0xf] }
  0x30   : > { %v494_v41 = vunpack.c.l.b16 %v486_v36  ;;  %v495_v60 = vunpack.c.h.b16 %v486_v36  ;;  %v3217_v8 = vld [vmem:[%s3768_s19 + $0x6c8] sm:$0xf0]  ;;  %v2639_v11 = vld [vmem:[%s3768_s19 + $0x208] sm:$0xf]  ;;  %v3216_v13 = vor.u32 %v3634_v5, %v3215_v4  ;;  %v2839_v2 = vld [vmem:[%s3768_s19 + $0x390] sm:$0xf] }
  0x31   : > { %v3490_v12 = vld [vmem:[%s3768_s19 + $0x244] sm:$0xf0]  ;;  %v3482_v14 = vld [vmem:[%s3768_s19 + $0x20c] sm:$0xf]  ;;  %v3220_v16 = vor.u32 %v3626_v7, %v3217_v8  ;;  %v3667_v4 = vld [vmem:[%s3768_s19 + $0x7cc] sm:$0x30] }
  0x32   : > { %v3854_v55 = vpack.c.b16 %v494_v41, %v494_v41  ;;  %1836 = vmatpush.bf16.msra.mxu1 %v2888_v45  ;;  %1862 = vmatpush.bf16.msra.mxu3 %v2892_v49  ;;  %v3868_v9 = vpack.c.b16 %v495_v60, %v495_v60  ;;  %v2641_v15 = vld [vmem:[%s3768_s19 + $0x248] sm:$0xf0]  ;;  %v3151_v17 = vld [vmem:[%s3768_s19 + $0x608] sm:$0xf]  ;;  %v2640_v19 = vor.u32 %v3490_v12, %v2639_v11  ;;  %v3659_v7 = vld [vmem:[%s3768_s19 + $0x794] sm:$0xf] }
  0x33   : > { %1868 = vmatpush.bf16.msrb.mxu0 %v2832_v43  ;;  %1894 = vmatpush.bf16.msrb.mxu2 %v2836_v46  ;;  %v3618_v18 = vld [vmem:[%s3768_s19 + $0x644] sm:$0xf0]  ;;  %v3610_v20 = vld [vmem:[%s3768_s19 + $0x60c] sm:$0xf]  ;;  %v2644_v22 = vor.u32 %v3482_v14, %v2641_v15  ;;  %v3353_v8 = vld [vmem:[%s3768_s19 + $0x7d0] sm:$0x30] }
  0x34   : > { %1850 = vmatmul.bf16.vlgmr.msra.gmra.mxu2 %v3854_v55  ;;  %1824 = vmatmul.bf16.vlgmr.msra.gmra.mxu0 %v3854_v55  ;;  %v3153_v21 = vld [vmem:[%s3768_s19 + $0x648] sm:$0xf0]  ;;  %v2575_v23 = vld [vmem:[%s3768_s19 + $0x188] sm:$0xf]  ;;  %v3152_v25 = vor.u32 %v3618_v18, %v3151_v17  ;;  %v3531_v11 = vld [vmem:[%s3768_s19 + $0x394] sm:$0xf] }
  0x35   : > { %3397 = vmatmul.msk.bf16.vlgmr.msra.gmra.mxu1 %vm1763_vm1, %v3868_v9  ;;  %3398 = vmatmul.msk.bf16.vlgmr.msra.gmra.mxu3 %vm1763_vm1, %v3868_v9  ;;  %v3474_v24 = vld [vmem:[%s3768_s19 + $0x1c4] sm:$0xf0]  ;;  %v3466_v26 = vld [vmem:[%s3768_s19 + $0x18c] sm:$0xf]  ;;  %v3156_v28 = vor.u32 %v3610_v20, %v3153_v21  ;;  %v2841_v12 = vld [vmem:[%s3768_s19 + $0x3d0] sm:$0xf0]  ;;  %v3356_v21 = vor.u32 %v3659_v7, %v3353_v8 }
  0x36   : > { %1881 = vmatpush.bf16.msrb.mxu1 %v1775_v52  ;;  %1907 = vmatpush.bf16.msrb.mxu3 %v1778_v56  ;;  %v2577_v27 = vld [vmem:[%s3768_s19 + $0x1c8] sm:$0xf0]  ;;  %v3087_v29 = vld [vmem:[%s3768_s19 + $0x588] sm:$0xf]  ;;  %v2576_v31 = vor.u32 %v3474_v24, %v2575_v23  ;;  %v3723_v18 = vmov 0   ;;  %v2844_v23 = vor.u32 %v3531_v11, %v2841_v12 }
  0x37   : > { %1869 = vmatpush.bf16.msrb.mxu0 %v2768_v57  ;;  %1895 = vmatpush.bf16.msrb.mxu2 %v2772_v61  ;;  %v3602_v30 = vld [vmem:[%s3768_s19 + $0x5c4] sm:$0xf0]  ;;  %v3594_v32 = vld [vmem:[%s3768_s19 + $0x58c] sm:$0xf]  ;;  %v2580_v34 = vor.u32 %v3466_v26, %v2577_v27  ;;  %v2775_v24 = vld [vmem:[%s3768_s19 + $0x310] sm:$0xf] }
  0x38   : > { %v3089_v33 = vld [vmem:[%s3768_s19 + $0x5c8] sm:$0xf0]  ;;  %v2511_v35 = vld [vmem:[%s3768_s19 + $0x108] sm:$0xf]  ;;  %v3088_v37 = vor.u32 %v3602_v30, %v3087_v29  ;;  %3698 = vset.pattern.permute.xlu0 %v3723_v18  ;;  %v3515_v27 = vld [vmem:[%s3768_s19 + $0x314] sm:$0xf] }
  0x39   : > { %v3458_v36 = vld [vmem:[%s3768_s19 + $0x144] sm:$0xf0]  ;;  %v3450_v38 = vld [vmem:[%s3768_s19 + $0x10c] sm:$0xf]  ;;  %v3092_v40 = vor.u32 %v3594_v32, %v3089_v33  ;;  %v3287_v30 = vld [vmem:[%s3768_s19 + $0x710] sm:$0xf] }
  0x3a   : > { %1882 = vmatpush.bf16.msrb.mxu1 %v3280_v0  ;;  %1908 = vmatpush.bf16.msrb.mxu3 %v3284_v3  ;;  %v2513_v39 = vld [vmem:[%s3768_s19 + $0x148] sm:$0xf0]  ;;  %v3023_v41 = vld [vmem:[%s3768_s19 + $0x508] sm:$0xf]  ;;  %v2512_v43 = vor.u32 %v3458_v36, %v2511_v35  ;;  %v3351_v3 = vld [vmem:[%s3768_s19 + $0x790] sm:$0xf] }
  0x3b   : > { %1870 = vmatpush.bf16.msrb.mxu0 %v2704_v6  ;;  %1896 = vmatpush.bf16.msrb.mxu2 %v2708_v10  ;;  %v3586_v42 = vld [vmem:[%s3768_s19 + $0x544] sm:$0xf0]  ;;  %v3578_v44 = vld [vmem:[%s3768_s19 + $0x50c] sm:$0xf]  ;;  %v2516_v46 = vor.u32 %v3450_v38, %v2513_v39  ;;  %v3539_v6 = vld [vmem:[%s3768_s19 + $0x3cc] sm:$0xf0]  ;;  %v3352_v17 = vor.u32 %v3667_v4, %v3351_v3 }
  0x3c   : > { %v3025_v45 = vld [vmem:[%s3768_s19 + $0x548] sm:$0xf0]  ;;  %v2447_v47 = vld [vmem:[%s3768_s19 + $0x88] sm:$0xf]  ;;  %v3024_v50 = vor.u32 %v3586_v42, %v3023_v41  ;;  %v2840_v20 = vor.u32 %v3539_v6, %v2839_v2  ;;  %v1784_v32 = vsel %vm1767_vm0, %v3356_v21, 0 }
  0x3d   : > { %v3442_v48 = vld [vmem:[%s3768_s19 + $0xc4] sm:$0xf0]  ;;  %v3434_v49 = vld [vmem:[%s3768_s19 + $0x8c] sm:$0xf]  ;;  %v3028_v54 = vor.u32 %v3578_v44, %v3025_v45  ;;  %v1781_v29 = vsel %vm1767_vm0, %v3352_v17, 0 }
  0x3e   : > { %1883 = vmatpush.bf16.msrb.mxu1 %v3216_v13  ;;  %1909 = vmatpush.bf16.msrb.mxu3 %v3220_v16  ;;  %v2449_v51 = vld [vmem:[%s3768_s19 + $0xc8] sm:$0xf0]  ;;  %v2959_v52 = vld [vmem:[%s3768_s19 + $0x488] sm:$0xf]  ;;  %v2448_v59 = vor.u32 %v3442_v48, %v2447_v47  ;;  %v487_v13 = vld [vmem:[%s4409_s2] sm:$0xff] }
  0x3f   : > { %1871 = vmatpush.bf16.msrb.mxu0 %v2640_v19  ;;  %1897 = vmatpush.bf16.msrb.mxu2 %v2644_v22  ;;  %v3570_v53 = vld [vmem:[%s3768_s19 + $0x4c4] sm:$0xf0]  ;;  %v3562_v56 = vld [vmem:[%s3768_s19 + $0x48c] sm:$0xf]  ;;  %v2452_v63 = vor.u32 %v3434_v49, %v2449_v51  ;;  %v3289_v35 = vld [vmem:[%s3768_s19 + $0x750] sm:$0xf0] }
  0x40   : > { %v2961_v57 = vld [vmem:[%s3768_s19 + $0x4c8] sm:$0xf0]  ;;  %v2383_v58 = vld [vmem:[%s3768_s19 + $0x8] sm:$0xf]  ;;  %v2960_v5 = vor.u32 %v3570_v53, %v2959_v52  ;;  %490 = vperm.xlu0 %3698, %v487_v13   ;;  %v3507_v38 = vld [vmem:[%s3768_s19 + $0x2cc] sm:$0xf0] }
  0x41   : > { %v3426_v60 = vld [vmem:[%s3768_s19 + $0x44] sm:$0xf0]  ;;  %v3418_v61 = vld [vmem:[%s3768_s19 + $0xc] sm:$0xf]  ;;  %v2964_v10 = vor.u32 %v3562_v56, %v2961_v57  ;;  %v2713_v41 = vld [vmem:[%s3768_s19 + $0x2d0] sm:$0xf0] }
  0x42   : > { %1884 = vmatpush.bf16.msrb.mxu1 %v3152_v25  ;;  %1910 = vmatpush.bf16.msrb.mxu3 %v3156_v28  ;;  %v2385_v62 = vld [vmem:[%s3768_s19 + $0x48] sm:$0xf0]  ;;  %v2895_v0 = vld [vmem:[%s3768_s19 + $0x408] sm:$0xf]  ;;  %v2384_v14 = vor.u32 %v3426_v60, %v2383_v58  ;;  %v3523_v25 = vld [vmem:[%s3768_s19 + $0x34c] sm:$0xf0] }
  0x43   : > { %1872 = vmatpush.bf16.msrb.mxu0 %v2576_v31  ;;  %1898 = vmatpush.bf16.msrb.mxu2 %v2580_v34  ;;  %v3554_v1 = vld [vmem:[%s3768_s19 + $0x444] sm:$0xf0]  ;;  %v3546_v15 = vld [vmem:[%s3768_s19 + $0x40c] sm:$0xf]  ;;  %v2388_v19 = vor.u32 %v3418_v61, %v2385_v62  ;;  %v2777_v28 = vld [vmem:[%s3768_s19 + $0x350] sm:$0xf0]  ;;  %v2776_v33 = vor.u32 %v3523_v25, %v2775_v24 }
  0x44   : > { %v2897_v16 = vld [vmem:[%s3768_s19 + $0x448] sm:$0xf0]  ;;  %v2896_v22 = vor.u32 %v3554_v1, %v2895_v0  ;;  %v3651_v31 = vld [vmem:[%s3768_s19 + $0x74c] sm:$0xf0]  ;;  %v3643_v34 = vld [vmem:[%s3768_s19 + $0x714] sm:$0xf]  ;;  %v2780_v36 = vor.u32 %v3515_v27, %v2777_v28 }
  0x45   : > { %v2900_v26 = vor.u32 %v3546_v15, %v2897_v16  ;;  %v3288_v39 = vor.u32 %v3651_v31, %v3287_v30  ;;  %v3292_v42 = vor.u32 %v3643_v34, %v3289_v35  ;;  %v3635_v44 = vld [vmem:[%s3768_s19 + $0x6cc] sm:$0xf0]  ;;  %v3225_v47 = vld [vmem:[%s3768_s19 + $0x6d0] sm:$0xf0] }
  0x46   : > { %1885 = vmatpush.bf16.msrb.mxu1 %v3088_v37  ;;  %1911 = vmatpush.bf16.msrb.mxu3 %v3092_v40  ;;  %v2711_v37 = vld [vmem:[%s3768_s19 + $0x290] sm:$0xf]  ;;  %v3499_v40 = vld [vmem:[%s3768_s19 + $0x294] sm:$0xf] }
  0x47   : > { %1873 = vmatpush.bf16.msrb.mxu0 %v2512_v43  ;;  %1899 = vmatpush.bf16.msrb.mxu2 %v2516_v46  ;;  %v3223_v43 = vld [vmem:[%s3768_s19 + $0x690] sm:$0xf]  ;;  %v2712_v45 = vor.u32 %v3507_v38, %v2711_v37  ;;  %v3627_v46 = vld [vmem:[%s3768_s19 + $0x694] sm:$0xf]  ;;  %v2716_v48 = vor.u32 %v3499_v40, %v2713_v41  ;;  %v2847_v40 = vld [vmem:[%s3768_s19 + $0x398] sm:$0xf] }
  0x48   : > { %v2647_v49 = vld [vmem:[%s3768_s19 + $0x210] sm:$0xf]  ;;  %v3224_v51 = vor.u32 %v3635_v44, %v3223_v43  ;;  %v3483_v52 = vld [vmem:[%s3768_s19 + $0x214] sm:$0xf]  ;;  %v3359_v41 = vld [vmem:[%s3768_s19 + $0x798] sm:$0xf] }
  0x49   : > { %v2649_v53 = vld [vmem:[%s3768_s19 + $0x250] sm:$0xf0]  ;;  %v3159_v56 = vld [vmem:[%s3768_s19 + $0x610] sm:$0xf]  ;;  %v3540_v44 = vld [vmem:[%s3768_s19 + $0x3d4] sm:$0xf0] }
  0x4a   : > { %1886 = vmatpush.bf16.msrb.mxu1 %v3024_v50  ;;  %1912 = vmatpush.bf16.msrb.mxu3 %v3028_v54  ;;  %v3491_v50 = vld [vmem:[%s3768_s19 + $0x24c] sm:$0xf0]  ;;  %v3228_v54 = vor.u32 %v3627_v46, %v3225_v47  ;;  %v3161_v60 = vld [vmem:[%s3768_s19 + $0x650] sm:$0xf0]  ;;  %v2652_v61 = vor.u32 %v3483_v52, %v2649_v53  ;;  %v3361_v46 = vld [vmem:[%s3768_s19 + $0x7d8] sm:$0x30] }
  0x4b   : > { %1874 = vmatpush.bf16.msrb.mxu0 %v2448_v59  ;;  %1900 = vmatpush.bf16.msrb.mxu2 %v2452_v63  ;;  %v3619_v57 = vld [vmem:[%s3768_s19 + $0x64c] sm:$0xf0]  ;;  %v2648_v58 = vor.u32 %v3491_v50, %v2647_v49  ;;  %v3611_v59 = vld [vmem:[%s3768_s19 + $0x614] sm:$0xf]  ;;  %v3532_v49 = vld [vmem:[%s3768_s19 + $0x39c] sm:$0xf] }
  0x4c   : > { %v2583_v62 = vld [vmem:[%s3768_s19 + $0x190] sm:$0xf]  ;;  %v3160_v0 = vor.u32 %v3619_v57, %v3159_v56  ;;  %v3467_v1 = vld [vmem:[%s3768_s19 + $0x194] sm:$0xf]  ;;  %v3164_v3 = vor.u32 %v3611_v59, %v3161_v60  ;;  %v2849_v50 = vld [vmem:[%s3768_s19 + $0x3d8] sm:$0xf0]  ;;  %v2848_v57 = vor.u32 %v3540_v44, %v2847_v40 }
  0x4d   : > { %v3475_v63 = vld [vmem:[%s3768_s19 + $0x1cc] sm:$0xf0]  ;;  %v2585_v2 = vld [vmem:[%s3768_s19 + $0x1d0] sm:$0xf0]  ;;  %v2852_v60 = vor.u32 %v3532_v49, %v2849_v50  ;;  %v3596_v44 = vld [vmem:[%s3768_s19 + $0x59c] sm:$0xf] }
  0x4e   : > { %1887 = vmatpush.bf16.msrb.mxu1 %v2960_v5  ;;  %1913 = vmatpush.bf16.msrb.mxu3 %v2964_v10  ;;  %v3095_v4 = vld [vmem:[%s3768_s19 + $0x590] sm:$0xf]  ;;  %v2584_v6 = vor.u32 %v3475_v63, %v2583_v62  ;;  %v3595_v7 = vld [vmem:[%s3768_s19 + $0x594] sm:$0xf]  ;;  %v2588_v10 = vor.u32 %v3467_v1, %v2585_v2  ;;  %v3524_v62 = vld [vmem:[%s3768_s19 + $0x354] sm:$0xf0] }
  0x4f   : > { %1875 = vmatpush.bf16.msrb.mxu0 %v2384_v14  ;;  %1901 = vmatpush.bf16.msrb.mxu2 %v2388_v19  ;;  %v3603_v5 = vld [vmem:[%s3768_s19 + $0x5cc] sm:$0xf0]  ;;  %v3097_v8 = vld [vmem:[%s3768_s19 + $0x5d0] sm:$0xf0]  ;;  %v2785_v1 = vld [vmem:[%s3768_s19 + $0x358] sm:$0xf0] }
  0x50   : > { %v2519_v11 = vld [vmem:[%s3768_s19 + $0x110] sm:$0xf]  ;;  %v3096_v13 = vor.u32 %v3603_v5, %v3095_v4  ;;  %v3451_v14 = vld [vmem:[%s3768_s19 + $0x114] sm:$0xf]  ;;  %v3100_v16 = vor.u32 %v3595_v7, %v3097_v8  ;;  %v3652_v4 = vld [vmem:[%s3768_s19 + $0x754] sm:$0xf0] }
  0x51   : > { %v3459_v12 = vld [vmem:[%s3768_s19 + $0x14c] sm:$0xf0]  ;;  %v2521_v15 = vld [vmem:[%s3768_s19 + $0x150] sm:$0xf0]  ;;  %v3644_v7 = vld [vmem:[%s3768_s19 + $0x71c] sm:$0xf] }
  0x52   : > { %1888 = vmatpush.bf16.msrb.mxu1 %v2896_v22  ;;  %1914 = vmatpush.bf16.msrb.mxu3 %v2900_v26  ;;  %v3031_v17 = vld [vmem:[%s3768_s19 + $0x510] sm:$0xf]  ;;  %v2520_v19 = vor.u32 %v3459_v12, %v2519_v11  ;;  %v3033_v21 = vld [vmem:[%s3768_s19 + $0x550] sm:$0xf0]  ;;  %v2524_v22 = vor.u32 %v3451_v14, %v2521_v15  ;;  %v3297_v8 = vld [vmem:[%s3768_s19 + $0x758] sm:$0xf0] }
  0x53   : > { %1920 = vmatpush.bf16.msra.mxu0 %v2840_v20  ;;  %1946 = vmatpush.bf16.msra.mxu2 %v2844_v23  ;;  %v3587_v18 = vld [vmem:[%s3768_s19 + $0x54c] sm:$0xf0]  ;;  %v3579_v20 = vld [vmem:[%s3768_s19 + $0x514] sm:$0xf]  ;;  %v2719_v11 = vld [vmem:[%s3768_s19 + $0x298] sm:$0xf] }
  0x54   : > { %1902 = vmatmul.bf16.vlgmr.msrb.gmra.mxu2 %v3854_v55  ;;  %1876 = vmatmul.bf16.vlgmr.msrb.gmra.mxu0 %v3854_v55  ;;  %v2455_v23 = vld [vmem:[%s3768_s19 + $0x90] sm:$0xf]  ;;  %v3435_v25 = vld [vmem:[%s3768_s19 + $0x94] sm:$0xf]  ;;  %v3032_v26 = vor.u32 %v3587_v18, %v3031_v17  ;;  %v3036_v30 = vor.u32 %v3579_v20, %v3033_v21  ;;  %v3508_v12 = vld [vmem:[%s3768_s19 + $0x2d4] sm:$0xf0] }
  0x55   : > { %3399 = vmatmul.msk.bf16.vlgmr.msrb.gmra.mxu1 %vm1763_vm1, %v3868_v9  ;;  %3400 = vmatmul.msk.bf16.vlgmr.msrb.gmra.mxu3 %vm1763_vm1, %v3868_v9  ;;  %v3443_v24 = vld [vmem:[%s3768_s19 + $0xcc] sm:$0xf0]  ;;  %v2457_v27 = vld [vmem:[%s3768_s19 + $0xd0] sm:$0xf0]  ;;  %v3500_v14 = vld [vmem:[%s3768_s19 + $0x29c] sm:$0xf] }
  0x56   : > { %1933 = vmatpush.bf16.msra.mxu1 %v1781_v29  ;;  %1959 = vmatpush.bf16.msra.mxu3 %v1784_v32  ;;  %v2967_v28 = vld [vmem:[%s3768_s19 + $0x490] sm:$0xf]  ;;  %v3563_v31 = vld [vmem:[%s3768_s19 + $0x494] sm:$0xf]  ;;  %v2456_v34 = vor.u32 %v3443_v24, %v2455_v23  ;;  %v2460_v38 = vor.u32 %v3435_v25, %v2457_v27  ;;  %v2721_v15 = vld [vmem:[%s3768_s19 + $0x2d8] sm:$0xf0] }
  0x57   : > { %1921 = vmatpush.bf16.msra.mxu0 %v2776_v33  ;;  %1947 = vmatpush.bf16.msra.mxu2 %v2780_v36  ;;  %v3571_v29 = vld [vmem:[%s3768_s19 + $0x4cc] sm:$0xf0]  ;;  %v2969_v32 = vld [vmem:[%s3768_s19 + $0x4d0] sm:$0xf0]  ;;  %v3231_v17 = vld [vmem:[%s3768_s19 + $0x698] sm:$0xf] }
  0x58   : > { %v2391_v33 = vld [vmem:[%s3768_s19 + $0x10] sm:$0xf]  ;;  %v3419_v36 = vld [vmem:[%s3768_s19 + $0x14] sm:$0xf]  ;;  %v2968_v43 = vor.u32 %v3571_v29, %v2967_v28  ;;  %v2972_v47 = vor.u32 %v3563_v31, %v2969_v32  ;;  %v3636_v18 = vld [vmem:[%s3768_s19 + $0x6d4] sm:$0xf0] }
  0x59   : > { %v3427_v35 = vld [vmem:[%s3768_s19 + $0x4c] sm:$0xf0]  ;;  %v2393_v37 = vld [vmem:[%s3768_s19 + $0x50] sm:$0xf0]  ;;  %v3628_v20 = vld [vmem:[%s3768_s19 + $0x69c] sm:$0xf]  ;;  %v3232_v25 = vor.u32 %v3636_v18, %v3231_v17 }
  0x5a   : > { %1934 = vmatpush.bf16.msra.mxu1 %v3288_v39  ;;  %1960 = vmatpush.bf16.msra.mxu3 %v3292_v42  ;;  %v2903_v39 = vld [vmem:[%s3768_s19 + $0x410] sm:$0xf]  ;;  %v3668_v42 = vld [vmem:[%s3768_s19 + $0x7d4] sm:$0x30]  ;;  %v3547_v52 = vld [vmem:[%s3768_s19 + $0x414] sm:$0xf]  ;;  %v2396_v56 = vor.u32 %v3419_v36, %v2393_v37 }
  0x5b   : > { %1922 = vmatpush.bf16.msra.mxu0 %v2712_v45  ;;  %1948 = vmatpush.bf16.msra.mxu2 %v2716_v48  ;;  %v3660_v45 = vld [vmem:[%s3768_s19 + $0x79c] sm:$0xf]  ;;  %v3555_v48 = vld [vmem:[%s3768_s19 + $0x44c] sm:$0xf0]  ;;  %v2905_v53 = vld [vmem:[%s3768_s19 + $0x450] sm:$0xf0] }
  0x5c   : > { %v2904_v59 = vor.u32 %v3555_v48, %v2903_v39  ;;  %v2908_v63 = vor.u32 %v3547_v52, %v2905_v53  ;;  %v3233_v21 = vld [vmem:[%s3768_s19 + $0x6d8] sm:$0xf0]  ;;  %v2655_v23 = vld [vmem:[%s3768_s19 + $0x218] sm:$0xf]  ;;  %v3541_v18 = vld [vmem:[%s3768_s19 + $0x3dc] sm:$0xf0] }
  0x5d   : > { %v3492_v24 = vld [vmem:[%s3768_s19 + $0x254] sm:$0xf0]  ;;  %v2657_v27 = vld [vmem:[%s3768_s19 + $0x258] sm:$0xf0]  ;;  %v3236_v28 = vor.u32 %v3628_v20, %v3233_v21  ;;  %v3369_v20 = vld [vmem:[%s3768_s19 + $0x7e0] sm:$0x30] }
  0x5e   : > { %1935 = vmatpush.bf16.msra.mxu1 %v3224_v51  ;;  %1961 = vmatpush.bf16.msra.mxu3 %v3228_v54  ;;  %v2392_v51 = vor.u32 %v3427_v35, %v2391_v33  ;;  %v3360_v54 = vor.u32 %v3668_v42, %v3359_v41  ;;  %v3167_v29 = vld [vmem:[%s3768_s19 + $0x618] sm:$0xf]  ;;  %v2656_v31 = vor.u32 %v3492_v24, %v2655_v23  ;;  %v3612_v32 = vld [vmem:[%s3768_s19 + $0x61c] sm:$0xf]  ;;  %v3533_v23 = vld [vmem:[%s3768_s19 + $0x3a4] sm:$0xf] }
  0x5f   : > { %1923 = vmatpush.bf16.msra.mxu0 %v2648_v58  ;;  %1949 = vmatpush.bf16.msra.mxu2 %v2652_v61  ;;  %v3364_v58 = vor.u32 %v3660_v45, %v3361_v46  ;;  %v2783_v61 = vld [vmem:[%s3768_s19 + $0x318] sm:$0xf]  ;;  %v3169_v33 = vld [vmem:[%s3768_s19 + $0x658] sm:$0xf0]  ;;  %v2857_v24 = vld [vmem:[%s3768_s19 + $0x3e0] sm:$0xf0] }
  0x60   : > { %v1787_v2 = vsel %vm1767_vm0, %v3360_v54, 0  ;;  %v2591_v35 = vld [vmem:[%s3768_s19 + $0x198] sm:$0xf]  ;;  %v2593_v39 = vld [vmem:[%s3768_s19 + $0x1d8] sm:$0xf0]  ;;  %v3172_v40 = vor.u32 %v3612_v32, %v3169_v33  ;;  %v2860_v33 = vor.u32 %v3533_v23, %v2857_v24 }
  0x61   : > { %v1790_v5 = vsel %vm1767_vm0, %v3364_v58, 0  ;;  %v3476_v36 = vld [vmem:[%s3768_s19 + $0x1d4] sm:$0xf0]  ;;  %v3105_v45 = vld [vmem:[%s3768_s19 + $0x5d8] sm:$0xf0] }
  0x62   : > { %1936 = vmatpush.bf16.msra.mxu1 %v3160_v0  ;;  %1962 = vmatpush.bf16.msra.mxu3 %v3164_v3  ;;  %v3516_v0 = vld [vmem:[%s3768_s19 + $0x31c] sm:$0xf]  ;;  %v3295_v3 = vld [vmem:[%s3768_s19 + $0x718] sm:$0xf]  ;;  %v3108_v52 = vor.u32 %v3596_v44, %v3105_v45  ;;  %v3645_v44 = vld [vmem:[%s3768_s19 + $0x724] sm:$0xf] }
  0x63   : > { %1924 = vmatpush.bf16.msra.mxu0 %v2584_v6  ;;  %1950 = vmatpush.bf16.msra.mxu2 %v2588_v10  ;;  %v2784_v6 = vor.u32 %v3524_v62, %v2783_v61  ;;  %v2788_v10 = vor.u32 %v3516_v0, %v2785_v1  ;;  %v3103_v41 = vld [vmem:[%s3768_s19 + $0x598] sm:$0xf]  ;;  %v3452_v50 = vld [vmem:[%s3768_s19 + $0x11c] sm:$0xf]  ;;  %v3305_v45 = vld [vmem:[%s3768_s19 + $0x760] sm:$0xf0] }
  0x64   : > { %v3604_v42 = vld [vmem:[%s3768_s19 + $0x5d4] sm:$0xf0]  ;;  %v3041_v58 = vld [vmem:[%s3768_s19 + $0x558] sm:$0xf0]  ;;  %v3453_v24 = vld [vmem:[%s3768_s19 + $0x124] sm:$0xf] }
  0x65   : > { %v3460_v48 = vld [vmem:[%s3768_s19 + $0x154] sm:$0xf0]  ;;  %v3104_v49 = vor.u32 %v3604_v42, %v3103_v41  ;;  %v3436_v62 = vld [vmem:[%s3768_s19 + $0x9c] sm:$0xf]  ;;  %v3653_v41 = vld [vmem:[%s3768_s19 + $0x75c] sm:$0xf0] }
  0x66   : > { %1937 = vmatpush.bf16.msra.mxu1 %v3096_v13  ;;  %1963 = vmatpush.bf16.msra.mxu3 %v3100_v16  ;;  %v3296_v13 = vor.u32 %v3652_v4, %v3295_v3  ;;  %v3300_v16 = vor.u32 %v3644_v7, %v3297_v8  ;;  %v3039_v53 = vld [vmem:[%s3768_s19 + $0x518] sm:$0xf]  ;;  %v2465_v0 = vld [vmem:[%s3768_s19 + $0xd8] sm:$0xf0] }
  0x67   : > { %1925 = vmatpush.bf16.msra.mxu0 %v2520_v19  ;;  %1951 = vmatpush.bf16.msra.mxu2 %v2524_v22  ;;  %v2720_v19 = vor.u32 %v3508_v12, %v2719_v11  ;;  %v2724_v22 = vor.u32 %v3500_v14, %v2721_v15  ;;  %v3588_v54 = vld [vmem:[%s3768_s19 + $0x554] sm:$0xf0]  ;;  %v3564_v4 = vld [vmem:[%s3768_s19 + $0x49c] sm:$0xf]  ;;  %v2468_v12 = vor.u32 %v3436_v62, %v2465_v0  ;;  %v2855_v14 = vld [vmem:[%s3768_s19 + $0x3a0] sm:$0xf] }
  0x68   : > { %v3444_v61 = vld [vmem:[%s3768_s19 + $0xd4] sm:$0xf0]  ;;  %v2401_v11 = vld [vmem:[%s3768_s19 + $0x58] sm:$0xf0]  ;;  %v3367_v15 = vld [vmem:[%s3768_s19 + $0x7a0] sm:$0xf] }
  0x69   : > { %v2975_v1 = vld [vmem:[%s3768_s19 + $0x498] sm:$0xf]  ;;  %v2665_v0 = vld [vmem:[%s3768_s19 + $0x260] sm:$0xf0] }
  0x6a   : > { %1938 = vmatpush.bf16.msra.mxu1 %v3032_v26  ;;  %1964 = vmatpush.bf16.msra.mxu3 %v3036_v30  ;;  %v3484_v26 = vld [vmem:[%s3768_s19 + $0x21c] sm:$0xf]  ;;  %v3620_v30 = vld [vmem:[%s3768_s19 + $0x654] sm:$0xf0] }
  0x6b   : > { %1926 = vmatpush.bf16.msra.mxu0 %v2456_v34  ;;  %1952 = vmatpush.bf16.msra.mxu2 %v2460_v38  ;;  %v2660_v34 = vor.u32 %v3484_v26, %v2657_v27  ;;  %v3168_v37 = vor.u32 %v3620_v30, %v3167_v29  ;;  %v3468_v38 = vld [vmem:[%s3768_s19 + $0x19c] sm:$0xf]  ;;  %v3428_v8 = vld [vmem:[%s3768_s19 + $0x54] sm:$0xf0]  ;;  %v2856_v30 = vor.u32 %v3541_v18, %v2855_v14  ;;  %v3597_v18 = vld [vmem:[%s3768_s19 + $0x5a4] sm:$0xf] }
  0x6c   : > { %v2596_v46 = vor.u32 %v3468_v38, %v2593_v39  ;;  %v3548_v26 = vld [vmem:[%s3768_s19 + $0x41c] sm:$0xf]  ;;  %v2793_v38 = vld [vmem:[%s3768_s19 + $0x360] sm:$0xf0] }
  0x6d   : > { %v2913_v27 = vld [vmem:[%s3768_s19 + $0x458] sm:$0xf0] }
  0x6e   : > { %1939 = vmatpush.bf16.msra.mxu1 %v2968_v43  ;;  %1965 = vmatpush.bf16.msra.mxu3 %v2972_v47  ;;  %v2592_v43 = vor.u32 %v3476_v36, %v2591_v35  ;;  %v2527_v47 = vld [vmem:[%s3768_s19 + $0x118] sm:$0xf]  ;;  %v3525_v35 = vld [vmem:[%s3768_s19 + $0x35c] sm:$0xf0]  ;;  %v2916_v36 = vor.u32 %v3548_v26, %v2913_v27 }
  0x6f   : > { %1927 = vmatpush.bf16.msra.mxu0 %v2392_v51  ;;  %1953 = vmatpush.bf16.msra.mxu2 %v2396_v56  ;;  %v2529_v51 = vld [vmem:[%s3768_s19 + $0x158] sm:$0xf0]  ;;  %v2528_v56 = vor.u32 %v3460_v48, %v2527_v47  ;;  %v2727_v47 = vld [vmem:[%s3768_s19 + $0x2a0] sm:$0xf] }
  0x70   : > { %v3509_v48 = vld [vmem:[%s3768_s19 + $0x2dc] sm:$0xf0] }
  0x71   : > { %v3047_v27 = vld [vmem:[%s3768_s19 + $0x520] sm:$0xf] }
  0x72   : > { %1940 = vmatpush.bf16.msra.mxu1 %v2904_v59  ;;  %1966 = vmatpush.bf16.msra.mxu3 %v2908_v63  ;;  %v2532_v59 = vor.u32 %v3452_v50, %v2529_v51  ;;  %v3040_v63 = vor.u32 %v3588_v54, %v3039_v53  ;;  %v3501_v50 = vld [vmem:[%s3768_s19 + $0x2a4] sm:$0xf]  ;;  %v3239_v53 = vld [vmem:[%s3768_s19 + $0x6a0] sm:$0xf] }
  0x73   : > { %1972 = vmatpush.bf16.msrb.mxu0 %v2848_v57  ;;  %1998 = vmatpush.bf16.msrb.mxu2 %v2852_v60  ;;  %v3580_v57 = vld [vmem:[%s3768_s19 + $0x51c] sm:$0xf]  ;;  %v2463_v60 = vld [vmem:[%s3768_s19 + $0x98] sm:$0xf]  ;;  %v2729_v51 = vld [vmem:[%s3768_s19 + $0x2e0] sm:$0xf0] }
  0x74   : > { %1954 = vmatmul.bf16.vlgmr.msra.gmra.mxu2 %v3854_v55  ;;  %1928 = vmatmul.bf16.vlgmr.msra.gmra.mxu0 %v3854_v55  ;;  %v3044_v3 = vor.u32 %v3580_v57, %v3041_v58  ;;  %v2464_v7 = vor.u32 %v3444_v61, %v2463_v60  ;;  %v3637_v54 = vld [vmem:[%s3768_s19 + $0x6dc] sm:$0xf0]  ;;  %v3629_v57 = vld [vmem:[%s3768_s19 + $0x6a4] sm:$0xf] }
  0x75   : > { %3401 = vmatmul.msk.bf16.vlgmr.msra.gmra.mxu1 %vm1763_vm1, %v3868_v9  ;;  %3402 = vmatmul.msk.bf16.vlgmr.msra.gmra.mxu3 %vm1763_vm1, %v3868_v9  ;;  %v3241_v58 = vld [vmem:[%s3768_s19 + $0x6e0] sm:$0xf0]  ;;  %v2663_v60 = vld [vmem:[%s3768_s19 + $0x220] sm:$0xf]  ;;  %v3240_v62 = vor.u32 %v3637_v54, %v3239_v53  ;;  %v3542_v54 = vld [vmem:[%s3768_s19 + $0x3e4] sm:$0xf0] }
  0x76   : > { %1985 = vmatpush.bf16.msrb.mxu1 %v1787_v2  ;;  %2011 = vmatpush.bf16.msrb.mxu3 %v1790_v5  ;;  %v3572_v2 = vld [vmem:[%s3768_s19 + $0x4d4] sm:$0xf0]  ;;  %v2977_v5 = vld [vmem:[%s3768_s19 + $0x4d8] sm:$0xf0]  ;;  %v3493_v61 = vld [vmem:[%s3768_s19 + $0x25c] sm:$0xf0] }
  0x77   : > { %1973 = vmatpush.bf16.msrb.mxu0 %v2784_v6  ;;  %1999 = vmatpush.bf16.msrb.mxu2 %v2788_v10  ;;  %v2399_v6 = vld [vmem:[%s3768_s19 + $0x18] sm:$0xf]  ;;  %v3420_v10 = vld [vmem:[%s3768_s19 + $0x1c] sm:$0xf]  ;;  %v2976_v17 = vor.u32 %v3572_v2, %v2975_v1  ;;  %v2980_v21 = vor.u32 %v3564_v4, %v2977_v5  ;;  %v3244_v1 = vor.u32 %v3629_v57, %v3241_v58  ;;  %v3175_v2 = vld [vmem:[%s3768_s19 + $0x620] sm:$0xf] }
  0x78   : > { %v2404_v29 = vor.u32 %v3420_v10, %v2401_v11  ;;  %v2664_v4 = vor.u32 %v3493_v61, %v2663_v60  ;;  %v3613_v5 = vld [vmem:[%s3768_s19 + $0x624] sm:$0xf]  ;;  %v3477_v10 = vld [vmem:[%s3768_s19 + $0x1dc] sm:$0xf0]  ;;  %v3377_v57 = vld [vmem:[%s3768_s19 + $0x7e8] sm:$0x30] }
  0x79   : > { %v3534_v60 = vld [vmem:[%s3768_s19 + $0x3ac] sm:$0xf] }
  0x7a   : > { %1986 = vmatpush.bf16.msrb.mxu1 %v3296_v13  ;;  %2012 = vmatpush.bf16.msrb.mxu3 %v3300_v16  ;;  %v2911_v13 = vld [vmem:[%s3768_s19 + $0x418] sm:$0xf]  ;;  %v3669_v16 = vld [vmem:[%s3768_s19 + $0x7dc] sm:$0x30]  ;;  %v2865_v61 = vld [vmem:[%s3768_s19 + $0x3e8] sm:$0xf0] }
  0x7b   : > { %1974 = vmatpush.bf16.msrb.mxu0 %v2720_v19  ;;  %2000 = vmatpush.bf16.msrb.mxu2 %v2724_v22  ;;  %v3661_v19 = vld [vmem:[%s3768_s19 + $0x7a4] sm:$0xf]  ;;  %v3556_v22 = vld [vmem:[%s3768_s19 + $0x454] sm:$0xf0] }
  0x7c   : > { %v2912_v32 = vor.u32 %v3556_v22, %v2911_v13  ;;  %v2601_v13 = vld [vmem:[%s3768_s19 + $0x1e0] sm:$0xf0]  ;;  %v3461_v22 = vld [vmem:[%s3768_s19 + $0x15c] sm:$0xf0] }
  0x7e   : > { %1987 = vmatpush.bf16.msrb.mxu1 %v3232_v25  ;;  %2013 = vmatpush.bf16.msrb.mxu3 %v3236_v28  ;;  %v2400_v25 = vor.u32 %v3428_v8, %v2399_v6  ;;  %v3368_v28 = vor.u32 %v3669_v16, %v3367_v15  ;;  %v3177_v6 = vld [vmem:[%s3768_s19 + $0x660] sm:$0xf0]  ;;  %v2599_v8 = vld [vmem:[%s3768_s19 + $0x1a0] sm:$0xf] }
  0x7f   : > { %1975 = vmatpush.bf16.msrb.mxu0 %v2656_v31  ;;  %2001 = vmatpush.bf16.msrb.mxu2 %v2660_v34  ;;  %v3372_v31 = vor.u32 %v3661_v19, %v3369_v20  ;;  %v2791_v34 = vld [vmem:[%s3768_s19 + $0x320] sm:$0xf]  ;;  %v3180_v14 = vor.u32 %v3613_v5, %v3177_v6  ;;  %v3113_v19 = vld [vmem:[%s3768_s19 + $0x5e0] sm:$0xf0]  ;;  %v2868_v6 = vor.u32 %v3534_v60, %v2865_v61  ;;  %v3454_v61 = vld [vmem:[%s3768_s19 + $0x12c] sm:$0xf] }
  0x80   : > { %v1793_v39 = vsel %vm1767_vm0, %v3368_v28, 0  ;;  %v3111_v15 = vld [vmem:[%s3768_s19 + $0x5a0] sm:$0xf]  ;;  %v3116_v26 = vor.u32 %v3597_v18, %v3113_v19  ;;  %v3646_v18 = vld [vmem:[%s3768_s19 + $0x72c] sm:$0xf] }
  0x81   : > { %v1796_v42 = vsel %vm1767_vm0, %v3372_v31, 0  ;;  %v3605_v16 = vld [vmem:[%s3768_s19 + $0x5dc] sm:$0xf0]  ;;  %v3049_v31 = vld [vmem:[%s3768_s19 + $0x560] sm:$0xf0] }
  0x82   : > { %1988 = vmatpush.bf16.msrb.mxu1 %v3168_v37  ;;  %2014 = vmatpush.bf16.msrb.mxu3 %v3172_v40  ;;  %v3517_v37 = vld [vmem:[%s3768_s19 + $0x324] sm:$0xf]  ;;  %v3303_v40 = vld [vmem:[%s3768_s19 + $0x720] sm:$0xf]  ;;  %v3112_v23 = vor.u32 %v3605_v16, %v3111_v15  ;;  %v3654_v15 = vld [vmem:[%s3768_s19 + $0x764] sm:$0xf0] }
  0x83   : > { %1976 = vmatpush.bf16.msrb.mxu0 %v2592_v43  ;;  %2002 = vmatpush.bf16.msrb.mxu2 %v2596_v46  ;;  %v2792_v43 = vor.u32 %v3525_v35, %v2791_v34  ;;  %v2796_v46 = vor.u32 %v3517_v37, %v2793_v38  ;;  %v3589_v28 = vld [vmem:[%s3768_s19 + $0x55c] sm:$0xf0]  ;;  %v3437_v35 = vld [vmem:[%s3768_s19 + $0xa4] sm:$0xf]  ;;  %v3313_v19 = vld [vmem:[%s3768_s19 + $0x768] sm:$0xf0] }
  0x84   : > { %v3445_v34 = vld [vmem:[%s3768_s19 + $0xdc] sm:$0xf0]  ;;  %v2473_v37 = vld [vmem:[%s3768_s19 + $0xe0] sm:$0xf0] }
  0x85   : > { %v2983_v38 = vld [vmem:[%s3768_s19 + $0x4a0] sm:$0xf] }
  0x86   : > { %1989 = vmatpush.bf16.msrb.mxu1 %v3104_v49  ;;  %2015 = vmatpush.bf16.msrb.mxu3 %v3108_v52  ;;  %v3304_v49 = vor.u32 %v3653_v41, %v3303_v40  ;;  %v3308_v52 = vor.u32 %v3645_v44, %v3305_v45  ;;  %v3565_v41 = vld [vmem:[%s3768_s19 + $0x4a4] sm:$0xf]  ;;  %v3429_v45 = vld [vmem:[%s3768_s19 + $0x5c] sm:$0xf0] }
  0x87   : > { %1977 = vmatpush.bf16.msrb.mxu0 %v2528_v56  ;;  %2003 = vmatpush.bf16.msrb.mxu2 %v2532_v59  ;;  %v2728_v56 = vor.u32 %v3509_v48, %v2727_v47  ;;  %v2732_v59 = vor.u32 %v3501_v50, %v2729_v51  ;;  %v2409_v47 = vld [vmem:[%s3768_s19 + $0x60] sm:$0xf0]  ;;  %v2476_v48 = vor.u32 %v3437_v35, %v2473_v37  ;;  %v2863_v50 = vld [vmem:[%s3768_s19 + $0x3a8] sm:$0xf]  ;;  %v2673_v37 = vld [vmem:[%s3768_s19 + $0x268] sm:$0xf0] }
  0x88   : > { %v3375_v51 = vld [vmem:[%s3768_s19 + $0x7a8] sm:$0xf] }
  0x8a   : > { %1990 = vmatpush.bf16.msrb.mxu1 %v3040_v63  ;;  %2016 = vmatpush.bf16.msrb.mxu3 %v3044_v3  ;;  %v3485_v63 = vld [vmem:[%s3768_s19 + $0x224] sm:$0xf]  ;;  %v3621_v3 = vld [vmem:[%s3768_s19 + $0x65c] sm:$0xf0] }
  0x8b   : > { %1978 = vmatpush.bf16.msrb.mxu0 %v2464_v7  ;;  %2004 = vmatpush.bf16.msrb.mxu2 %v2468_v12  ;;  %v2668_v7 = vor.u32 %v3485_v63, %v2665_v0  ;;  %v3176_v11 = vor.u32 %v3621_v3, %v3175_v2  ;;  %v3469_v12 = vld [vmem:[%s3768_s19 + $0x1a4] sm:$0xf]  ;;  %v2864_v3 = vor.u32 %v3542_v54, %v2863_v50  ;;  %v3598_v54 = vld [vmem:[%s3768_s19 + $0x5ac] sm:$0xf] }
  0x8c   : > { %v2604_v20 = vor.u32 %v3469_v12, %v2601_v13  ;;  %v3549_v63 = vld [vmem:[%s3768_s19 + $0x424] sm:$0xf]  ;;  %v2801_v12 = vld [vmem:[%s3768_s19 + $0x368] sm:$0xf0] }
  0x8d   : > { %v2921_v0 = vld [vmem:[%s3768_s19 + $0x460] sm:$0xf0] }
  0x8e   : > { %1991 = vmatpush.bf16.msrb.mxu1 %v2976_v17  ;;  %2017 = vmatpush.bf16.msrb.mxu3 %v2980_v21  ;;  %v2600_v17 = vor.u32 %v3477_v10, %v2599_v8  ;;  %v2535_v21 = vld [vmem:[%s3768_s19 + $0x120] sm:$0xf]  ;;  %v3526_v8 = vld [vmem:[%s3768_s19 + $0x364] sm:$0xf0]  ;;  %v2924_v10 = vor.u32 %v3549_v63, %v2921_v0 }
  0x8f   : > { %1979 = vmatpush.bf16.msrb.mxu0 %v2400_v25  ;;  %2005 = vmatpush.bf16.msrb.mxu2 %v2404_v29  ;;  %v2537_v25 = vld [vmem:[%s3768_s19 + $0x160] sm:$0xf0]  ;;  %v2536_v29 = vor.u32 %v3461_v22, %v2535_v21  ;;  %v2735_v21 = vld [vmem:[%s3768_s19 + $0x2a8] sm:$0xf] }
  0x90   : > { %v3510_v22 = vld [vmem:[%s3768_s19 + $0x2e4] sm:$0xf0] }
  0x92   : > { %1992 = vmatpush.bf16.msrb.mxu1 %v2912_v32  ;;  %2018 = vmatpush.bf16.msrb.mxu3 %v2916_v36  ;;  %v2540_v32 = vor.u32 %v3453_v24, %v2537_v25  ;;  %v3048_v36 = vor.u32 %v3589_v28, %v3047_v27  ;;  %v3502_v24 = vld [vmem:[%s3768_s19 + $0x2ac] sm:$0xf]  ;;  %v3247_v27 = vld [vmem:[%s3768_s19 + $0x6a8] sm:$0xf] }
  0x93   : > { %2024 = vmatpush.bf16.msra.mxu0 %v2856_v30  ;;  %2050 = vmatpush.bf16.msra.mxu2 %v2860_v33  ;;  %v3581_v30 = vld [vmem:[%s3768_s19 + $0x524] sm:$0xf]  ;;  %v2471_v33 = vld [vmem:[%s3768_s19 + $0xa0] sm:$0xf]  ;;  %v2737_v25 = vld [vmem:[%s3768_s19 + $0x2e8] sm:$0xf0] }
  0x94   : > { %2006 = vmatmul.bf16.vlgmr.msrb.gmra.mxu2 %v3854_v55  ;;  %1980 = vmatmul.bf16.vlgmr.msrb.gmra.mxu0 %v3854_v55  ;;  %v3052_v40 = vor.u32 %v3581_v30, %v3049_v31  ;;  %v2472_v44 = vor.u32 %v3445_v34, %v2471_v33  ;;  %v3638_v28 = vld [vmem:[%s3768_s19 + $0x6e4] sm:$0xf0]  ;;  %v3630_v30 = vld [vmem:[%s3768_s19 + $0x6ac] sm:$0xf] }
  0x95   : > { %3403 = vmatmul.msk.bf16.vlgmr.msrb.gmra.mxu1 %vm1763_vm1, %v3868_v9  ;;  %3404 = vmatmul.msk.bf16.vlgmr.msrb.gmra.mxu3 %vm1763_vm1, %v3868_v9  ;;  %v3249_v31 = vld [vmem:[%s3768_s19 + $0x6e8] sm:$0xf0]  ;;  %v2671_v33 = vld [vmem:[%s3768_s19 + $0x228] sm:$0xf]  ;;  %v3248_v35 = vor.u32 %v3638_v28, %v3247_v27  ;;  %v2871_v27 = vld [vmem:[%s3768_s19 + $0x3b0] sm:$0xf] }
  0x96   : > { %2037 = vmatpush.bf16.msra.mxu1 %v1793_v39  ;;  %2063 = vmatpush.bf16.msra.mxu3 %v1796_v42  ;;  %v3573_v39 = vld [vmem:[%s3768_s19 + $0x4dc] sm:$0xf0]  ;;  %v2985_v42 = vld [vmem:[%s3768_s19 + $0x4e0] sm:$0xf0]  ;;  %v3494_v34 = vld [vmem:[%s3768_s19 + $0x264] sm:$0xf0] }
  0x97   : > { %2025 = vmatpush.bf16.msra.mxu0 %v2792_v43  ;;  %2051 = vmatpush.bf16.msra.mxu2 %v2796_v46  ;;  %v2407_v43 = vld [vmem:[%s3768_s19 + $0x20] sm:$0xf]  ;;  %v3421_v46 = vld [vmem:[%s3768_s19 + $0x24] sm:$0xf]  ;;  %v2984_v53 = vor.u32 %v3573_v39, %v2983_v38  ;;  %v2988_v58 = vor.u32 %v3565_v41, %v2985_v42  ;;  %v3252_v38 = vor.u32 %v3630_v30, %v3249_v31  ;;  %v3183_v39 = vld [vmem:[%s3768_s19 + $0x628] sm:$0xf] }
  0x98   : > { %v2412_v2 = vor.u32 %v3421_v46, %v2409_v47  ;;  %v2672_v41 = vor.u32 %v3494_v34, %v2671_v33  ;;  %v3614_v42 = vld [vmem:[%s3768_s19 + $0x62c] sm:$0xf]  ;;  %v3478_v46 = vld [vmem:[%s3768_s19 + $0x1e4] sm:$0xf0]  ;;  %v3383_v28 = vld [vmem:[%s3768_s19 + $0x7b0] sm:$0xf] }
  0x99   : > { %v3543_v31 = vld [vmem:[%s3768_s19 + $0x3ec] sm:$0xf0]  ;;  %v3385_v33 = vld [vmem:[%s3768_s19 + $0x7f0] sm:$0x30] }
  0x9a   : > { %2038 = vmatpush.bf16.msra.mxu1 %v3304_v49  ;;  %2064 = vmatpush.bf16.msra.mxu3 %v3308_v52  ;;  %v2919_v49 = vld [vmem:[%s3768_s19 + $0x420] sm:$0xf]  ;;  %v3670_v52 = vld [vmem:[%s3768_s19 + $0x7e4] sm:$0x30] }
  0x9b   : > { %2026 = vmatpush.bf16.msra.mxu0 %v2728_v56  ;;  %2052 = vmatpush.bf16.msra.mxu2 %v2732_v59  ;;  %v3662_v56 = vld [vmem:[%s3768_s19 + $0x7ac] sm:$0xf]  ;;  %v3557_v59 = vld [vmem:[%s3768_s19 + $0x45c] sm:$0xf0] }
  0x9c   : > { %v2920_v5 = vor.u32 %v3557_v59, %v2919_v49  ;;  %v2609_v49 = vld [vmem:[%s3768_s19 + $0x1e8] sm:$0xf0]  ;;  %v3462_v59 = vld [vmem:[%s3768_s19 + $0x164] sm:$0xf0] }
  0x9e   : > { %2039 = vmatpush.bf16.msra.mxu1 %v3240_v62  ;;  %2065 = vmatpush.bf16.msra.mxu3 %v3244_v1  ;;  %v2408_v62 = vor.u32 %v3429_v45, %v2407_v43  ;;  %v3376_v1 = vor.u32 %v3670_v52, %v3375_v51  ;;  %v3185_v43 = vld [vmem:[%s3768_s19 + $0x668] sm:$0xf0]  ;;  %v2607_v45 = vld [vmem:[%s3768_s19 + $0x1a8] sm:$0xf] }
  0x9f   : > { %2027 = vmatpush.bf16.msra.mxu0 %v2664_v4  ;;  %2053 = vmatpush.bf16.msra.mxu2 %v2668_v7  ;;  %v3380_v4 = vor.u32 %v3662_v56, %v3377_v57  ;;  %v2799_v7 = vld [vmem:[%s3768_s19 + $0x328] sm:$0xf]  ;;  %v3188_v50 = vor.u32 %v3614_v42, %v3185_v43  ;;  %v3121_v56 = vld [vmem:[%s3768_s19 + $0x5e8] sm:$0xf0] }
  0xa0   : > { %v1799_v13 = vsel %vm1767_vm0, %v3376_v1, 0  ;;  %v3119_v51 = vld [vmem:[%s3768_s19 + $0x5a8] sm:$0xf]  ;;  %v3124_v0 = vor.u32 %v3598_v54, %v3121_v56  ;;  %v3550_v42 = vld [vmem:[%s3768_s19 + $0x42c] sm:$0xf] }
  0xa1   : > { %v1802_v16 = vsel %vm1767_vm0, %v3380_v4, 0  ;;  %v3606_v52 = vld [vmem:[%s3768_s19 + $0x5e4] sm:$0xf0]  ;;  %v3582_v4 = vld [vmem:[%s3768_s19 + $0x52c] sm:$0xf] }
  0xa2   : > { %2040 = vmatpush.bf16.msra.mxu1 %v3176_v11  ;;  %2066 = vmatpush.bf16.msra.mxu3 %v3180_v14  ;;  %v3518_v11 = vld [vmem:[%s3768_s19 + $0x32c] sm:$0xf]  ;;  %v3311_v14 = vld [vmem:[%s3768_s19 + $0x728] sm:$0xf]  ;;  %v3120_v60 = vor.u32 %v3606_v52, %v3119_v51  ;;  %v3527_v54 = vld [vmem:[%s3768_s19 + $0x36c] sm:$0xf0] }
  0xa3   : > { %2028 = vmatpush.bf16.msra.mxu0 %v2600_v17  ;;  %2054 = vmatpush.bf16.msra.mxu2 %v2604_v20  ;;  %v2800_v17 = vor.u32 %v3526_v8, %v2799_v7  ;;  %v2804_v20 = vor.u32 %v3518_v11, %v2801_v12  ;;  %v3055_v1 = vld [vmem:[%s3768_s19 + $0x528] sm:$0xf]  ;;  %v3438_v11 = vld [vmem:[%s3768_s19 + $0xac] sm:$0xf] }
  0xa4   : > { %v2479_v8 = vld [vmem:[%s3768_s19 + $0xa8] sm:$0xf]  ;;  %v2929_v43 = vld [vmem:[%s3768_s19 + $0x468] sm:$0xf0] }
  0xa6   : > { %2041 = vmatpush.bf16.msra.mxu1 %v3112_v23  ;;  %2067 = vmatpush.bf16.msra.mxu3 %v3116_v26  ;;  %v3312_v23 = vor.u32 %v3654_v15, %v3311_v14  ;;  %v3316_v26 = vor.u32 %v3646_v18, %v3313_v19  ;;  %v2991_v14 = vld [vmem:[%s3768_s19 + $0x4a8] sm:$0xf]  ;;  %v3566_v18 = vld [vmem:[%s3768_s19 + $0x4ac] sm:$0xf] }
  0xa7   : > { %2029 = vmatpush.bf16.msra.mxu0 %v2536_v29  ;;  %2055 = vmatpush.bf16.msra.mxu2 %v2540_v32  ;;  %v2736_v29 = vor.u32 %v3510_v22, %v2735_v21  ;;  %v2740_v32 = vor.u32 %v3502_v24, %v2737_v25  ;;  %v3574_v15 = vld [vmem:[%s3768_s19 + $0x4e4] sm:$0xf0]  ;;  %v2993_v19 = vld [vmem:[%s3768_s19 + $0x4e8] sm:$0xf0] }
  0xa8   : > { %v3430_v22 = vld [vmem:[%s3768_s19 + $0x64] sm:$0xf0]  ;;  %v2417_v24 = vld [vmem:[%s3768_s19 + $0x68] sm:$0xf0]  ;;  %v2992_v30 = vor.u32 %v3574_v15, %v2991_v14  ;;  %v3255_v14 = vld [vmem:[%s3768_s19 + $0x6b0] sm:$0xf] }
  0xa9   : > { %v3639_v15 = vld [vmem:[%s3768_s19 + $0x6ec] sm:$0xf0] }
  0xaa   : > { %2042 = vmatpush.bf16.msra.mxu1 %v3048_v36  ;;  %2068 = vmatpush.bf16.msra.mxu3 %v3052_v40  ;;  %v3486_v36 = vld [vmem:[%s3768_s19 + $0x22c] sm:$0xf]  ;;  %v3622_v40 = vld [vmem:[%s3768_s19 + $0x664] sm:$0xf0] }
  0xab   : > { %2030 = vmatpush.bf16.msra.mxu0 %v2472_v44  ;;  %2056 = vmatpush.bf16.msra.mxu2 %v2476_v48  ;;  %v2676_v44 = vor.u32 %v3486_v36, %v2673_v37  ;;  %v3184_v47 = vor.u32 %v3622_v40, %v3183_v39  ;;  %v3470_v48 = vld [vmem:[%s3768_s19 + $0x1ac] sm:$0xf]  ;;  %v3558_v36 = vld [vmem:[%s3768_s19 + $0x464] sm:$0xf0]  ;;  %v3535_v37 = vld [vmem:[%s3768_s19 + $0x3b4] sm:$0xf] }
  0xac   : > { %v2612_v57 = vor.u32 %v3470_v48, %v2609_v49  ;;  %v2872_v49 = vor.u32 %v3543_v31, %v2871_v27  ;;  %v3623_v27 = vld [vmem:[%s3768_s19 + $0x66c] sm:$0xf0] }
  0xae   : > { %2043 = vmatpush.bf16.msra.mxu1 %v2984_v53  ;;  %2069 = vmatpush.bf16.msra.mxu3 %v2988_v58  ;;  %v2608_v53 = vor.u32 %v3478_v46, %v2607_v45  ;;  %v2543_v58 = vld [vmem:[%s3768_s19 + $0x128] sm:$0xf] }
  0xaf   : > { %2031 = vmatpush.bf16.msra.mxu0 %v2408_v62  ;;  %2057 = vmatpush.bf16.msra.mxu2 %v2412_v2  ;;  %v2545_v62 = vld [vmem:[%s3768_s19 + $0x168] sm:$0xf0]  ;;  %v3590_v2 = vld [vmem:[%s3768_s19 + $0x564] sm:$0xf0] }
  0xb0   : > { %v2548_v7 = vor.u32 %v3454_v61, %v2545_v62  ;;  %v3056_v12 = vor.u32 %v3590_v2, %v3055_v1 }
  0xb1   : > { %v1825_v63 = vpop.f32.mrf.mxu0 }
  0xb2   : > { %2044 = vmatpush.bf16.msra.mxu1 %v2920_v5  ;;  %2070 = vmatpush.bf16.msra.mxu3 %v2924_v10  ;;  %v3057_v5 = vld [vmem:[%s3768_s19 + $0x568] sm:$0xf0]  ;;  %v3446_v10 = vld [vmem:[%s3768_s19 + $0xe4] sm:$0xf0]  ;;  %v4213_v40 = vpop.permute.xlu0 %490 }
  0xb3   : > { %2076 = vmatpush.bf16.msrb.mxu0 %v2864_v3  ;;  %2102 = vmatpush.bf16.msrb.mxu2 %v2868_v6  ;;  %v2544_v3 = vor.u32 %v3462_v59, %v2543_v58  ;;  %v1838_v6 = vpop.f32.mrf.mxu1  ;;  %v2480_v21 = vor.u32 %v3446_v10, %v2479_v8  ;;  %v1826_v45 = vadd.f32 %v1825_v63, %v4213_v40  ;;  %v3519_v59 = vld [vmem:[%s3768_s19 + $0x334] sm:$0xf]  ;;  %v3319_v63 = vld [vmem:[%s3768_s19 + $0x730] sm:$0xf] }
  0xb4   : > { %2058 = vmatmul.bf16.vlgmr.msra.gmra.mxu2 %v3854_v55  ;;  %2032 = vmatmul.bf16.vlgmr.msra.gmra.mxu0 %v3854_v55  ;;  %v2932_v58 = vor.u32 %v3550_v42, %v2929_v43  ;;  %v3503_v10 = vld [vmem:[%s3768_s19 + $0x2b4] sm:$0xf] }
  0xb5   : > { %3405 = vmatmul.msk.bf16.vlgmr.msra.gmra.mxu1 %vm1763_vm1, %v3868_v9  ;;  %3406 = vmatmul.msk.bf16.vlgmr.msra.gmra.mxu3 %vm1763_vm1, %v3868_v9  ;;  %v1839_v56 = vadd.f32 %v1838_v6, %v1826_v45  ;;  %v2743_v6 = vld [vmem:[%s3768_s19 + $0x2b0] sm:$0xf]  ;;  %v3599_v42 = vld [vmem:[%s3768_s19 + $0x5b4] sm:$0xf] }
  0xb6   : > { %2089 = vmatpush.bf16.msrb.mxu1 %v1799_v13  ;;  %2115 = vmatpush.bf16.msrb.mxu3 %v1802_v16  ;;  %v2481_v13 = vld [vmem:[%s3768_s19 + $0xe8] sm:$0xf0]  ;;  %v3129_v43 = vld [vmem:[%s3768_s19 + $0x5f0] sm:$0xf0]  ;;  %v2551_v45 = vld [vmem:[%s3768_s19 + $0x130] sm:$0xf] }
  0xb7   : > { %2077 = vmatpush.bf16.msrb.mxu0 %v2800_v17  ;;  %2103 = vmatpush.bf16.msrb.mxu2 %v2804_v20  ;;  %v1851_v16 = vpop.f32.mrf.mxu2  ;;  %v3060_v17 = vor.u32 %v3582_v4, %v3057_v5  ;;  %v2415_v20 = vld [vmem:[%s3768_s19 + $0x28] sm:$0xf]  ;;  %v2484_v25 = vor.u32 %v3438_v11, %v2481_v13  ;;  %2232 = vst [vmem:[%s4224_s27] sm:$0xff] %v1839_v56  ;;  %v3321_v4 = vld [vmem:[%s3768_s19 + $0x770] sm:$0xf0] }
  0xb8   : > { %v1864_v39 = vpop.f32.mrf.mxu3  ;;  %v1852_v46 = vadd.f32 %v1851_v16, %v4213_v40  ;;  %v2745_v11 = vld [vmem:[%s3768_s19 + $0x2f0] sm:$0xf0] }
  0xb9   : > { %v1827_v34 = vpop.f32.mrf.mxu0 }
  0xba   : > { %2090 = vmatpush.bf16.msrb.mxu1 %v3312_v23  ;;  %2116 = vmatpush.bf16.msrb.mxu3 %v3316_v26  ;;  %v3422_v23 = vld [vmem:[%s3768_s19 + $0x2c] sm:$0xf]  ;;  %v2927_v26 = vld [vmem:[%s3768_s19 + $0x428] sm:$0xf]  ;;  %v1865_v61 = vadd.f32 %v1864_v39, %v1852_v46  ;;  %v3607_v39 = vld [vmem:[%s3768_s19 + $0x5ec] sm:$0xf0] }
  0xbb   : > { %2078 = vmatpush.bf16.msrb.mxu0 %v2736_v29  ;;  %2104 = vmatpush.bf16.msrb.mxu2 %v2740_v32  ;;  %v3671_v29 = vld [vmem:[%s3768_s19 + $0x7ec] sm:$0x30]  ;;  %v3663_v32 = vld [vmem:[%s3768_s19 + $0x7b4] sm:$0xf]  ;;  %v2420_v48 = vor.u32 %v3422_v23, %v2417_v24  ;;  %v2928_v51 = vor.u32 %v3558_v36, %v2927_v26 }
  0xbc   : > { %2233 = vst [vmem:[%s4224_s27 + $0x8] sm:$0xff] %v1865_v61  ;;  %v3487_v23 = vld [vmem:[%s3768_s19 + $0x234] sm:$0xf]  ;;  %v3191_v26 = vld [vmem:[%s3768_s19 + $0x630] sm:$0xf] }
  0xbd   : > { %v2681_v24 = vld [vmem:[%s3768_s19 + $0x270] sm:$0xf0]  ;;  %v3192_v34 = vor.u32 %v3623_v27, %v3191_v26  ;;  %v3463_v46 = vld [vmem:[%s3768_s19 + $0x16c] sm:$0xf0]  ;;  %v3544_v26 = vld [vmem:[%s3768_s19 + $0x3f4] sm:$0xf0] }
  0xbe   : > { %2091 = vmatpush.bf16.msrb.mxu1 %v3248_v35  ;;  %2117 = vmatpush.bf16.msrb.mxu3 %v3252_v38  ;;  %v2996_v35 = vor.u32 %v3566_v18, %v2993_v19  ;;  %v2873_v38 = vld [vmem:[%s3768_s19 + $0x3f0] sm:$0xf0]  ;;  %v2748_v19 = vor.u32 %v3503_v10, %v2745_v11  ;;  %v2684_v31 = vor.u32 %v3487_v23, %v2681_v24  ;;  %v2423_v10 = vld [vmem:[%s3768_s19 + $0x30] sm:$0xf]  ;;  %v3664_v27 = vld [vmem:[%s3768_s19 + $0x7bc] sm:$0xf] }
  0xbf   : > { %2079 = vmatpush.bf16.msrb.mxu0 %v2672_v41  ;;  %2105 = vmatpush.bf16.msrb.mxu2 %v2676_v44  ;;  %v2416_v41 = vor.u32 %v3430_v22, %v2415_v20  ;;  %v3384_v44 = vor.u32 %v3671_v29, %v3383_v28  ;;  %v2876_v52 = vor.u32 %v3535_v37, %v2873_v38  ;;  %v3257_v18 = vld [vmem:[%s3768_s19 + $0x6f0] sm:$0xf0]  ;;  %v2679_v20 = vld [vmem:[%s3768_s19 + $0x230] sm:$0xf] }
  0xc0   : > { %v3256_v22 = vor.u32 %v3639_v15, %v3255_v14  ;;  %v3615_v29 = vld [vmem:[%s3768_s19 + $0x634] sm:$0xf]  ;;  %v3127_v38 = vld [vmem:[%s3768_s19 + $0x5b0] sm:$0xf]  ;;  %v2552_v56 = vor.u32 %v3463_v46, %v2551_v45 }
  0xc1   : > { %v1805_v62 = vsel %vm1767_vm0, %v3384_v44, 0  ;;  %v2617_v36 = vld [vmem:[%s3768_s19 + $0x1f0] sm:$0xf0]  ;;  %v3431_v11 = vld [vmem:[%s3768_s19 + $0x6c] sm:$0xf0] }
  0xc2   : > { %2092 = vmatpush.bf16.msrb.mxu1 %v3184_v47  ;;  %2118 = vmatpush.bf16.msrb.mxu3 %v3188_v50  ;;  %v1840_v47 = vpop.f32.mrf.mxu1  ;;  %v3388_v50 = vor.u32 %v3663_v32, %v3385_v33  ;;  %v2615_v32 = vld [vmem:[%s3768_s19 + $0x1b0] sm:$0xf]  ;;  %v3423_v14 = vld [vmem:[%s3768_s19 + $0x34] sm:$0xf] }
  0xc3   : > { %2080 = vmatpush.bf16.msrb.mxu0 %v2608_v53  ;;  %2106 = vmatpush.bf16.msrb.mxu2 %v2612_v57  ;;  %v2807_v53 = vld [vmem:[%s3768_s19 + $0x330] sm:$0xf]  ;;  %v1853_v57 = vpop.f32.mrf.mxu2  ;;  %v2425_v15 = vld [vmem:[%s3768_s19 + $0x70] sm:$0xf0] }
  0xc4   : > { %v1808_v1 = vsel %vm1767_vm0, %v3388_v50, 0  ;;  %v2808_v2 = vor.u32 %v3527_v54, %v2807_v53  ;;  %v3479_v33 = vld [vmem:[%s3768_s19 + $0x1ec] sm:$0xf0]  ;;  %v2553_v50 = vld [vmem:[%s3768_s19 + $0x170] sm:$0xf0] }
  0xc5   : > { %v3591_v53 = vld [vmem:[%s3768_s19 + $0x56c] sm:$0xf0]  ;;  %v3583_v57 = vld [vmem:[%s3768_s19 + $0x534] sm:$0xf] }
  0xc6   : > { %2093 = vmatpush.bf16.msrb.mxu1 %v3120_v60  ;;  %2119 = vmatpush.bf16.msrb.mxu3 %v3124_v0  ;;  %v2809_v60 = vld [vmem:[%s3768_s19 + $0x370] sm:$0xf0]  ;;  %v3655_v0 = vld [vmem:[%s3768_s19 + $0x76c] sm:$0xf0] }
  0xc7   : > { %2081 = vmatpush.bf16.msrb.mxu0 %v2544_v3  ;;  %2107 = vmatpush.bf16.msrb.mxu2 %v2548_v7  ;;  %v3647_v3 = vld [vmem:[%s3768_s19 + $0x734] sm:$0xf]  ;;  %v2812_v5 = vor.u32 %v3519_v59, %v2809_v60  ;;  %v3511_v7 = vld [vmem:[%s3768_s19 + $0x2ec] sm:$0xf0]  ;;  %v3320_v8 = vor.u32 %v3655_v0, %v3319_v63 }
  0xc8   : > { %v3324_v13 = vor.u32 %v3647_v3, %v3321_v4  ;;  %v2744_v16 = vor.u32 %v3511_v7, %v2743_v6  ;;  %v2487_v59 = vld [vmem:[%s3768_s19 + $0xb0] sm:$0xf]  ;;  %v3439_v63 = vld [vmem:[%s3768_s19 + $0xb4] sm:$0xf] }
  0xc9   : > { %v2489_v0 = vld [vmem:[%s3768_s19 + $0xf0] sm:$0xf0]  ;;  %v3575_v3 = vld [vmem:[%s3768_s19 + $0x4ec] sm:$0xf0] }
  0xca   : > { %2094 = vmatpush.bf16.msrb.mxu1 %v3056_v12  ;;  %2120 = vmatpush.bf16.msrb.mxu3 %v3060_v17  ;;  %v1866_v12 = vpop.f32.mrf.mxu3  ;;  %v3631_v17 = vld [vmem:[%s3768_s19 + $0x6b4] sm:$0xf] }
  0xcb   : > { %2082 = vmatpush.bf16.msrb.mxu0 %v2480_v21  ;;  %2108 = vmatpush.bf16.msrb.mxu2 %v2484_v25  ;;  %v3495_v21 = vld [vmem:[%s3768_s19 + $0x26c] sm:$0xf0]  ;;  %v3260_v25 = vor.u32 %v3631_v17, %v3257_v18  ;;  %v3567_v4 = vld [vmem:[%s3768_s19 + $0x4b4] sm:$0xf]  ;;  %v2492_v17 = vor.u32 %v3439_v63, %v2489_v0  ;;  %v2753_v63 = vld [vmem:[%s3768_s19 + $0x2f8] sm:$0xf0] }
  0xcc   : > { %v2680_v28 = vor.u32 %v3495_v21, %v2679_v20  ;;  %v2935_v18 = vld [vmem:[%s3768_s19 + $0x430] sm:$0xf]  ;;  %v2879_v20 = vld [vmem:[%s3768_s19 + $0x3b8] sm:$0xf] }
  0xcd   : > { %v3391_v21 = vld [vmem:[%s3768_s19 + $0x7b8] sm:$0xf] }
  0xce   : > { %2095 = vmatpush.bf16.msrb.mxu1 %v2992_v30  ;;  %2121 = vmatpush.bf16.msrb.mxu3 %v2996_v35  ;;  %v3193_v30 = vld [vmem:[%s3768_s19 + $0x670] sm:$0xf0] }
  0xcf   : > { %2083 = vmatpush.bf16.msrb.mxu0 %v2416_v41  ;;  %2109 = vmatpush.bf16.msrb.mxu2 %v2420_v48  ;;  %v3471_v35 = vld [vmem:[%s3768_s19 + $0x1b4] sm:$0xf]  ;;  %v3196_v37 = vor.u32 %v3615_v29, %v3193_v30  ;;  %v2616_v41 = vor.u32 %v3479_v33, %v2615_v32  ;;  %v3128_v48 = vor.u32 %v3607_v39, %v3127_v38  ;;  %v3536_v30 = vld [vmem:[%s3768_s19 + $0x3bc] sm:$0xf] }
  0xd0   : > { %v2620_v44 = vor.u32 %v3471_v35, %v2617_v36  ;;  %v2424_v33 = vor.u32 %v3431_v11, %v2423_v10  ;;  %v2937_v35 = vld [vmem:[%s3768_s19 + $0x470] sm:$0xf0]  ;;  %v2880_v38 = vor.u32 %v3544_v26, %v2879_v20  ;;  %v3488_v11 = vld [vmem:[%s3768_s19 + $0x23c] sm:$0xf]  ;;  %v2623_v20 = vld [vmem:[%s3768_s19 + $0x1b8] sm:$0xf] }
  0xd1   : > { %v1877_v54 = vpop.f32.mrf.mxu0  ;;  %v3135_v26 = vld [vmem:[%s3768_s19 + $0x5b8] sm:$0xf] }
  0xd2   : > { %2096 = vmatpush.bf16.msrb.mxu1 %v2928_v51  ;;  %2122 = vmatpush.bf16.msrb.mxu3 %v2932_v58  ;;  %v1890_v47 = vpop.f32.mrf.mxu1  ;;  %v3132_v51 = vor.u32 %v3599_v42, %v3129_v43  ;;  %v3065_v58 = vld [vmem:[%s3768_s19 + $0x570] sm:$0xf0]  ;;  %v1878_v60 = vadd.f32 %v1877_v54, %v4213_v40  ;;  %v2815_v43 = vld [vmem:[%s3768_s19 + $0x338] sm:$0xf] }
  0xd3   : > { %2128 = vmatpush.bf16.msra.mxu0 %v2872_v49  ;;  %2154 = vmatpush.bf16.msra.mxu2 %v2876_v52  ;;  %v3455_v49 = vld [vmem:[%s3768_s19 + $0x134] sm:$0xf]  ;;  %v3063_v52 = vld [vmem:[%s3768_s19 + $0x530] sm:$0xf]  ;;  %v3068_v7 = vor.u32 %v3583_v57, %v3065_v58  ;;  %v3329_v57 = vld [vmem:[%s3768_s19 + $0x778] sm:$0xf0] }
  0xd4   : > { %2110 = vmatmul.bf16.vlgmr.msrb.gmra.mxu2 %v3854_v55  ;;  %2084 = vmatmul.bf16.vlgmr.msrb.gmra.mxu0 %v3854_v55  ;;  %v2556_v61 = vor.u32 %v3455_v49, %v2553_v50  ;;  %v3327_v50 = vld [vmem:[%s3768_s19 + $0x738] sm:$0xf] }
  0xd5   : > { %3407 = vmatmul.msk.bf16.vlgmr.msrb.gmra.mxu1 %vm1763_vm1, %v3868_v9  ;;  %3408 = vmatmul.msk.bf16.vlgmr.msrb.gmra.mxu3 %vm1763_vm1, %v3868_v9 }
  0xd6   : > { %2141 = vmatpush.bf16.msra.mxu1 %v1805_v62  ;;  %2167 = vmatpush.bf16.msra.mxu3 %v1808_v1  ;;  %v3447_v62 = vld [vmem:[%s3768_s19 + $0xec] sm:$0xf0]  ;;  %v3064_v1 = vor.u32 %v3591_v53, %v3063_v52 }
  0xd7   : > { %2129 = vmatpush.bf16.msra.mxu0 %v2808_v2  ;;  %2155 = vmatpush.bf16.msra.mxu2 %v2812_v5  ;;  %v2999_v2 = vld [vmem:[%s3768_s19 + $0x4b0] sm:$0xf]  ;;  %v1891_v5 = vadd.f32 %v1890_v47, %v1878_v60  ;;  %v1903_v6 = vpop.f32.mrf.mxu2  ;;  %v3520_v47 = vld [vmem:[%s3768_s19 + $0x33c] sm:$0xf]  ;;  %v3512_v60 = vld [vmem:[%s3768_s19 + $0x2f4] sm:$0xf0] }
  0xd8   : > { %v1904_v12 = vadd.f32 %v1903_v6, %v4213_v40 }
  0xd9   : > { %2234 = vst [vmem:[%s4224_s27 + $0x10] sm:$0xff] %v1891_v5  ;;  %v1879_v32 = vpop.f32.mrf.mxu0  ;;  %v3265_v5 = vld [vmem:[%s3768_s19 + $0x6f8] sm:$0xf0] }
  0xda   : > { %2142 = vmatpush.bf16.msra.mxu1 %v3320_v8  ;;  %2168 = vmatpush.bf16.msra.mxu3 %v3324_v13  ;;  %v3001_v8 = vld [vmem:[%s3768_s19 + $0x4f0] sm:$0xf0]  ;;  %v2488_v13 = vor.u32 %v3447_v62, %v2487_v59  ;;  %v1892_v24 = vpop.f32.mrf.mxu1  ;;  %v2751_v59 = vld [vmem:[%s3768_s19 + $0x2b8] sm:$0xf]  ;;  %v3504_v62 = vld [vmem:[%s3768_s19 + $0x2bc] sm:$0xf] }
  0xdb   : > { %2130 = vmatpush.bf16.msra.mxu0 %v2744_v16  ;;  %2156 = vmatpush.bf16.msra.mxu2 %v2748_v19  ;;  %v1916_v16 = vpop.f32.mrf.mxu3  ;;  %v3559_v19 = vld [vmem:[%s3768_s19 + $0x46c] sm:$0xf0]  ;;  %v3004_v29 = vor.u32 %v3567_v4, %v3001_v8  ;;  %v3632_v4 = vld [vmem:[%s3768_s19 + $0x6bc] sm:$0xf]  ;;  %v2756_v6 = vor.u32 %v3504_v62, %v2753_v63  ;;  %v3496_v8 = vld [vmem:[%s3768_s19 + $0x274] sm:$0xf0] }
  0xdc   : > { %v1917_v23 = vadd.f32 %v1916_v16, %v1904_v12  ;;  %v2689_v12 = vld [vmem:[%s3768_s19 + $0x278] sm:$0xf0]  ;;  %v2559_v32 = vld [vmem:[%s3768_s19 + $0x138] sm:$0xf] }
  0xdd   : > { %v2625_v24 = vld [vmem:[%s3768_s19 + $0x1f8] sm:$0xf0] }
  0xde   : > { %2143 = vmatpush.bf16.msra.mxu1 %v3256_v22  ;;  %2169 = vmatpush.bf16.msra.mxu3 %v3260_v25  ;;  %v3672_v22 = vld [vmem:[%s3768_s19 + $0x7f4] sm:$0x30]  ;;  %v3000_v25 = vor.u32 %v3575_v3, %v2999_v2  ;;  %2235 = vst [vmem:[%s4224_s27 + $0x18] sm:$0xff] %v1917_v23  ;;  %v2752_v3 = vor.u32 %v3512_v60, %v2751_v59  ;;  %v3472_v23 = vld [vmem:[%s3768_s19 + $0x1bc] sm:$0xf] }
  0xdf   : > { %2131 = vmatpush.bf16.msra.mxu0 %v2680_v28  ;;  %2157 = vmatpush.bf16.msra.mxu2 %v2684_v31  ;;  %v3393_v28 = vld [vmem:[%s3768_s19 + $0x7f8] sm:$0x30]  ;;  %v3392_v36 = vor.u32 %v3672_v22, %v3391_v21  ;;  %v1905_v45 = vpop.f32.mrf.mxu2  ;;  %v3640_v2 = vld [vmem:[%s3768_s19 + $0x6f4] sm:$0xf0] }
  0xe0   : > { %v2881_v31 = vld [vmem:[%s3768_s19 + $0x3f8] sm:$0xf0]  ;;  %v3396_v39 = vor.u32 %v3664_v27, %v3393_v28  ;;  %v3480_v21 = vld [vmem:[%s3768_s19 + $0x1f4] sm:$0xf0] }
  0xe1   : > { %v2884_v42 = vor.u32 %v3536_v30, %v2881_v31  ;;  %v1811_v49 = vsel %vm1767_vm0, %v3392_v36, 0  ;;  %v3608_v27 = vld [vmem:[%s3768_s19 + $0x5f4] sm:$0xf0]  ;;  %v2624_v28 = vor.u32 %v3480_v21, %v2623_v20  ;;  %v3137_v30 = vld [vmem:[%s3768_s19 + $0x5f8] sm:$0xf0]  ;;  %v2628_v31 = vor.u32 %v3472_v23, %v2625_v24 }
  0xe2   : > { %2144 = vmatpush.bf16.msra.mxu1 %v3192_v34  ;;  %2170 = vmatpush.bf16.msra.mxu3 %v3196_v37  ;;  %v3551_v34 = vld [vmem:[%s3768_s19 + $0x434] sm:$0xf]  ;;  %v2428_v37 = vor.u32 %v3423_v14, %v2425_v15  ;;  %v1814_v53 = vsel %vm1767_vm0, %v3396_v39, 0  ;;  %v3199_v14 = vld [vmem:[%s3768_s19 + $0x638] sm:$0xf] }
  0xe3   : > { %2132 = vmatpush.bf16.msra.mxu0 %v2616_v41  ;;  %2158 = vmatpush.bf16.msra.mxu2 %v2620_v44  ;;  %v2936_v41 = vor.u32 %v3559_v19, %v2935_v18  ;;  %v3528_v44 = vld [vmem:[%s3768_s19 + $0x374] sm:$0xf0]  ;;  %v2940_v46 = vor.u32 %v3551_v34, %v2937_v35  ;;  %v1918_v52 = vpop.f32.mrf.mxu3  ;;  %v3201_v18 = vld [vmem:[%s3768_s19 + $0x678] sm:$0xf0]  ;;  %v2692_v19 = vor.u32 %v3488_v11, %v2689_v12 }
  0xe4   : > { %v2816_v54 = vor.u32 %v3528_v44, %v2815_v43  ;;  %v3624_v15 = vld [vmem:[%s3768_s19 + $0x674] sm:$0xf0]  ;;  %v3136_v35 = vor.u32 %v3608_v27, %v3135_v26  ;;  %v3456_v36 = vld [vmem:[%s3768_s19 + $0x13c] sm:$0xf] }
  0xe5   : > { %v3200_v22 = vor.u32 %v3624_v15, %v3199_v14  ;;  %v3071_v39 = vld [vmem:[%s3768_s19 + $0x538] sm:$0xf]  ;;  %v3584_v44 = vld [vmem:[%s3768_s19 + $0x53c] sm:$0xf] }
  0xe6   : > { %2145 = vmatpush.bf16.msra.mxu1 %v3128_v48  ;;  %2171 = vmatpush.bf16.msra.mxu3 %v3132_v51  ;;  %v2817_v48 = vld [vmem:[%s3768_s19 + $0x378] sm:$0xf0]  ;;  %v3656_v51 = vld [vmem:[%s3768_s19 + $0x774] sm:$0xf0] }
  0xe7   : > { %2133 = vmatpush.bf16.msra.mxu0 %v2552_v56  ;;  %2159 = vmatpush.bf16.msra.mxu2 %v2556_v61  ;;  %v3648_v56 = vld [vmem:[%s3768_s19 + $0x73c] sm:$0xf]  ;;  %v2820_v58 = vor.u32 %v3520_v47, %v2817_v48  ;;  %v3328_v61 = vor.u32 %v3656_v51, %v3327_v50  ;;  %v2495_v48 = vld [vmem:[%s3768_s19 + $0xb8] sm:$0xf] }
  0xe8   : > { %v3332_v0 = vor.u32 %v3648_v56, %v3329_v57  ;;  %v3073_v45 = vld [vmem:[%s3768_s19 + $0x578] sm:$0xf0]  ;;  %v3007_v57 = vld [vmem:[%s3768_s19 + $0x4b8] sm:$0xf] }
  0xe9   : > { %v3440_v51 = vld [vmem:[%s3768_s19 + $0xbc] sm:$0xf]  ;;  %v3076_v56 = vor.u32 %v3584_v44, %v3073_v45  ;;  %v3560_v11 = vld [vmem:[%s3768_s19 + $0x474] sm:$0xf0] }
  0xea   : > { %2146 = vmatpush.bf16.msra.mxu1 %v3064_v1  ;;  %2172 = vmatpush.bf16.msra.mxu3 %v3068_v7  ;;  %v3263_v1 = vld [vmem:[%s3768_s19 + $0x6b8] sm:$0xf]  ;;  %v2497_v52 = vld [vmem:[%s3768_s19 + $0xf8] sm:$0xf0] }
  0xeb   : > { %2134 = vmatpush.bf16.msra.mxu0 %v2488_v13  ;;  %2160 = vmatpush.bf16.msra.mxu2 %v2492_v17  ;;  %v2687_v7 = vld [vmem:[%s3768_s19 + $0x238] sm:$0xf]  ;;  %v3264_v10 = vor.u32 %v3640_v2, %v3263_v1  ;;  %v3268_v13 = vor.u32 %v3632_v4, %v3265_v5  ;;  %v3616_v17 = vld [vmem:[%s3768_s19 + $0x63c] sm:$0xf] }
  0xec   : > { %v2688_v16 = vor.u32 %v3496_v8, %v2687_v7  ;;  %v3009_v62 = vld [vmem:[%s3768_s19 + $0x4f8] sm:$0xf0]  ;;  %v2431_v1 = vld [vmem:[%s3768_s19 + $0x38] sm:$0xf] }
  0xed   : > { %v3432_v2 = vld [vmem:[%s3768_s19 + $0x74] sm:$0xf0]  ;;  %v2433_v7 = vld [vmem:[%s3768_s19 + $0x78] sm:$0xf0] }
  0xee   : > { %2147 = vmatpush.bf16.msra.mxu1 %v3000_v25  ;;  %2173 = vmatpush.bf16.msra.mxu3 %v3004_v29  ;;  %v3204_v25 = vor.u32 %v3616_v17, %v3201_v18  ;;  %v3600_v29 = vld [vmem:[%s3768_s19 + $0x5bc] sm:$0xf] }
  0xef   : > { %2135 = vmatpush.bf16.msra.mxu0 %v2424_v33  ;;  %2161 = vmatpush.bf16.msra.mxu2 %v2428_v37  ;;  %v3464_v33 = vld [vmem:[%s3768_s19 + $0x174] sm:$0xf0]  ;;  %v2561_v37 = vld [vmem:[%s3768_s19 + $0x178] sm:$0xf0] }
  0xf0   : > { %v2560_v43 = vor.u32 %v3464_v33, %v2559_v32  ;;  %v2564_v47 = vor.u32 %v3456_v36, %v2561_v37  ;;  %v3552_v14 = vld [vmem:[%s3768_s19 + $0x43c] sm:$0xf] }
  0xf1   : > { %v2945_v15 = vld [vmem:[%s3768_s19 + $0x478] sm:$0xf0] }
  0xf2   : > { %2148 = vmatpush.bf16.msra.mxu1 %v2936_v41  ;;  %2174 = vmatpush.bf16.msra.mxu3 %v2940_v46  ;;  %v1942_v34 = vpop.f32.mrf.mxu1  ;;  %v3592_v41 = vld [vmem:[%s3768_s19 + $0x574] sm:$0xf0] }
  0xf3   : > { %2180 = vmatpush.bf16.msrb.mxu0 %v2880_v38  ;;  %2206 = vmatpush.bf16.msrb.mxu2 %v2884_v42  ;;  %v3140_v38 = vor.u32 %v3600_v29, %v3137_v30  ;;  %v1929_v42 = vpop.f32.mrf.mxu0  ;;  %v3072_v50 = vor.u32 %v3592_v41, %v3071_v39 }
  0xf4   : > { %2162 = vmatmul.bf16.vlgmr.msra.gmra.mxu2 %v3854_v55  ;;  %2136 = vmatmul.bf16.vlgmr.msra.gmra.mxu0 %v3854_v55  ;;  %v1930_v46 = vadd.f32 %v1929_v42, %v4213_v40 }
  0xf5   : > { %3409 = vmatmul.msk.bf16.vlgmr.msra.gmra.mxu1 %vm1763_vm1, %v3868_v9  ;;  %3410 = vmatmul.msk.bf16.vlgmr.msra.gmra.mxu3 %vm1763_vm1, %v3868_v9 }
  0xf6   : > { %2193 = vmatpush.bf16.msrb.mxu1 %v1811_v49  ;;  %2219 = vmatpush.bf16.msrb.mxu3 %v1814_v53  ;;  %v3448_v49 = vld [vmem:[%s3768_s19 + $0xf4] sm:$0xf0]  ;;  %v1943_v53 = vadd.f32 %v1942_v34, %v1930_v46 }
  0xf7   : > { %2181 = vmatpush.bf16.msrb.mxu0 %v2816_v54  ;;  %2207 = vmatpush.bf16.msrb.mxu2 %v2820_v58  ;;  %v1955_v54 = vpop.f32.mrf.mxu2  ;;  %v3576_v58 = vld [vmem:[%s3768_s19 + $0x4f4] sm:$0xf0]  ;;  %v2496_v60 = vor.u32 %v3448_v49, %v2495_v48 }
  0xf8   : > { %v1956_v59 = vadd.f32 %v1955_v54, %v4213_v40  ;;  %2236 = vst [vmem:[%s4224_s27 + $0x20] sm:$0xff] %v1943_v53  ;;  %v1968_v63 = vpop.f32.mrf.mxu3  ;;  %v3008_v5 = vor.u32 %v3576_v58, %v3007_v57 }
  0xfa   : > { %2194 = vmatpush.bf16.msrb.mxu1 %v3328_v61  ;;  %2220 = vmatpush.bf16.msrb.mxu3 %v3332_v0  ;;  %v3568_v61 = vld [vmem:[%s3768_s19 + $0x4bc] sm:$0xf]  ;;  %v2500_v0 = vor.u32 %v3440_v51, %v2497_v52  ;;  %v1944_v4 = vpop.f32.mrf.mxu1 }
  0xfb   : > { %2182 = vmatpush.bf16.msrb.mxu0 %v2752_v3  ;;  %2208 = vmatpush.bf16.msrb.mxu2 %v2756_v6  ;;  %v1969_v3 = vadd.f32 %v1968_v63, %v1956_v59  ;;  %v3424_v6 = vld [vmem:[%s3768_s19 + $0x3c] sm:$0xf]  ;;  %v3012_v8 = vor.u32 %v3568_v61, %v3009_v62  ;;  %v1931_v12 = vpop.f32.mrf.mxu0 }
  0xfd   : > { %2237 = vst [vmem:[%s4224_s27 + $0x28] sm:$0xff] %v1969_v3 }
  0xfe   : > { %2195 = vmatpush.bf16.msrb.mxu1 %v3264_v10  ;;  %2221 = vmatpush.bf16.msrb.mxu3 %v3268_v13  ;;  %v2943_v10 = vld [vmem:[%s3768_s19 + $0x438] sm:$0xf]  ;;  %v2432_v13 = vor.u32 %v3432_v2, %v2431_v1 }
  0xff   : > { %2183 = vmatpush.bf16.msrb.mxu0 %v2688_v16  ;;  %2209 = vmatpush.bf16.msrb.mxu2 %v2692_v19  ;;  %v2436_v16 = vor.u32 %v3424_v6, %v2433_v7  ;;  %v2944_v17 = vor.u32 %v3560_v11, %v2943_v10  ;;  %v1957_v18 = vpop.f32.mrf.mxu2  ;;  %v2948_v19 = vor.u32 %v3552_v14, %v2945_v15 }
 0x100   : > { %v1970_v20 = vpop.f32.mrf.mxu3 }
 0x102   : > { %2196 = vmatpush.bf16.msrb.mxu1 %v3200_v22  ;;  %2222 = vmatpush.bf16.msrb.mxu3 %v3204_v25 }
 0x103   : > { %2184 = vmatpush.bf16.msrb.mxu0 %v2624_v28  ;;  %2210 = vmatpush.bf16.msrb.mxu2 %v2628_v31 }
 0x106   : > { %2197 = vmatpush.bf16.msrb.mxu1 %v3136_v35  ;;  %2223 = vmatpush.bf16.msrb.mxu3 %v3140_v38 }
 0x107   : > { %2185 = vmatpush.bf16.msrb.mxu0 %v2560_v43  ;;  %2211 = vmatpush.bf16.msrb.mxu2 %v2564_v47 }
 0x10a   : > { %2198 = vmatpush.bf16.msrb.mxu1 %v3072_v50  ;;  %2224 = vmatpush.bf16.msrb.mxu3 %v3076_v56 }
 0x10b   : > { %2186 = vmatpush.bf16.msrb.mxu0 %v2496_v60  ;;  %2212 = vmatpush.bf16.msrb.mxu2 %v2500_v0 }
 0x10e   : > { %2199 = vmatpush.bf16.msrb.mxu1 %v3008_v5  ;;  %2225 = vmatpush.bf16.msrb.mxu3 %v3012_v8 }
 0x10f   : > { %2187 = vmatpush.bf16.msrb.mxu0 %v2432_v13  ;;  %2213 = vmatpush.bf16.msrb.mxu2 %v2436_v16 }
 0x111   : > { %v1981_v22 = vpop.f32.mrf.mxu0 }
 0x112   : > { %2200 = vmatpush.bf16.msrb.mxu1 %v2944_v17  ;;  %2226 = vmatpush.bf16.msrb.mxu3 %v2948_v19  ;;  %v1994_v21 = vpop.f32.mrf.mxu1  ;;  %v1982_v23 = vadd.f32 %v1981_v22, %v4213_v40 }
 0x113   : > { %2188 = vmatmul.bf16.vlgmr.msrb.gmra.mxu0 %v3854_v55  ;;  %2214 = vmatmul.bf16.vlgmr.msrb.gmra.mxu2 %v3854_v55 }
 0x114   : > { %v1995_v24 = vadd.f32 %v1994_v21, %v1982_v23 }
 0x115   : > { %3411 = vmatmul.msk.bf16.vlgmr.msrb.gmra.mxu1 %vm1763_vm1, %v3868_v9  ;;  %3412 = vmatmul.msk.bf16.vlgmr.msrb.gmra.mxu3 %vm1763_vm1, %v3868_v9 }
 0x116   : > { %2238 = vst [vmem:[%s4224_s27 + $0x30] sm:$0xff] %v1995_v24 }
 0x117   : > { %v2007_v25 = vpop.f32.mrf.mxu2 }
 0x118   : > { %v2008_v26 = vadd.f32 %v2007_v25, %v4213_v40  ;;  %v2020_v27 = vpop.f32.mrf.mxu3 }
 0x119   : > { %v1983_v29 = vpop.f32.mrf.mxu0 }
 0x11a   : > { %v2021_v28 = vadd.f32 %v2020_v27, %v2008_v26  ;;  %v1996_v55 = vpop.f32.mrf.mxu1 }
 0x11c   : > { %2239 = vst [vmem:[%s4224_s27 + $0x38] sm:$0xff] %v2021_v28 }
 0x11f   : > { %v2009_v30 = vpop.f32.mrf.mxu2 }
 0x120   : > { %v2022_v31 = vpop.f32.mrf.mxu3 }
 0x131   : > { %v2033_v9 = vpop.f32.mrf.mxu0 }
 0x132   : > { %v2046_v32 = vpop.f32.mrf.mxu1  ;;  %v2034_v33 = vadd.f32 %v2033_v9, %v4213_v40 }
 0x134   : > { %v2047_v34 = vadd.f32 %v2046_v32, %v2034_v33 }
 0x136   : > { %2240 = vst [vmem:[%s4224_s27 + $0x40] sm:$0xff] %v2047_v34 }
 0x137   : > { %v2059_v35 = vpop.f32.mrf.mxu2 }
 0x138   : > { %v2060_v36 = vadd.f32 %v2059_v35, %v4213_v40  ;;  %v2072_v37 = vpop.f32.mrf.mxu3 }
 0x139   : > { %v2035_v41 = vpop.f32.mrf.mxu0 }
 0x13a   : > { %v2073_v38 = vadd.f32 %v2072_v37, %v2060_v36  ;;  %v2048_v39 = vpop.f32.mrf.mxu1 }
 0x13c   : > { %2241 = vst [vmem:[%s4224_s27 + $0x48] sm:$0xff] %v2073_v38 }
 0x13f   : > { %v2061_v42 = vpop.f32.mrf.mxu2 }
 0x140   : > { %v2074_v43 = vpop.f32.mrf.mxu3 }
 0x151   : > { %v2085_v45 = vpop.f32.mrf.mxu0 }
 0x152   : > { %v2098_v44 = vpop.f32.mrf.mxu1  ;;  %v2086_v46 = vadd.f32 %v2085_v45, %v4213_v40 }
 0x154   : > { %v2099_v47 = vadd.f32 %v2098_v44, %v2086_v46 }
 0x156   : > { %2242 = vst [vmem:[%s4224_s27 + $0x50] sm:$0xff] %v2099_v47 }
 0x157   : > { %v2111_v48 = vpop.f32.mrf.mxu2 }
 0x158   : > { %v2112_v49 = vadd.f32 %v2111_v48, %v4213_v40  ;;  %v2124_v50 = vpop.f32.mrf.mxu3 }
 0x159   : > { %v2087_v53 = vpop.f32.mrf.mxu0 }
 0x15a   : > { %v2125_v51 = vadd.f32 %v2124_v50, %v2112_v49  ;;  %v2100_v52 = vpop.f32.mrf.mxu1 }
 0x15c   : > { %2243 = vst [vmem:[%s4224_s27 + $0x58] sm:$0xff] %v2125_v51 }
 0x15f   : > { %v2113_v54 = vpop.f32.mrf.mxu2 }
 0x160   : > { %v2126_v56 = vpop.f32.mrf.mxu3 }
 0x171   : > { %v2137_v58 = vpop.f32.mrf.mxu0 }
 0x172   : > { %v2150_v57 = vpop.f32.mrf.mxu1  ;;  %v2138_v59 = vadd.f32 %v2137_v58, %v4213_v40 }
 0x174   : > { %v2151_v60 = vadd.f32 %v2150_v57, %v2138_v59 }
 0x176   : > { %2244 = vst [vmem:[%s4224_s27 + $0x60] sm:$0xff] %v2151_v60 }
 0x177   : > { %v2163_v61 = vpop.f32.mrf.mxu2 }
 0x178   : > { %v2164_v62 = vadd.f32 %v2163_v61, %v4213_v40  ;;  %v2176_v63 = vpop.f32.mrf.mxu3 }
 0x179   : > { %v2139_v2 = vpop.f32.mrf.mxu0 }
 0x17a   : > { %v2177_v0 = vadd.f32 %v2176_v63, %v2164_v62  ;;  %v2152_v1 = vpop.f32.mrf.mxu1 }
 0x17c   : > { %2245 = vst [vmem:[%s4224_s27 + $0x68] sm:$0xff] %v2177_v0 }
 0x17f   : > { %v2165_v3 = vpop.f32.mrf.mxu2 }
 0x180   : > { %v2178_v4 = vpop.f32.mrf.mxu3 }
 0x190   : > { %v2189_v5 = vpop.f32.mrf.mxu0 }
 0x191   : > { %v2190_v6 = vadd.f32 %v2189_v5, %v4213_v40 }
 0x192   : > { %v2202_v7 = vpop.f32.mrf.mxu1 }
 0x193   : > { %v2203_v8 = vadd.f32 %v2202_v7, %v2190_v6 }
 0x195   : > { %2246 = vst [vmem:[%s4224_s27 + $0x70] sm:$0xff] %v2203_v8 }
 0x196   : > { %v2215_v10 = vpop.f32.mrf.mxu2 }
 0x197   : > { %v2216_v11 = vadd.f32 %v2215_v10, %v4213_v40 }
 0x198   : > { %v2191_v12 = vpop.f32.mrf.mxu0  ;;  %v2228_v13 = vpop.f32.mrf.mxu3 }
 0x199   : > { %v2229_v14 = vadd.f32 %v2228_v13, %v2216_v11 }
 0x19a   : > { %v2204_v15 = vpop.f32.mrf.mxu1 }
 0x19b   : > { %2247 = vst [vmem:[%s4224_s27 + $0x78] sm:$0xff] %v2229_v14 }
 0x19e   : > { %v2217_v16 = vpop.f32.mrf.mxu2 }
 0x1a0   : > { %v2230_v17 = vpop.f32.mrf.mxu3 }
 0x1a1 PF: > { %s13_s14 = sadd.s32 1, %s3721_s14   ;;  %s4411_s12 = smov %s3717_s13 }
 0x1a2   : > { %p10_p5 = scmp.ge.s32.totalorder %s13_s14, 4   ;;  %s4412_s13 = smov %s4414_s15 }
 0x1a4   :  { %12 = sbr.rel (!%p10_p5) target bundleno = 2 (0x2), region = 68 }

</bundles_post_ra>
